<compile_context>
chip_gen: v7x
topology: tpu7x:2x2x1
jax: 0.10.0
libtpu: 0.0.40
codegen_flags: <defaults>
</compile_context>

<pallas_src>
import jax
import jax.numpy as jnp
from jax.experimental import pallas as pl
from jax.experimental.pallas import tpu as pltpu

_BN_EPS = 1e-5


# ---------------------------------------------------------------------------
# Hardware-aware sizing helpers
# ---------------------------------------------------------------------------
def _vmem_budget_bytes():
    """~75% of this generation's VMEM (v5e/v6e: 128 MiB, v7x: 64 MiB)."""
    try:
        cap = pltpu.get_tpu_info().vmem_capacity_bytes
    except Exception:                       # conservative fallback (v7x size)
        cap = 64 * 1024 * 1024
    return int(cap) * 3 // 4


def _pick_stripe_rows(total_rows, target_rows):
    """Largest divisor of total_rows that is <= target_rows (and >= 1)."""
    t = int(max(1, min(total_rows, target_rows)))
    while total_rows % t:
        t -= 1
    return t


# ---------------------------------------------------------------------------
# Kernel 1: ConvTranspose2d(Cin, Cup, kernel=2, stride=2) + bias
# ---------------------------------------------------------------------------
def _upconv_kernel(x1_ref, w_ref, b_ref, o_ref):
    """One (batch, row-stripe) grid step of the 2x2 stride-2 transposed conv.

    x1_ref: (TH, W, Cin)       bf16 input stripe
    w_ref : (2, Cin, 2*Cup)    bf16 weights, [dy, cin, (dx, cout)]
    b_ref : (1, 2*Cup)         f32 bias tiled over dx
    o_ref : (TH, 2, W, 2*Cup)  o[h, dy, w, dx*Cup+c] = x1u[2h+dy, 2w+dx, c];
                               a free contiguous reshape in the wrapper yields
                               the (2H, 2W, Cup) upsampled image.
    """
    TH, W, Cin = x1_ref.shape
    x = x1_ref[...].reshape(TH * W, Cin)
    for dy in range(2):                                   # both dy taps: x1 DMA'd once
        y = jnp.dot(x, w_ref[dy], preferred_element_type=jnp.float32) + b_ref[...]
        o_ref[:, dy, :, :] = y.reshape(TH, W, w_ref.shape[2]).astype(o_ref.dtype)


# ---------------------------------------------------------------------------
# Kernel 2: fused  pad + concat + (conv3x3 -> BN -> ReLU) x 2, row-striped
# ---------------------------------------------------------------------------
def _gather_conv_taps(col_ref, src_ref, r0, tap_stride, chan_off, row_off, col_off):
    """Write the nine 3x3-conv shifted copies of `src_ref` into an im2col slab.

    col_ref: (TH, W2, 9*tap_stride) VMEM slab covering output rows [r0, r0+TH).
    src_ref: (Hs, Ws, C) ref whose top-left corner sits at (row_off, col_off)
             inside the (H2, W2) conv input; the conv uses padding=1.
    Tap t = ty*3+tx occupies slab channels [t*tap_stride+chan_off, ...+C).
    Only the never-written border strips are zeroed (conv zero padding and the
    F.pad frame around x1u); interior taps issue a single copy and no zeroes.
    All bounds are static Python ints (the stripe loop is unrolled at trace time).
    """
    Hs, Ws, C = src_ref.shape
    TH, W2 = col_ref.shape[0], col_ref.shape[1]

    def zeros(nr, nc):
        return jnp.zeros((nr, nc, C), col_ref.dtype)

    for ty in range(3):
        dr = r0 + ty - 1 - row_off                 # src row = slab row + dr
        i0, i1 = max(0, -dr), min(TH, Hs - dr)
        for tx in range(3):
            dc = tx - 1 - col_off                  # src col = slab col + dc
            j0, j1 = max(0, -dc), min(W2, Ws - dc)
            c0 = (ty * 3 + tx) * tap_stride + chan_off
            if i1 <= i0 or j1 <= j0:               # source misses this stripe
                col_ref[:, :, c0:c0 + C] = zeros(TH, W2)
                continue
            if i0 > 0:
                col_ref[:i0, :, c0:c0 + C] = zeros(i0, W2)
            if i1 < TH:
                col_ref[i1:, :, c0:c0 + C] = zeros(TH - i1, W2)
            if j0 > 0:
                col_ref[i0:i1, :j0, c0:c0 + C] = zeros(i1 - i0, j0)
            if j1 < W2:
                col_ref[i0:i1, j1:, c0:c0 + C] = zeros(i1 - i0, W2 - j1)
            col_ref[i0:i1, j0:j1, c0:c0 + C] = (
                src_ref[i0 + dr:i1 + dr, j0 + dc:j1 + dc, :].astype(col_ref.dtype))


def _doubleconv_kernel(x2_ref, x1u_ref, w1_ref, s1_ref, t1_ref,
                       w2_ref, s2_ref, t2_ref, o_ref, h_s, col1_s, col2_s):
    """Per-batch fused  pad + concat([x2, x1u]) + DoubleConv (BN folded)."""
    H2, W2, C2 = x2_ref.shape
    Hu, Wu, Cup = x1u_ref.shape
    Ctot = C2 + Cup
    Cmid = w1_ref.shape[1]
    Cout = w2_ref.shape[1]
    TH = col1_s.shape[0]
    n_stripes = H2 // TH
    pT = (H2 - Hu) // 2        # F.pad placement of x1u inside x2's extent
    pL = (W2 - Wu) // 2

    # ---- conv1 + BN + ReLU, one row stripe at a time; h stays in VMEM (bf16)
    for s in range(n_stripes):
        r0 = s * TH
        _gather_conv_taps(col1_s, x2_ref, r0, Ctot, 0, 0, 0)      # x2 channels
        _gather_conv_taps(col1_s, x1u_ref, r0, Ctot, C2, pT, pL)  # x1u channels
        h = jnp.dot(col1_s[...].reshape(TH * W2, 9 * Ctot), w1_ref[...],
                    preferred_element_type=jnp.float32)
        h = jnp.maximum(h * s1_ref[...] + t1_ref[...], 0.0)       # folded BN + ReLU
        h_s[r0:r0 + TH, :, :] = h.reshape(TH, W2, Cmid).astype(h_s.dtype)

    # ---- conv2 + BN + ReLU, one row stripe at a time --------------------------
    for s in range(n_stripes):
        r0 = s * TH
        _gather_conv_taps(col2_s, h_s, r0, Cmid, 0, 0, 0)
        y = jnp.dot(col2_s[...].reshape(TH * W2, 9 * Cmid), w2_ref[...],
                    preferred_element_type=jnp.float32)
        y = jnp.maximum(y * s2_ref[...] + t2_ref[...], 0.0)
        o_ref[r0:r0 + TH, :, :] = y.reshape(TH, W2, Cout).astype(o_ref.dtype)


# ---------------------------------------------------------------------------
# Wrapper
# ---------------------------------------------------------------------------
def up_forward(x1_nchw, x2_nchw, p, *, up_stripe_rows=None, conv_stripe_rows=None):
    """Up.forward: x1 (B, Cin, H, W), x2 (B, Cin//2, H2, W2) -> (B, Cout, H2, W2)."""
    # NCHW -> NHWC with the bf16 cast fused into the same XLA copy (halves the
    # activation HBM traffic both kernels read).
    x1 = jnp.transpose(x1_nchw, (0, 2, 3, 1)).astype(jnp.bfloat16)
    x2 = jnp.transpose(x2_nchw, (0, 2, 3, 1)).astype(jnp.bfloat16)
    B, H, W, Cin = x1.shape
    _, H2, W2, C2 = x2.shape
    Cup = Cin // 2
    Ctot = C2 + Cup
    Cmid = p["w1"].shape[1]
    Cout = p["w2"].shape[1]
    Hu, Wu = 2 * H, 2 * W
    assert H2 >= Hu and W2 >= Wu, "x2 must be spatially >= upsampled x1"

    vmem_budget = _vmem_budget_bytes()           # 48 MiB on v7x, 96 MiB on v5e/v6e
    vmem_limit = vmem_budget

    # --- stripe sizing ------------------------------------------------------
    if up_stripe_rows is None:
        up_stripe_rows = 128
    th1 = _pick_stripe_rows(H, up_stripe_rows)

    if conv_stripe_rows is None:
        # Resident bytes per grid step besides the slabs: double-buffered
        # x2 / x1u / out blocks, whole-image h scratch, weights.
        resident = (2 * H2 * W2 * C2 * 2 + 2 * Hu * Wu * Cup * 2
                    + H2 * W2 * Cmid * 2 + 2 * H2 * W2 * Cout * 4
                    + 2 * (p["w1"].size + p["w2"].size) * 2)
        per_row = W2 * 9 * (Ctot + Cmid) * 2     # both bf16 im2col slabs
        conv_stripe_rows = max(1, (vmem_budget - resident) // max(per_row, 1))
    th2 = _pick_stripe_rows(H2, conv_stripe_rows)

    # --- ConvTranspose2d(Cin, Cup, k=2, s=2) + bias --------------------------
    cost1 = pl.CostEstimate(
        flops=2 * B * H * W * Cin * 4 * Cup,
        transcendentals=0,
        bytes_accessed=(x1.size * 2 + p["up_w"].size * 2 + p["up_b"].size * 4
                        + B * Hu * Wu * Cup * 2))
    y = pl.pallas_call(
        _upconv_kernel,
        out_shape=jax.ShapeDtypeStruct((B, H, 2, W, 2 * Cup), jnp.bfloat16),
        grid=(B, H // th1),
        in_specs=[
            pl.BlockSpec((None, th1, W, Cin), lambda b, s: (b, s, 0, 0)),
            pl.BlockSpec((2, Cin, 2 * Cup), lambda b, s: (0, 0, 0)),
            pl.BlockSpec((1, 2 * Cup), lambda b, s: (0, 0)),
        ],
        out_specs=pl.BlockSpec((None, th1, 2, W, 2 * Cup),
                               lambda b, s: (b, s, 0, 0, 0)),
        compiler_params=pltpu.CompilerParams(
            dimension_semantics=("parallel", "parallel"),
            vmem_limit_bytes=vmem_limit),
        cost_estimate=cost1,
    )(x1, p["up_w"], p["up_b"])
    # Free (contiguous) reshape: the output DMA already interleaved dy/dx.
    x1u = y.reshape(B, Hu, Wu, Cup)

    # --- fused  pad + concat + DoubleConv ------------------------------------
    cost2 = pl.CostEstimate(
        flops=2 * B * H2 * W2 * 9 * (Ctot * Cmid + Cmid * Cout),
        transcendentals=0,
        bytes_accessed=(x2.size * 2 + x1u.size * 2
                        + (p["w1"].size + p["w2"].size) * 2
                        + (p["s1"].size + p["t1"].size
                           + p["s2"].size + p["t2"].size) * 4
                        + B * H2 * W2 * Cout * 4))
    out = pl.pallas_call(
        _doubleconv_kernel,
        out_shape=jax.ShapeDtypeStruct((B, H2, W2, Cout), x1_nchw.dtype),
        grid=(B,),
        in_specs=[
            pl.BlockSpec((None, H2, W2, C2), lambda b: (b, 0, 0, 0)),
            pl.BlockSpec((None, Hu, Wu, Cup), lambda b: (b, 0, 0, 0)),
            # Constant block indices: weights / BN params are DMA'd once and
            # stay resident in VMEM across the batch grid.
            pl.BlockSpec((9 * Ctot, Cmid), lambda b: (0, 0)),
            pl.BlockSpec((1, Cmid), lambda b: (0, 0)),
            pl.BlockSpec((1, Cmid), lambda b: (0, 0)),
            pl.BlockSpec((9 * Cmid, Cout), lambda b: (0, 0)),
            pl.BlockSpec((1, Cout), lambda b: (0, 0)),
            pl.BlockSpec((1, Cout), lambda b: (0, 0)),
        ],
        out_specs=pl.BlockSpec((None, H2, W2, Cout), lambda b: (b, 0, 0, 0)),
        scratch_shapes=[
            pltpu.VMEM((H2, W2, Cmid), jnp.bfloat16),        # conv1 activation h
            pltpu.VMEM((th2, W2, 9 * Ctot), jnp.bfloat16),   # im2col slab, conv1
            pltpu.VMEM((th2, W2, 9 * Cmid), jnp.bfloat16),   # im2col slab, conv2
        ],
        compiler_params=pltpu.CompilerParams(
            dimension_semantics=("parallel",),
            vmem_limit_bytes=vmem_limit),
        cost_estimate=cost2,
    )(x2, x1u, p["w1"], p["s1"], p["t1"], p["w2"], p["s2"], p["t2"])

    return jnp.transpose(out, (0, 3, 1, 2))     # back to NCHW


# ---------------------------------------------------------------------------
# Parameters (torch layout) + packing into kernel layouts
# ---------------------------------------------------------------------------
def make_params(key, in_channels, out_channels):
    """Deterministic torch-layout parameters for Up(in_channels, out_channels)."""
    cin = in_channels
    cup = in_channels // 2
    ctot = in_channels            # DoubleConv input = cat([x2, x1u])
    cmid = out_channels           # mid_channels defaults to out_channels
    cout = out_channels
    ks = jax.random.split(key, 12)
    p = {}
    p["up_w_t"] = 0.1 * jax.random.normal(ks[0], (cin, cup, 2, 2), jnp.float32)
    p["up_b_t"] = 0.1 * jax.random.normal(ks[1], (cup,), jnp.float32)
    p["c1_w_t"] = 0.1 * jax.random.normal(ks[2], (cmid, ctot, 3, 3), jnp.float32)
    p["bn1_g"] = 1.0 + 0.1 * jax.random.normal(ks[3], (cmid,), jnp.float32)
    p["bn1_b"] = 0.1 * jax.random.normal(ks[4], (cmid,), jnp.float32)
    p["bn1_m"] = 0.1 * jax.random.normal(ks[5], (cmid,), jnp.float32)
    p["bn1_v"] = jax.random.uniform(ks[6], (cmid,), jnp.float32, 0.5, 1.5)
    p["c2_w_t"] = 0.1 * jax.random.normal(ks[7], (cout, cmid, 3, 3), jnp.float32)
    p["bn2_g"] = 1.0 + 0.1 * jax.random.normal(ks[8], (cout,), jnp.float32)
    p["bn2_b"] = 0.1 * jax.random.normal(ks[9], (cout,), jnp.float32)
    p["bn2_m"] = 0.1 * jax.random.normal(ks[10], (cout,), jnp.float32)
    p["bn2_v"] = jax.random.uniform(ks[11], (cout,), jnp.float32, 0.5, 1.5)
    return p


def _fold_bn(gamma, beta, mean, var):
    scale = gamma / jnp.sqrt(var + _BN_EPS)
    shift = beta - mean * scale
    return scale.reshape(1, -1), shift.reshape(1, -1)


def pack_params(tp):
    """Torch-layout params -> kernel layouts (matmul weights in bf16)."""
    cin, cup = tp["up_w_t"].shape[0], tp["up_w_t"].shape[1]
    # ConvTranspose2d weight (Cin, Cup, 2, 2) -> (dy, Cin, dx*Cup + cout)
    up_w = jnp.transpose(tp["up_w_t"], (2, 0, 3, 1)).reshape(2, cin, 2 * cup)
    up_b = jnp.tile(tp["up_b_t"], 2).reshape(1, 2 * cup)          # tiled over dx

    def conv_w(w):  # (Cout, Cin, 3, 3) -> ((ty*3+tx)*Cin + cin, Cout) im2col layout
        co, ci = w.shape[0], w.shape[1]
        return jnp.transpose(w, (2, 3, 1, 0)).reshape(9 * ci, co).astype(jnp.bfloat16)

    s1, t1 = _fold_bn(tp["bn1_g"], tp["bn1_b"], tp["bn1_m"], tp["bn1_v"])
    s2, t2 = _fold_bn(tp["bn2_g"], tp["bn2_b"], tp["bn2_m"], tp["bn2_v"])
    return dict(up_w=up_w.astype(jnp.bfloat16), up_b=up_b,
                w1=conv_w(tp["c1_w_t"]), s1=s1, t1=t1,
                w2=conv_w(tp["c2_w_t"]), s2=s2, t2=t2)


# ---------------------------------------------------------------------------
# Pure-JAX float32 reference (mirrors the PyTorch module in eval mode)
# ---------------------------------------------------------------------------
def ref_forward(x1_nchw, x2_nchw, tp):
    # ConvTranspose2d(k=2, s=2): out[b,o,2h+dy,2w+dx] = b[o] + sum_i x[b,i,h,w]*W[i,o,dy,dx]
    t = jnp.einsum("bihw,iopq->bohpwq", x1_nchw, tp["up_w_t"])
    B, Cup, H, _, W, _ = t.shape
    x1u = t.reshape(B, Cup, 2 * H, 2 * W) + tp["up_b_t"][None, :, None, None]
    dY = x2_nchw.shape[2] - x1u.shape[2]
    dX = x2_nchw.shape[3] - x1u.shape[3]
    x1u = jnp.pad(x1u, ((0, 0), (0, 0),
                        (dY // 2, dY - dY // 2), (dX // 2, dX - dX // 2)))
    x = jnp.concatenate([x2_nchw, x1u], axis=1)

    def conv_bn_relu(x, w, g, b, m, v):
        y = jax.lax.conv_general_dilated(
            x, w, window_strides=(1, 1), padding=((1, 1), (1, 1)),
            dimension_numbers=("NCHW", "OIHW", "NCHW"))
        scale = (g / jnp.sqrt(v + _BN_EPS))[None, :, None, None]
        shift = (b - m * g / jnp.sqrt(v + _BN_EPS))[None, :, None, None]
        return jnp.maximum(y * scale + shift, 0.0)

    h = conv_bn_relu(x, tp["c1_w_t"], tp["bn1_g"], tp["bn1_b"], tp["bn1_m"], tp["bn1_v"])
    return conv_bn_relu(h, tp["c2_w_t"], tp["bn2_g"], tp["bn2_b"], tp["bn2_m"], tp["bn2_v"])


# ---------------------------------------------------------------------------
if __name__ == "__main__":
    in_channels, out_channels = 8, 4
    B, H, W = 2, 8, 8                       # x1 spatial; x2 is 2x larger

    key = jax.random.PRNGKey(0)
    k1, k2, kp = jax.random.split(key, 3)
    x1 = jax.random.normal(k1, (B, in_channels, H, W), jnp.float32)            # NCHW
    x2 = jax.random.normal(k2, (B, in_channels // 2, 2 * H, 2 * W), jnp.float32)

    tparams = make_params(kp, in_channels, out_channels)
    kparams = pack_params(tparams)

    # Small stripe sizes so the row-striped paths (multiple stripes, border-only
    # zeroing at the seams) are exercised and verified even at test shapes.
    fwd = jax.jit(lambda a, b, p: up_forward(a, b, p,
                                             up_stripe_rows=4,
                                             conv_stripe_rows=8))
    out = jax.block_until_ready(fwd(x1, x2, kparams))
    assert out.shape == (B, out_channels, 2 * H, 2 * W), out.shape
    assert bool(jnp.all(jnp.isfinite(out)))

    ref = ref_forward(x1, x2, tparams)
    max_err = float(jnp.max(jnp.abs(out - ref)))
    # bf16 activations / weights (f32 accumulation) -> small deviation vs f32.
    assert max_err < 2e-1, f"max |kernel - reference| = {max_err}"
    print("KERNEL_OK")
</pallas_src>

<mosaic_0001>
module attributes {stable_mosaic.version = 11 : i64} {
  func.func @_upconv_kernel(%arg0: i32, %arg1: i32, %arg2: memref<1x4x8x8xbf16, #tpu.memory_space<vmem>>, %arg3: memref<2x8x8xbf16, #tpu.memory_space<vmem>>, %arg4: memref<1x8xf32, #tpu.memory_space<vmem>>, %arg5: memref<1x4x2x8x8xbf16, #tpu.memory_space<vmem>>) attributes {dimension_semantics = [#tpu.dimension_semantics<parallel>, #tpu.dimension_semantics<parallel>], iteration_bounds = array<i64: 2, 2>, scalar_prefetch = 0 : i64, scratch_operands = 0 : i64, tpu.core_type = #tpu.core_type<tc>, window_params = [{transform_indices = @transform_0, window_bounds = array<i64: 1, 4, 8, 8>}, {pipeline_mode = #tpu.pipeline_mode<synchronous>, transform_indices = @transform_1, window_bounds = array<i64: 2, 8, 8>}, {pipeline_mode = #tpu.pipeline_mode<synchronous>, transform_indices = @transform_2, window_bounds = array<i64: 1, 8>}, {transform_indices = @transform_3, window_bounds = array<i64: 1, 4, 2, 8, 8>}]} {
    %c0 = arith.constant 0 : index
    %c0_0 = arith.constant 0 : index
    %c0_1 = arith.constant 0 : index
    %c0_2 = arith.constant 0 : index
    %0 = vector.load %arg2[%c0, %c0_0, %c0_1, %c0_2] : memref<1x4x8x8xbf16, #tpu.memory_space<vmem>>, vector<1x4x8x8xbf16>
    %1 = vector.shape_cast %0 : vector<1x4x8x8xbf16> to vector<4x8x8xbf16>
    %2 = vector.shape_cast %1 : vector<4x8x8xbf16> to vector<32x8xbf16>
    %c0_3 = arith.constant 0 : index
    %c0_4 = arith.constant 0 : index
    %c0_5 = arith.constant 0 : index
    %3 = vector.load %arg3[%c0_3, %c0_4, %c0_5] : memref<2x8x8xbf16, #tpu.memory_space<vmem>>, vector<1x8x8xbf16>
    %4 = vector.shape_cast %3 : vector<1x8x8xbf16> to vector<8x8xbf16>
    %cst = arith.constant dense<0.000000e+00> : vector<32x8xf32>
    %5 = tpu.matmul %2, %4, %cst {dimension_numbers = #tpu.dot_dimension_numbers<[1], [0], [0], [1], [0, 0, 1, 1], [], []>} : vector<32x8xbf16>, vector<8x8xbf16>, vector<32x8xf32> -> vector<32x8xf32>
    %c0_6 = arith.constant 0 : index
    %c0_7 = arith.constant 0 : index
    %6 = vector.load %arg4[%c0_6, %c0_7] : memref<1x8xf32, #tpu.memory_space<vmem>>, vector<1x8xf32>
    %7 = vector.broadcast %6 : vector<1x8xf32> to vector<32x8xf32>
    %8 = arith.addf %5, %7 : vector<32x8xf32>
    %9 = vector.shape_cast %8 : vector<32x8xf32> to vector<4x8x8xf32>
    %10 = arith.truncf %9 : vector<4x8x8xf32> to vector<4x8x8xbf16>
    %c0_8 = arith.constant 0 : index
    %c0_9 = arith.constant 0 : index
    %c0_10 = arith.constant 0 : index
    %c0_11 = arith.constant 0 : index
    %c0_12 = arith.constant 0 : index
    %11 = vector.load %arg5[%c0_8, %c0_9, %c0_10, %c0_11, %c0_12] : memref<1x4x2x8x8xbf16, #tpu.memory_space<vmem>>, vector<1x4x1x8x8xbf16>
    %12 = vector.shape_cast %11 : vector<1x4x1x8x8xbf16> to vector<4x8x8xbf16>
    %13 = vector.shape_cast %10 : vector<4x8x8xbf16> to vector<1x4x1x8x8xbf16>
    tpu.vector_store %arg5[%c0_8, %c0_9, %c0_10, %c0_11, %c0_12], %13 {strides = array<i32>} : memref<1x4x2x8x8xbf16, #tpu.memory_space<vmem>>, vector<1x4x1x8x8xbf16>,
    %c1 = arith.constant 1 : index
    %c0_13 = arith.constant 0 : index
    %c0_14 = arith.constant 0 : index
    %14 = vector.load %arg3[%c1, %c0_13, %c0_14] : memref<2x8x8xbf16, #tpu.memory_space<vmem>>, vector<1x8x8xbf16>
    %15 = vector.shape_cast %14 : vector<1x8x8xbf16> to vector<8x8xbf16>
    %cst_15 = arith.constant dense<0.000000e+00> : vector<32x8xf32>
    %16 = tpu.matmul %2, %15, %cst_15 {dimension_numbers = #tpu.dot_dimension_numbers<[1], [0], [0], [1], [0, 0, 1, 1], [], []>} : vector<32x8xbf16>, vector<8x8xbf16>, vector<32x8xf32> -> vector<32x8xf32>
    %c0_16 = arith.constant 0 : index
    %c0_17 = arith.constant 0 : index
    %17 = vector.load %arg4[%c0_16, %c0_17] : memref<1x8xf32, #tpu.memory_space<vmem>>, vector<1x8xf32>
    %18 = vector.broadcast %17 : vector<1x8xf32> to vector<32x8xf32>
    %19 = arith.addf %16, %18 : vector<32x8xf32>
    %20 = vector.shape_cast %19 : vector<32x8xf32> to vector<4x8x8xf32>
    %21 = arith.truncf %20 : vector<4x8x8xf32> to vector<4x8x8xbf16>
    %c0_18 = arith.constant 0 : index
    %c0_19 = arith.constant 0 : index
    %c1_20 = arith.constant 1 : index
    %c0_21 = arith.constant 0 : index
    %c0_22 = arith.constant 0 : index
    %22 = vector.load %arg5[%c0_18, %c0_19, %c1_20, %c0_21, %c0_22] : memref<1x4x2x8x8xbf16, #tpu.memory_space<vmem>>, vector<1x4x1x8x8xbf16>
    %23 = vector.shape_cast %22 : vector<1x4x1x8x8xbf16> to vector<4x8x8xbf16>
    %24 = vector.shape_cast %21 : vector<4x8x8xbf16> to vector<1x4x1x8x8xbf16>
    tpu.vector_store %arg5[%c0_18, %c0_19, %c1_20, %c0_21, %c0_22], %24 {strides = array<i32>} : memref<1x4x2x8x8xbf16, #tpu.memory_space<vmem>>, vector<1x4x1x8x8xbf16>,
    return
  }
  func.func @transform_0(%arg0: i32, %arg1: i32) -> (i32, i32, i32, i32) {
    %c0_i32 = arith.constant 0 : i32
    %c0_i32_0 = arith.constant 0 : i32
    %c0_i32_1 = arith.constant 0 : i32
    return %arg0, %arg1, %c0_i32, %c0_i32_0 : i32, i32, i32, i32
  }
  func.func @transform_1(%arg0: i32, %arg1: i32) -> (i32, i32, i32) {
    %c0_i32 = arith.constant 0 : i32
    %c0_i32_0 = arith.constant 0 : i32
    %c0_i32_1 = arith.constant 0 : i32
    %c0_i32_2 = arith.constant 0 : i32
    return %c0_i32, %c0_i32_0, %c0_i32_1 : i32, i32, i32
  }
  func.func @transform_2(%arg0: i32, %arg1: i32) -> (i32, i32) {
    %c0_i32 = arith.constant 0 : i32
    %c0_i32_0 = arith.constant 0 : i32
    %c0_i32_1 = arith.constant 0 : i32
    return %c0_i32, %c0_i32_0 : i32, i32
  }
  func.func @transform_3(%arg0: i32, %arg1: i32) -> (i32, i32, i32, i32, i32) {
    %c0_i32 = arith.constant 0 : i32
    %c0_i32_0 = arith.constant 0 : i32
    %c0_i32_1 = arith.constant 0 : i32
    %c0_i32_2 = arith.constant 0 : i32
    return %arg0, %arg1, %c0_i32, %c0_i32_0, %c0_i32_1 : i32, i32, i32, i32, i32
  }
}

module attributes {stable_mosaic.version = 11 : i64} {
  func.func @_doubleconv_kernel(%arg0: i32, %arg1: memref<1x16x16x4xbf16, #tpu.memory_space<vmem>>, %arg2: memref<1x16x16x4xbf16, #tpu.memory_space<vmem>>, %arg3: memref<72x4xbf16, #tpu.memory_space<vmem>>, %arg4: memref<1x4xf32, #tpu.memory_space<vmem>>, %arg5: memref<1x4xf32, #tpu.memory_space<vmem>>, %arg6: memref<36x4xbf16, #tpu.memory_space<vmem>>, %arg7: memref<1x4xf32, #tpu.memory_space<vmem>>, %arg8: memref<1x4xf32, #tpu.memory_space<vmem>>, %arg9: memref<1x16x16x4xf32, #tpu.memory_space<vmem>>, %arg10: memref<16x16x4xbf16, #tpu.memory_space<vmem>>, %arg11: memref<8x16x72xbf16, #tpu.memory_space<vmem>>, %arg12: memref<8x16x36xbf16, #tpu.memory_space<vmem>>) attributes {dimension_semantics = [#tpu.dimension_semantics<parallel>], iteration_bounds = array<i64: 2>, scalar_prefetch = 0 : i64, scratch_operands = 3 : i64, tpu.core_type = #tpu.core_type<tc>, window_params = [{transform_indices = @transform_0, window_bounds = array<i64: 1, 16, 16, 4>}, {transform_indices = @transform_1, window_bounds = array<i64: 1, 16, 16, 4>}, {pipeline_mode = #tpu.pipeline_mode<synchronous>, transform_indices = @transform_2, window_bounds = array<i64: 72, 4>}, {pipeline_mode = #tpu.pipeline_mode<synchronous>, transform_indices = @transform_3, window_bounds = array<i64: 1, 4>}, {pipeline_mode = #tpu.pipeline_mode<synchronous>, transform_indices = @transform_4, window_bounds = array<i64: 1, 4>}, {pipeline_mode = #tpu.pipeline_mode<synchronous>, transform_indices = @transform_5, window_bounds = array<i64: 36, 4>}, {pipeline_mode = #tpu.pipeline_mode<synchronous>, transform_indices = @transform_6, window_bounds = array<i64: 1, 4>}, {pipeline_mode = #tpu.pipeline_mode<synchronous>, transform_indices = @transform_7, window_bounds = array<i64: 1, 4>}, {transform_indices = @transform_8, window_bounds = array<i64: 1, 16, 16, 4>}]} {
    %cst = arith.constant 0.000000e+00 : bf16
    %0 = vector.broadcast %cst : bf16 to vector<1x16x4xbf16>
    %c0 = arith.constant 0 : index
    %c0_0 = arith.constant 0 : index
    %c0_1 = arith.constant 0 : index
    %1 = vector.load %arg11[%c0, %c0_0, %c0_1] : memref<8x16x72xbf16, #tpu.memory_space<vmem>>, vector<1x16x4xbf16>
    tpu.vector_store %arg11[%c0, %c0_0, %c0_1], %0 {strides = array<i32>} : memref<8x16x72xbf16, #tpu.memory_space<vmem>>, vector<1x16x4xbf16>,
    %cst_2 = arith.constant 0.000000e+00 : bf16
    %2 = vector.broadcast %cst_2 : bf16 to vector<7x1x4xbf16>
    %c1 = arith.constant 1 : index
    %c0_3 = arith.constant 0 : index
    %c0_4 = arith.constant 0 : index
    %3 = vector.load %arg11[%c1, %c0_3, %c0_4] : memref<8x16x72xbf16, #tpu.memory_space<vmem>>, vector<7x1x4xbf16>
    tpu.vector_store %arg11[%c1, %c0_3, %c0_4], %2 {strides = array<i32>} : memref<8x16x72xbf16, #tpu.memory_space<vmem>>, vector<7x1x4xbf16>,
    %c0_5 = arith.constant 0 : index
    %c0_6 = arith.constant 0 : index
    %c0_7 = arith.constant 0 : index
    %c0_8 = arith.constant 0 : index
    %4 = vector.load %arg1[%c0_5, %c0_6, %c0_7, %c0_8] : memref<1x16x16x4xbf16, #tpu.memory_space<vmem>>, vector<1x7x15x4xbf16>
    %5 = vector.shape_cast %4 : vector<1x7x15x4xbf16> to vector<7x15x4xbf16>
    %c1_9 = arith.constant 1 : index
    %c1_10 = arith.constant 1 : index
    %c0_11 = arith.constant 0 : index
    %6 = vector.load %arg11[%c1_9, %c1_10, %c0_11] : memref<8x16x72xbf16, #tpu.memory_space<vmem>>, vector<7x15x4xbf16>
    tpu.vector_store %arg11[%c1_9, %c1_10, %c0_11], %5 {strides = array<i32>} : memref<8x16x72xbf16, #tpu.memory_space<vmem>>, vector<7x15x4xbf16>,
    %cst_12 = arith.constant 0.000000e+00 : bf16
    %7 = vector.broadcast %cst_12 : bf16 to vector<1x16x4xbf16>
    %c0_13 = arith.constant 0 : index
    %c0_14 = arith.constant 0 : index
    %c8 = arith.constant 8 : index
    %8 = vector.load %arg11[%c0_13, %c0_14, %c8] : memref<8x16x72xbf16, #tpu.memory_space<vmem>>, vector<1x16x4xbf16>
    tpu.vector_store %arg11[%c0_13, %c0_14, %c8], %7 {strides = array<i32>} : memref<8x16x72xbf16, #tpu.memory_space<vmem>>, vector<1x16x4xbf16>,
    %c0_15 = arith.constant 0 : index
    %c0_16 = arith.constant 0 : index
    %c0_17 = arith.constant 0 : index
    %c0_18 = arith.constant 0 : index
    %9 = vector.load %arg1[%c0_15, %c0_16, %c0_17, %c0_18] : memref<1x16x16x4xbf16, #tpu.memory_space<vmem>>, vector<1x7x16x4xbf16>
    %10 = vector.shape_cast %9 : vector<1x7x16x4xbf16> to vector<7x16x4xbf16>
    %c1_19 = arith.constant 1 : index
    %c0_20 = arith.constant 0 : index
    %c8_21 = arith.constant 8 : index
    %11 = vector.load %arg11[%c1_19, %c0_20, %c8_21] : memref<8x16x72xbf16, #tpu.memory_space<vmem>>, vector<7x16x4xbf16>
    tpu.vector_store %arg11[%c1_19, %c0_20, %c8_21], %10 {strides = array<i32>} : memref<8x16x72xbf16, #tpu.memory_space<vmem>>, vector<7x16x4xbf16>,
    %cst_22 = arith.constant 0.000000e+00 : bf16
    %12 = vector.broadcast %cst_22 : bf16 to vector<1x16x4xbf16>
    %c0_23 = arith.constant 0 : index
    %c0_24 = arith.constant 0 : index
    %c16 = arith.constant 16 : index
    %13 = vector.load %arg11[%c0_23, %c0_24, %c16] : memref<8x16x72xbf16, #tpu.memory_space<vmem>>, vector<1x16x4xbf16>
    tpu.vector_store %arg11[%c0_23, %c0_24, %c16], %12 {strides = array<i32>} : memref<8x16x72xbf16, #tpu.memory_space<vmem>>, vector<1x16x4xbf16>,
    %cst_25 = arith.constant 0.000000e+00 : bf16
    %14 = vector.broadcast %cst_25 : bf16 to vector<7x1x4xbf16>
    %c1_26 = arith.constant 1 : index
    %c15 = arith.constant 15 : index
    %c16_27 = arith.constant 16 : index
    %15 = vector.load %arg11[%c1_26, %c15, %c16_27] : memref<8x16x72xbf16, #tpu.memory_space<vmem>>, vector<7x1x4xbf16>
    tpu.vector_store %arg11[%c1_26, %c15, %c16_27], %14 {strides = array<i32>} : memref<8x16x72xbf16, #tpu.memory_space<vmem>>, vector<7x1x4xbf16>,
    %c0_28 = arith.constant 0 : index
    %c0_29 = arith.constant 0 : index
    %c1_30 = arith.constant 1 : index
    %c0_31 = arith.constant 0 : index
    %16 = vector.load %arg1[%c0_28, %c0_29, %c1_30, %c0_31] : memref<1x16x16x4xbf16, #tpu.memory_space<vmem>>, vector<1x7x15x4xbf16>
    %17 = vector.shape_cast %16 : vector<1x7x15x4xbf16> to vector<7x15x4xbf16>
    %c1_32 = arith.constant 1 : index
    %c0_33 = arith.constant 0 : index
    %c16_34 = arith.constant 16 : index
    %18 = vector.load %arg11[%c1_32, %c0_33, %c16_34] : memref<8x16x72xbf16, #tpu.memory_space<vmem>>, vector<7x15x4xbf16>
    tpu.vector_store %arg11[%c1_32, %c0_33, %c16_34], %17 {strides = array<i32>} : memref<8x16x72xbf16, #tpu.memory_space<vmem>>, vector<7x15x4xbf16>,
    %cst_35 = arith.constant 0.000000e+00 : bf16
    %19 = vector.broadcast %cst_35 : bf16 to vector<8x1x4xbf16>
    %c0_36 = arith.constant 0 : index
    %c0_37 = arith.constant 0 : index
    %c24 = arith.constant 24 : index
    %20 = vector.load %arg11[%c0_36, %c0_37, %c24] : memref<8x16x72xbf16, #tpu.memory_space<vmem>>, vector<8x1x4xbf16>
    tpu.vector_store %arg11[%c0_36, %c0_37, %c24], %19 {strides = array<i32>} : memref<8x16x72xbf16, #tpu.memory_space<vmem>>, vector<8x1x4xbf16>,
    %c0_38 = arith.constant 0 : index
    %c0_39 = arith.constant 0 : index
    %c0_40 = arith.constant 0 : index
    %c0_41 = arith.constant 0 : index
    %21 = vector.load %arg1[%c0_38, %c0_39, %c0_40, %c0_41] : memref<1x16x16x4xbf16, #tpu.memory_space<vmem>>, vector<1x8x15x4xbf16>
    %22 = vector.shape_cast %21 : vector<1x8x15x4xbf16> to vector<8x15x4xbf16>
    %c0_42 = arith.constant 0 : index
    %c1_43 = arith.constant 1 : index
    %c24_44 = arith.constant 24 : index
    %23 = vector.load %arg11[%c0_42, %c1_43, %c24_44] : memref<8x16x72xbf16, #tpu.memory_space<vmem>>, vector<8x15x4xbf16>
    tpu.vector_store %arg11[%c0_42, %c1_43, %c24_44], %22 {strides = array<i32>} : memref<8x16x72xbf16, #tpu.memory_space<vmem>>, vector<8x15x4xbf16>,
    %c0_45 = arith.constant 0 : index
    %c0_46 = arith.constant 0 : index
    %c0_47 = arith.constant 0 : index
    %c0_48 = arith.constant 0 : index
    %24 = vector.load %arg1[%c0_45, %c0_46, %c0_47, %c0_48] : memref<1x16x16x4xbf16, #tpu.memory_space<vmem>>, vector<1x8x16x4xbf16>
    %25 = vector.shape_cast %24 : vector<1x8x16x4xbf16> to vector<8x16x4xbf16>
    %c0_49 = arith.constant 0 : index
    %c0_50 = arith.constant 0 : index
    %c32 = arith.constant 32 : index
    %26 = vector.load %arg11[%c0_49, %c0_50, %c32] : memref<8x16x72xbf16, #tpu.memory_space<vmem>>, vector<8x16x4xbf16>
    tpu.vector_store %arg11[%c0_49, %c0_50, %c32], %25 {strides = array<i32>} : memref<8x16x72xbf16, #tpu.memory_space<vmem>>, vector<8x16x4xbf16>,
    %cst_51 = arith.constant 0.000000e+00 : bf16
    %27 = vector.broadcast %cst_51 : bf16 to vector<8x1x4xbf16>
    %c0_52 = arith.constant 0 : index
    %c15_53 = arith.constant 15 : index
    %c40 = arith.constant 40 : index
    %28 = vector.load %arg11[%c0_52, %c15_53, %c40] : memref<8x16x72xbf16, #tpu.memory_space<vmem>>, vector<8x1x4xbf16>
    tpu.vector_store %arg11[%c0_52, %c15_53, %c40], %27 {strides = array<i32>} : memref<8x16x72xbf16, #tpu.memory_space<vmem>>, vector<8x1x4xbf16>,
    %c0_54 = arith.constant 0 : index
    %c0_55 = arith.constant 0 : index
    %c1_56 = arith.constant 1 : index
    %c0_57 = arith.constant 0 : index
    %29 = vector.load %arg1[%c0_54, %c0_55, %c1_56, %c0_57] : memref<1x16x16x4xbf16, #tpu.memory_space<vmem>>, vector<1x8x15x4xbf16>
    %30 = vector.shape_cast %29 : vector<1x8x15x4xbf16> to vector<8x15x4xbf16>
    %c0_58 = arith.constant 0 : index
    %c0_59 = arith.constant 0 : index
    %c40_60 = arith.constant 40 : index
    %31 = vector.load %arg11[%c0_58, %c0_59, %c40_60] : memref<8x16x72xbf16, #tpu.memory_space<vmem>>, vector<8x15x4xbf16>
    tpu.vector_store %arg11[%c0_58, %c0_59, %c40_60], %30 {strides = array<i32>} : memref<8x16x72xbf16, #tpu.memory_space<vmem>>, vector<8x15x4xbf16>,
    %cst_61 = arith.constant 0.000000e+00 : bf16
    %32 = vector.broadcast %cst_61 : bf16 to vector<8x1x4xbf16>
    %c0_62 = arith.constant 0 : index
    %c0_63 = arith.constant 0 : index
    %c48 = arith.constant 48 : index
    %33 = vector.load %arg11[%c0_62, %c0_63, %c48] : memref<8x16x72xbf16, #tpu.memory_space<vmem>>, vector<8x1x4xbf16>
    tpu.vector_store %arg11[%c0_62, %c0_63, %c48], %32 {strides = array<i32>} : memref<8x16x72xbf16, #tpu.memory_space<vmem>>, vector<8x1x4xbf16>,
    %c0_64 = arith.constant 0 : index
    %c1_65 = arith.constant 1 : index
    %c0_66 = arith.constant 0 : index
    %c0_67 = arith.constant 0 : index
    %34 = vector.load %arg1[%c0_64, %c1_65, %c0_66, %c0_67] : memref<1x16x16x4xbf16, #tpu.memory_space<vmem>>, vector<1x8x15x4xbf16>
    %35 = vector.shape_cast %34 : vector<1x8x15x4xbf16> to vector<8x15x4xbf16>
    %c0_68 = arith.constant 0 : index
    %c1_69 = arith.constant 1 : index
    %c48_70 = arith.constant 48 : index
    %36 = vector.load %arg11[%c0_68, %c1_69, %c48_70] : memref<8x16x72xbf16, #tpu.memory_space<vmem>>, vector<8x15x4xbf16>
    tpu.vector_store %arg11[%c0_68, %c1_69, %c48_70], %35 {strides = array<i32>} : memref<8x16x72xbf16, #tpu.memory_space<vmem>>, vector<8x15x4xbf16>,
    %c0_71 = arith.constant 0 : index
    %c1_72 = arith.constant 1 : index
    %c0_73 = arith.constant 0 : index
    %c0_74 = arith.constant 0 : index
    %37 = vector.load %arg1[%c0_71, %c1_72, %c0_73, %c0_74] : memref<1x16x16x4xbf16, #tpu.memory_space<vmem>>, vector<1x8x16x4xbf16>
    %38 = vector.shape_cast %37 : vector<1x8x16x4xbf16> to vector<8x16x4xbf16>
    %c0_75 = arith.constant 0 : index
    %c0_76 = arith.constant 0 : index
    %c56 = arith.constant 56 : index
    %39 = vector.load %arg11[%c0_75, %c0_76, %c56] : memref<8x16x72xbf16, #tpu.memory_space<vmem>>, vector<8x16x4xbf16>
    tpu.vector_store %arg11[%c0_75, %c0_76, %c56], %38 {strides = array<i32>} : memref<8x16x72xbf16, #tpu.memory_space<vmem>>, vector<8x16x4xbf16>,
    %cst_77 = arith.constant 0.000000e+00 : bf16
    %40 = vector.broadcast %cst_77 : bf16 to vector<8x1x4xbf16>
    %c0_78 = arith.constant 0 : index
    %c15_79 = arith.constant 15 : index
    %c64 = arith.constant 64 : index
    %41 = vector.load %arg11[%c0_78, %c15_79, %c64] : memref<8x16x72xbf16, #tpu.memory_space<vmem>>, vector<8x1x4xbf16>
    tpu.vector_store %arg11[%c0_78, %c15_79, %c64], %40 {strides = array<i32>} : memref<8x16x72xbf16, #tpu.memory_space<vmem>>, vector<8x1x4xbf16>,
    %c0_80 = arith.constant 0 : index
    %c1_81 = arith.constant 1 : index
    %c1_82 = arith.constant 1 : index
    %c0_83 = arith.constant 0 : index
    %42 = vector.load %arg1[%c0_80, %c1_81, %c1_82, %c0_83] : memref<1x16x16x4xbf16, #tpu.memory_space<vmem>>, vector<1x8x15x4xbf16>
    %43 = vector.shape_cast %42 : vector<1x8x15x4xbf16> to vector<8x15x4xbf16>
    %c0_84 = arith.constant 0 : index
    %c0_85 = arith.constant 0 : index
    %c64_86 = arith.constant 64 : index
    %44 = vector.load %arg11[%c0_84, %c0_85, %c64_86] : memref<8x16x72xbf16, #tpu.memory_space<vmem>>, vector<8x15x4xbf16>
    tpu.vector_store %arg11[%c0_84, %c0_85, %c64_86], %43 {strides = array<i32>} : memref<8x16x72xbf16, #tpu.memory_space<vmem>>, vector<8x15x4xbf16>,
    %cst_87 = arith.constant 0.000000e+00 : bf16
    %45 = vector.broadcast %cst_87 : bf16 to vector<1x16x4xbf16>
    %c0_88 = arith.constant 0 : index
    %c0_89 = arith.constant 0 : index
    %c4 = arith.constant 4 : index
    %46 = vector.load %arg11[%c0_88, %c0_89, %c4] : memref<8x16x72xbf16, #tpu.memory_space<vmem>>, vector<1x16x4xbf16>
    tpu.vector_store %arg11[%c0_88, %c0_89, %c4], %45 {strides = array<i32>} : memref<8x16x72xbf16, #tpu.memory_space<vmem>>, vector<1x16x4xbf16>,
    %cst_90 = arith.constant 0.000000e+00 : bf16
    %47 = vector.broadcast %cst_90 : bf16 to vector<7x1x4xbf16>
    %c1_91 = arith.constant 1 : index
    %c0_92 = arith.constant 0 : index
    %c4_93 = arith.constant 4 : index
    %48 = vector.load %arg11[%c1_91, %c0_92, %c4_93] : memref<8x16x72xbf16, #tpu.memory_space<vmem>>, vector<7x1x4xbf16>
    tpu.vector_store %arg11[%c1_91, %c0_92, %c4_93], %47 {strides = array<i32>} : memref<8x16x72xbf16, #tpu.memory_space<vmem>>, vector<7x1x4xbf16>,
    %c0_94 = arith.constant 0 : index
    %c0_95 = arith.constant 0 : index
    %c0_96 = arith.constant 0 : index
    %c0_97 = arith.constant 0 : index
    %49 = vector.load %arg2[%c0_94, %c0_95, %c0_96, %c0_97] : memref<1x16x16x4xbf16, #tpu.memory_space<vmem>>, vector<1x7x15x4xbf16>
    %50 = vector.shape_cast %49 : vector<1x7x15x4xbf16> to vector<7x15x4xbf16>
    %c1_98 = arith.constant 1 : index
    %c1_99 = arith.constant 1 : index
    %c4_100 = arith.constant 4 : index
    %51 = vector.load %arg11[%c1_98, %c1_99, %c4_100] : memref<8x16x72xbf16, #tpu.memory_space<vmem>>, vector<7x15x4xbf16>
    tpu.vector_store %arg11[%c1_98, %c1_99, %c4_100], %50 {strides = array<i32>} : memref<8x16x72xbf16, #tpu.memory_space<vmem>>, vector<7x15x4xbf16>,
    %cst_101 = arith.constant 0.000000e+00 : bf16
    %52 = vector.broadcast %cst_101 : bf16 to vector<1x16x4xbf16>
    %c0_102 = arith.constant 0 : index
    %c0_103 = arith.constant 0 : index
    %c12 = arith.constant 12 : index
    %53 = vector.load %arg11[%c0_102, %c0_103, %c12] : memref<8x16x72xbf16, #tpu.memory_space<vmem>>, vector<1x16x4xbf16>
    tpu.vector_store %arg11[%c0_102, %c0_103, %c12], %52 {strides = array<i32>} : memref<8x16x72xbf16, #tpu.memory_space<vmem>>, vector<1x16x4xbf16>,
    %c0_104 = arith.constant 0 : index
    %c0_105 = arith.constant 0 : index
    %c0_106 = arith.constant 0 : index
    %c0_107 = arith.constant 0 : index
    %54 = vector.load %arg2[%c0_104, %c0_105, %c0_106, %c0_107] : memref<1x16x16x4xbf16, #tpu.memory_space<vmem>>, vector<1x7x16x4xbf16>
    %55 = vector.shape_cast %54 : vector<1x7x16x4xbf16> to vector<7x16x4xbf16>
    %c1_108 = arith.constant 1 : index
    %c0_109 = arith.constant 0 : index
    %c12_110 = arith.constant 12 : index
    %56 = vector.load %arg11[%c1_108, %c0_109, %c12_110] : memref<8x16x72xbf16, #tpu.memory_space<vmem>>, vector<7x16x4xbf16>
    tpu.vector_store %arg11[%c1_108, %c0_109, %c12_110], %55 {strides = array<i32>} : memref<8x16x72xbf16, #tpu.memory_space<vmem>>, vector<7x16x4xbf16>,
    %cst_111 = arith.constant 0.000000e+00 : bf16
    %57 = vector.broadcast %cst_111 : bf16 to vector<1x16x4xbf16>
    %c0_112 = arith.constant 0 : index
    %c0_113 = arith.constant 0 : index
    %c20 = arith.constant 20 : index
    %58 = vector.load %arg11[%c0_112, %c0_113, %c20] : memref<8x16x72xbf16, #tpu.memory_space<vmem>>, vector<1x16x4xbf16>
    tpu.vector_store %arg11[%c0_112, %c0_113, %c20], %57 {strides = array<i32>} : memref<8x16x72xbf16, #tpu.memory_space<vmem>>, vector<1x16x4xbf16>,
    %cst_114 = arith.constant 0.000000e+00 : bf16
    %59 = vector.broadcast %cst_114 : bf16 to vector<7x1x4xbf16>
    %c1_115 = arith.constant 1 : index
    %c15_116 = arith.constant 15 : index
    %c20_117 = arith.constant 20 : index
    %60 = vector.load %arg11[%c1_115, %c15_116, %c20_117] : memref<8x16x72xbf16, #tpu.memory_space<vmem>>, vector<7x1x4xbf16>
    tpu.vector_store %arg11[%c1_115, %c15_116, %c20_117], %59 {strides = array<i32>} : memref<8x16x72xbf16, #tpu.memory_space<vmem>>, vector<7x1x4xbf16>,
    %c0_118 = arith.constant 0 : index
    %c0_119 = arith.constant 0 : index
    %c1_120 = arith.constant 1 : index
    %c0_121 = arith.constant 0 : index
    %61 = vector.load %arg2[%c0_118, %c0_119, %c1_120, %c0_121] : memref<1x16x16x4xbf16, #tpu.memory_space<vmem>>, vector<1x7x15x4xbf16>
    %62 = vector.shape_cast %61 : vector<1x7x15x4xbf16> to vector<7x15x4xbf16>
    %c1_122 = arith.constant 1 : index
    %c0_123 = arith.constant 0 : index
    %c20_124 = arith.constant 20 : index
    %63 = vector.load %arg11[%c1_122, %c0_123, %c20_124] : memref<8x16x72xbf16, #tpu.memory_space<vmem>>, vector<7x15x4xbf16>
    tpu.vector_store %arg11[%c1_122, %c0_123, %c20_124], %62 {strides = array<i32>} : memref<8x16x72xbf16, #tpu.memory_space<vmem>>, vector<7x15x4xbf16>,
    %cst_125 = arith.constant 0.000000e+00 : bf16
    %64 = vector.broadcast %cst_125 : bf16 to vector<8x1x4xbf16>
    %c0_126 = arith.constant 0 : index
    %c0_127 = arith.constant 0 : index
    %c28 = arith.constant 28 : index
    %65 = vector.load %arg11[%c0_126, %c0_127, %c28] : memref<8x16x72xbf16, #tpu.memory_space<vmem>>, vector<8x1x4xbf16>
    tpu.vector_store %arg11[%c0_126, %c0_127, %c28], %64 {strides = array<i32>} : memref<8x16x72xbf16, #tpu.memory_space<vmem>>, vector<8x1x4xbf16>,
    %c0_128 = arith.constant 0 : index
    %c0_129 = arith.constant 0 : index
    %c0_130 = arith.constant 0 : index
    %c0_131 = arith.constant 0 : index
    %66 = vector.load %arg2[%c0_128, %c0_129, %c0_130, %c0_131] : memref<1x16x16x4xbf16, #tpu.memory_space<vmem>>, vector<1x8x15x4xbf16>
    %67 = vector.shape_cast %66 : vector<1x8x15x4xbf16> to vector<8x15x4xbf16>
    %c0_132 = arith.constant 0 : index
    %c1_133 = arith.constant 1 : index
    %c28_134 = arith.constant 28 : index
    %68 = vector.load %arg11[%c0_132, %c1_133, %c28_134] : memref<8x16x72xbf16, #tpu.memory_space<vmem>>, vector<8x15x4xbf16>
    tpu.vector_store %arg11[%c0_132, %c1_133, %c28_134], %67 {strides = array<i32>} : memref<8x16x72xbf16, #tpu.memory_space<vmem>>, vector<8x15x4xbf16>,
    %c0_135 = arith.constant 0 : index
    %c0_136 = arith.constant 0 : index
    %c0_137 = arith.constant 0 : index
    %c0_138 = arith.constant 0 : index
    %69 = vector.load %arg2[%c0_135, %c0_136, %c0_137, %c0_138] : memref<1x16x16x4xbf16, #tpu.memory_space<vmem>>, vector<1x8x16x4xbf16>
    %70 = vector.shape_cast %69 : vector<1x8x16x4xbf16> to vector<8x16x4xbf16>
    %c0_139 = arith.constant 0 : index
    %c0_140 = arith.constant 0 : index
    %c36 = arith.constant 36 : index
    %71 = vector.load %arg11[%c0_139, %c0_140, %c36] : memref<8x16x72xbf16, #tpu.memory_space<vmem>>, vector<8x16x4xbf16>
    tpu.vector_store %arg11[%c0_139, %c0_140, %c36], %70 {strides = array<i32>} : memref<8x16x72xbf16, #tpu.memory_space<vmem>>, vector<8x16x4xbf16>,
    %cst_141 = arith.constant 0.000000e+00 : bf16
    %72 = vector.broadcast %cst_141 : bf16 to vector<8x1x4xbf16>
    %c0_142 = arith.constant 0 : index
    %c15_143 = arith.constant 15 : index
    %c44 = arith.constant 44 : index
    %73 = vector.load %arg11[%c0_142, %c15_143, %c44] : memref<8x16x72xbf16, #tpu.memory_space<vmem>>, vector<8x1x4xbf16>
    tpu.vector_store %arg11[%c0_142, %c15_143, %c44], %72 {strides = array<i32>} : memref<8x16x72xbf16, #tpu.memory_space<vmem>>, vector<8x1x4xbf16>,
    %c0_144 = arith.constant 0 : index
    %c0_145 = arith.constant 0 : index
    %c1_146 = arith.constant 1 : index
    %c0_147 = arith.constant 0 : index
    %74 = vector.load %arg2[%c0_144, %c0_145, %c1_146, %c0_147] : memref<1x16x16x4xbf16, #tpu.memory_space<vmem>>, vector<1x8x15x4xbf16>
    %75 = vector.shape_cast %74 : vector<1x8x15x4xbf16> to vector<8x15x4xbf16>
    %c0_148 = arith.constant 0 : index
    %c0_149 = arith.constant 0 : index
    %c44_150 = arith.constant 44 : index
    %76 = vector.load %arg11[%c0_148, %c0_149, %c44_150] : memref<8x16x72xbf16, #tpu.memory_space<vmem>>, vector<8x15x4xbf16>
    tpu.vector_store %arg11[%c0_148, %c0_149, %c44_150], %75 {strides = array<i32>} : memref<8x16x72xbf16, #tpu.memory_space<vmem>>, vector<8x15x4xbf16>,
    %cst_151 = arith.constant 0.000000e+00 : bf16
    %77 = vector.broadcast %cst_151 : bf16 to vector<8x1x4xbf16>
    %c0_152 = arith.constant 0 : index
    %c0_153 = arith.constant 0 : index
    %c52 = arith.constant 52 : index
    %78 = vector.load %arg11[%c0_152, %c0_153, %c52] : memref<8x16x72xbf16, #tpu.memory_space<vmem>>, vector<8x1x4xbf16>
    tpu.vector_store %arg11[%c0_152, %c0_153, %c52], %77 {strides = array<i32>} : memref<8x16x72xbf16, #tpu.memory_space<vmem>>, vector<8x1x4xbf16>,
    %c0_154 = arith.constant 0 : index
    %c1_155 = arith.constant 1 : index
    %c0_156 = arith.constant 0 : index
    %c0_157 = arith.constant 0 : index
    %79 = vector.load %arg2[%c0_154, %c1_155, %c0_156, %c0_157] : memref<1x16x16x4xbf16, #tpu.memory_space<vmem>>, vector<1x8x15x4xbf16>
    %80 = vector.shape_cast %79 : vector<1x8x15x4xbf16> to vector<8x15x4xbf16>
    %c0_158 = arith.constant 0 : index
    %c1_159 = arith.constant 1 : index
    %c52_160 = arith.constant 52 : index
    %81 = vector.load %arg11[%c0_158, %c1_159, %c52_160] : memref<8x16x72xbf16, #tpu.memory_space<vmem>>, vector<8x15x4xbf16>
    tpu.vector_store %arg11[%c0_158, %c1_159, %c52_160], %80 {strides = array<i32>} : memref<8x16x72xbf16, #tpu.memory_space<vmem>>, vector<8x15x4xbf16>,
    %c0_161 = arith.constant 0 : index
    %c1_162 = arith.constant 1 : index
    %c0_163 = arith.constant 0 : index
    %c0_164 = arith.constant 0 : index
    %82 = vector.load %arg2[%c0_161, %c1_162, %c0_163, %c0_164] : memref<1x16x16x4xbf16, #tpu.memory_space<vmem>>, vector<1x8x16x4xbf16>
    %83 = vector.shape_cast %82 : vector<1x8x16x4xbf16> to vector<8x16x4xbf16>
    %c0_165 = arith.constant 0 : index
    %c0_166 = arith.constant 0 : index
    %c60 = arith.constant 60 : index
    %84 = vector.load %arg11[%c0_165, %c0_166, %c60] : memref<8x16x72xbf16, #tpu.memory_space<vmem>>, vector<8x16x4xbf16>
    tpu.vector_store %arg11[%c0_165, %c0_166, %c60], %83 {strides = array<i32>} : memref<8x16x72xbf16, #tpu.memory_space<vmem>>, vector<8x16x4xbf16>,
    %cst_167 = arith.constant 0.000000e+00 : bf16
    %85 = vector.broadcast %cst_167 : bf16 to vector<8x1x4xbf16>
    %c0_168 = arith.constant 0 : index
    %c15_169 = arith.constant 15 : index
    %c68 = arith.constant 68 : index
    %86 = vector.load %arg11[%c0_168, %c15_169, %c68] : memref<8x16x72xbf16, #tpu.memory_space<vmem>>, vector<8x1x4xbf16>
    tpu.vector_store %arg11[%c0_168, %c15_169, %c68], %85 {strides = array<i32>} : memref<8x16x72xbf16, #tpu.memory_space<vmem>>, vector<8x1x4xbf16>,
    %c0_170 = arith.constant 0 : index
    %c1_171 = arith.constant 1 : index
    %c1_172 = arith.constant 1 : index
    %c0_173 = arith.constant 0 : index
    %87 = vector.load %arg2[%c0_170, %c1_171, %c1_172, %c0_173] : memref<1x16x16x4xbf16, #tpu.memory_space<vmem>>, vector<1x8x15x4xbf16>
    %88 = vector.shape_cast %87 : vector<1x8x15x4xbf16> to vector<8x15x4xbf16>
    %c0_174 = arith.constant 0 : index
    %c0_175 = arith.constant 0 : index
    %c68_176 = arith.constant 68 : index
    %89 = vector.load %arg11[%c0_174, %c0_175, %c68_176] : memref<8x16x72xbf16, #tpu.memory_space<vmem>>, vector<8x15x4xbf16>
    tpu.vector_store %arg11[%c0_174, %c0_175, %c68_176], %88 {strides = array<i32>} : memref<8x16x72xbf16, #tpu.memory_space<vmem>>, vector<8x15x4xbf16>,
    %c0_177 = arith.constant 0 : index
    %c0_178 = arith.constant 0 : index
    %c0_179 = arith.constant 0 : index
    %90 = vector.load %arg11[%c0_177, %c0_178, %c0_179] : memref<8x16x72xbf16, #tpu.memory_space<vmem>>, vector<8x16x72xbf16>
    %91 = vector.shape_cast %90 : vector<8x16x72xbf16> to vector<128x72xbf16>
    %c0_180 = arith.constant 0 : index
    %c0_181 = arith.constant 0 : index
    %92 = vector.load %arg3[%c0_180, %c0_181] : memref<72x4xbf16, #tpu.memory_space<vmem>>, vector<72x4xbf16>
    %cst_182 = arith.constant dense<0.000000e+00> : vector<128x4xf32>
    %93 = tpu.matmul %91, %92, %cst_182 {dimension_numbers = #tpu.dot_dimension_numbers<[1], [0], [0], [1], [0, 0, 1, 1], [], []>} : vector<128x72xbf16>, vector<72x4xbf16>, vector<128x4xf32> -> vector<128x4xf32>
    %c0_183 = arith.constant 0 : index
    %c0_184 = arith.constant 0 : index
    %94 = vector.load %arg4[%c0_183, %c0_184] : memref<1x4xf32, #tpu.memory_space<vmem>>, vector<1x4xf32>
    %95 = vector.broadcast %94 : vector<1x4xf32> to vector<128x4xf32>
    %96 = arith.mulf %93, %95 : vector<128x4xf32>
    %c0_185 = arith.constant 0 : index
    %c0_186 = arith.constant 0 : index
    %97 = vector.load %arg5[%c0_185, %c0_186] : memref<1x4xf32, #tpu.memory_space<vmem>>, vector<1x4xf32>
    %98 = vector.broadcast %97 : vector<1x4xf32> to vector<128x4xf32>
    %99 = arith.addf %96, %98 : vector<128x4xf32>
    %cst_187 = arith.constant 0.000000e+00 : f32
    %100 = vector.broadcast %cst_187 : f32 to vector<128x4xf32>
    %101 = arith.maximumf %99, %100 : vector<128x4xf32>
    %102 = vector.shape_cast %101 : vector<128x4xf32> to vector<8x16x4xf32>
    %103 = arith.truncf %102 : vector<8x16x4xf32> to vector<8x16x4xbf16>
    %c0_188 = arith.constant 0 : index
    %c0_189 = arith.constant 0 : index
    %c0_190 = arith.constant 0 : index
    %104 = vector.load %arg10[%c0_188, %c0_189, %c0_190] : memref<16x16x4xbf16, #tpu.memory_space<vmem>>, vector<8x16x4xbf16>
    tpu.vector_store %arg10[%c0_188, %c0_189, %c0_190], %103 {strides = array<i32>} : memref<16x16x4xbf16, #tpu.memory_space<vmem>>, vector<8x16x4xbf16>,
    %cst_191 = arith.constant 0.000000e+00 : bf16
    %105 = vector.broadcast %cst_191 : bf16 to vector<8x1x4xbf16>
    %c0_192 = arith.constant 0 : index
    %c0_193 = arith.constant 0 : index
    %c0_194 = arith.constant 0 : index
    %106 = vector.load %arg11[%c0_192, %c0_193, %c0_194] : memref<8x16x72xbf16, #tpu.memory_space<vmem>>, vector<8x1x4xbf16>
    tpu.vector_store %arg11[%c0_192, %c0_193, %c0_194], %105 {strides = array<i32>} : memref<8x16x72xbf16, #tpu.memory_space<vmem>>, vector<8x1x4xbf16>,
    %c0_195 = arith.constant 0 : index
    %c7 = arith.constant 7 : index
    %c0_196 = arith.constant 0 : index
    %c0_197 = arith.constant 0 : index
    %107 = vector.load %arg1[%c0_195, %c7, %c0_196, %c0_197] : memref<1x16x16x4xbf16, #tpu.memory_space<vmem>>, vector<1x8x15x4xbf16>
    %108 = vector.shape_cast %107 : vector<1x8x15x4xbf16> to vector<8x15x4xbf16>
    %c0_198 = arith.constant 0 : index
    %c1_199 = arith.constant 1 : index
    %c0_200 = arith.constant 0 : index
    %109 = vector.load %arg11[%c0_198, %c1_199, %c0_200] : memref<8x16x72xbf16, #tpu.memory_space<vmem>>, vector<8x15x4xbf16>
    tpu.vector_store %arg11[%c0_198, %c1_199, %c0_200], %108 {strides = array<i32>} : memref<8x16x72xbf16, #tpu.memory_space<vmem>>, vector<8x15x4xbf16>,
    %c0_201 = arith.constant 0 : index
    %c7_202 = arith.constant 7 : index
    %c0_203 = arith.constant 0 : index
    %c0_204 = arith.constant 0 : index
    %110 = vector.load %arg1[%c0_201, %c7_202, %c0_203, %c0_204] : memref<1x16x16x4xbf16, #tpu.memory_space<vmem>>, vector<1x8x16x4xbf16>
    %111 = vector.shape_cast %110 : vector<1x8x16x4xbf16> to vector<8x16x4xbf16>
    %c0_205 = arith.constant 0 : index
    %c0_206 = arith.constant 0 : index
    %c8_207 = arith.constant 8 : index
    %112 = vector.load %arg11[%c0_205, %c0_206, %c8_207] : memref<8x16x72xbf16, #tpu.memory_space<vmem>>, vector<8x16x4xbf16>
    tpu.vector_store %arg11[%c0_205, %c0_206, %c8_207], %111 {strides = array<i32>} : memref<8x16x72xbf16, #tpu.memory_space<vmem>>, vector<8x16x4xbf16>,
    %cst_208 = arith.constant 0.000000e+00 : bf16
    %113 = vector.broadcast %cst_208 : bf16 to vector<8x1x4xbf16>
    %c0_209 = arith.constant 0 : index
    %c15_210 = arith.constant 15 : index
    %c16_211 = arith.constant 16 : index
    %114 = vector.load %arg11[%c0_209, %c15_210, %c16_211] : memref<8x16x72xbf16, #tpu.memory_space<vmem>>, vector<8x1x4xbf16>
    tpu.vector_store %arg11[%c0_209, %c15_210, %c16_211], %113 {strides = array<i32>} : memref<8x16x72xbf16, #tpu.memory_space<vmem>>, vector<8x1x4xbf16>,
    %c0_212 = arith.constant 0 : index
    %c7_213 = arith.constant 7 : index
    %c1_214 = arith.constant 1 : index
    %c0_215 = arith.constant 0 : index
    %115 = vector.load %arg1[%c0_212, %c7_213, %c1_214, %c0_215] : memref<1x16x16x4xbf16, #tpu.memory_space<vmem>>, vector<1x8x15x4xbf16>
    %116 = vector.shape_cast %115 : vector<1x8x15x4xbf16> to vector<8x15x4xbf16>
    %c0_216 = arith.constant 0 : index
    %c0_217 = arith.constant 0 : index
    %c16_218 = arith.constant 16 : index
    %117 = vector.load %arg11[%c0_216, %c0_217, %c16_218] : memref<8x16x72xbf16, #tpu.memory_space<vmem>>, vector<8x15x4xbf16>
    tpu.vector_store %arg11[%c0_216, %c0_217, %c16_218], %116 {strides = array<i32>} : memref<8x16x72xbf16, #tpu.memory_space<vmem>>, vector<8x15x4xbf16>,
    %cst_219 = arith.constant 0.000000e+00 : bf16
    %118 = vector.broadcast %cst_219 : bf16 to vector<8x1x4xbf16>
    %c0_220 = arith.constant 0 : index
    %c0_221 = arith.constant 0 : index
    %c24_222 = arith.constant 24 : index
    %119 = vector.load %arg11[%c0_220, %c0_221, %c24_222] : memref<8x16x72xbf16, #tpu.memory_space<vmem>>, vector<8x1x4xbf16>
    tpu.vector_store %arg11[%c0_220, %c0_221, %c24_222], %118 {strides = array<i32>} : memref<8x16x72xbf16, #tpu.memory_space<vmem>>, vector<8x1x4xbf16>,
    %c0_223 = arith.constant 0 : index
    %c8_224 = arith.constant 8 : index
    %c0_225 = arith.constant 0 : index
    %c0_226 = arith.constant 0 : index
    %120 = vector.load %arg1[%c0_223, %c8_224, %c0_225, %c0_226] : memref<1x16x16x4xbf16, #tpu.memory_space<vmem>>, vector<1x8x15x4xbf16>
    %121 = vector.shape_cast %120 : vector<1x8x15x4xbf16> to vector<8x15x4xbf16>
    %c0_227 = arith.constant 0 : index
    %c1_228 = arith.constant 1 : index
    %c24_229 = arith.constant 24 : index
    %122 = vector.load %arg11[%c0_227, %c1_228, %c24_229] : memref<8x16x72xbf16, #tpu.memory_space<vmem>>, vector<8x15x4xbf16>
    tpu.vector_store %arg11[%c0_227, %c1_228, %c24_229], %121 {strides = array<i32>} : memref<8x16x72xbf16, #tpu.memory_space<vmem>>, vector<8x15x4xbf16>,
    %c0_230 = arith.constant 0 : index
    %c8_231 = arith.constant 8 : index
    %c0_232 = arith.constant 0 : index
    %c0_233 = arith.constant 0 : index
    %123 = vector.load %arg1[%c0_230, %c8_231, %c0_232, %c0_233] : memref<1x16x16x4xbf16, #tpu.memory_space<vmem>>, vector<1x8x16x4xbf16>
    %124 = vector.shape_cast %123 : vector<1x8x16x4xbf16> to vector<8x16x4xbf16>
    %c0_234 = arith.constant 0 : index
    %c0_235 = arith.constant 0 : index
    %c32_236 = arith.constant 32 : index
    %125 = vector.load %arg11[%c0_234, %c0_235, %c32_236] : memref<8x16x72xbf16, #tpu.memory_space<vmem>>, vector<8x16x4xbf16>
    tpu.vector_store %arg11[%c0_234, %c0_235, %c32_236], %124 {strides = array<i32>} : memref<8x16x72xbf16, #tpu.memory_space<vmem>>, vector<8x16x4xbf16>,
    %cst_237 = arith.constant 0.000000e+00 : bf16
    %126 = vector.broadcast %cst_237 : bf16 to vector<8x1x4xbf16>
    %c0_238 = arith.constant 0 : index
    %c15_239 = arith.constant 15 : index
    %c40_240 = arith.constant 40 : index
    %127 = vector.load %arg11[%c0_238, %c15_239, %c40_240] : memref<8x16x72xbf16, #tpu.memory_space<vmem>>, vector<8x1x4xbf16>
    tpu.vector_store %arg11[%c0_238, %c15_239, %c40_240], %126 {strides = array<i32>} : memref<8x16x72xbf16, #tpu.memory_space<vmem>>, vector<8x1x4xbf16>,
    %c0_241 = arith.constant 0 : index
    %c8_242 = arith.constant 8 : index
    %c1_243 = arith.constant 1 : index
    %c0_244 = arith.constant 0 : index
    %128 = vector.load %arg1[%c0_241, %c8_242, %c1_243, %c0_244] : memref<1x16x16x4xbf16, #tpu.memory_space<vmem>>, vector<1x8x15x4xbf16>
    %129 = vector.shape_cast %128 : vector<1x8x15x4xbf16> to vector<8x15x4xbf16>
    %c0_245 = arith.constant 0 : index
    %c0_246 = arith.constant 0 : index
    %c40_247 = arith.constant 40 : index
    %130 = vector.load %arg11[%c0_245, %c0_246, %c40_247] : memref<8x16x72xbf16, #tpu.memory_space<vmem>>, vector<8x15x4xbf16>
    tpu.vector_store %arg11[%c0_245, %c0_246, %c40_247], %129 {strides = array<i32>} : memref<8x16x72xbf16, #tpu.memory_space<vmem>>, vector<8x15x4xbf16>,
    %cst_248 = arith.constant 0.000000e+00 : bf16
    %131 = vector.broadcast %cst_248 : bf16 to vector<1x16x4xbf16>
    %c7_249 = arith.constant 7 : index
    %c0_250 = arith.constant 0 : index
    %c48_251 = arith.constant 48 : index
    %132 = vector.load %arg11[%c7_249, %c0_250, %c48_251] : memref<8x16x72xbf16, #tpu.memory_space<vmem>>, vector<1x16x4xbf16>
    tpu.vector_store %arg11[%c7_249, %c0_250, %c48_251], %131 {strides = array<i32>} : memref<8x16x72xbf16, #tpu.memory_space<vmem>>, vector<1x16x4xbf16>,
    %cst_252 = arith.constant 0.000000e+00 : bf16
    %133 = vector.broadcast %cst_252 : bf16 to vector<7x1x4xbf16>
    %c0_253 = arith.constant 0 : index
    %c0_254 = arith.constant 0 : index
    %c48_255 = arith.constant 48 : index
    %134 = vector.load %arg11[%c0_253, %c0_254, %c48_255] : memref<8x16x72xbf16, #tpu.memory_space<vmem>>, vector<7x1x4xbf16>
    tpu.vector_store %arg11[%c0_253, %c0_254, %c48_255], %133 {strides = array<i32>} : memref<8x16x72xbf16, #tpu.memory_space<vmem>>, vector<7x1x4xbf16>,
    %c0_256 = arith.constant 0 : index
    %c9 = arith.constant 9 : index
    %c0_257 = arith.constant 0 : index
    %c0_258 = arith.constant 0 : index
    %135 = vector.load %arg1[%c0_256, %c9, %c0_257, %c0_258] : memref<1x16x16x4xbf16, #tpu.memory_space<vmem>>, vector<1x7x15x4xbf16>
    %136 = vector.shape_cast %135 : vector<1x7x15x4xbf16> to vector<7x15x4xbf16>
    %c0_259 = arith.constant 0 : index
    %c1_260 = arith.constant 1 : index
    %c48_261 = arith.constant 48 : index
    %137 = vector.load %arg11[%c0_259, %c1_260, %c48_261] : memref<8x16x72xbf16, #tpu.memory_space<vmem>>, vector<7x15x4xbf16>
    tpu.vector_store %arg11[%c0_259, %c1_260, %c48_261], %136 {strides = array<i32>} : memref<8x16x72xbf16, #tpu.memory_space<vmem>>, vector<7x15x4xbf16>,
    %cst_262 = arith.constant 0.000000e+00 : bf16
    %138 = vector.broadcast %cst_262 : bf16 to vector<1x16x4xbf16>
    %c7_263 = arith.constant 7 : index
    %c0_264 = arith.constant 0 : index
    %c56_265 = arith.constant 56 : index
    %139 = vector.load %arg11[%c7_263, %c0_264, %c56_265] : memref<8x16x72xbf16, #tpu.memory_space<vmem>>, vector<1x16x4xbf16>
    tpu.vector_store %arg11[%c7_263, %c0_264, %c56_265], %138 {strides = array<i32>} : memref<8x16x72xbf16, #tpu.memory_space<vmem>>, vector<1x16x4xbf16>,
    %c0_266 = arith.constant 0 : index
    %c9_267 = arith.constant 9 : index
    %c0_268 = arith.constant 0 : index
    %c0_269 = arith.constant 0 : index
    %140 = vector.load %arg1[%c0_266, %c9_267, %c0_268, %c0_269] : memref<1x16x16x4xbf16, #tpu.memory_space<vmem>>, vector<1x7x16x4xbf16>
    %141 = vector.shape_cast %140 : vector<1x7x16x4xbf16> to vector<7x16x4xbf16>
    %c0_270 = arith.constant 0 : index
    %c0_271 = arith.constant 0 : index
    %c56_272 = arith.constant 56 : index
    %142 = vector.load %arg11[%c0_270, %c0_271, %c56_272] : memref<8x16x72xbf16, #tpu.memory_space<vmem>>, vector<7x16x4xbf16>
    tpu.vector_store %arg11[%c0_270, %c0_271, %c56_272], %141 {strides = array<i32>} : memref<8x16x72xbf16, #tpu.memory_space<vmem>>, vector<7x16x4xbf16>,
    %cst_273 = arith.constant 0.000000e+00 : bf16
    %143 = vector.broadcast %cst_273 : bf16 to vector<1x16x4xbf16>
    %c7_274 = arith.constant 7 : index
    %c0_275 = arith.constant 0 : index
    %c64_276 = arith.constant 64 : index
    %144 = vector.load %arg11[%c7_274, %c0_275, %c64_276] : memref<8x16x72xbf16, #tpu.memory_space<vmem>>, vector<1x16x4xbf16>
    tpu.vector_store %arg11[%c7_274, %c0_275, %c64_276], %143 {strides = array<i32>} : memref<8x16x72xbf16, #tpu.memory_space<vmem>>, vector<1x16x4xbf16>,
    %cst_277 = arith.constant 0.000000e+00 : bf16
    %145 = vector.broadcast %cst_277 : bf16 to vector<7x1x4xbf16>
    %c0_278 = arith.constant 0 : index
    %c15_279 = arith.constant 15 : index
    %c64_280 = arith.constant 64 : index
    %146 = vector.load %arg11[%c0_278, %c15_279, %c64_280] : memref<8x16x72xbf16, #tpu.memory_space<vmem>>, vector<7x1x4xbf16>
    tpu.vector_store %arg11[%c0_278, %c15_279, %c64_280], %145 {strides = array<i32>} : memref<8x16x72xbf16, #tpu.memory_space<vmem>>, vector<7x1x4xbf16>,
    %c0_281 = arith.constant 0 : index
    %c9_282 = arith.constant 9 : index
    %c1_283 = arith.constant 1 : index
    %c0_284 = arith.constant 0 : index
    %147 = vector.load %arg1[%c0_281, %c9_282, %c1_283, %c0_284] : memref<1x16x16x4xbf16, #tpu.memory_space<vmem>>, vector<1x7x15x4xbf16>
    %148 = vector.shape_cast %147 : vector<1x7x15x4xbf16> to vector<7x15x4xbf16>
    %c0_285 = arith.constant 0 : index
    %c0_286 = arith.constant 0 : index
    %c64_287 = arith.constant 64 : index
    %149 = vector.load %arg11[%c0_285, %c0_286, %c64_287] : memref<8x16x72xbf16, #tpu.memory_space<vmem>>, vector<7x15x4xbf16>
    tpu.vector_store %arg11[%c0_285, %c0_286, %c64_287], %148 {strides = array<i32>} : memref<8x16x72xbf16, #tpu.memory_space<vmem>>, vector<7x15x4xbf16>,
    %cst_288 = arith.constant 0.000000e+00 : bf16
    %150 = vector.broadcast %cst_288 : bf16 to vector<8x1x4xbf16>
    %c0_289 = arith.constant 0 : index
    %c0_290 = arith.constant 0 : index
    %c4_291 = arith.constant 4 : index
    %151 = vector.load %arg11[%c0_289, %c0_290, %c4_291] : memref<8x16x72xbf16, #tpu.memory_space<vmem>>, vector<8x1x4xbf16>
    tpu.vector_store %arg11[%c0_289, %c0_290, %c4_291], %150 {strides = array<i32>} : memref<8x16x72xbf16, #tpu.memory_space<vmem>>, vector<8x1x4xbf16>,
    %c0_292 = arith.constant 0 : index
    %c7_293 = arith.constant 7 : index
    %c0_294 = arith.constant 0 : index
    %c0_295 = arith.constant 0 : index
    %152 = vector.load %arg2[%c0_292, %c7_293, %c0_294, %c0_295] : memref<1x16x16x4xbf16, #tpu.memory_space<vmem>>, vector<1x8x15x4xbf16>
    %153 = vector.shape_cast %152 : vector<1x8x15x4xbf16> to vector<8x15x4xbf16>
    %c0_296 = arith.constant 0 : index
    %c1_297 = arith.constant 1 : index
    %c4_298 = arith.constant 4 : index
    %154 = vector.load %arg11[%c0_296, %c1_297, %c4_298] : memref<8x16x72xbf16, #tpu.memory_space<vmem>>, vector<8x15x4xbf16>
    tpu.vector_store %arg11[%c0_296, %c1_297, %c4_298], %153 {strides = array<i32>} : memref<8x16x72xbf16, #tpu.memory_space<vmem>>, vector<8x15x4xbf16>,
    %c0_299 = arith.constant 0 : index
    %c7_300 = arith.constant 7 : index
    %c0_301 = arith.constant 0 : index
    %c0_302 = arith.constant 0 : index
    %155 = vector.load %arg2[%c0_299, %c7_300, %c0_301, %c0_302] : memref<1x16x16x4xbf16, #tpu.memory_space<vmem>>, vector<1x8x16x4xbf16>
    %156 = vector.shape_cast %155 : vector<1x8x16x4xbf16> to vector<8x16x4xbf16>
    %c0_303 = arith.constant 0 : index
    %c0_304 = arith.constant 0 : index
    %c12_305 = arith.constant 12 : index
    %157 = vector.load %arg11[%c0_303, %c0_304, %c12_305] : memref<8x16x72xbf16, #tpu.memory_space<vmem>>, vector<8x16x4xbf16>
    tpu.vector_store %arg11[%c0_303, %c0_304, %c12_305], %156 {strides = array<i32>} : memref<8x16x72xbf16, #tpu.memory_space<vmem>>, vector<8x16x4xbf16>,
    %cst_306 = arith.constant 0.000000e+00 : bf16
    %158 = vector.broadcast %cst_306 : bf16 to vector<8x1x4xbf16>
    %c0_307 = arith.constant 0 : index
    %c15_308 = arith.constant 15 : index
    %c20_309 = arith.constant 20 : index
    %159 = vector.load %arg11[%c0_307, %c15_308, %c20_309] : memref<8x16x72xbf16, #tpu.memory_space<vmem>>, vector<8x1x4xbf16>
    tpu.vector_store %arg11[%c0_307, %c15_308, %c20_309], %158 {strides = array<i32>} : memref<8x16x72xbf16, #tpu.memory_space<vmem>>, vector<8x1x4xbf16>,
    %c0_310 = arith.constant 0 : index
    %c7_311 = arith.constant 7 : index
    %c1_312 = arith.constant 1 : index
    %c0_313 = arith.constant 0 : index
    %160 = vector.load %arg2[%c0_310, %c7_311, %c1_312, %c0_313] : memref<1x16x16x4xbf16, #tpu.memory_space<vmem>>, vector<1x8x15x4xbf16>
    %161 = vector.shape_cast %160 : vector<1x8x15x4xbf16> to vector<8x15x4xbf16>
    %c0_314 = arith.constant 0 : index
    %c0_315 = arith.constant 0 : index
    %c20_316 = arith.constant 20 : index
    %162 = vector.load %arg11[%c0_314, %c0_315, %c20_316] : memref<8x16x72xbf16, #tpu.memory_space<vmem>>, vector<8x15x4xbf16>
    tpu.vector_store %arg11[%c0_314, %c0_315, %c20_316], %161 {strides = array<i32>} : memref<8x16x72xbf16, #tpu.memory_space<vmem>>, vector<8x15x4xbf16>,
    %cst_317 = arith.constant 0.000000e+00 : bf16
    %163 = vector.broadcast %cst_317 : bf16 to vector<8x1x4xbf16>
    %c0_318 = arith.constant 0 : index
    %c0_319 = arith.constant 0 : index
    %c28_320 = arith.constant 28 : index
    %164 = vector.load %arg11[%c0_318, %c0_319, %c28_320] : memref<8x16x72xbf16, #tpu.memory_space<vmem>>, vector<8x1x4xbf16>
    tpu.vector_store %arg11[%c0_318, %c0_319, %c28_320], %163 {strides = array<i32>} : memref<8x16x72xbf16, #tpu.memory_space<vmem>>, vector<8x1x4xbf16>,
    %c0_321 = arith.constant 0 : index
    %c8_322 = arith.constant 8 : index
    %c0_323 = arith.constant 0 : index
    %c0_324 = arith.constant 0 : index
    %165 = vector.load %arg2[%c0_321, %c8_322, %c0_323, %c0_324] : memref<1x16x16x4xbf16, #tpu.memory_space<vmem>>, vector<1x8x15x4xbf16>
    %166 = vector.shape_cast %165 : vector<1x8x15x4xbf16> to vector<8x15x4xbf16>
    %c0_325 = arith.constant 0 : index
    %c1_326 = arith.constant 1 : index
    %c28_327 = arith.constant 28 : index
    %167 = vector.load %arg11[%c0_325, %c1_326, %c28_327] : memref<8x16x72xbf16, #tpu.memory_space<vmem>>, vector<8x15x4xbf16>
    tpu.vector_store %arg11[%c0_325, %c1_326, %c28_327], %166 {strides = array<i32>} : memref<8x16x72xbf16, #tpu.memory_space<vmem>>, vector<8x15x4xbf16>,
    %c0_328 = arith.constant 0 : index
    %c8_329 = arith.constant 8 : index
    %c0_330 = arith.constant 0 : index
    %c0_331 = arith.constant 0 : index
    %168 = vector.load %arg2[%c0_328, %c8_329, %c0_330, %c0_331] : memref<1x16x16x4xbf16, #tpu.memory_space<vmem>>, vector<1x8x16x4xbf16>
    %169 = vector.shape_cast %168 : vector<1x8x16x4xbf16> to vector<8x16x4xbf16>
    %c0_332 = arith.constant 0 : index
    %c0_333 = arith.constant 0 : index
    %c36_334 = arith.constant 36 : index
    %170 = vector.load %arg11[%c0_332, %c0_333, %c36_334] : memref<8x16x72xbf16, #tpu.memory_space<vmem>>, vector<8x16x4xbf16>
    tpu.vector_store %arg11[%c0_332, %c0_333, %c36_334], %169 {strides = array<i32>} : memref<8x16x72xbf16, #tpu.memory_space<vmem>>, vector<8x16x4xbf16>,
    %cst_335 = arith.constant 0.000000e+00 : bf16
    %171 = vector.broadcast %cst_335 : bf16 to vector<8x1x4xbf16>
    %c0_336 = arith.constant 0 : index
    %c15_337 = arith.constant 15 : index
    %c44_338 = arith.constant 44 : index
    %172 = vector.load %arg11[%c0_336, %c15_337, %c44_338] : memref<8x16x72xbf16, #tpu.memory_space<vmem>>, vector<8x1x4xbf16>
    tpu.vector_store %arg11[%c0_336, %c15_337, %c44_338], %171 {strides = array<i32>} : memref<8x16x72xbf16, #tpu.memory_space<vmem>>, vector<8x1x4xbf16>,
    %c0_339 = arith.constant 0 : index
    %c8_340 = arith.constant 8 : index
    %c1_341 = arith.constant 1 : index
    %c0_342 = arith.constant 0 : index
    %173 = vector.load %arg2[%c0_339, %c8_340, %c1_341, %c0_342] : memref<1x16x16x4xbf16, #tpu.memory_space<vmem>>, vector<1x8x15x4xbf16>
    %174 = vector.shape_cast %173 : vector<1x8x15x4xbf16> to vector<8x15x4xbf16>
    %c0_343 = arith.constant 0 : index
    %c0_344 = arith.constant 0 : index
    %c44_345 = arith.constant 44 : index
    %175 = vector.load %arg11[%c0_343, %c0_344, %c44_345] : memref<8x16x72xbf16, #tpu.memory_space<vmem>>, vector<8x15x4xbf16>
    tpu.vector_store %arg11[%c0_343, %c0_344, %c44_345], %174 {strides = array<i32>} : memref<8x16x72xbf16, #tpu.memory_space<vmem>>, vector<8x15x4xbf16>,
    %cst_346 = arith.constant 0.000000e+00 : bf16
    %176 = vector.broadcast %cst_346 : bf16 to vector<1x16x4xbf16>
    %c7_347 = arith.constant 7 : index
    %c0_348 = arith.constant 0 : index
    %c52_349 = arith.constant 52 : index
    %177 = vector.load %arg11[%c7_347, %c0_348, %c52_349] : memref<8x16x72xbf16, #tpu.memory_space<vmem>>, vector<1x16x4xbf16>
    tpu.vector_store %arg11[%c7_347, %c0_348, %c52_349], %176 {strides = array<i32>} : memref<8x16x72xbf16, #tpu.memory_space<vmem>>, vector<1x16x4xbf16>,
    %cst_350 = arith.constant 0.000000e+00 : bf16
    %178 = vector.broadcast %cst_350 : bf16 to vector<7x1x4xbf16>
    %c0_351 = arith.constant 0 : index
    %c0_352 = arith.constant 0 : index
    %c52_353 = arith.constant 52 : index
    %179 = vector.load %arg11[%c0_351, %c0_352, %c52_353] : memref<8x16x72xbf16, #tpu.memory_space<vmem>>, vector<7x1x4xbf16>
    tpu.vector_store %arg11[%c0_351, %c0_352, %c52_353], %178 {strides = array<i32>} : memref<8x16x72xbf16, #tpu.memory_space<vmem>>, vector<7x1x4xbf16>,
    %c0_354 = arith.constant 0 : index
    %c9_355 = arith.constant 9 : index
    %c0_356 = arith.constant 0 : index
    %c0_357 = arith.constant 0 : index
    %180 = vector.load %arg2[%c0_354, %c9_355, %c0_356, %c0_357] : memref<1x16x16x4xbf16, #tpu.memory_space<vmem>>, vector<1x7x15x4xbf16>
    %181 = vector.shape_cast %180 : vector<1x7x15x4xbf16> to vector<7x15x4xbf16>
    %c0_358 = arith.constant 0 : index
    %c1_359 = arith.constant 1 : index
    %c52_360 = arith.constant 52 : index
    %182 = vector.load %arg11[%c0_358, %c1_359, %c52_360] : memref<8x16x72xbf16, #tpu.memory_space<vmem>>, vector<7x15x4xbf16>
    tpu.vector_store %arg11[%c0_358, %c1_359, %c52_360], %181 {strides = array<i32>} : memref<8x16x72xbf16, #tpu.memory_space<vmem>>, vector<7x15x4xbf16>,
    %cst_361 = arith.constant 0.000000e+00 : bf16
    %183 = vector.broadcast %cst_361 : bf16 to vector<1x16x4xbf16>
    %c7_362 = arith.constant 7 : index
    %c0_363 = arith.constant 0 : index
    %c60_364 = arith.constant 60 : index
    %184 = vector.load %arg11[%c7_362, %c0_363, %c60_364] : memref<8x16x72xbf16, #tpu.memory_space<vmem>>, vector<1x16x4xbf16>
    tpu.vector_store %arg11[%c7_362, %c0_363, %c60_364], %183 {strides = array<i32>} : memref<8x16x72xbf16, #tpu.memory_space<vmem>>, vector<1x16x4xbf16>,
    %c0_365 = arith.constant 0 : index
    %c9_366 = arith.constant 9 : index
    %c0_367 = arith.constant 0 : index
    %c0_368 = arith.constant 0 : index
    %185 = vector.load %arg2[%c0_365, %c9_366, %c0_367, %c0_368] : memref<1x16x16x4xbf16, #tpu.memory_space<vmem>>, vector<1x7x16x4xbf16>
    %186 = vector.shape_cast %185 : vector<1x7x16x4xbf16> to vector<7x16x4xbf16>
    %c0_369 = arith.constant 0 : index
    %c0_370 = arith.constant 0 : index
    %c60_371 = arith.constant 60 : index
    %187 = vector.load %arg11[%c0_369, %c0_370, %c60_371] : memref<8x16x72xbf16, #tpu.memory_space<vmem>>, vector<7x16x4xbf16>
    tpu.vector_store %arg11[%c0_369, %c0_370, %c60_371], %186 {strides = array<i32>} : memref<8x16x72xbf16, #tpu.memory_space<vmem>>, vector<7x16x4xbf16>,
    %cst_372 = arith.constant 0.000000e+00 : bf16
    %188 = vector.broadcast %cst_372 : bf16 to vector<1x16x4xbf16>
    %c7_373 = arith.constant 7 : index
    %c0_374 = arith.constant 0 : index
    %c68_375 = arith.constant 68 : index
    %189 = vector.load %arg11[%c7_373, %c0_374, %c68_375] : memref<8x16x72xbf16, #tpu.memory_space<vmem>>, vector<1x16x4xbf16>
    tpu.vector_store %arg11[%c7_373, %c0_374, %c68_375], %188 {strides = array<i32>} : memref<8x16x72xbf16, #tpu.memory_space<vmem>>, vector<1x16x4xbf16>,
    %cst_376 = arith.constant 0.000000e+00 : bf16
    %190 = vector.broadcast %cst_376 : bf16 to vector<7x1x4xbf16>
    %c0_377 = arith.constant 0 : index
    %c15_378 = arith.constant 15 : index
    %c68_379 = arith.constant 68 : index
    %191 = vector.load %arg11[%c0_377, %c15_378, %c68_379] : memref<8x16x72xbf16, #tpu.memory_space<vmem>>, vector<7x1x4xbf16>
    tpu.vector_store %arg11[%c0_377, %c15_378, %c68_379], %190 {strides = array<i32>} : memref<8x16x72xbf16, #tpu.memory_space<vmem>>, vector<7x1x4xbf16>,
    %c0_380 = arith.constant 0 : index
    %c9_381 = arith.constant 9 : index
    %c1_382 = arith.constant 1 : index
    %c0_383 = arith.constant 0 : index
    %192 = vector.load %arg2[%c0_380, %c9_381, %c1_382, %c0_383] : memref<1x16x16x4xbf16, #tpu.memory_space<vmem>>, vector<1x7x15x4xbf16>
    %193 = vector.shape_cast %192 : vector<1x7x15x4xbf16> to vector<7x15x4xbf16>
    %c0_384 = arith.constant 0 : index
    %c0_385 = arith.constant 0 : index
    %c68_386 = arith.constant 68 : index
    %194 = vector.load %arg11[%c0_384, %c0_385, %c68_386] : memref<8x16x72xbf16, #tpu.memory_space<vmem>>, vector<7x15x4xbf16>
    tpu.vector_store %arg11[%c0_384, %c0_385, %c68_386], %193 {strides = array<i32>} : memref<8x16x72xbf16, #tpu.memory_space<vmem>>, vector<7x15x4xbf16>,
    %c0_387 = arith.constant 0 : index
    %c0_388 = arith.constant 0 : index
    %c0_389 = arith.constant 0 : index
    %195 = vector.load %arg11[%c0_387, %c0_388, %c0_389] : memref<8x16x72xbf16, #tpu.memory_space<vmem>>, vector<8x16x72xbf16>
    %196 = vector.shape_cast %195 : vector<8x16x72xbf16> to vector<128x72xbf16>
    %c0_390 = arith.constant 0 : index
    %c0_391 = arith.constant 0 : index
    %197 = vector.load %arg3[%c0_390, %c0_391] : memref<72x4xbf16, #tpu.memory_space<vmem>>, vector<72x4xbf16>
    %cst_392 = arith.constant dense<0.000000e+00> : vector<128x4xf32>
    %198 = tpu.matmul %196, %197, %cst_392 {dimension_numbers = #tpu.dot_dimension_numbers<[1], [0], [0], [1], [0, 0, 1, 1], [], []>} : vector<128x72xbf16>, vector<72x4xbf16>, vector<128x4xf32> -> vector<128x4xf32>
    %c0_393 = arith.constant 0 : index
    %c0_394 = arith.constant 0 : index
    %199 = vector.load %arg4[%c0_393, %c0_394] : memref<1x4xf32, #tpu.memory_space<vmem>>, vector<1x4xf32>
    %200 = vector.broadcast %199 : vector<1x4xf32> to vector<128x4xf32>
    %201 = arith.mulf %198, %200 : vector<128x4xf32>
    %c0_395 = arith.constant 0 : index
    %c0_396 = arith.constant 0 : index
    %202 = vector.load %arg5[%c0_395, %c0_396] : memref<1x4xf32, #tpu.memory_space<vmem>>, vector<1x4xf32>
    %203 = vector.broadcast %202 : vector<1x4xf32> to vector<128x4xf32>
    %204 = arith.addf %201, %203 : vector<128x4xf32>
    %cst_397 = arith.constant 0.000000e+00 : f32
    %205 = vector.broadcast %cst_397 : f32 to vector<128x4xf32>
    %206 = arith.maximumf %204, %205 : vector<128x4xf32>
    %207 = vector.shape_cast %206 : vector<128x4xf32> to vector<8x16x4xf32>
    %208 = arith.truncf %207 : vector<8x16x4xf32> to vector<8x16x4xbf16>
    %c8_398 = arith.constant 8 : index
    %c0_399 = arith.constant 0 : index
    %c0_400 = arith.constant 0 : index
    %209 = vector.load %arg10[%c8_398, %c0_399, %c0_400] : memref<16x16x4xbf16, #tpu.memory_space<vmem>>, vector<8x16x4xbf16>
    tpu.vector_store %arg10[%c8_398, %c0_399, %c0_400], %208 {strides = array<i32>} : memref<16x16x4xbf16, #tpu.memory_space<vmem>>, vector<8x16x4xbf16>,
    %cst_401 = arith.constant 0.000000e+00 : bf16
    %210 = vector.broadcast %cst_401 : bf16 to vector<1x16x4xbf16>
    %c0_402 = arith.constant 0 : index
    %c0_403 = arith.constant 0 : index
    %c0_404 = arith.constant 0 : index
    %211 = vector.load %arg12[%c0_402, %c0_403, %c0_404] : memref<8x16x36xbf16, #tpu.memory_space<vmem>>, vector<1x16x4xbf16>
    tpu.vector_store %arg12[%c0_402, %c0_403, %c0_404], %210 {strides = array<i32>} : memref<8x16x36xbf16, #tpu.memory_space<vmem>>, vector<1x16x4xbf16>,
    %cst_405 = arith.constant 0.000000e+00 : bf16
    %212 = vector.broadcast %cst_405 : bf16 to vector<7x1x4xbf16>
    %c1_406 = arith.constant 1 : index
    %c0_407 = arith.constant 0 : index
    %c0_408 = arith.constant 0 : index
    %213 = vector.load %arg12[%c1_406, %c0_407, %c0_408] : memref<8x16x36xbf16, #tpu.memory_space<vmem>>, vector<7x1x4xbf16>
    tpu.vector_store %arg12[%c1_406, %c0_407, %c0_408], %212 {strides = array<i32>} : memref<8x16x36xbf16, #tpu.memory_space<vmem>>, vector<7x1x4xbf16>,
    %c0_409 = arith.constant 0 : index
    %c0_410 = arith.constant 0 : index
    %c0_411 = arith.constant 0 : index
    %214 = vector.load %arg10[%c0_409, %c0_410, %c0_411] : memref<16x16x4xbf16, #tpu.memory_space<vmem>>, vector<7x15x4xbf16>
    %c1_412 = arith.constant 1 : index
    %c1_413 = arith.constant 1 : index
    %c0_414 = arith.constant 0 : index
    %215 = vector.load %arg12[%c1_412, %c1_413, %c0_414] : memref<8x16x36xbf16, #tpu.memory_space<vmem>>, vector<7x15x4xbf16>
    tpu.vector_store %arg12[%c1_412, %c1_413, %c0_414], %214 {strides = array<i32>} : memref<8x16x36xbf16, #tpu.memory_space<vmem>>, vector<7x15x4xbf16>,
    %cst_415 = arith.constant 0.000000e+00 : bf16
    %216 = vector.broadcast %cst_415 : bf16 to vector<1x16x4xbf16>
    %c0_416 = arith.constant 0 : index
    %c0_417 = arith.constant 0 : index
    %c4_418 = arith.constant 4 : index
    %217 = vector.load %arg12[%c0_416, %c0_417, %c4_418] : memref<8x16x36xbf16, #tpu.memory_space<vmem>>, vector<1x16x4xbf16>
    tpu.vector_store %arg12[%c0_416, %c0_417, %c4_418], %216 {strides = array<i32>} : memref<8x16x36xbf16, #tpu.memory_space<vmem>>, vector<1x16x4xbf16>,
    %c0_419 = arith.constant 0 : index
    %c0_420 = arith.constant 0 : index
    %c0_421 = arith.constant 0 : index
    %218 = vector.load %arg10[%c0_419, %c0_420, %c0_421] : memref<16x16x4xbf16, #tpu.memory_space<vmem>>, vector<7x16x4xbf16>
    %c1_422 = arith.constant 1 : index
    %c0_423 = arith.constant 0 : index
    %c4_424 = arith.constant 4 : index
    %219 = vector.load %arg12[%c1_422, %c0_423, %c4_424] : memref<8x16x36xbf16, #tpu.memory_space<vmem>>, vector<7x16x4xbf16>
    tpu.vector_store %arg12[%c1_422, %c0_423, %c4_424], %218 {strides = array<i32>} : memref<8x16x36xbf16, #tpu.memory_space<vmem>>, vector<7x16x4xbf16>,
    %cst_425 = arith.constant 0.000000e+00 : bf16
    %220 = vector.broadcast %cst_425 : bf16 to vector<1x16x4xbf16>
    %c0_426 = arith.constant 0 : index
    %c0_427 = arith.constant 0 : index
    %c8_428 = arith.constant 8 : index
    %221 = vector.load %arg12[%c0_426, %c0_427, %c8_428] : memref<8x16x36xbf16, #tpu.memory_space<vmem>>, vector<1x16x4xbf16>
    tpu.vector_store %arg12[%c0_426, %c0_427, %c8_428], %220 {strides = array<i32>} : memref<8x16x36xbf16, #tpu.memory_space<vmem>>, vector<1x16x4xbf16>,
    %cst_429 = arith.constant 0.000000e+00 : bf16
    %222 = vector.broadcast %cst_429 : bf16 to vector<7x1x4xbf16>
    %c1_430 = arith.constant 1 : index
    %c15_431 = arith.constant 15 : index
    %c8_432 = arith.constant 8 : index
    %223 = vector.load %arg12[%c1_430, %c15_431, %c8_432] : memref<8x16x36xbf16, #tpu.memory_space<vmem>>, vector<7x1x4xbf16>
    tpu.vector_store %arg12[%c1_430, %c15_431, %c8_432], %222 {strides = array<i32>} : memref<8x16x36xbf16, #tpu.memory_space<vmem>>, vector<7x1x4xbf16>,
    %c0_433 = arith.constant 0 : index
    %c1_434 = arith.constant 1 : index
    %c0_435 = arith.constant 0 : index
    %224 = vector.load %arg10[%c0_433, %c1_434, %c0_435] : memref<16x16x4xbf16, #tpu.memory_space<vmem>>, vector<7x15x4xbf16>
    %c1_436 = arith.constant 1 : index
    %c0_437 = arith.constant 0 : index
    %c8_438 = arith.constant 8 : index
    %225 = vector.load %arg12[%c1_436, %c0_437, %c8_438] : memref<8x16x36xbf16, #tpu.memory_space<vmem>>, vector<7x15x4xbf16>
    tpu.vector_store %arg12[%c1_436, %c0_437, %c8_438], %224 {strides = array<i32>} : memref<8x16x36xbf16, #tpu.memory_space<vmem>>, vector<7x15x4xbf16>,
    %cst_439 = arith.constant 0.000000e+00 : bf16
    %226 = vector.broadcast %cst_439 : bf16 to vector<8x1x4xbf16>
    %c0_440 = arith.constant 0 : index
    %c0_441 = arith.constant 0 : index
    %c12_442 = arith.constant 12 : index
    %227 = vector.load %arg12[%c0_440, %c0_441, %c12_442] : memref<8x16x36xbf16, #tpu.memory_space<vmem>>, vector<8x1x4xbf16>
    tpu.vector_store %arg12[%c0_440, %c0_441, %c12_442], %226 {strides = array<i32>} : memref<8x16x36xbf16, #tpu.memory_space<vmem>>, vector<8x1x4xbf16>,
    %c0_443 = arith.constant 0 : index
    %c0_444 = arith.constant 0 : index
    %c0_445 = arith.constant 0 : index
    %228 = vector.load %arg10[%c0_443, %c0_444, %c0_445] : memref<16x16x4xbf16, #tpu.memory_space<vmem>>, vector<8x15x4xbf16>
    %c0_446 = arith.constant 0 : index
    %c1_447 = arith.constant 1 : index
    %c12_448 = arith.constant 12 : index
    %229 = vector.load %arg12[%c0_446, %c1_447, %c12_448] : memref<8x16x36xbf16, #tpu.memory_space<vmem>>, vector<8x15x4xbf16>
    tpu.vector_store %arg12[%c0_446, %c1_447, %c12_448], %228 {strides = array<i32>} : memref<8x16x36xbf16, #tpu.memory_space<vmem>>, vector<8x15x4xbf16>,
    %c0_449 = arith.constant 0 : index
    %c0_450 = arith.constant 0 : index
    %c0_451 = arith.constant 0 : index
    %230 = vector.load %arg10[%c0_449, %c0_450, %c0_451] : memref<16x16x4xbf16, #tpu.memory_space<vmem>>, vector<8x16x4xbf16>
    %c0_452 = arith.constant 0 : index
    %c0_453 = arith.constant 0 : index
    %c16_454 = arith.constant 16 : index
    %231 = vector.load %arg12[%c0_452, %c0_453, %c16_454] : memref<8x16x36xbf16, #tpu.memory_space<vmem>>, vector<8x16x4xbf16>
    tpu.vector_store %arg12[%c0_452, %c0_453, %c16_454], %230 {strides = array<i32>} : memref<8x16x36xbf16, #tpu.memory_space<vmem>>, vector<8x16x4xbf16>,
    %cst_455 = arith.constant 0.000000e+00 : bf16
    %232 = vector.broadcast %cst_455 : bf16 to vector<8x1x4xbf16>
    %c0_456 = arith.constant 0 : index
    %c15_457 = arith.constant 15 : index
    %c20_458 = arith.constant 20 : index
    %233 = vector.load %arg12[%c0_456, %c15_457, %c20_458] : memref<8x16x36xbf16, #tpu.memory_space<vmem>>, vector<8x1x4xbf16>
    tpu.vector_store %arg12[%c0_456, %c15_457, %c20_458], %232 {strides = array<i32>} : memref<8x16x36xbf16, #tpu.memory_space<vmem>>, vector<8x1x4xbf16>,
    %c0_459 = arith.constant 0 : index
    %c1_460 = arith.constant 1 : index
    %c0_461 = arith.constant 0 : index
    %234 = vector.load %arg10[%c0_459, %c1_460, %c0_461] : memref<16x16x4xbf16, #tpu.memory_space<vmem>>, vector<8x15x4xbf16>
    %c0_462 = arith.constant 0 : index
    %c0_463 = arith.constant 0 : index
    %c20_464 = arith.constant 20 : index
    %235 = vector.load %arg12[%c0_462, %c0_463, %c20_464] : memref<8x16x36xbf16, #tpu.memory_space<vmem>>, vector<8x15x4xbf16>
    tpu.vector_store %arg12[%c0_462, %c0_463, %c20_464], %234 {strides = array<i32>} : memref<8x16x36xbf16, #tpu.memory_space<vmem>>, vector<8x15x4xbf16>,
    %cst_465 = arith.constant 0.000000e+00 : bf16
    %236 = vector.broadcast %cst_465 : bf16 to vector<8x1x4xbf16>
    %c0_466 = arith.constant 0 : index
    %c0_467 = arith.constant 0 : index
    %c24_468 = arith.constant 24 : index
    %237 = vector.load %arg12[%c0_466, %c0_467, %c24_468] : memref<8x16x36xbf16, #tpu.memory_space<vmem>>, vector<8x1x4xbf16>
    tpu.vector_store %arg12[%c0_466, %c0_467, %c24_468], %236 {strides = array<i32>} : memref<8x16x36xbf16, #tpu.memory_space<vmem>>, vector<8x1x4xbf16>,
    %c1_469 = arith.constant 1 : index
    %c0_470 = arith.constant 0 : index
    %c0_471 = arith.constant 0 : index
    %238 = vector.load %arg10[%c1_469, %c0_470, %c0_471] : memref<16x16x4xbf16, #tpu.memory_space<vmem>>, vector<8x15x4xbf16>
    %c0_472 = arith.constant 0 : index
    %c1_473 = arith.constant 1 : index
    %c24_474 = arith.constant 24 : index
    %239 = vector.load %arg12[%c0_472, %c1_473, %c24_474] : memref<8x16x36xbf16, #tpu.memory_space<vmem>>, vector<8x15x4xbf16>
    tpu.vector_store %arg12[%c0_472, %c1_473, %c24_474], %238 {strides = array<i32>} : memref<8x16x36xbf16, #tpu.memory_space<vmem>>, vector<8x15x4xbf16>,
    %c1_475 = arith.constant 1 : index
    %c0_476 = arith.constant 0 : index
    %c0_477 = arith.constant 0 : index
    %240 = vector.load %arg10[%c1_475, %c0_476, %c0_477] : memref<16x16x4xbf16, #tpu.memory_space<vmem>>, vector<8x16x4xbf16>
    %c0_478 = arith.constant 0 : index
    %c0_479 = arith.constant 0 : index
    %c28_480 = arith.constant 28 : index
    %241 = vector.load %arg12[%c0_478, %c0_479, %c28_480] : memref<8x16x36xbf16, #tpu.memory_space<vmem>>, vector<8x16x4xbf16>
    tpu.vector_store %arg12[%c0_478, %c0_479, %c28_480], %240 {strides = array<i32>} : memref<8x16x36xbf16, #tpu.memory_space<vmem>>, vector<8x16x4xbf16>,
    %cst_481 = arith.constant 0.000000e+00 : bf16
    %242 = vector.broadcast %cst_481 : bf16 to vector<8x1x4xbf16>
    %c0_482 = arith.constant 0 : index
    %c15_483 = arith.constant 15 : index
    %c32_484 = arith.constant 32 : index
    %243 = vector.load %arg12[%c0_482, %c15_483, %c32_484] : memref<8x16x36xbf16, #tpu.memory_space<vmem>>, vector<8x1x4xbf16>
    tpu.vector_store %arg12[%c0_482, %c15_483, %c32_484], %242 {strides = array<i32>} : memref<8x16x36xbf16, #tpu.memory_space<vmem>>, vector<8x1x4xbf16>,
    %c1_485 = arith.constant 1 : index
    %c1_486 = arith.constant 1 : index
    %c0_487 = arith.constant 0 : index
    %244 = vector.load %arg10[%c1_485, %c1_486, %c0_487] : memref<16x16x4xbf16, #tpu.memory_space<vmem>>, vector<8x15x4xbf16>
    %c0_488 = arith.constant 0 : index
    %c0_489 = arith.constant 0 : index
    %c32_490 = arith.constant 32 : index
    %245 = vector.load %arg12[%c0_488, %c0_489, %c32_490] : memref<8x16x36xbf16, #tpu.memory_space<vmem>>, vector<8x15x4xbf16>
    tpu.vector_store %arg12[%c0_488, %c0_489, %c32_490], %244 {strides = array<i32>} : memref<8x16x36xbf16, #tpu.memory_space<vmem>>, vector<8x15x4xbf16>,
    %c0_491 = arith.constant 0 : index
    %c0_492 = arith.constant 0 : index
    %c0_493 = arith.constant 0 : index
    %246 = vector.load %arg12[%c0_491, %c0_492, %c0_493] : memref<8x16x36xbf16, #tpu.memory_space<vmem>>, vector<8x16x36xbf16>
    %247 = vector.shape_cast %246 : vector<8x16x36xbf16> to vector<128x36xbf16>
    %c0_494 = arith.constant 0 : index
    %c0_495 = arith.constant 0 : index
    %248 = vector.load %arg6[%c0_494, %c0_495] : memref<36x4xbf16, #tpu.memory_space<vmem>>, vector<36x4xbf16>
    %cst_496 = arith.constant dense<0.000000e+00> : vector<128x4xf32>
    %249 = tpu.matmul %247, %248, %cst_496 {dimension_numbers = #tpu.dot_dimension_numbers<[1], [0], [0], [1], [0, 0, 1, 1], [], []>} : vector<128x36xbf16>, vector<36x4xbf16>, vector<128x4xf32> -> vector<128x4xf32>
    %c0_497 = arith.constant 0 : index
    %c0_498 = arith.constant 0 : index
    %250 = vector.load %arg7[%c0_497, %c0_498] : memref<1x4xf32, #tpu.memory_space<vmem>>, vector<1x4xf32>
    %251 = vector.broadcast %250 : vector<1x4xf32> to vector<128x4xf32>
    %252 = arith.mulf %249, %251 : vector<128x4xf32>
    %c0_499 = arith.constant 0 : index
    %c0_500 = arith.constant 0 : index
    %253 = vector.load %arg8[%c0_499, %c0_500] : memref<1x4xf32, #tpu.memory_space<vmem>>, vector<1x4xf32>
    %254 = vector.broadcast %253 : vector<1x4xf32> to vector<128x4xf32>
    %255 = arith.addf %252, %254 : vector<128x4xf32>
    %cst_501 = arith.constant 0.000000e+00 : f32
    %256 = vector.broadcast %cst_501 : f32 to vector<128x4xf32>
    %257 = arith.maximumf %255, %256 : vector<128x4xf32>
    %258 = vector.shape_cast %257 : vector<128x4xf32> to vector<8x16x4xf32>
    %c0_502 = arith.constant 0 : index
    %c0_503 = arith.constant 0 : index
    %c0_504 = arith.constant 0 : index
    %c0_505 = arith.constant 0 : index
    %259 = vector.load %arg9[%c0_502, %c0_503, %c0_504, %c0_505] : memref<1x16x16x4xf32, #tpu.memory_space<vmem>>, vector<1x8x16x4xf32>
    %260 = vector.shape_cast %259 : vector<1x8x16x4xf32> to vector<8x16x4xf32>
    %261 = vector.shape_cast %258 : vector<8x16x4xf32> to vector<1x8x16x4xf32>
    tpu.vector_store %arg9[%c0_502, %c0_503, %c0_504, %c0_505], %261 {strides = array<i32>} : memref<1x16x16x4xf32, #tpu.memory_space<vmem>>, vector<1x8x16x4xf32>,
    %cst_506 = arith.constant 0.000000e+00 : bf16
    %262 = vector.broadcast %cst_506 : bf16 to vector<8x1x4xbf16>
    %c0_507 = arith.constant 0 : index
    %c0_508 = arith.constant 0 : index
    %c0_509 = arith.constant 0 : index
    %263 = vector.load %arg12[%c0_507, %c0_508, %c0_509] : memref<8x16x36xbf16, #tpu.memory_space<vmem>>, vector<8x1x4xbf16>
    tpu.vector_store %arg12[%c0_507, %c0_508, %c0_509], %262 {strides = array<i32>} : memref<8x16x36xbf16, #tpu.memory_space<vmem>>, vector<8x1x4xbf16>,
    %c7_510 = arith.constant 7 : index
    %c0_511 = arith.constant 0 : index
    %c0_512 = arith.constant 0 : index
    %264 = vector.load %arg10[%c7_510, %c0_511, %c0_512] : memref<16x16x4xbf16, #tpu.memory_space<vmem>>, vector<8x15x4xbf16>
    %c0_513 = arith.constant 0 : index
    %c1_514 = arith.constant 1 : index
    %c0_515 = arith.constant 0 : index
    %265 = vector.load %arg12[%c0_513, %c1_514, %c0_515] : memref<8x16x36xbf16, #tpu.memory_space<vmem>>, vector<8x15x4xbf16>
    tpu.vector_store %arg12[%c0_513, %c1_514, %c0_515], %264 {strides = array<i32>} : memref<8x16x36xbf16, #tpu.memory_space<vmem>>, vector<8x15x4xbf16>,
    %c7_516 = arith.constant 7 : index
    %c0_517 = arith.constant 0 : index
    %c0_518 = arith.constant 0 : index
    %266 = vector.load %arg10[%c7_516, %c0_517, %c0_518] : memref<16x16x4xbf16, #tpu.memory_space<vmem>>, vector<8x16x4xbf16>
    %c0_519 = arith.constant 0 : index
    %c0_520 = arith.constant 0 : index
    %c4_521 = arith.constant 4 : index
    %267 = vector.load %arg12[%c0_519, %c0_520, %c4_521] : memref<8x16x36xbf16, #tpu.memory_space<vmem>>, vector<8x16x4xbf16>
    tpu.vector_store %arg12[%c0_519, %c0_520, %c4_521], %266 {strides = array<i32>} : memref<8x16x36xbf16, #tpu.memory_space<vmem>>, vector<8x16x4xbf16>,
    %cst_522 = arith.constant 0.000000e+00 : bf16
    %268 = vector.broadcast %cst_522 : bf16 to vector<8x1x4xbf16>
    %c0_523 = arith.constant 0 : index
    %c15_524 = arith.constant 15 : index
    %c8_525 = arith.constant 8 : index
    %269 = vector.load %arg12[%c0_523, %c15_524, %c8_525] : memref<8x16x36xbf16, #tpu.memory_space<vmem>>, vector<8x1x4xbf16>
    tpu.vector_store %arg12[%c0_523, %c15_524, %c8_525], %268 {strides = array<i32>} : memref<8x16x36xbf16, #tpu.memory_space<vmem>>, vector<8x1x4xbf16>,
    %c7_526 = arith.constant 7 : index
    %c1_527 = arith.constant 1 : index
    %c0_528 = arith.constant 0 : index
    %270 = vector.load %arg10[%c7_526, %c1_527, %c0_528] : memref<16x16x4xbf16, #tpu.memory_space<vmem>>, vector<8x15x4xbf16>
    %c0_529 = arith.constant 0 : index
    %c0_530 = arith.constant 0 : index
    %c8_531 = arith.constant 8 : index
    %271 = vector.load %arg12[%c0_529, %c0_530, %c8_531] : memref<8x16x36xbf16, #tpu.memory_space<vmem>>, vector<8x15x4xbf16>
    tpu.vector_store %arg12[%c0_529, %c0_530, %c8_531], %270 {strides = array<i32>} : memref<8x16x36xbf16, #tpu.memory_space<vmem>>, vector<8x15x4xbf16>,
    %cst_532 = arith.constant 0.000000e+00 : bf16
    %272 = vector.broadcast %cst_532 : bf16 to vector<8x1x4xbf16>
    %c0_533 = arith.constant 0 : index
    %c0_534 = arith.constant 0 : index
    %c12_535 = arith.constant 12 : index
    %273 = vector.load %arg12[%c0_533, %c0_534, %c12_535] : memref<8x16x36xbf16, #tpu.memory_space<vmem>>, vector<8x1x4xbf16>
    tpu.vector_store %arg12[%c0_533, %c0_534, %c12_535], %272 {strides = array<i32>} : memref<8x16x36xbf16, #tpu.memory_space<vmem>>, vector<8x1x4xbf16>,
    %c8_536 = arith.constant 8 : index
    %c0_537 = arith.constant 0 : index
    %c0_538 = arith.constant 0 : index
    %274 = vector.load %arg10[%c8_536, %c0_537, %c0_538] : memref<16x16x4xbf16, #tpu.memory_space<vmem>>, vector<8x15x4xbf16>
    %c0_539 = arith.constant 0 : index
    %c1_540 = arith.constant 1 : index
    %c12_541 = arith.constant 12 : index
    %275 = vector.load %arg12[%c0_539, %c1_540, %c12_541] : memref<8x16x36xbf16, #tpu.memory_space<vmem>>, vector<8x15x4xbf16>
    tpu.vector_store %arg12[%c0_539, %c1_540, %c12_541], %274 {strides = array<i32>} : memref<8x16x36xbf16, #tpu.memory_space<vmem>>, vector<8x15x4xbf16>,
    %c8_542 = arith.constant 8 : index
    %c0_543 = arith.constant 0 : index
    %c0_544 = arith.constant 0 : index
    %276 = vector.load %arg10[%c8_542, %c0_543, %c0_544] : memref<16x16x4xbf16, #tpu.memory_space<vmem>>, vector<8x16x4xbf16>
    %c0_545 = arith.constant 0 : index
    %c0_546 = arith.constant 0 : index
    %c16_547 = arith.constant 16 : index
    %277 = vector.load %arg12[%c0_545, %c0_546, %c16_547] : memref<8x16x36xbf16, #tpu.memory_space<vmem>>, vector<8x16x4xbf16>
    tpu.vector_store %arg12[%c0_545, %c0_546, %c16_547], %276 {strides = array<i32>} : memref<8x16x36xbf16, #tpu.memory_space<vmem>>, vector<8x16x4xbf16>,
    %cst_548 = arith.constant 0.000000e+00 : bf16
    %278 = vector.broadcast %cst_548 : bf16 to vector<8x1x4xbf16>
    %c0_549 = arith.constant 0 : index
    %c15_550 = arith.constant 15 : index
    %c20_551 = arith.constant 20 : index
    %279 = vector.load %arg12[%c0_549, %c15_550, %c20_551] : memref<8x16x36xbf16, #tpu.memory_space<vmem>>, vector<8x1x4xbf16>
    tpu.vector_store %arg12[%c0_549, %c15_550, %c20_551], %278 {strides = array<i32>} : memref<8x16x36xbf16, #tpu.memory_space<vmem>>, vector<8x1x4xbf16>,
    %c8_552 = arith.constant 8 : index
    %c1_553 = arith.constant 1 : index
    %c0_554 = arith.constant 0 : index
    %280 = vector.load %arg10[%c8_552, %c1_553, %c0_554] : memref<16x16x4xbf16, #tpu.memory_space<vmem>>, vector<8x15x4xbf16>
    %c0_555 = arith.constant 0 : index
    %c0_556 = arith.constant 0 : index
    %c20_557 = arith.constant 20 : index
    %281 = vector.load %arg12[%c0_555, %c0_556, %c20_557] : memref<8x16x36xbf16, #tpu.memory_space<vmem>>, vector<8x15x4xbf16>
    tpu.vector_store %arg12[%c0_555, %c0_556, %c20_557], %280 {strides = array<i32>} : memref<8x16x36xbf16, #tpu.memory_space<vmem>>, vector<8x15x4xbf16>,
    %cst_558 = arith.constant 0.000000e+00 : bf16
    %282 = vector.broadcast %cst_558 : bf16 to vector<1x16x4xbf16>
    %c7_559 = arith.constant 7 : index
    %c0_560 = arith.constant 0 : index
    %c24_561 = arith.constant 24 : index
    %283 = vector.load %arg12[%c7_559, %c0_560, %c24_561] : memref<8x16x36xbf16, #tpu.memory_space<vmem>>, vector<1x16x4xbf16>
    tpu.vector_store %arg12[%c7_559, %c0_560, %c24_561], %282 {strides = array<i32>} : memref<8x16x36xbf16, #tpu.memory_space<vmem>>, vector<1x16x4xbf16>,
    %cst_562 = arith.constant 0.000000e+00 : bf16
    %284 = vector.broadcast %cst_562 : bf16 to vector<7x1x4xbf16>
    %c0_563 = arith.constant 0 : index
    %c0_564 = arith.constant 0 : index
    %c24_565 = arith.constant 24 : index
    %285 = vector.load %arg12[%c0_563, %c0_564, %c24_565] : memref<8x16x36xbf16, #tpu.memory_space<vmem>>, vector<7x1x4xbf16>
    tpu.vector_store %arg12[%c0_563, %c0_564, %c24_565], %284 {strides = array<i32>} : memref<8x16x36xbf16, #tpu.memory_space<vmem>>, vector<7x1x4xbf16>,
    %c9_566 = arith.constant 9 : index
    %c0_567 = arith.constant 0 : index
    %c0_568 = arith.constant 0 : index
    %286 = vector.load %arg10[%c9_566, %c0_567, %c0_568] : memref<16x16x4xbf16, #tpu.memory_space<vmem>>, vector<7x15x4xbf16>
    %c0_569 = arith.constant 0 : index
    %c1_570 = arith.constant 1 : index
    %c24_571 = arith.constant 24 : index
    %287 = vector.load %arg12[%c0_569, %c1_570, %c24_571] : memref<8x16x36xbf16, #tpu.memory_space<vmem>>, vector<7x15x4xbf16>
    tpu.vector_store %arg12[%c0_569, %c1_570, %c24_571], %286 {strides = array<i32>} : memref<8x16x36xbf16, #tpu.memory_space<vmem>>, vector<7x15x4xbf16>,
    %cst_572 = arith.constant 0.000000e+00 : bf16
    %288 = vector.broadcast %cst_572 : bf16 to vector<1x16x4xbf16>
    %c7_573 = arith.constant 7 : index
    %c0_574 = arith.constant 0 : index
    %c28_575 = arith.constant 28 : index
    %289 = vector.load %arg12[%c7_573, %c0_574, %c28_575] : memref<8x16x36xbf16, #tpu.memory_space<vmem>>, vector<1x16x4xbf16>
    tpu.vector_store %arg12[%c7_573, %c0_574, %c28_575], %288 {strides = array<i32>} : memref<8x16x36xbf16, #tpu.memory_space<vmem>>, vector<1x16x4xbf16>,
    %c9_576 = arith.constant 9 : index
    %c0_577 = arith.constant 0 : index
    %c0_578 = arith.constant 0 : index
    %290 = vector.load %arg10[%c9_576, %c0_577, %c0_578] : memref<16x16x4xbf16, #tpu.memory_space<vmem>>, vector<7x16x4xbf16>
    %c0_579 = arith.constant 0 : index
    %c0_580 = arith.constant 0 : index
    %c28_581 = arith.constant 28 : index
    %291 = vector.load %arg12[%c0_579, %c0_580, %c28_581] : memref<8x16x36xbf16, #tpu.memory_space<vmem>>, vector<7x16x4xbf16>
    tpu.vector_store %arg12[%c0_579, %c0_580, %c28_581], %290 {strides = array<i32>} : memref<8x16x36xbf16, #tpu.memory_space<vmem>>, vector<7x16x4xbf16>,
    %cst_582 = arith.constant 0.000000e+00 : bf16
    %292 = vector.broadcast %cst_582 : bf16 to vector<1x16x4xbf16>
    %c7_583 = arith.constant 7 : index
    %c0_584 = arith.constant 0 : index
    %c32_585 = arith.constant 32 : index
    %293 = vector.load %arg12[%c7_583, %c0_584, %c32_585] : memref<8x16x36xbf16, #tpu.memory_space<vmem>>, vector<1x16x4xbf16>
    tpu.vector_store %arg12[%c7_583, %c0_584, %c32_585], %292 {strides = array<i32>} : memref<8x16x36xbf16, #tpu.memory_space<vmem>>, vector<1x16x4xbf16>,
    %cst_586 = arith.constant 0.000000e+00 : bf16
    %294 = vector.broadcast %cst_586 : bf16 to vector<7x1x4xbf16>
    %c0_587 = arith.constant 0 : index
    %c15_588 = arith.constant 15 : index
    %c32_589 = arith.constant 32 : index
    %295 = vector.load %arg12[%c0_587, %c15_588, %c32_589] : memref<8x16x36xbf16, #tpu.memory_space<vmem>>, vector<7x1x4xbf16>
    tpu.vector_store %arg12[%c0_587, %c15_588, %c32_589], %294 {strides = array<i32>} : memref<8x16x36xbf16, #tpu.memory_space<vmem>>, vector<7x1x4xbf16>,
    %c9_590 = arith.constant 9 : index
    %c1_591 = arith.constant 1 : index
    %c0_592 = arith.constant 0 : index
    %296 = vector.load %arg10[%c9_590, %c1_591, %c0_592] : memref<16x16x4xbf16, #tpu.memory_space<vmem>>, vector<7x15x4xbf16>
    %c0_593 = arith.constant 0 : index
    %c0_594 = arith.constant 0 : index
    %c32_595 = arith.constant 32 : index
    %297 = vector.load %arg12[%c0_593, %c0_594, %c32_595] : memref<8x16x36xbf16, #tpu.memory_space<vmem>>, vector<7x15x4xbf16>
    tpu.vector_store %arg12[%c0_593, %c0_594, %c32_595], %296 {strides = array<i32>} : memref<8x16x36xbf16, #tpu.memory_space<vmem>>, vector<7x15x4xbf16>,
    %c0_596 = arith.constant 0 : index
    %c0_597 = arith.constant 0 : index
    %c0_598 = arith.constant 0 : index
    %298 = vector.load %arg12[%c0_596, %c0_597, %c0_598] : memref<8x16x36xbf16, #tpu.memory_space<vmem>>, vector<8x16x36xbf16>
    %299 = vector.shape_cast %298 : vector<8x16x36xbf16> to vector<128x36xbf16>
    %c0_599 = arith.constant 0 : index
    %c0_600 = arith.constant 0 : index
    %300 = vector.load %arg6[%c0_599, %c0_600] : memref<36x4xbf16, #tpu.memory_space<vmem>>, vector<36x4xbf16>
    %cst_601 = arith.constant dense<0.000000e+00> : vector<128x4xf32>
    %301 = tpu.matmul %299, %300, %cst_601 {dimension_numbers = #tpu.dot_dimension_numbers<[1], [0], [0], [1], [0, 0, 1, 1], [], []>} : vector<128x36xbf16>, vector<36x4xbf16>, vector<128x4xf32> -> vector<128x4xf32>
    %c0_602 = arith.constant 0 : index
    %c0_603 = arith.constant 0 : index
    %302 = vector.load %arg7[%c0_602, %c0_603] : memref<1x4xf32, #tpu.memory_space<vmem>>, vector<1x4xf32>
    %303 = vector.broadcast %302 : vector<1x4xf32> to vector<128x4xf32>
    %304 = arith.mulf %301, %303 : vector<128x4xf32>
    %c0_604 = arith.constant 0 : index
    %c0_605 = arith.constant 0 : index
    %305 = vector.load %arg8[%c0_604, %c0_605] : memref<1x4xf32, #tpu.memory_space<vmem>>, vector<1x4xf32>
    %306 = vector.broadcast %305 : vector<1x4xf32> to vector<128x4xf32>
    %307 = arith.addf %304, %306 : vector<128x4xf32>
    %cst_606 = arith.constant 0.000000e+00 : f32
    %308 = vector.broadcast %cst_606 : f32 to vector<128x4xf32>
    %309 = arith.maximumf %307, %308 : vector<128x4xf32>
    %310 = vector.shape_cast %309 : vector<128x4xf32> to vector<8x16x4xf32>
    %c0_607 = arith.constant 0 : index
    %c8_608 = arith.constant 8 : index
    %c0_609 = arith.constant 0 : index
    %c0_610 = arith.constant 0 : index
    %311 = vector.load %arg9[%c0_607, %c8_608, %c0_609, %c0_610] : memref<1x16x16x4xf32, #tpu.memory_space<vmem>>, vector<1x8x16x4xf32>
    %312 = vector.shape_cast %311 : vector<1x8x16x4xf32> to vector<8x16x4xf32>
    %313 = vector.shape_cast %310 : vector<8x16x4xf32> to vector<1x8x16x4xf32>
    tpu.vector_store %arg9[%c0_607, %c8_608, %c0_609, %c0_610], %313 {strides = array<i32>} : memref<1x16x16x4xf32, #tpu.memory_space<vmem>>, vector<1x8x16x4xf32>,
    return
  }
  func.func @transform_0(%arg0: i32) -> (i32, i32, i32, i32) {
    %c0_i32 = arith.constant 0 : i32
    %c0_i32_0 = arith.constant 0 : i32
    %c0_i32_1 = arith.constant 0 : i32
    %c0_i32_2 = arith.constant 0 : i32
    return %arg0, %c0_i32, %c0_i32_0, %c0_i32_1 : i32, i32, i32, i32
  }
  func.func @transform_1(%arg0: i32) -> (i32, i32, i32, i32) {
    %c0_i32 = arith.constant 0 : i32
    %c0_i32_0 = arith.constant 0 : i32
    %c0_i32_1 = arith.constant 0 : i32
    %c0_i32_2 = arith.constant 0 : i32
    return %arg0, %c0_i32, %c0_i32_0, %c0_i32_1 : i32, i32, i32, i32
  }
  func.func @transform_2(%arg0: i32) -> (i32, i32) {
    %c0_i32 = arith.constant 0 : i32
    %c0_i32_0 = arith.constant 0 : i32
    %c0_i32_1 = arith.constant 0 : i32
    return %c0_i32, %c0_i32_0 : i32, i32
  }
  func.func @transform_3(%arg0: i32) -> (i32, i32) {
    %c0_i32 = arith.constant 0 : i32
    %c0_i32_0 = arith.constant 0 : i32
    %c0_i32_1 = arith.constant 0 : i32
    return %c0_i32, %c0_i32_0 : i32, i32
  }
  func.func @transform_4(%arg0: i32) -> (i32, i32) {
    %c0_i32 = arith.constant 0 : i32
    %c0_i32_0 = arith.constant 0 : i32
    %c0_i32_1 = arith.constant 0 : i32
    return %c0_i32, %c0_i32_0 : i32, i32
  }
  func.func @transform_5(%arg0: i32) -> (i32, i32) {
    %c0_i32 = arith.constant 0 : i32
    %c0_i32_0 = arith.constant 0 : i32
    %c0_i32_1 = arith.constant 0 : i32
    return %c0_i32, %c0_i32_0 : i32, i32
  }
  func.func @transform_6(%arg0: i32) -> (i32, i32) {
    %c0_i32 = arith.constant 0 : i32
    %c0_i32_0 = arith.constant 0 : i32
    %c0_i32_1 = arith.constant 0 : i32
    return %c0_i32, %c0_i32_0 : i32, i32
  }
  func.func @transform_7(%arg0: i32) -> (i32, i32) {
    %c0_i32 = arith.constant 0 : i32
    %c0_i32_0 = arith.constant 0 : i32
    %c0_i32_1 = arith.constant 0 : i32
    return %c0_i32, %c0_i32_0 : i32, i32
  }
  func.func @transform_8(%arg0: i32) -> (i32, i32, i32, i32) {
    %c0_i32 = arith.constant 0 : i32
    %c0_i32_0 = arith.constant 0 : i32
    %c0_i32_1 = arith.constant 0 : i32
    %c0_i32_2 = arith.constant 0 : i32
    return %arg0, %c0_i32, %c0_i32_0, %c0_i32_1 : i32, i32, i32, i32
  }
}

</mosaic_0001>

<bundles_post_ra>
// kernel: _lambda_.2
= control target key start
LH: loop header
LB: loop body
LE: loop exit
PB: predicated region body
PF: predicated region fallthrough
CT: control target
= control target key end

     0   :  { %s619_s12 = smov 0   ;;  %s621_s13 = smov 0   ;;  %s690_s0 = inlined_call_operand.vmem [shape: bf16[2,8,8,8], index: 0, kind: input, shape index: {}]   ;;  %s691_s1 = inlined_call_operand.vmem [shape: bf16[2,8,8], index: 1, kind: input, shape index: {}]   ;;  %s692_s2 = inlined_call_operand.vmem [shape: f32[1,8], index: 2, kind: input, shape index: {}]   ;;  %s693_s3 = inlined_call_operand.vmem [shape: bf16[2,8,2,8,8], index: 3, kind: output, shape index: {}]  }
   0x1   :  { %s623_s14 = smov 0   ;;  %s625_s15 = smov 0  }
   0x2   :  { %s627_s16 = smov 0  }
   0x3 LB: > { %s22_s17 = sadd.s32 1, %s589_s14  ;;  %s25_s18 = sadd.s32 1, %s593_s15  ;;  %s597_s16 = sphi %s627_s16, %s13_s16   ;;  %s593_s15 = sphi %s625_s15, %s697_s15   ;;  %s589_s14 = sphi %s623_s14, %s696_s14   ;;  %s585_s13 = sphi %s621_s13, %s695_s13   ;;  %s581_s12 = sphi %s619_s12, %s694_s12  }
   0x4   : > { %p23_p0 = scmp.ge.s32.totalorder %s22_s17, 2  ;;  %p474_p1 = scmp.ge.s32.totalorder %s597_s16, 1 }
   0x5   : > { %p158_p2 = scmp.lt.s32.totalorder %s597_s16, 5 }
   0x6   : > { %s699_s17 = smov (%p23_p0, %s22_s17), 0  ;;  %s701_s18 = smov (!%p23_p0, %s25_s18), %s593_s15 }
   0x7   : > { %p159_p3 = pnand %p474_p1, %p158_p2  ;;  %p27_p4 = scmp.ge.s32.totalorder %s701_s18, 2 }
   0x8   : > { %v217_v0 = vld [vmem:[%s691_s1] sm:$0xf] (!%p159_p3)  ;;  %vm242_vm0 = vcmask (!%p159_p3), 1043456   ;;  %v487_v1 = vld [vmem:[%s691_s1 + $0x4] sm:$0xf] (!%p159_p3)  ;;  %s475_s23 = sshll.u32 (!%p159_p3), %s581_s12, 2 }
   0x9   : > { %s703_s18 = smov (%p27_p4, %s701_s18), 0  ;;  %162 = sbr.rel (%p159_p3) target bundleno = 243 (0xf3), region = 32 }
   0xa   : > { %515 = vmatprep.subr.msk.bf16.mxu0 (!%p159_p3), %vm242_vm0, %v217_v0  ;;  %516 = vmatprep.subr.msk.bf16.mxu1 (!%p159_p3), %vm242_vm0, %v487_v1  ;;  %v244_v2 = vsel (!%p159_p3), %vm242_vm0, %v217_v0, 0  ;;  %v314_v3 = vsel (!%p159_p3), %vm242_vm0, %v487_v1, 0  ;;  %p192_p5 = scmp.lt.s32.totalorder (!%p159_p3), %s585_s13, 1  ;;  %p194_p6 = scmp.lt.s32.totalorder (!%p159_p3), %s475_s23, 7  ;;  %vm235_vm1 = vcmask (!%p159_p3), 64512   ;;  %vm299_vm2 = vcmask (!%p159_p3), 60416  }
   0xb   : > { %504 = vmatpush3.bf16.msra.mxu0 (!%p159_p3), %v244_v2  ;;  %510 = vmatpush3.bf16.msra.mxu1 (!%p159_p3), %v314_v3  ;;  %v482_v6 = vld [vmem:[%s692_s2] ss:$0 sm:$0xff] (!%p159_p3) }
  0x10   : > { %s705_s13 = smov (!%p192_p5, %s585_s13), 1  ;;  %s707_s23 = smov (!%p194_p6, %s475_s23), 7 }
  0x11   : > { %s476_s24 = sshll.u32 %s705_s13, 3  ;;  %s480_s25 = sshll.u32 %s705_s13, 4 }
  0x12   : > { %s197_s26 = sadd.s32 %s476_s24, %s707_s23  ;;  %s479_s27 = sshll.u32 %s707_s23, 1 }
  0x13   : > { %s477_s28 = sshll.u32 %s197_s26, 2  ;;  %s208_s29 = sadd.s32 %s480_s25, %s479_s27 }
  0x14   : > { %s199_s5 = scalar_lea.vmem %s690_s0, %s477_s28  ;;  %s481_s8 = sshll.u32 %s208_s29, 2 }
  0x15   : > { %v557_v4 = vld [vmem:[%s199_s5] sm:$0xff]   ;;  %v558_v5 = vld [vmem:[%s199_s5 + $0x8] sm:$0xff]   ;;  %s210_s11 = scalar_lea.vmem %s693_s3, %s481_s8 }
  0x16   : > { %505 = vmatprep.mubr.msk.bf16.mxu0 %vm235_vm1, %v557_v4  ;;  %511 = vmatprep.mubr.msk.bf16.mxu1 %vm235_vm1, %v557_v4 }
  0x17   : > { %506 = vmatmul.mubr.msk.bf16.vlgmr.msra.gmra.mrb[0].mxu0 %vm235_vm1, %v558_v5  ;;  %512 = vmatmul.mubr.msk.bf16.vlgmr.msra.gmra.mrb[0].mxu1 %vm235_vm1, %v558_v5 }
  0xea   : > { %v507_v7 = vpop.f32.mrb[0].mxu0  ;;  %v513_v8 = vpop.f32.mrb[0].mxu1 }
  0xeb   : > { %v289_v9 = vadd.f32 %v507_v7, %v482_v6  ;;  %v359_v10 = vadd.f32 %v513_v8, %v482_v6  ;;  %v280_v11 = vpop.f32.mrb[1].mxu0  ;;  %v350_v12 = vpop.f32.mrb[1].mxu1 }
  0xec   : > { %v281_v13 = vadd.f32 %v482_v6, %v280_v11  ;;  %v351_v14 = vadd.f32 %v482_v6, %v350_v12  ;;  %v508_v15 = vpop.f32.mrb[2].mxu0  ;;  %v514_v16 = vpop.f32.mrb[2].mxu1 }
  0xed   : > { %v297_v17 = vpack.c.bf16 %v289_v9, %v289_v9  ;;  %v367_v18 = vpack.c.bf16 %v359_v10, %v359_v10  ;;  %v292_v19 = vadd.f32 %v508_v15, %v482_v6  ;;  %v362_v20 = vadd.f32 %v514_v16, %v482_v6  ;;  %v283_v21 = vpop.f32.mrb[3].mxu0  ;;  %v353_v22 = vpop.f32.mrb[3].mxu1 }
  0xee   : > { %v295_v23 = vpack.c.bf16 %v281_v13, %v281_v13  ;;  %v365_v24 = vpack.c.bf16 %v351_v14, %v351_v14  ;;  %v284_v25 = vadd.f32 %v482_v6, %v283_v21  ;;  %v354_v26 = vadd.f32 %v482_v6, %v353_v22 }
  0xef   : > { %302 = vst.msk [vmem:[%s210_s11 + $0x10] sm:$0xf] %vm299_vm2, %v297_v17  ;;  %493 = vst.msk [vmem:[%s210_s11 + $0x14] sm:$0xf] %vm299_vm2, %v367_v18  ;;  %v298_v27 = vpack.c.bf16 %v292_v19, %v292_v19  ;;  %v368_v28 = vpack.c.bf16 %v362_v20, %v362_v20 }
  0xf0   : > { %300 = vst.msk [vmem:[%s210_s11] sm:$0xf] %vm299_vm2, %v295_v23  ;;  %491 = vst.msk [vmem:[%s210_s11 + $0x4] sm:$0xf] %vm299_vm2, %v365_v24  ;;  %v296_v29 = vpack.c.bf16 %v284_v25, %v284_v25  ;;  %v366_v30 = vpack.c.bf16 %v354_v26, %v354_v26 }
  0xf1   : > { %303 = vst.msk [vmem:[%s210_s11 + $0x18] sm:$0xf] %vm299_vm2, %v298_v27  ;;  %494 = vst.msk [vmem:[%s210_s11 + $0x1c] sm:$0xf] %vm299_vm2, %v368_v28 }
  0xf2   : > { %301 = vst.msk [vmem:[%s210_s11 + $0x8] sm:$0xf] %vm299_vm2, %v296_v29  ;;  %492 = vst.msk [vmem:[%s210_s11 + $0xc] sm:$0xf] %vm299_vm2, %v366_v30 }
  0xf3 PF: > { %s13_s16 = sadd.s32 1, %s597_s16   ;;  %s694_s12 = smov %s589_s14 }
  0xf4   : > { %p10_p7 = scmp.ge.s32.totalorder %s13_s16, 6   ;;  %s695_s13 = smov %s593_s15 }
  0xf5   : > { %s696_s14 = smov %s699_s17  ;;  %s697_s15 = smov %s703_s18 }
  0xf6   :  { %12 = sbr.rel (!%p10_p7) target bundleno = 3 (0x3), region = 64 }

// kernel: _lambda_.3
= control target key start
LH: loop header
LB: loop body
LE: loop exit
PB: predicated region body
PF: predicated region fallthrough
CT: control target
= control target key end

     0   :  { %s9762_s27 = smov 0   ;;  %s13096_s0 = inlined_call_operand.vmem [shape: bf16[2,16,16,4], index: 0, kind: input, shape index: {}]   ;;  %s13097_s1 = inlined_call_operand.vmem [shape: bf16[2,16,16,4], index: 1, kind: input, shape index: {}]   ;;  %s13098_s2 = inlined_call_operand.vmem [shape: bf16[72,4], index: 2, kind: input, shape index: {}]   ;;  %s13099_s3 = inlined_call_operand.vmem [shape: f32[1,4], index: 3, kind: input, shape index: {}]   ;;  %s13100_s4 = inlined_call_operand.vmem [shape: f32[1,4], index: 4, kind: input, shape index: {}]   ;;  %s13101_s5 = inlined_call_operand.vmem [shape: bf16[36,4], index: 5, kind: input, shape index: {}]   ;;  %s13102_s6 = inlined_call_operand.vmem [shape: f32[1,4], index: 6, kind: input, shape index: {}]   ;;  %s13103_s7 = inlined_call_operand.vmem [shape: f32[1,4], index: 7, kind: input, shape index: {}]   ;;  %s13104_s8 = inlined_call_operand.vmem [shape: f32[2,16,16,4], index: 8, kind: output, shape index: {}]  }
   0x1 LB: > { %s8489_s28 = sadd.s32 4294967295, %s9697_s27   ;;  %p8493_p0 = scmp.ge.s32.totalorder %s9697_s27, 1  ;;  %s9697_s27 = sphi %s9762_s27, %s18_s27  }
   0x2   : > { %p272_p1 = scmp.lt.s32.totalorder %s9697_s27, 3 }
   0x4   : > { %p273_p2 = pnand %p8493_p0, %p272_p1 }
   0x5   : > { %p311_p3 = scmp.lt.s32.totalorder (!%p273_p2), %s8489_s28, 1  ;;  %vm330_vm0 = vcmask (!%p273_p2), 24576   ;;  %vm13110_vm1 = vsmask.f32 (!%p273_p2), 256  ;;  %v13173_v0 = vmov (!%p273_p2), 0  ;;  %s9699_s11 = smov (!%p273_p2), 8  }
   0x6   : > { %276 = sbr.rel (%p273_p2) target bundleno = 1338 (0x53a), region = 52  ;;  %vm9771_vm2 = vmand (!%p273_p2), %vm330_vm0, %vm13110_vm1  ;;  %v339_v1 = vld [vmem:[#allocation3 + $0x18] sm:$0x1] (!%p273_p2)  ;;  %v333_v3 = vld [vmem:[#allocation3 + $0x8] sm:$0x1] (!%p273_p2)  ;;  %s9700_s12 = smov (!%p273_p2), 16  }
   0x7   : > { %v13174_v0 = vsel (!%p273_p2), %vm9771_vm2, 4294967295, %v13173_v0  ;;  %v340_v2 = vsel (!%p273_p2), %vm9771_vm2, 0, %v339_v1  ;;  %v342_v4 = vld [vmem:[#allocation3 + $0x20] sm:$0x1] (!%p273_p2)  ;;  %v334_v5 = vsel (!%p273_p2), %vm9771_vm2, 0, %v333_v3  ;;  %s9701_s13 = smov (!%p273_p2), 32  }
   0x8   : > { %341 = vst [vmem:[#allocation3 + $0x18] sm:$0x1] (!%p273_p2), %v340_v2  ;;  %v343_v6 = vsel (!%p273_p2), %vm9771_vm2, 0, %v342_v4  ;;  %v336_v7 = vld [vmem:[#allocation3 + $0x10] sm:$0x1] (!%p273_p2)  ;;  %s9702_s14 = smov (!%p273_p2), 24  }
   0x9   : > { %335 = vst [vmem:[#allocation3 + $0x8] sm:$0x1] (!%p273_p2), %v334_v5  ;;  %344 = vst [vmem:[#allocation3 + $0x20] sm:$0x1] (!%p273_p2), %v343_v6  ;;  %v337_v8 = vsel (!%p273_p2), %vm9771_vm2, 0, %v336_v7  ;;  %s9703_s15 = smov (!%p273_p2), 40  }
   0xa   : > { %338 = vst [vmem:[#allocation3 + $0x10] sm:$0x1] (!%p273_p2), %v337_v8  ;;  %v345_v12 = vld [vmem:[#allocation3 + $0x28] sm:$0x1] (!%p273_p2)  ;;  %vm13107_vm3 = vcmask (!%p273_p2), 31744   ;;  %s9704_s19 = smov (!%p273_p2), 48  }
   0xb   : > { %v346_v19 = vsel (!%p273_p2), %vm9771_vm2, 0, %v345_v12  ;;  %vm13108_vm4 = vcmask (!%p273_p2), 97344   ;;  %s9705_s20 = smov (!%p273_p2), 56   ;;  %vm13106_vm5 = vcmask (!%p273_p2), 162944   ;;  %vm13112_vm6 = vsmask.f32 (!%p273_p2), 7938 }
   0xc   : > { %347 = vst [vmem:[#allocation3 + $0x28] sm:$0x1] (!%p273_p2), %v346_v19  ;;  %vm9907_vm7 = vmand (!%p273_p2), %vm13107_vm3, %vm13112_vm6  ;;  %s13124_s21 = smov (!%p273_p2), 64   ;;  %vm731_vm8 = vcmask (!%p273_p2), 221376   ;;  %s9708_s22 = smov (!%p273_p2), 12   ;;  %vm13109_vm10 = vcmask (!%p273_p2), 64544  }
   0xd   : > { %s13469_s28 = smov (!%p311_p3, %s8489_s28), 1  ;;  %vm9947_vm9 = vmand %vm731_vm8, %vm13110_vm1  ;;  %s9709_s23 = smov 4   ;;  %vm564_vm11 = vcmask 162951   ;;  %vm13114_vm12 = vsmask.f32 7966  ;;  %vm13105_vm0 = vcmask 228544  }
   0xe   : > { %s9222_s29 = sshll.u32 %s13469_s28, 7  ;;  %vm13116_vm13 = vsmask.f32 7424  ;;  %vm9992_vm14 = vmand %vm564_vm11, %vm13114_vm12  ;;  %s9710_s24 = smov 20   ;;  %vm13113_vm11 = vcmask 294144  }
   0xf   : > { %s9789_s10 = scalar_lea.vmem %s13096_s0, %s9222_s29  ;;  %s9865_s18 = scalar_lea.vmem %s13097_s1, %s9222_s29  ;;  %vm10035_vm15 = vmand %vm13106_vm5, %vm13116_vm13 }
  0x10   : > { %v9399_v9 = vld [vmem:[%s9789_s10 + $0x10] sm:$0xff]   ;;  %v9400_v10 = vld [vmem:[%s9789_s10] sm:$0xff]   ;;  %v9401_v11 = vld [vmem:[%s9789_s10 + $0x18] sm:$0xff]   ;;  %s9711_s25 = smov 28   ;;  %s9712_s26 = smov 36  }
  0x11   : > { %538 = vrot.lane.b32.xlu1 %v9399_v9, %s9699_s11  ;;  %534 = vrot.lane.b32.xlu0 %v9400_v10, %s9699_s11  ;;  %v9402_v13 = vld [vmem:[%s9789_s10 + $0x8] sm:$0xff]   ;;  %v9403_v14 = vld [vmem:[%s9789_s10] sm:$0xff]   ;;  %vm10098_vm8 = vmand %vm13105_vm0, %vm13112_vm6  ;;  %vm1008_vm0 = vcmask 359751   ;;  %s9713_s29 = smov 44   ;;  %s9714_s30 = smov 52  }
  0x12   : > { %v9404_v15 = vld [vmem:[%s9789_s10 + $0x20] sm:$0xff]   ;;  %v638_v16 = vshrl.u32 %v9403_v14, 16  ;;  %v640_v17 = vshll.u32 %v9403_v14, 16  ;;  %v9405_v18 = vld [vmem:[%s9789_s10 + $0x10] sm:$0xff]   ;;  %v9406_v21 = vld [vmem:[%s9789_s10 + $0x8] sm:$0xff]   ;;  %s9715_s9 = smov 60  }
  0x13   : > { %v652_v22 = vshrl.u32 %v9405_v18, 16  ;;  %v654_v23 = vshll.u32 %v9405_v18, 16  ;;  %v9407_v24 = vld [vmem:[%s9789_s10 + $0x20] sm:$0xff]   ;;  %v9408_v25 = vld [vmem:[%s9789_s10 + $0x18] sm:$0xff]   ;;  %v645_v27 = vshrl.u32 %v9406_v21, 16  ;;  %v647_v28 = vshll.u32 %v9406_v21, 16 }
  0x14   : > { %v642_v20 = vrot.slane %v640_v17, 1  ;;  %v666_v30 = vshrl.u32 %v9407_v24, 16  ;;  %v668_v31 = vshll.u32 %v9407_v24, 16  ;;  %v659_v33 = vshrl.u32 %v9408_v25, 16  ;;  %v9410_v35 = vld [vmem:[%s9789_s10 + $0x8] sm:$0xff]   ;;  %v9411_v38 = vld [vmem:[%s9789_s10 + $0x18] sm:$0xff]  }
  0x15   : > { %540 = vrot.lane.b32.xlu1 %v9401_v11, %s9699_s11  ;;  %536 = vrot.lane.b32.xlu0 %v9402_v13, %s9699_s11  ;;  %v656_v29 = vrot.slane %v654_v23, 1  ;;  %v649_v32 = vrot.slane %v647_v28, 1  ;;  %v661_v34 = vshll.u32 %v9408_v25, 16  ;;  %v821_v41 = vshrl.u32 %v9410_v35, 16  ;;  %v9412_v42 = vld [vmem:[%s9789_s10 + $0x10] sm:$0xff]   ;;  %v9409_v49 = vld [vmem:[%s9789_s10 + $0x8] sm:$0xff]  }
  0x16   : > { %v643_v26 = vor.u32 %v642_v20, %v638_v16  ;;  %v670_v37 = vrot.slane %v668_v31, 1  ;;  %v824_v44 = vshll.u32 %v9410_v35, 16  ;;  %v835_v47 = vshrl.u32 %v9411_v38, 16  ;;  %v9416_v55 = vld [vmem:[%s9789_s10 + $0x20] sm:$0xff]   ;;  %v9418_v59 = vld [vmem:[%s9789_s10 + $0x28] sm:$0xff]   ;;  %v9413_v60 = vld [vmem:[%s9789_s10 + $0x18] sm:$0xff]  }
  0x17   : > { %v657_v36 = vor.u32 %v656_v29, %v652_v22  ;;  %v650_v39 = vor.u32 %v649_v32, %v645_v27  ;;  %v663_v40 = vrot.slane %v661_v34, 1  ;;  %v823_v46 = vrot.slane %v821_v41, 7  ;;  %v9414_v61 = vld [vmem:[%s9789_s10 + $0x10] sm:$0xff]   ;;  %v9419_v2 = vld [vmem:[%s9789_s10 + $0x8] sm:$0xff]   ;;  %v9421_v3 = vld [vmem:[%s9789_s10 + $0x18] sm:$0xff]   ;;  %s9716_s16 = smov 68  }
  0x18   : > { %v671_v43 = vor.u32 %v670_v37, %v666_v30  ;;  %v828_v48 = vshrl.u32 %v9412_v42, 16  ;;  %v838_v50 = vshll.u32 %v9411_v38, 16  ;;  %v837_v52 = vrot.slane %v835_v47, 7  ;;  %v9415_v4 = vld [vmem:[%s9789_s10 + $0x28] sm:$0xff]   ;;  %v9422_v6 = vld [vmem:[%s9789_s10 + $0x10] sm:$0xff]   ;;  %v9417_v10 = vld [vmem:[%s9789_s10 + $0x20] sm:$0xff]  }
  0x19   : > { %542 = vrot.lane.b32.xlu0 %v9404_v15, %s9699_s11  ;;  %686 = vrot.lane.b32.xlu1 %v643_v26, %s9700_s12  ;;  %v664_v45 = vor.u32 %v663_v40, %v659_v33  ;;  %v826_v51 = vor.u32 %v824_v44, %v823_v46  ;;  %v831_v54 = vshll.u32 %v9412_v42, 16  ;;  %v842_v58 = vshrl.u32 %v9416_v55, 16  ;;  %v9423_v12 = vld [vmem:[%s9789_s10] sm:$0xff]   ;;  %v9424_v17 = vld [vmem:[%s9789_s10 + $0x28] sm:$0xff]  }
  0x1a   : > { %v830_v53 = vrot.slane %v828_v48, 7  ;;  %v840_v56 = vor.u32 %v838_v50, %v837_v52  ;;  %v845_v63 = vshll.u32 %v9416_v55, 16  ;;  %v849_v1 = vshrl.u32 %v9418_v59, 16  ;;  %v9420_v19 = vld [vmem:[%s9789_s10 + $0x28] sm:$0xff]   ;;  %v9426_v23 = vld [vmem:[%s9789_s10 + $0x20] sm:$0xff]   ;;  %v9427_v30 = vld [vmem:[%s9789_s10 + $0x10] sm:$0xff]  }
  0x1b   : > { %v844_v62 = vrot.slane %v842_v58, 7  ;;  %v852_v5 = vshll.u32 %v9418_v59, 16  ;;  %v1100_v9 = vshll.u32 %v9419_v2, 16  ;;  %v1114_v11 = vshll.u32 %v9421_v3, 16  ;;  %v9428_v35 = vld [vmem:[%s9789_s10 + $0x28] sm:$0xff]   ;;  %v9429_v38 = vld [vmem:[%s9789_s10 + $0x18] sm:$0xff]  }
  0x1c   : > { %v833_v57 = vor.u32 %v831_v54, %v830_v53  ;;  %v851_v8 = vrot.slane %v849_v1, 7  ;;  %v1098_v14 = vshrl.u32 %v9419_v2, 16  ;;  %v1107_v16 = vshll.u32 %v9422_v6, 16  ;;  %v9432_v50 = vld [vmem:[%s9789_s10 + $0x20] sm:$0xff]   ;;  %v9435_v59 = vld [vmem:[%s9789_s10 + $0x28] sm:$0xff]  }
  0x1d   : > { %690 = vrot.lane.b32.xlu1 %v657_v36, %s9700_s12  ;;  %688 = vrot.lane.b32.xlu0 %v650_v39, %s9700_s12  ;;  %v847_v7 = vor.u32 %v845_v63, %v844_v62  ;;  %v1102_v15 = vrot.slane %v1100_v9, 1  ;;  %v1112_v18 = vshrl.u32 %v9421_v3, 16  ;;  %v1116_v20 = vrot.slane %v1114_v11, 1  ;;  %v9436_v2 = vld [vmem:[%s9789_s10] sm:$0xff]   ;;  %v9431_v3 = vld [vmem:[%s9789_s10 + $0x18] sm:$0xff]  }
  0x1e   : > { %v854_v13 = vor.u32 %v852_v5, %v851_v8  ;;  %v1105_v21 = vshrl.u32 %v9422_v6, 16  ;;  %v814_v22 = vshrl.u32 %v9423_v12, 16  ;;  %v1109_v25 = vrot.slane %v1107_v16, 1  ;;  %v9437_v6 = vld [vmem:[%s9789_s10 + $0x30] sm:$0xff]   ;;  %v9434_v11 = vld [vmem:[%s9789_s10 + $0x20] sm:$0xff]  }
  0x1f   : > { %v1103_v24 = vor.u32 %v1102_v15, %v1098_v14  ;;  %v675_v26 = vshll.u32 %v9424_v17, 16  ;;  %v1117_v27 = vor.u32 %v1116_v20, %v1112_v18  ;;  %v817_v28 = vshll.u32 %v9423_v12, 16  ;;  %v9884_v15 = vld [vmem:[%s9789_s10 + $0x18] sm:$0xff]   ;;  %v9890_v20 = vld [vmem:[%s9789_s10 + $0x30] sm:$0xff]  }
  0x20   : > { %v673_v29 = vshrl.u32 %v9424_v17, 16  ;;  %v1110_v31 = vor.u32 %v1109_v25, %v1105_v21  ;;  %v816_v32 = vrot.slane %v814_v22, 7  ;;  %v1121_v34 = vshll.u32 %v9426_v23, 16  ;;  %v9457_v22 = vld [vmem:[%s9789_s10 + $0x10] sm:$0xff]  }
  0x21   : > { %694 = vrot.lane.b32.xlu1 %v671_v43, %s9700_s12  ;;  %692 = vrot.lane.b32.xlu0 %v664_v45, %s9700_s12  ;;  %v677_v33 = vrot.slane %v675_v26, 1  ;;  %v1119_v36 = vshrl.u32 %v9426_v23, 16  ;;  %v1287_v37 = vshrl.u32 %v9427_v30, 16  ;;  %v1128_v42 = vshll.u32 %v9428_v35, 16  ;;  %v9425_v43 = vld [vmem:[%s9789_s10] sm:$0xff]  }
  0x22   : > { %v819_v39 = vor.u32 %v817_v28, %v816_v32  ;;  %v1123_v41 = vrot.slane %v1121_v34, 1  ;;  %v1290_v45 = vshll.u32 %v9427_v30, 16  ;;  %v1126_v47 = vshrl.u32 %v9428_v35, 16  ;;  %v468_v32 = vld [vmem:[#allocation3 + $0x18] sm:$0xff]  ;;  %v9438_v35 = vld [vmem:[%s9789_s10 + $0x30] sm:$0xff]  }
  0x23   : > { %v678_v40 = vor.u32 %v677_v33, %v673_v29  ;;  %v1289_v44 = vrot.slane %v1287_v37, 7  ;;  %v1130_v48 = vrot.slane %v1128_v42, 1  ;;  %v1297_v53 = vshll.u32 %v9429_v38, 16  ;;  %v9898_v29 = vld [vmem:[%s9789_s10 + $0x20] sm:$0xff]  }
  0x24   : > { %v1124_v46 = vor.u32 %v1123_v41, %v1119_v36  ;;  %v1304_v63 = vshll.u32 %v9432_v50, 16  ;;  %v1308_v5 = vshrl.u32 %v9435_v59, 16  ;;  %v1093_v9 = vshll.u32 %v9436_v2, 16 }
  0x25   : > { %977 = vrot.lane.b32.xlu1 %v9409_v49, %s9701_s13  ;;  %871 = vrot.lane.b32.xlu0 %v826_v51, %s9702_s14  ;;  %v1294_v49 = vshrl.u32 %v9429_v38, 16  ;;  %v348_v51 = vld [vmem:[#allocation3 + $0x30] sm:$0x1]  ;;  %v1292_v52 = vor.u32 %v1290_v45, %v1289_v44  ;;  %v1131_v54 = vor.u32 %v1130_v48, %v1126_v47  ;;  %v1091_v14 = vshrl.u32 %v9436_v2, 16  ;;  %v9461_v45 = vld [vmem:[%s9789_s10 + $0x18] sm:$0xff]   ;;  %v9462_v48 = vld [vmem:[%s9789_s10 + $0x8] sm:$0xff]  }
  0x26   : > { %v349_v58 = vsel %vm9771_vm2, 0, %v348_v51  ;;  %v1310_v12 = vrot.slane %v1308_v5, 7  ;;  %v1095_v17 = vrot.slane %v1093_v9, 1  ;;  %v1315_v18 = vshrl.u32 %v9437_v6, 16 }
  0x27   : > { %v1296_v55 = vrot.slane %v1294_v49, 7  ;;  %350 = vst [vmem:[#allocation3 + $0x30] sm:$0x1] %v349_v58  ;;  %v1318_v21 = vshll.u32 %v9437_v6, 16  ;;  %v1573_v26 = vshll.u32 %v9884_v15, 16  ;;  %v418_v30 = vshrl.u32 %v9457_v22, 16 }
  0x28   : > { %v1317_v25 = vrot.slane %v1315_v18, 7  ;;  %v1571_v36 = vshrl.u32 %v9884_v15, 16  ;;  %v1135_v42 = vshll.u32 %v9890_v20, 16  ;;  %v9439_v49 = vld [vmem:[%s9789_s10 + $0x30] sm:$0xff]   ;;  %v1580_v51 = vshll.u32 %v9898_v29, 16 }
  0x29   : > { %875 = vrot.lane.b32.xlu1 %v840_v56, %s9702_s14  ;;  %873 = vrot.lane.b32.xlu0 %v833_v57, %s9702_s14  ;;  %v1301_v56 = vshrl.u32 %v9432_v50, 16  ;;  %v9433_v57 = vld [vmem:[%s9789_s10 + $0x30] sm:$0xff]   ;;  %v420_v38 = vrot.slane %v418_v30, 7  ;;  %v1575_v41 = vrot.slane %v1573_v26, 1  ;;  %v9440_v50 = vld [vmem:[%s9789_s10 + $0x28] sm:$0xff]   ;;  %v411_v58 = vshrl.u32 %v9462_v48, 16 }
  0x2a   : > { %v856_v1 = vshrl.u32 %v9433_v57, 16  ;;  %v1578_v2 = vshrl.u32 %v9898_v29, 16  ;;  %v1137_v5 = vrot.slane %v1135_v42, 1  ;;  %v1582_v9 = vrot.slane %v1580_v51, 1  ;;  %v9451_v30 = vld [vmem:[%s9865_s18 + $0x10] sm:$0xff]  }
  0x2b   : > { %v1303_v62 = vrot.slane %v1301_v56, 7 }
  0x2c   : > { %v858_v8 = vrot.slane %v856_v1, 7  ;;  %v465_v1 = vld [vmem:[#allocation3 + $0x10] sm:$0xff]  ;;  %v1583_v26 = vor.u32 %v1582_v9, %v1578_v2 }
  0x2d   : > { %981 = vrot.lane.b32.xlu1 %v9413_v60, %s9701_s13  ;;  %979 = vrot.lane.b32.xlu0 %v9414_v61, %s9701_s13  ;;  %v9430_v60 = vld [vmem:[%s9789_s10 + $0x10] sm:$0xff]   ;;  %v1299_v61 = vor.u32 %v1297_v53, %v1296_v55  ;;  %v428_v55 = vshll.u32 %v9461_v45, 16 }
  0x31   : > { %544 = vrot.lane.b32.xlu1 %v9415_v4, %s9699_s11  ;;  %877 = vrot.lane.b32.xlu0 %v847_v7, %s9702_s14  ;;  %v859_v4 = vshll.u32 %v9433_v57, 16  ;;  %v1306_v7 = vor.u32 %v1304_v63, %v1303_v62  ;;  %v471_v57 = vld [vmem:[#allocation3 + $0x20] sm:$0xff] }
  0x33   : > { %v861_v16 = vor.u32 %v859_v4, %v858_v8  ;;  %v1576_v4 = vor.u32 %v1575_v41, %v1571_v36  ;;  %v1751_v41 = vshrl.u32 %v9451_v30, 16 }
  0x35   : > { %983 = vrot.lane.b32.xlu1 %v9417_v10, %s9701_s13  ;;  %879 = vrot.lane.b32.xlu0 %v854_v13, %s9702_s14  ;;  %v13145_v10 = vmov 0   ;;  %v1311_v13 = vshll.u32 %v9435_v59, 16  ;;  %v414_v59 = vshll.u32 %v9462_v48, 16  ;;  %v9449_v48 = vld [vmem:[%s9865_s18] sm:$0xff]   ;;  %v1753_v51 = vrot.slane %v1751_v41, 7  ;;  %v10006_v41 = vld [vmem:[%s9789_s10 + $0x38] sm:$0xff]  }
  0x36   : > { %328 = vst.msk [vmem:[#allocation3] sm:$0xff] %vm13107_vm3, %v13145_v10  ;;  %6124 = vst.msk [vmem:[#allocation4] sm:$0xff] %vm13107_vm3, %v13145_v10 }
  0x37   : > { %484 = vst.msk [vmem:[#allocation3] sm:$0xff] %vm13108_vm4, %v13145_v10  ;;  %v1313_v23 = vor.u32 %v1311_v13, %v1310_v12  ;;  %vm10140_vm3 = vmand %vm1008_vm0, %vm13114_vm12  ;;  %vm1196_vm0 = vcmask 418176  }
  0x38   : > { %563 = vst.msk [vmem:[#allocation3] sm:$0xff] %vm13106_vm5, %v13145_v10  ;;  %vm1170_vm5 = vcmask 359744  }
  0x39   : > { %1148 = vrot.lane.b32.xlu1 %v1103_v24, %s9703_s15  ;;  %985 = vrot.lane.b32.xlu0 %v9420_v19, %s9701_s13  ;;  %v9442_v19 = vld [vmem:[%s9789_s10 + $0x10] sm:$0xff]   ;;  %v1096_v24 = vor.u32 %v1095_v17, %v1091_v14  ;;  %6231 = vst.msk [vmem:[#allocation4] sm:$0xff] %vm13109_vm10, %v13145_v10 }
  0x3a   : > { %v1566_v28 = vshll.u32 %v9442_v19, 16  ;;  %v1564_v37 = vshrl.u32 %v9442_v19, 16  ;;  %v9447_v14 = vld [vmem:[%s9789_s10 + $0x30] sm:$0xff]   ;;  %v474_v19 = vld [vmem:[#allocation3 + $0x28] sm:$0xff]  ;;  %6274 = vst.msk [vmem:[#allocation4] sm:$0xff] %vm13108_vm4, %v13145_v10 }
  0x3b   : > { %v1592_v36 = vshrl.u32 %v9447_v14, 16 }
  0x3d   : > { %1152 = vrot.lane.b32.xlu1 %v1117_v27, %s9703_s15  ;;  %1150 = vrot.lane.b32.xlu0 %v1110_v31, %s9703_s15  ;;  %v9458_v27 = vld [vmem:[%s9789_s10] sm:$0xff]   ;;  %v421_v31 = vshll.u32 %v9457_v22, 16 }
  0x3e   : > { %v404_v33 = vshrl.u32 %v9458_v27, 16  ;;  %v407_v34 = vshll.u32 %v9458_v27, 16 }
  0x3f   : > { %v423_v47 = vor.u32 %v421_v31, %v420_v38  ;;  %v9448_v38 = vld [vmem:[%s9789_s10 + $0x8] sm:$0xff]  }
  0x40   : > { %v406_v44 = vrot.slane %v404_v33, 7  ;;  %v9452_v33 = vld [vmem:[%s9865_s18 + $0x8] sm:$0xff]  }
  0x41   : > { %869 = vrot.lane.b32.xlu1 %v819_v39, %s9702_s14  ;;  %696 = vrot.lane.b32.xlu0 %v678_v40, %s9700_s12  ;;  %v462_v39 = vld [vmem:[#allocation3 + $0x8] sm:$0xff]  ;;  %v1320_v40 = vor.u32 %v1318_v21, %v1317_v25  ;;  %v469_v56 = vsel %vm9907_vm7, %v423_v47, %v468_v32  ;;  %v9450_v25 = vld [vmem:[%s9865_s18] sm:$0xff]   ;;  %v1744_v42 = vshrl.u32 %v9452_v33, 16  ;;  %v13177_v47 = vmov 0 }
  0x42   : > { %v409_v53 = vor.u32 %v407_v34, %v406_v44  ;;  %470 = vst [vmem:[#allocation3 + $0x18] sm:$0xff] %v469_v56  ;;  %v1737_v32 = vshrl.u32 %v9450_v25, 16  ;;  %v13178_v47 = vsel %vm9947_vm9, 4294967295, %v13177_v47 }
  0x44   : > { %v463_v62 = vsel %vm9907_vm7, %v409_v53, %v462_v39  ;;  %v1739_v39 = vrot.slane %v1737_v32, 7  ;;  %v1747_v53 = vshll.u32 %v9452_v33, 16  ;;  %v9464_v32 = vld [vmem:[%s9789_s10 + $0x38] sm:$0xff]  }
  0x45   : > { %975 = vrot.lane.b32.xlu1 %v9425_v43, %s9701_s13  ;;  %1154 = vrot.lane.b32.xlu0 %v1124_v46, %s9703_s15  ;;  %v13175_v43 = vmov 0  ;;  %v1568_v46 = vrot.slane %v1566_v28, 1  ;;  %464 = vst [vmem:[#allocation3 + $0x8] sm:$0xff] %v463_v62  ;;  %v1594_v28 = vshll.u32 %v9447_v14, 16  ;;  %v9460_v62 = vld [vmem:[%s9789_s10 + $0x8] sm:$0xff]  }
  0x46   : > { %v13176_v43 = vsel %vm9907_vm7, 4294967295, %v13175_v43  ;;  %v1559_v9 = vshll.u32 %v9460_v62, 16 }
  0x47   : > { %v1569_v8 = vor.u32 %v1568_v46, %v1564_v37  ;;  %v1596_v37 = vrot.slane %v1594_v28, 1  ;;  %v1754_v46 = vshll.u32 %v9451_v30, 16  ;;  %v9985_v28 = vld [vmem:[%s9865_s18 + $0x10] sm:$0xff]  }
  0x49   : > { %1337 = vrot.lane.b32.xlu1 %v1292_v52, %s9704_s19  ;;  %1156 = vrot.lane.b32.xlu0 %v1131_v54, %s9703_s15  ;;  %v9445_v52 = vld [vmem:[%s9789_s10 + $0x28] sm:$0xff]   ;;  %v425_v54 = vshrl.u32 %v9461_v45, 16  ;;  %v1597_v44 = vor.u32 %v1596_v37, %v1592_v36  ;;  %v733_v45 = vld [vmem:[#allocation3] sm:$0x1]  ;;  %v1999_v37 = vshll.u32 %v9985_v28, 16 }
  0x4a   : > { %v1585_v22 = vshrl.u32 %v9445_v52, 16 }
  0x4b   : > { %v427_v63 = vrot.slane %v425_v54, 7  ;;  %v9455_v54 = vld [vmem:[%s9789_s10 + $0x38] sm:$0xff]  }
  0x4d   : > { %1339 = vrot.lane.b32.xlu1 %v1299_v61, %s9704_s19  ;;  %1443 = vrot.lane.b32.xlu0 %v9430_v60, %s9705_s20  ;;  %v1133_v60 = vshrl.u32 %v9890_v20, 16  ;;  %v9446_v61 = vld [vmem:[%s9789_s10 + $0x8] sm:$0xff]   ;;  %v430_v6 = vor.u32 %v428_v55, %v427_v63  ;;  %v1756_v63 = vor.u32 %v1754_v46, %v1753_v51 }
  0x4e   : > { %v1280_v13 = vshrl.u32 %v9446_v61, 16 }
  0x4f   : > { %v472_v15 = vsel %vm9907_vm7, %v430_v6, %v471_v57  ;;  %v1138_v21 = vor.u32 %v1137_v5, %v1133_v60  ;;  %v1322_v60 = vshrl.u32 %v9455_v54, 16  ;;  %v1325_v5 = vshll.u32 %v9455_v54, 16 }
  0x50   : > { %473 = vst [vmem:[#allocation3 + $0x20] sm:$0xff] %v472_v15  ;;  %v1282_v27 = vrot.slane %v1280_v13, 7  ;;  %v9456_v13 = vld [vmem:[%s9789_s10 + $0x30] sm:$0xff]  }
  0x51   : > { %1445 = vrot.lane.b32.xlu1 %v9431_v3, %s9705_s20  ;;  %1341 = vrot.lane.b32.xlu0 %v1306_v7, %s9704_s19  ;;  %v413_v3 = vrot.slane %v411_v58, 7  ;;  %v9465_v7 = vld [vmem:[%s9789_s10 + $0x20] sm:$0xff]   ;;  %v477_v58 = vld [vmem:[#allocation3 + $0x30] sm:$0xff] }
  0x52   : > { %v435_v17 = vshll.u32 %v9465_v7, 16 }
  0x53   : > { %v416_v12 = vor.u32 %v414_v59, %v413_v3  ;;  %v9453_v3 = vld [vmem:[%s9865_s18 + $0x10] sm:$0xff]  }
  0x55   : > { %881 = vrot.lane.b32.xlu1 %v861_v16, %s9702_s14  ;;  %1447 = vrot.lane.b32.xlu0 %v9434_v11, %s9705_s20  ;;  %v1587_v11 = vshll.u32 %v9445_v52, 16  ;;  %v432_v16 = vshrl.u32 %v9465_v7, 16  ;;  %v466_v18 = vsel %vm9907_vm7, %v416_v12, %v465_v1  ;;  %v1746_v52 = vrot.slane %v1744_v42, 7 }
  0x56   : > { %467 = vst [vmem:[#allocation3 + $0x10] sm:$0xff] %v466_v18  ;;  %v1324_v7 = vrot.slane %v1322_v60, 7  ;;  %v1601_v60 = vshll.u32 %v10006_v41, 16 }
  0x57   : > { %v434_v20 = vrot.slane %v432_v16, 7  ;;  %v1749_v1 = vor.u32 %v1747_v53, %v1746_v52  ;;  %v1557_v16 = vshrl.u32 %v9460_v62, 16  ;;  %v351_v62 = vld [vmem:[#allocation3 + $0x38] sm:$0x1] }
  0x58   : > { %v1327_v12 = vor.u32 %v1325_v5, %v1324_v7 }
  0x59   : > { %1343 = vrot.lane.b32.xlu1 %v1313_v23, %s9704_s19  ;;  %1146 = vrot.lane.b32.xlu0 %v1096_v24, %s9703_s15  ;;  %v1589_v23 = vrot.slane %v1587_v11, 1  ;;  %v1283_v24 = vshll.u32 %v9446_v61, 16  ;;  %v437_v29 = vor.u32 %v435_v17, %v434_v20  ;;  %v9459_v61 = vld [vmem:[%s9865_s18 + $0x18] sm:$0xff]   ;;  %v9463_v11 = vld [vmem:[%s9865_s18 + $0x20] sm:$0xff]   ;;  %v1561_v17 = vrot.slane %v1559_v9, 1 }
  0x5a   : > { %v1761_v14 = vshll.u32 %v9459_v61, 16  ;;  %v1765_v18 = vshrl.u32 %v9463_v11, 16  ;;  %v9469_v20 = vld [vmem:[%s9865_s18] sm:$0xff]   ;;  %v1599_v9 = vshrl.u32 %v10006_v41, 16 }
  0x5b   : > { %v475_v31 = vsel %vm9907_vm7, %v437_v29, %v474_v19  ;;  %v1590_v34 = vor.u32 %v1589_v23, %v1585_v22  ;;  %v9468_v19 = vld [vmem:[%s9865_s18 + $0x8] sm:$0xff]   ;;  %v1562_v23 = vor.u32 %v1561_v17, %v1557_v16  ;;  %v1985_v33 = vshll.u32 %v9469_v20, 16 }
  0x5c   : > { %476 = vst [vmem:[#allocation3 + $0x28] sm:$0xff] %v475_v31  ;;  %v1992_v29 = vshll.u32 %v9468_v19, 16  ;;  %v1990_v42 = vshrl.u32 %v9468_v19, 16  ;;  %v1603_v17 = vrot.slane %v1601_v60, 1  ;;  %v9477_v19 = vld [vmem:[%s9865_s18 + $0x8] sm:$0xff]  }
  0x5d   : > { %1345 = vrot.lane.b32.xlu1 %v1320_v40, %s9704_s19  ;;  %987 = vrot.lane.b32.xlu0 %v9438_v35, %s9701_s13  ;;  %v1285_v35 = vor.u32 %v1283_v24, %v1282_v27  ;;  %v1740_v40 = vshll.u32 %v9450_v25, 16  ;;  %v1767_v24 = vrot.slane %v1765_v18, 7  ;;  %v1768_v25 = vshll.u32 %v9463_v11, 16 }
  0x5f   : > { %v1742_v55 = vor.u32 %v1740_v40, %v1739_v39  ;;  %v1770_v31 = vor.u32 %v1768_v25, %v1767_v24  ;;  %v9466_v39 = vld [vmem:[%s9865_s18 + $0x20] sm:$0xff]   ;;  %v9467_v40 = vld [vmem:[%s9865_s18 + $0x18] sm:$0xff]  }
  0x61   : > { %1451 = vrot.lane.b32.xlu1 %v9439_v49, %s9705_s20  ;;  %1449 = vrot.lane.b32.xlu0 %v9440_v50, %s9705_s20  ;;  %v9478_v49 = vld [vmem:[%s9789_s10 + $0x28] sm:$0xff]   ;;  %v734_v50 = vsel %vm9947_vm9, 0, %v733_v45  ;;  %v1983_v45 = vshrl.u32 %v9469_v20, 16 }
  0x62   : > { %735 = vst [vmem:[#allocation3] sm:$0x1] %v734_v50  ;;  %v439_v56 = vshrl.u32 %v9478_v49, 16  ;;  %v442_v57 = vshll.u32 %v9478_v49, 16  ;;  %v1987_v49 = vrot.slane %v1985_v33, 1  ;;  %v1997_v50 = vshrl.u32 %v9985_v28, 16 }
  0x63   : > { %v1604_v33 = vor.u32 %v1603_v17, %v1599_v9 }
  0x64   : > { %v441_v59 = vrot.slane %v439_v56, 7  ;;  %v10015_v56 = vld [vmem:[%s9865_s18] sm:$0xff]  }
  0x65   : > { %1616 = vrot.lane.b32.xlu1 %v1576_v4, %s13124_s21  ;;  %1614 = vrot.lane.b32.xlu0 %v1569_v8, %s13124_s21  ;;  %v9454_v4 = vld [vmem:[%s9865_s18 + $0x8] sm:$0xff]   ;;  %v1758_v8 = vshrl.u32 %v9459_v61, 16  ;;  %v10023_v61 = vld [vmem:[%s9865_s18 + $0x20] sm:$0xff]  }
  0x66   : > { %v444_v2 = vor.u32 %v442_v57, %v441_v59  ;;  %v2013_v18 = vshll.u32 %v10023_v61, 16 }
  0x67   : > { %v1760_v15 = vrot.slane %v1758_v8, 7 }
  0x68   : > { %v478_v6 = vsel %vm9907_vm7, %v444_v2, %v477_v58  ;;  %v1988_v2 = vor.u32 %v1987_v49, %v1983_v45  ;;  %v2168_v45 = vshll.u32 %v9477_v19, 16 }
  0x69   : > { %1158 = vrot.lane.b32.xlu1 %v1138_v21, %s9703_s15  ;;  %1618 = vrot.lane.b32.xlu0 %v1583_v26, %s13124_s21  ;;  %479 = vst [vmem:[#allocation3 + $0x30] sm:$0xff] %v478_v6  ;;  %v1763_v22 = vor.u32 %v1761_v14, %v1760_v15  ;;  %v9981_v26 = vld [vmem:[%s9789_s10 + $0x30] sm:$0xff]   ;;  %v352_v14 = vsel %vm9771_vm2, 0, %v351_v62  ;;  %v9476_v62 = vld [vmem:[%s9865_s18] sm:$0xff]  }
  0x6a   : > { %v682_v36 = vshll.u32 %v9981_v26, 16  ;;  %v680_v46 = vshrl.u32 %v9981_v26, 16  ;;  %353 = vst [vmem:[#allocation3 + $0x38] sm:$0x1] %v352_v14  ;;  %v10090_v14 = vld [vmem:[%s9865_s18 + $0x28] sm:$0xff]  }
  0x6c   : > { %v684_v54 = vrot.slane %v682_v36, 1  ;;  %v2165_v36 = vshrl.u32 %v9477_v19, 16 }
  0x6d   : > { %1620 = vrot.lane.b32.xlu1 %v1590_v34, %s13124_s21  ;;  %1335 = vrot.lane.b32.xlu0 %v1285_v35, %s9704_s19  ;;  %v13179_v34 = vmov 0 }
  0x6e   : > { %v13180_v34 = vsel %vm9992_vm14, 4294967295, %v13179_v34 }
  0x71   : > { %1622 = vrot.lane.b32.xlu1 %v1597_v44, %s13124_s21  ;;  %1441 = vrot.lane.b32.xlu0 %v9448_v38, %s9705_s20  ;;  %v10000_v38 = vld [vmem:[%s9865_s18 + $0x18] sm:$0xff]   ;;  %v1994_v44 = vrot.slane %v1992_v29, 1  ;;  %v2161_v29 = vshll.u32 %v10015_v56, 16 }
  0x72   : > { %v2006_v59 = vshll.u32 %v10000_v38, 16  ;;  %v2004_v5 = vshrl.u32 %v10000_v38, 16 }
  0x74   : > { %v2008_v16 = vrot.slane %v2006_v59, 1 }
  0x75   : > { %1880 = vrot.lane.b32.xlu1 %v9449_v48, %s9708_s22  ;;  %1785 = vrot.lane.b32.xlu0 %v1742_v55, %s9709_s23  ;;  %v2001_v55 = vrot.slane %v1999_v37, 1 }
  0x77   : > { %v2002_v15 = vor.u32 %v2001_v55, %v1997_v50  ;;  %v2167_v50 = vrot.slane %v2165_v36, 7  ;;  %v9519_v36 = vld [vmem:[%s9789_s10 + $0x30] sm:$0xff]  }
  0x79   : > { %1789 = vrot.lane.b32.xlu1 %v1756_v63, %s9709_s23  ;;  %1787 = vrot.lane.b32.xlu0 %v1749_v1, %s9709_s23  ;;  %v1995_v1 = vor.u32 %v1994_v44, %v1990_v42  ;;  %v10064_v42 = vld [vmem:[%s9789_s10 + $0x38] sm:$0xff]  }
  0x7d   : > { %1884 = vrot.lane.b32.xlu1 %v9453_v3, %s9708_s22  ;;  %1882 = vrot.lane.b32.xlu0 %v9454_v4, %s9708_s22 }
  0x81   : > { %1347 = vrot.lane.b32.xlu1 %v1327_v12, %s9704_s19  ;;  %546 = vrot.lane.b32.xlu0 %v9456_v13, %s9699_s11  ;;  %v685_v12 = vor.u32 %v684_v54, %v680_v46  ;;  %v2158_v13 = vshrl.u32 %v10015_v56, 16  ;;  %v9482_v46 = vld [vmem:[%s9865_s18 + $0x18] sm:$0xff]   ;;  %v863_v56 = vshrl.u32 %v10064_v42, 16 }
  0x82   : > { %v2182_v9 = vshll.u32 %v9482_v46, 16 }
  0x83   : > { %v539_v21 = vpop.permute.xlu1 %538  ;;  %v535_v27 = vpop.permute.xlu0 %534  ;;  %v2160_v28 = vrot.slane %v2158_v13, 7 }
  0x84   : > { %557 = vst.msk [vmem:[#allocation3 + $0x18] sm:$0xff] %vm13108_vm4, %v539_v21  ;;  %555 = vst.msk [vmem:[#allocation3 + $0x8] sm:$0xff] %vm13108_vm4, %v535_v27 }
  0x85   : > { %1791 = vrot.lane.b32.xlu1 %v1763_v22, %s9709_s23  ;;  %1612 = vrot.lane.b32.xlu0 %v1562_v23, %s13124_s21 }
  0x87   : > { %v541_v30 = vpop.permute.xlu1 %540  ;;  %v537_v35 = vpop.permute.xlu0 %536 }
  0x88   : > { %558 = vst.msk [vmem:[#allocation3 + $0x20] sm:$0xff] %vm13108_vm4, %v541_v30  ;;  %556 = vst.msk [vmem:[#allocation3 + $0x10] sm:$0xff] %vm13108_vm4, %v537_v35  ;;  %v2011_v30 = vshrl.u32 %v10023_v61, 16  ;;  %v2015_v35 = vrot.slane %v2013_v18, 1  ;;  %v13183_v18 = vmov 0 }
  0x89   : > { %1793 = vrot.lane.b32.xlu1 %v1770_v31, %s9709_s23  ;;  %1453 = vrot.lane.b32.xlu0 %v9464_v32, %s9705_s20  ;;  %v9479_v31 = vld [vmem:[%s9865_s18 + $0x10] sm:$0xff]   ;;  %v2009_v32 = vor.u32 %v2008_v16, %v2004_v5  ;;  %v13184_v18 = vsel %vm10098_vm8, 4294967295, %v13183_v18 }
  0x8a   : > { %v2016_v49 = vor.u32 %v2015_v35, %v2011_v30  ;;  %v2175_v60 = vshll.u32 %v9479_v31, 16  ;;  %v9483_v35 = vld [vmem:[%s9865_s18 + $0x18] sm:$0xff]  }
  0x8b   : > { %v573_v48 = vld [vmem:[#allocation3 + $0x18] sm:$0x80]  ;;  %v567_v52 = vld [vmem:[#allocation3 + $0x8] sm:$0x80]  ;;  %v543_v53 = vpop.permute.xlu0 %542  ;;  %v687_v58 = vpop.permute.xlu1 %686 }
  0x8c   : > { %v574_v51 = vsel %vm9992_vm14, 0, %v573_v48  ;;  %v568_v57 = vsel %vm9992_vm14, 0, %v567_v52  ;;  %559 = vst.msk [vmem:[#allocation3 + $0x28] sm:$0xff] %vm13108_vm4, %v543_v53  ;;  %v2163_v48 = vor.u32 %v2161_v29, %v2160_v28  ;;  %v10111_v29 = vld [vmem:[%s9865_s18 + $0x20] sm:$0xff]  }
  0x8d   : > { %575 = vst [vmem:[#allocation3 + $0x18] sm:$0x80] %v574_v51  ;;  %569 = vst [vmem:[#allocation3 + $0x8] sm:$0x80] %v568_v57  ;;  %1888 = vrot.lane.b32.xlu1 %v9466_v39, %s9708_s22  ;;  %1886 = vrot.lane.b32.xlu0 %v9467_v40, %s9708_s22  ;;  %v2172_v51 = vshrl.u32 %v9479_v31, 16  ;;  %v10117_v31 = vld [vmem:[%s9865_s18 + $0x28] sm:$0xff]  }
  0x8f   : > { %v576_v63 = vld [vmem:[#allocation3 + $0x20] sm:$0x80]  ;;  %v570_v4 = vld [vmem:[#allocation3 + $0x10] sm:$0x80]  ;;  %v691_v7 = vpop.permute.xlu1 %690  ;;  %v689_v8 = vpop.permute.xlu0 %688 }
  0x90   : > { %v577_v3 = vsel %vm9992_vm14, 0, %v576_v63  ;;  %v571_v6 = vsel %vm9992_vm14, 0, %v570_v4  ;;  %v2170_v63 = vor.u32 %v2168_v45, %v2167_v50  ;;  %v2186_v45 = vshrl.u32 %v10111_v29, 16  ;;  %v10136_v50 = vld [vmem:[%s9865_s18] sm:$0xff]  }
  0x91   : > { %578 = vst [vmem:[#allocation3 + $0x20] sm:$0x80] %v577_v3  ;;  %572 = vst [vmem:[#allocation3 + $0x10] sm:$0x80] %v571_v6  ;;  %2033 = vrot.lane.b32.xlu1 %v1995_v1, %s9710_s24  ;;  %2031 = vrot.lane.b32.xlu0 %v1988_v2, %s9710_s24  ;;  %v2174_v1 = vrot.slane %v2172_v51, 7  ;;  %v2179_v2 = vshrl.u32 %v9482_v46, 16 }
  0x92   : > { %v866_v3 = vshll.u32 %v10064_v42, 16  ;;  %v446_v46 = vshrl.u32 %v9519_v36, 16  ;;  %v13185_v51 = vmov 0 }
  0x93   : > { %v579_v20 = vld [vmem:[#allocation3 + $0x28] sm:$0x80]  ;;  %v695_v25 = vpop.permute.xlu1 %694  ;;  %v693_v26 = vpop.permute.xlu0 %692  ;;  %v2177_v16 = vor.u32 %v2175_v60, %v2174_v1  ;;  %v2181_v17 = vrot.slane %v2179_v2, 7  ;;  %v13186_v51 = vsel %vm10140_vm3, 4294967295, %v13185_v51  ;;  %v10157_v1 = vld [vmem:[%s9865_s18 + $0x10] sm:$0xff]  }
  0x94   : > { %v716_v21 = vld [vmem:[#allocation3 + $0x18] sm:$0xff]  ;;  %v710_v22 = vld [vmem:[#allocation3 + $0x8] sm:$0xff]  ;;  %v580_v23 = vsel %vm9992_vm14, 0, %v579_v20 }
  0x95   : > { %v717_v24 = vsel %vm10035_vm15, %v691_v7, %v716_v21  ;;  %v711_v27 = vsel %vm10035_vm15, %v687_v58, %v710_v22  ;;  %581 = vst [vmem:[#allocation3 + $0x28] sm:$0x80] %v580_v23  ;;  %698 = vrot.lane.b32.xlu1 %v685_v12, %s9700_s12  ;;  %2035 = vrot.lane.b32.xlu0 %v2002_v15, %s9710_s24  ;;  %v9480_v7 = vld [vmem:[%s9865_s18 + $0x8] sm:$0xff]   ;;  %v1772_v23 = vshrl.u32 %v10090_v14, 16 }
  0x96   : > { %718 = vst [vmem:[#allocation3 + $0x18] sm:$0xff] %v717_v24  ;;  %712 = vst [vmem:[#allocation3 + $0x8] sm:$0xff] %v711_v27  ;;  %v2184_v28 = vor.u32 %v2182_v9, %v2181_v17  ;;  %v10176_v17 = vld [vmem:[%s9789_s10 + $0x38] sm:$0xff]  }
  0x97   : > { %v10059_v40 = vpop.permute.xlu1 %977  ;;  %v10061_v41 = vpop.permute.xlu0 %871 }
  0x98   : > { %v719_v37 = vld [vmem:[#allocation3 + $0x20] sm:$0xff]  ;;  %v713_v38 = vld [vmem:[#allocation3 + $0x10] sm:$0xff] }
  0x99   : > { %v720_v39 = vsel %vm10035_vm15, %v693_v26, %v719_v37  ;;  %v714_v44 = vsel %vm10035_vm15, %v689_v8, %v713_v38  ;;  %2037 = vrot.lane.b32.xlu1 %v2009_v32, %s9710_s24  ;;  %1624 = vrot.lane.b32.xlu0 %v1604_v33, %s13124_s21  ;;  %v865_v8 = vrot.slane %v863_v56, 7  ;;  %v9484_v38 = vld [vmem:[%s9865_s18 + $0x10] sm:$0xff]  }
  0x9a   : > { %721 = vst [vmem:[#allocation3 + $0x20] sm:$0xff] %v720_v39  ;;  %715 = vst [vmem:[#allocation3 + $0x10] sm:$0xff] %v714_v44  ;;  %v1774_v39 = vrot.slane %v1772_v23, 7  ;;  %v2435_v23 = vshrl.u32 %v10136_v50, 16 }
  0x9b   : > { %v876_v54 = vpop.permute.xlu1 %875  ;;  %v10071_v55 = vpop.permute.xlu0 %873  ;;  %v868_v27 = vor.u32 %v866_v3, %v865_v8 }
  0x9c   : > { %v722_v53 = vld [vmem:[#allocation3 + $0x28] sm:$0xff] }
  0x9d   : > { %v742_v52 = vld [vmem:[#allocation3 + $0x18] sm:$0x1]  ;;  %v736_v57 = vld [vmem:[#allocation3 + $0x8] sm:$0x1]  ;;  %v723_v59 = vsel %vm10035_vm15, %v695_v25, %v722_v53  ;;  %2213 = vrot.lane.b32.xlu1 %v2163_v48, %s9711_s25  ;;  %2039 = vrot.lane.b32.xlu0 %v2016_v49, %s9710_s24  ;;  %v449_v48 = vshll.u32 %v9519_v36, 16  ;;  %v2193_v49 = vshrl.u32 %v10117_v31, 16 }
  0x9e   : > { %v743_v58 = vsel %vm9947_vm9, 0, %v742_v52  ;;  %v737_v61 = vsel %vm9947_vm9, 0, %v736_v57  ;;  %724 = vst [vmem:[#allocation3 + $0x28] sm:$0xff] %v723_v59  ;;  %v9486_v57 = vld [vmem:[%s9789_s10 + $0x38] sm:$0xff]   ;;  %v2449_v36 = vshrl.u32 %v10157_v1, 16 }
  0x9f   : > { %744 = vst [vmem:[#allocation3 + $0x18] sm:$0x1] %v743_v58  ;;  %738 = vst [vmem:[#allocation3 + $0x8] sm:$0x1] %v737_v61  ;;  %v982_v5 = vpop.permute.xlu1 %981  ;;  %v10084_v6 = vpop.permute.xlu0 %979  ;;  %v2189_v58 = vshll.u32 %v10111_v29, 16  ;;  %v480_v59 = vld [vmem:[#allocation3 + $0x38] sm:$0xff] }
  0xa0   : > { %v9489_v29 = vld [vmem:[%s9865_s18 + $0x20] sm:$0xff]  }
  0xa1   : > { %v745_v4 = vld [vmem:[#allocation3 + $0x20] sm:$0x1]  ;;  %v739_v12 = vld [vmem:[#allocation3 + $0x10] sm:$0x1]  ;;  %2319 = vrot.lane.b32.xlu1 %v9476_v62, %s9712_s26  ;;  %2215 = vrot.lane.b32.xlu0 %v2170_v63, %s9711_s25  ;;  %v2188_v62 = vrot.slane %v2186_v45, 7  ;;  %v2196_v63 = vshll.u32 %v10117_v31, 16 }
  0xa2   : > { %v746_v13 = vsel %vm9947_vm9, 0, %v745_v4  ;;  %v740_v15 = vsel %vm9947_vm9, 0, %v739_v12  ;;  %v10186_v31 = vld [vmem:[%s9865_s18 + $0x18] sm:$0xff]   ;;  %v10207_v45 = vld [vmem:[%s9865_s18 + $0x20] sm:$0xff]  }
  0xa3   : > { %747 = vst [vmem:[#allocation3 + $0x20] sm:$0x1] %v746_v13  ;;  %741 = vst [vmem:[#allocation3 + $0x10] sm:$0x1] %v740_v15  ;;  %v545_v19 = vpop.permute.xlu1 %544  ;;  %v878_v20 = vpop.permute.xlu0 %877  ;;  %v9487_v13 = vld [vmem:[%s9865_s18 + $0x28] sm:$0xff]  }
  0xa4   : > { %560 = vst.msk [vmem:[#allocation3 + $0x30] sm:$0xff] %vm13108_vm4, %v545_v19  ;;  %v895_v19 = vld [vmem:[#allocation3] sm:$0xff]  ;;  %vm10196_vm4 = vmand %vm1170_vm5, %vm13116_vm13 }
  0xa5   : > { %v748_v21 = vld [vmem:[#allocation3 + $0x28] sm:$0x1]  ;;  %2217 = vrot.lane.b32.xlu1 %v2177_v16, %s9711_s25  ;;  %2321 = vrot.lane.b32.xlu0 %v9480_v7, %s9712_s26  ;;  %vm10247_vm5 = vmand %vm1196_vm0, %vm13110_vm1  ;;  %vm13111_vm0 = vcmask 425344   ;;  %vm13117_vm1 = vcmask 490944  }
  0xa6   : > { %v904_v22 = vld [vmem:[#allocation3 + $0x18] sm:$0xff]  ;;  %v749_v24 = vsel %vm9947_vm9, 0, %v748_v21  ;;  %v898_v25 = vld [vmem:[#allocation3 + $0x8] sm:$0xff]  ;;  %v2451_v21 = vshll.u32 %v10157_v1, 16  ;;  %vm10288_vm10 = vmand %vm13111_vm0, %vm13112_vm6  ;;  %vm1474_vm0 = vcmask 556551  }
  0xa7   : > { %v905_v26 = vsel %vm10098_vm8, %v876_v54, %v904_v22  ;;  %750 = vst [vmem:[#allocation3 + $0x28] sm:$0x1] %v749_v24  ;;  %v899_v30 = vsel %vm10098_vm8, %v10061_v41, %v898_v25  ;;  %v984_v32 = vpop.permute.xlu1 %983  ;;  %v880_v33 = vpop.permute.xlu0 %879  ;;  %v1775_v41 = vshll.u32 %v10090_v14, 16  ;;  %v10168_v14 = vld [vmem:[%s9865_s18 + $0x8] sm:$0xff]   ;;  %vm10333_vm6 = vmand %vm1474_vm0, %vm13114_vm12  ;;  %vm13115_vm0 = vcmask 556544  }
  0xa8   : > { %906 = vst [vmem:[#allocation3 + $0x18] sm:$0xff] %v905_v26  ;;  %900 = vst [vmem:[#allocation3 + $0x8] sm:$0xff] %v899_v30  ;;  %vm1664_vm12 = vcmask 57376  }
  0xa9   : > { %1003 = vst.msk [vmem:[#allocation3 + $0x18] sm:$0xff] %vm13113_vm11, %v982_v5  ;;  %1001 = vst.msk [vmem:[#allocation3 + $0x8] sm:$0xff] %vm13113_vm11, %v10059_v40  ;;  %883 = vrot.lane.b32.xlu1 %v868_v27, %s9702_s14  ;;  %2219 = vrot.lane.b32.xlu0 %v2184_v28, %s9711_s25  ;;  %v1777_v61 = vor.u32 %v1775_v41, %v1774_v39  ;;  %v2195_v5 = vrot.slane %v2193_v49, 7  ;;  %v2453_v41 = vrot.slane %v2451_v21, 1  ;;  %v13189_v21 = vmov 0 }
  0xaa   : > { %v907_v37 = vld [vmem:[#allocation3 + $0x20] sm:$0xff]  ;;  %v901_v42 = vld [vmem:[#allocation3 + $0x10] sm:$0xff]  ;;  %v13190_v21 = vsel %vm10247_vm5, 4294967295, %v13189_v21 }
  0xab   : > { %v908_v44 = vsel %vm10098_vm8, %v878_v20, %v907_v37  ;;  %v902_v40 = vsel %vm10098_vm8, %v10071_v55, %v901_v42  ;;  %v582_v52 = vld [vmem:[#allocation3 + $0x30] sm:$0x80]  ;;  %v10145_v53 = vpop.permute.xlu1 %1148  ;;  %v986_v54 = vpop.permute.xlu0 %985  ;;  %v448_v55 = vrot.slane %v446_v46, 7  ;;  %v2191_v20 = vor.u32 %v2189_v58, %v2188_v62 }
  0xac   : > { %909 = vst [vmem:[#allocation3 + $0x20] sm:$0xff] %v908_v44  ;;  %903 = vst [vmem:[#allocation3 + $0x10] sm:$0xff] %v902_v40  ;;  %v583_v56 = vsel %vm9992_vm14, 0, %v582_v52  ;;  %v2198_v30 = vor.u32 %v2196_v63, %v2195_v5  ;;  %v2442_v37 = vshrl.u32 %v10168_v14, 16  ;;  %v2444_v42 = vshll.u32 %v10168_v14, 16 }
  0xad   : > { %1004 = vst.msk [vmem:[#allocation3 + $0x20] sm:$0xff] %vm13113_vm11, %v984_v32  ;;  %1002 = vst.msk [vmem:[#allocation3 + $0x10] sm:$0xff] %vm13113_vm11, %v10084_v6  ;;  %2325 = vrot.lane.b32.xlu1 %v9483_v35, %s9712_s26  ;;  %2323 = vrot.lane.b32.xlu0 %v9484_v38, %s9712_s26  ;;  %v451_v2 = vor.u32 %v449_v48, %v448_v55  ;;  %v2437_v6 = vshll.u32 %v10136_v50, 16  ;;  %v13187_v38 = vmov 0  ;;  %v1142_v44 = vshll.u32 %v10176_v17, 16 }
  0xae   : > { %584 = vst [vmem:[#allocation3 + $0x30] sm:$0x80] %v583_v56  ;;  %v910_v60 = vld [vmem:[#allocation3 + $0x28] sm:$0xff]  ;;  %v13188_v38 = vsel %vm10196_vm4, 4294967295, %v13187_v38  ;;  %v1140_v50 = vshrl.u32 %v10176_v17, 16  ;;  %v2458_v52 = vshll.u32 %v10186_v31, 16 }
  0xaf   : > { %v911_v4 = vsel %vm10098_vm8, %v880_v33, %v910_v60  ;;  %v1153_v9 = vpop.permute.xlu1 %1152  ;;  %v10164_v12 = vpop.permute.xlu0 %1150  ;;  %v481_v15 = vsel %vm9907_vm7, %v451_v2, %v480_v59  ;;  %v2439_v24 = vrot.slane %v2437_v6, 1  ;;  %v9492_v60 = vld [vmem:[%s9865_s18 + $0x28] sm:$0xff]   ;;  %v2456_v62 = vshrl.u32 %v10186_v31, 16 }
  0xb0   : > { %v1019_v3 = vld [vmem:[#allocation3 + $0x18] sm:$0x80]  ;;  %v1013_v7 = vld [vmem:[#allocation3 + $0x8] sm:$0x80]  ;;  %912 = vst [vmem:[#allocation3 + $0x28] sm:$0xff] %v911_v4  ;;  %482 = vst [vmem:[#allocation3 + $0x38] sm:$0xff] %v481_v15 }
  0xb1   : > { %v1020_v8 = vsel %vm10140_vm3, 0, %v1019_v3  ;;  %v1014_v16 = vsel %vm10140_vm3, 0, %v1013_v7  ;;  %1005 = vst.msk [vmem:[#allocation3 + $0x28] sm:$0xff] %vm13113_vm11, %v986_v54  ;;  %1795 = vrot.lane.b32.xlu1 %v1777_v61, %s9709_s23  ;;  %989 = vrot.lane.b32.xlu0 %v9486_v57, %s9701_s13  ;;  %v10212_v54 = vld [vmem:[%s9865_s18 + $0x28] sm:$0xff]   ;;  %v2440_v58 = vor.u32 %v2439_v24, %v2435_v23  ;;  %v2446_v61 = vrot.slane %v2444_v42, 1 }
  0xb2   : > { %1021 = vst [vmem:[#allocation3 + $0x18] sm:$0x80] %v1020_v8  ;;  %1015 = vst [vmem:[#allocation3 + $0x8] sm:$0x80] %v1014_v16  ;;  %v2465_v63 = vshll.u32 %v10207_v45, 16  ;;  %v1144_v1 = vrot.slane %v1142_v44, 1 }
  0xb3   : > { %v870_v27 = vpop.permute.xlu1 %869  ;;  %v697_v28 = vpop.permute.xlu0 %696  ;;  %v10228_v2 = vld [vmem:[%s9865_s18 + $0x8] sm:$0xff]   ;;  %v2460_v5 = vrot.slane %v2458_v52, 1  ;;  %v2463_v6 = vshrl.u32 %v10207_v45, 16  ;;  %v2020_v14 = vshll.u32 %v10212_v54, 16  ;;  %v2447_v17 = vor.u32 %v2446_v61, %v2442_v37  ;;  %v10268_v37 = vld [vmem:[%s9865_s18 + $0x10] sm:$0xff]  }
  0xb4   : > { %v1022_v22 = vld [vmem:[#allocation3 + $0x20] sm:$0x80]  ;;  %v1016_v25 = vld [vmem:[#allocation3 + $0x10] sm:$0x80]  ;;  %v896_v33 = vsel %vm10098_vm8, %v870_v27, %v895_v19  ;;  %v10234_v7 = vld [vmem:[%s9865_s18 + $0x28] sm:$0xff]   ;;  %v2467_v19 = vrot.slane %v2465_v63, 1 }
  0xb5   : > { %v1023_v26 = vsel %vm10140_vm3, 0, %v1022_v22  ;;  %v1017_v32 = vsel %vm10140_vm3, 0, %v1016_v25  ;;  %v725_v35 = vld [vmem:[#allocation3 + $0x30] sm:$0xff]  ;;  %897 = vst [vmem:[#allocation3] sm:$0xff] %v896_v33  ;;  %1890 = vrot.lane.b32.xlu1 %v9487_v13, %s9708_s22  ;;  %2221 = vrot.lane.b32.xlu0 %v2191_v20, %s9711_s25  ;;  %v2454_v13 = vor.u32 %v2453_v41, %v2449_v36  ;;  %v2018_v20 = vshrl.u32 %v10212_v54, 16 }
  0xb6   : > { %1024 = vst [vmem:[#allocation3 + $0x20] sm:$0x80] %v1023_v26  ;;  %1018 = vst [vmem:[#allocation3 + $0x10] sm:$0x80] %v1017_v32  ;;  %v726_v39 = vsel %vm10035_vm15, %v697_v28, %v725_v35  ;;  %v2624_v22 = vshrl.u32 %v10228_v2, 16  ;;  %v1145_v35 = vor.u32 %v1144_v1, %v1140_v50  ;;  %v2461_v36 = vor.u32 %v2460_v5, %v2456_v62 }
  0xb7   : > { %727 = vst [vmem:[#allocation3 + $0x30] sm:$0xff] %v726_v39  ;;  %v976_v40 = vpop.permute.xlu1 %975  ;;  %v1155_v49 = vpop.permute.xlu0 %1154  ;;  %v2627_v41 = vshll.u32 %v10228_v2, 16  ;;  %v2468_v54 = vor.u32 %v2467_v19, %v2463_v6  ;;  %v2634_v63 = vshll.u32 %v10268_v37, 16  ;;  %v10297_v2 = vld [vmem:[%s9789_s10 + $0x40] sm:$0xff]   ;;  %vm1910_vm7 = vcmask 195751  }
  0xb8   : > { %v1025_v46 = vld [vmem:[#allocation3 + $0x28] sm:$0x80]  ;;  %1000 = vst.msk [vmem:[#allocation3] sm:$0xff] %vm13113_vm11, %v976_v40 }
  0xb9   : > { %v1181_v48 = vld [vmem:[#allocation3 + $0x18] sm:$0xff]  ;;  %v1175_v55 = vld [vmem:[#allocation3 + $0x8] sm:$0xff]  ;;  %v1026_v56 = vsel %vm10140_vm3, 0, %v1025_v46  ;;  %2327 = vrot.lane.b32.xlu1 %v9489_v29, %s9712_s26  ;;  %2223 = vrot.lane.b32.xlu0 %v2198_v30, %s9711_s25  ;;  %v2022_v29 = vrot.slane %v2020_v14, 1  ;;  %v2472_v30 = vshll.u32 %v10234_v7, 16  ;;  %v2626_v46 = vrot.slane %v2624_v22, 7 }
  0xba   : > { %v1182_v57 = vsel %vm10196_vm4, %v1153_v9, %v1181_v48  ;;  %v1176_v59 = vsel %vm10196_vm4, %v10145_v53, %v1175_v55  ;;  %1027 = vst [vmem:[#allocation3 + $0x28] sm:$0x80] %v1026_v56  ;;  %v2470_v48 = vshrl.u32 %v10234_v7, 16  ;;  %v2631_v56 = vshrl.u32 %v10268_v37, 16  ;;  %v9509_v37 = vld [vmem:[%s9865_s18 + $0x30] sm:$0xff]  }
  0xbb   : > { %1183 = vst [vmem:[#allocation3 + $0x18] sm:$0xff] %v1182_v57  ;;  %1177 = vst [vmem:[#allocation3 + $0x8] sm:$0xff] %v1176_v59  ;;  %v10230_v4 = vpop.permute.xlu1 %1337  ;;  %v1157_v53 = vpop.permute.xlu0 %1156  ;;  %v2474_v40 = vrot.slane %v2472_v30, 1  ;;  %v2023_v55 = vor.u32 %v2022_v29, %v2018_v20  ;;  %v13191_v59 = vmov 0  ;;  %v2629_v6 = vor.u32 %v2627_v41, %v2626_v46 }
  0xbc   : > { %v13192_v59 = vsel %vm10288_vm10, 4294967295, %v13191_v59 }
  0xbd   : > { %v1184_v3 = vld [vmem:[#allocation3 + $0x20] sm:$0xff]  ;;  %v1178_v8 = vld [vmem:[#allocation3 + $0x10] sm:$0xff]  ;;  %2490 = vrot.lane.b32.xlu1 %v2440_v58, %s9713_s29  ;;  %2329 = vrot.lane.b32.xlu0 %v9492_v60, %s9712_s26  ;;  %v2475_v7 = vor.u32 %v2474_v40, %v2470_v48 }
  0xbe   : > { %v1185_v9 = vsel %vm10196_vm4, %v1155_v49, %v1184_v3  ;;  %v1179_v15 = vsel %vm10196_vm4, %v10164_v12, %v1178_v8  ;;  %v751_v16 = vld [vmem:[#allocation3 + $0x30] sm:$0x1]  ;;  %v10277_v49 = vld [vmem:[%s9865_s18 + $0x18] sm:$0xff]   ;;  %v10300_v3 = vld [vmem:[%s9865_s18 + $0x20] sm:$0xff]   ;;  %v2633_v8 = vrot.slane %v2631_v56, 7 }
  0xbf   : > { %1186 = vst [vmem:[#allocation3 + $0x20] sm:$0xff] %v1185_v9  ;;  %1180 = vst [vmem:[#allocation3 + $0x10] sm:$0xff] %v1179_v15  ;;  %v752_v12 = vsel %vm9947_vm9, 0, %v751_v16  ;;  %v1010_v23 = vld [vmem:[#allocation3] sm:$0x80]  ;;  %v10254_v24 = vpop.permute.xlu1 %1339  ;;  %v10256_v25 = vpop.permute.xlu0 %1443  ;;  %v2638_v1 = vshrl.u32 %v10277_v49, 16 }
  0xc0   : > { %753 = vst [vmem:[#allocation3 + $0x30] sm:$0x1] %v752_v12  ;;  %v1011_v27 = vsel %vm10140_vm3, 0, %v1010_v23  ;;  %v9501_v12 = vld [vmem:[%s9865_s18 + $0x8] sm:$0xff]   ;;  %v2641_v22 = vshll.u32 %v10277_v49, 16 }
  0xc1   : > { %v1187_v28 = vld [vmem:[#allocation3 + $0x28] sm:$0xff]  ;;  %1012 = vst [vmem:[#allocation3] sm:$0x80] %v1011_v27  ;;  %2494 = vrot.lane.b32.xlu1 %v2454_v13, %s9713_s29  ;;  %2492 = vrot.lane.b32.xlu0 %v2447_v17, %s9713_s29  ;;  %v1329_v27 = vshrl.u32 %v10297_v2, 16 }
  0xc2   : > { %v1207_v26 = vld [vmem:[#allocation3 + $0x18] sm:$0x1]  ;;  %v1201_v31 = vld [vmem:[#allocation3 + $0x8] sm:$0x1]  ;;  %v1188_v33 = vsel %vm10196_vm4, %v1157_v53, %v1187_v28  ;;  %v2645_v28 = vshrl.u32 %v10300_v3, 16 }
  0xc3   : > { %v1208_v32 = vsel %vm10247_vm5, 0, %v1207_v26  ;;  %v1202_v39 = vsel %vm10247_vm5, 0, %v1201_v31  ;;  %1189 = vst [vmem:[#allocation3 + $0x28] sm:$0xff] %v1188_v33  ;;  %v10273_v42 = vpop.permute.xlu1 %1445  ;;  %v1342_v44 = vpop.permute.xlu0 %1341  ;;  %v2640_v26 = vrot.slane %v2638_v1, 7  ;;  %v9504_v33 = vld [vmem:[%s9865_s18 + $0x10] sm:$0xff]   ;;  %v1331_v41 = vrot.slane %v1329_v27, 7 }
  0xc4   : > { %1209 = vst [vmem:[#allocation3 + $0x18] sm:$0x1] %v1208_v32  ;;  %1203 = vst [vmem:[#allocation3 + $0x8] sm:$0x1] %v1202_v39  ;;  %v9507_v1 = vld [vmem:[%s9865_s18 + $0x20] sm:$0xff]   ;;  %v13198_v27 = vmov 0 }
  0xc5   : > { %1160 = vrot.lane.b32.xlu1 %v1145_v35, %s9703_s15  ;;  %2496 = vrot.lane.b32.xlu0 %v2461_v36, %s9713_s29  ;;  %v1332_v35 = vshll.u32 %v10297_v2, 16  ;;  %v2648_v36 = vshll.u32 %v10300_v3, 16 }
  0xc6   : > { %v1210_v45 = vld [vmem:[#allocation3 + $0x20] sm:$0x1]  ;;  %v1204_v50 = vld [vmem:[#allocation3 + $0x10] sm:$0x1] }
  0xc7   : > { %v1211_v52 = vsel %vm10247_vm5, 0, %v1210_v45  ;;  %v1205_v57 = vsel %vm10247_vm5, 0, %v1204_v50  ;;  %v913_v58 = vld [vmem:[#allocation3 + $0x30] sm:$0xff]  ;;  %v882_v60 = vpop.permute.xlu1 %881  ;;  %v1448_v61 = vpop.permute.xlu0 %1447 }
  0xc8   : > { %1212 = vst [vmem:[#allocation3 + $0x20] sm:$0x1] %v1211_v52  ;;  %1206 = vst [vmem:[#allocation3 + $0x10] sm:$0x1] %v1205_v57  ;;  %v914_v62 = vsel %vm10098_vm8, %v882_v60, %v913_v58  ;;  %v1172_v17 = vld [vmem:[#allocation3] sm:$0xff]  ;;  %v1334_v57 = vor.u32 %v1332_v35, %v1331_v41  ;;  %v9512_v60 = vld [vmem:[%s9865_s18 + $0x28] sm:$0xff]  }
  0xc9   : > { %915 = vst [vmem:[#allocation3 + $0x30] sm:$0xff] %v914_v62  ;;  %2498 = vrot.lane.b32.xlu1 %v2468_v54, %s9713_s29  ;;  %2041 = vrot.lane.b32.xlu0 %v2023_v55, %s9710_s24  ;;  %v2200_v54 = vshrl.u32 %v9509_v37, 16 }
  0xca   : > { %v1213_v53 = vld [vmem:[#allocation3 + $0x28] sm:$0x1] }
  0xcb   : > { %v1370_v5 = vld [vmem:[#allocation3 + $0x18] sm:$0xff]  ;;  %v1364_v9 = vld [vmem:[#allocation3 + $0x8] sm:$0xff]  ;;  %v1214_v13 = vsel %vm10247_vm5, 0, %v1213_v53  ;;  %v1344_v16 = vpop.permute.xlu1 %1343  ;;  %v1147_v19 = vpop.permute.xlu0 %1146 }
  0xcc   : > { %v1371_v14 = vsel %vm10288_vm10, %v1342_v44, %v1370_v5  ;;  %v1365_v15 = vsel %vm10288_vm10, %v10230_v4, %v1364_v9  ;;  %1215 = vst [vmem:[#allocation3 + $0x28] sm:$0x1] %v1214_v13  ;;  %v1173_v20 = vsel %vm10196_vm4, %v1147_v19, %v1172_v17  ;;  %v2636_v4 = vor.u32 %v2634_v63, %v2633_v8  ;;  %v9508_v53 = vld [vmem:[%s9865_s18 + $0x18] sm:$0xff]   ;;  %v10363_v9 = vld [vmem:[%s9865_s18 + $0x30] sm:$0xff]   ;;  %v9510_v17 = vld [vmem:[%s9789_s10 + $0x40] sm:$0xff]  }
  0xcd   : > { %1372 = vst [vmem:[#allocation3 + $0x18] sm:$0xff] %v1371_v14  ;;  %1366 = vst [vmem:[#allocation3 + $0x8] sm:$0xff] %v1365_v15  ;;  %2679 = vrot.lane.b32.xlu1 %v2629_v6, %s9714_s30  ;;  %2500 = vrot.lane.b32.xlu0 %v2475_v7, %s9713_s29  ;;  %v2647_v44 = vrot.slane %v2645_v28, 7  ;;  %v2202_v5 = vrot.slane %v2200_v54, 7  ;;  %v2203_v6 = vshll.u32 %v9509_v37, 16  ;;  %v2652_v8 = vshrl.u32 %v9512_v60, 16 }
  0xce   : > { %1469 = vst.msk [vmem:[#allocation3 + $0x18] sm:$0xff] %vm13117_vm1, %v1448_v61  ;;  %1467 = vst.msk [vmem:[#allocation3 + $0x8] sm:$0xff] %vm13117_vm1, %v10256_v25  ;;  %v13195_v13 = vmov 0  ;;  %v2655_v19 = vshll.u32 %v9512_v60, 16  ;;  %v9511_v37 = vld [vmem:[%s9865_s18 + $0x30] sm:$0xff]   ;;  %v10410_v54 = vld [vmem:[%s9789_s10 + $0x40] sm:$0xff]  }
  0xcf   : > { %v1373_v23 = vld [vmem:[#allocation3 + $0x20] sm:$0xff]  ;;  %1174 = vst [vmem:[#allocation3] sm:$0xff] %v1173_v20  ;;  %v1367_v29 = vld [vmem:[#allocation3 + $0x10] sm:$0xff]  ;;  %v1346_v31 = vpop.permute.xlu1 %1345  ;;  %v988_v32 = vpop.permute.xlu0 %987  ;;  %v2650_v58 = vor.u32 %v2648_v36, %v2647_v44  ;;  %v10373_v20 = vld [vmem:[%s9865_s18 + $0x8] sm:$0xff]   ;;  %v2662_v44 = vshll.u32 %v10363_v9, 16 }
  0xd0   : > { %v1374_v25 = vsel %vm10288_vm10, %v1344_v16, %v1373_v23  ;;  %v1368_v30 = vsel %vm10288_vm10, %v10254_v24, %v1367_v29  ;;  %1006 = vst.msk [vmem:[#allocation3 + $0x30] sm:$0xff] %vm13113_vm11, %v988_v32  ;;  %v2643_v24 = vor.u32 %v2641_v22, %v2640_v26  ;;  %vm10367_vm11 = vmand %vm13115_vm0, %vm13116_vm13  ;;  %vm13197_vm0 = vsmask.f32 256  ;;  %v10392_v32 = vld [vmem:[%s9865_s18 + $0x18] sm:$0xff]  }
  0xd1   : > { %1375 = vst [vmem:[#allocation3 + $0x20] sm:$0xff] %v1374_v25  ;;  %1369 = vst [vmem:[#allocation3 + $0x10] sm:$0xff] %v1368_v30  ;;  %2785 = vrot.lane.b32.xlu1 %v9501_v12, %s9715_s9  ;;  %2681 = vrot.lane.b32.xlu0 %v2636_v4, %s9714_s30  ;;  %v13196_v13 = vsel %vm10367_vm11, 4294967295, %v13195_v13  ;;  %v2205_v4 = vor.u32 %v2203_v6, %v2202_v5  ;;  %v2654_v25 = vrot.slane %v2652_v8, 7  ;;  %v2659_v30 = vshrl.u32 %v10363_v9, 16 }
  0xd2   : > { %1468 = vst.msk [vmem:[#allocation3 + $0x10] sm:$0xff] %vm13117_vm1, %v10273_v42  ;;  %vm10380_vm13 = vmand %vm1664_vm12, %vm13197_vm0  ;;  %v1608_v8 = vshll.u32 %v10410_v54, 16  ;;  %vm13200_vm0 = vsmask.f32 7938 }
  0xd3   : > { %v1376_v45 = vld [vmem:[#allocation3 + $0x28] sm:$0xff]  ;;  %v1452_v40 = vpop.permute.xlu1 %1451  ;;  %v1450_v49 = vpop.permute.xlu0 %1449  ;;  %v13199_v27 = vsel %vm10380_vm13, 4294967295, %v13198_v27 }
  0xd4   : > { %v1377_v48 = vsel %vm10288_vm10, %v1346_v31, %v1376_v45  ;;  %1470 = vst.msk [vmem:[#allocation3 + $0x20] sm:$0xff] %vm13117_vm1, %v1450_v49  ;;  %v2903_v45 = vshll.u32 %v10373_v20, 16  ;;  %v2657_v49 = vor.u32 %v2655_v19, %v2654_v25  ;;  %v2915_v19 = vshrl.u32 %v10392_v32, 16 }
  0xd5   : > { %v1485_v46 = vld [vmem:[#allocation3 + $0x18] sm:$0x80]  ;;  %v1479_v50 = vld [vmem:[#allocation3 + $0x8] sm:$0x80]  ;;  %1378 = vst [vmem:[#allocation3 + $0x28] sm:$0xff] %v1377_v48  ;;  %2683 = vrot.lane.b32.xlu1 %v2643_v24, %s9714_s30  ;;  %2787 = vrot.lane.b32.xlu0 %v9504_v33, %s9715_s9 }
  0xd6   : > { %v1486_v42 = vsel %vm10333_vm6, 0, %v1485_v46  ;;  %v1198_v52 = vld [vmem:[#allocation3] sm:$0x1]  ;;  %v1480_v55 = vsel %vm10333_vm6, 0, %v1479_v50  ;;  %1471 = vst.msk [vmem:[#allocation3 + $0x28] sm:$0xff] %vm13117_vm1, %v1452_v40  ;;  %v10400_v46 = vld [vmem:[%s9865_s18 + $0x10] sm:$0xff]  }
  0xd7   : > { %1487 = vst [vmem:[#allocation3 + $0x18] sm:$0x80] %v1486_v42  ;;  %v1199_v56 = vsel %vm10247_vm5, 0, %v1198_v52  ;;  %1481 = vst [vmem:[#allocation3 + $0x8] sm:$0x80] %v1480_v55  ;;  %v1617_v62 = vpop.permute.xlu1 %1616  ;;  %v1615_v63 = vpop.permute.xlu0 %1614  ;;  %v2661_v50 = vrot.slane %v2659_v30, 7 }
  0xd8   : > { %1200 = vst [vmem:[#allocation3] sm:$0x1] %v1199_v56  ;;  %v1028_v61 = vld [vmem:[#allocation3 + $0x30] sm:$0x80]  ;;  %v2901_v52 = vshrl.u32 %v10373_v20, 16  ;;  %v2905_v60 = vrot.slane %v2903_v45, 1 }
  0xd9   : > { %v1482_v2 = vld [vmem:[#allocation3 + $0x10] sm:$0x80]  ;;  %v1029_v3 = vsel %vm10140_vm3, 0, %v1028_v61  ;;  %1349 = vrot.lane.b32.xlu1 %v1334_v57, %s9704_s19  ;;  %2685 = vrot.lane.b32.xlu0 %v2650_v58, %s9714_s30  ;;  %v9513_v57 = vld [vmem:[%s9865_s18 + $0x28] sm:$0xff]   ;;  %v2917_v61 = vshll.u32 %v10392_v32, 16  ;;  %v1606_v30 = vshrl.u32 %v10410_v54, 16 }
  0xda   : > { %v1483_v7 = vsel %vm10333_vm6, 0, %v1482_v2  ;;  %1030 = vst [vmem:[#allocation3 + $0x30] sm:$0x80] %v1029_v3  ;;  %v2664_v3 = vor.u32 %v2662_v44, %v2661_v50  ;;  %v13202_v44 = vmov 0  ;;  %v10463_v50 = vld [vmem:[%s9865_s18 + $0x30] sm:$0xff]  }
  0xdb   : > { %1484 = vst [vmem:[#allocation3 + $0x10] sm:$0x80] %v1483_v7  ;;  %v1488_v14 = vld [vmem:[#allocation3 + $0x20] sm:$0x80]  ;;  %v1159_v15 = vpop.permute.xlu1 %1158  ;;  %v1619_v16 = vpop.permute.xlu0 %1618  ;;  %v2919_v20 = vrot.slane %v2917_v61, 1 }
  0xdc   : > { %v1489_v22 = vsel %vm10333_vm6, 0, %v1488_v14 }
  0xdd   : > { %v1491_v12 = vld [vmem:[#allocation3 + $0x28] sm:$0x80]  ;;  %1490 = vst [vmem:[#allocation3 + $0x20] sm:$0x80] %v1489_v22  ;;  %2791 = vrot.lane.b32.xlu1 %v9507_v1, %s9715_s9  ;;  %2789 = vrot.lane.b32.xlu0 %v9508_v53, %s9715_s9  ;;  %v2910_v53 = vshll.u32 %v10400_v46, 16 }
  0xde   : > { %v1647_v23 = vld [vmem:[#allocation3 + $0x18] sm:$0xff]  ;;  %v1492_v26 = vsel %vm10333_vm6, 0, %v1491_v12  ;;  %v1641_v28 = vld [vmem:[#allocation3 + $0x8] sm:$0xff]  ;;  %v2908_v12 = vshrl.u32 %v10400_v46, 16 }
  0xdf   : > { %v1648_v29 = vsel %vm10367_vm11, %v1619_v16, %v1647_v23  ;;  %1493 = vst [vmem:[#allocation3 + $0x28] sm:$0x80] %v1492_v26  ;;  %v1642_v31 = vsel %vm10367_vm11, %v1615_v63, %v1641_v28  ;;  %v1621_v33 = vpop.permute.xlu1 %1620  ;;  %v1361_v35 = vld [vmem:[#allocation3] sm:$0xff]  ;;  %v1336_v36 = vpop.permute.xlu0 %1335  ;;  %v9516_v16 = vld [vmem:[%s9865_s18 + $0x30] sm:$0xff]   ;;  %v2912_v26 = vrot.slane %v2910_v53, 1 }
  0xe0   : > { %1649 = vst [vmem:[#allocation3 + $0x18] sm:$0xff] %v1648_v29  ;;  %1643 = vst [vmem:[#allocation3 + $0x8] sm:$0xff] %v1642_v31  ;;  %v1362_v41 = vsel %vm10288_vm10, %v1336_v36, %v1361_v35  ;;  %v10416_v63 = vld [vmem:[%s9865_s18 + $0x20] sm:$0xff]   ;;  %v10442_v28 = vld [vmem:[%s9865_s18 + $0x30] sm:$0xff]   ;;  %v1610_v36 = vrot.slane %v1608_v8, 1 }
  0xe1   : > { %v1190_v24 = vld [vmem:[#allocation3 + $0x30] sm:$0xff]  ;;  %1363 = vst [vmem:[#allocation3] sm:$0xff] %v1362_v41  ;;  %2225 = vrot.lane.b32.xlu1 %v2205_v4, %s9711_s25  ;;  %1455 = vrot.lane.b32.xlu0 %v9510_v17, %s9705_s20  ;;  %v10434_v17 = vld [vmem:[%s9865_s18 + $0x28] sm:$0xff]   ;;  %v2924_v22 = vshll.u32 %v10416_v63, 16  ;;  %v2906_v4 = vor.u32 %v2905_v60, %v2901_v52 }
  0xe2   : > { %v1644_v48 = vld [vmem:[#allocation3 + $0x10] sm:$0xff]  ;;  %v1191_v40 = vsel %vm10196_vm4, %v1159_v15, %v1190_v24  ;;  %v2931_v24 = vshll.u32 %v10434_v17, 16  ;;  %v2929_v61 = vshrl.u32 %v10434_v17, 16 }
  0xe3   : > { %v1645_v42 = vsel %vm10367_vm11, %v1617_v62, %v1644_v48  ;;  %1192 = vst [vmem:[#allocation3 + $0x30] sm:$0xff] %v1191_v40  ;;  %v1623_v55 = vpop.permute.xlu1 %1622  ;;  %v1442_v56 = vpop.permute.xlu0 %1441  ;;  %v2926_v45 = vrot.slane %v2924_v22, 1  ;;  %v2920_v48 = vor.u32 %v2919_v20, %v2915_v19  ;;  %v2913_v40 = vor.u32 %v2912_v26, %v2908_v12 }
  0xe4   : > { %1646 = vst [vmem:[#allocation3 + $0x10] sm:$0xff] %v1645_v42  ;;  %v1650_v58 = vld [vmem:[#allocation3 + $0x20] sm:$0xff]  ;;  %1466 = vst.msk [vmem:[#allocation3] sm:$0xff] %vm13117_vm1, %v1442_v56  ;;  %vm13201_vm1 = vcmask 64544   ;;  %v2933_v53 = vrot.slane %v2931_v24, 1  ;;  %v2936_v12 = vshrl.u32 %v10463_v50, 16 }
  0xe5   : > { %v1651_v62 = vsel %vm10367_vm11, %v1621_v33, %v1650_v58  ;;  %2331 = vrot.lane.b32.xlu1 %v9511_v37, %s9712_s26  ;;  %2687 = vrot.lane.b32.xlu0 %v2657_v49, %s9714_s30  ;;  %v2922_v37 = vshrl.u32 %v10416_v63, 16  ;;  %vm10455_vm12 = vmand %vm13201_vm1, %vm13200_vm0  ;;  %v2479_v49 = vshll.u32 %v10442_v28, 16  ;;  %vm13204_vm1 = vcmask 130144  }
  0xe6   : > { %v1653_v2 = vld [vmem:[#allocation3 + $0x28] sm:$0xff]  ;;  %1652 = vst [vmem:[#allocation3 + $0x20] sm:$0xff] %v1651_v62  ;;  %v13203_v44 = vsel %vm10455_vm12, 4294967295, %v13202_v44  ;;  %v2477_v62 = vshrl.u32 %v10442_v28, 16  ;;  %vm13205_vm0 = vmmov %vm13204_vm1 }
  0xe7   : > { %v1672_v1 = vld [vmem:[#allocation3 + $0x18] sm:$0x1]  ;;  %v1666_v5 = vld [vmem:[#allocation3 + $0x8] sm:$0x1]  ;;  %v1654_v7 = vsel %vm10367_vm11, %v1623_v55, %v1653_v2  ;;  %v10430_v14 = vpop.permute.xlu1 %1880  ;;  %v1786_v15 = vpop.permute.xlu0 %1785  ;;  %v10476_v2 = vld [vmem:[%s9865_s18 + $0x30] sm:$0xff]  }
  0xe8   : > { %v1673_v6 = vsel %vm10380_vm13, 0, %v1672_v1  ;;  %v1667_v9 = vsel %vm10380_vm13, 0, %v1666_v5  ;;  %1655 = vst [vmem:[#allocation3 + $0x28] sm:$0xff] %v1654_v7  ;;  %v1611_v1 = vor.u32 %v1610_v36, %v1606_v30  ;;  %v2481_v5 = vrot.slane %v2479_v49, 1  ;;  %v9570_v36 = vld [vmem:[%s13098_s2] sm:$0xff]  }
  0xe9   : > { %1674 = vst [vmem:[#allocation3 + $0x18] sm:$0x1] %v1673_v6  ;;  %1668 = vst [vmem:[#allocation3 + $0x8] sm:$0x1] %v1667_v9  ;;  %2793 = vrot.lane.b32.xlu1 %v9513_v57, %s9715_s9  ;;  %2689 = vrot.lane.b32.xlu0 %v2664_v3, %s9714_s30  ;;  %v2927_v3 = vor.u32 %v2926_v45, %v2922_v37  ;;  %v2938_v6 = vshll.u32 %v10463_v50, 16  ;;  %v1779_v19 = vshrl.u32 %v10476_v2, 16 }
  0xea   : > { %v1216_v23 = vld [vmem:[#allocation3 + $0x30] sm:$0x1]  ;;  %v2482_v20 = vor.u32 %v2481_v5, %v2477_v62  ;;  %v1782_v30 = vshll.u32 %v10476_v2, 16  ;;  %v10514_v45 = vld [vmem:[%s9865_s18 + $0x38] sm:$0xff]   ;;  %9273 = vmatprep.subr.bf16.mxu0 %v9570_v36  ;;  %v9529_v2 = vld [vmem:[%s9789_s10 + $0x48] sm:$0xff]   ;;  %v13220_v5 = vmov 0 }
  0xeb   : > { %v1669_v29 = vld [vmem:[#allocation3 + $0x10] sm:$0x1]  ;;  %v1217_v25 = vsel %vm10247_vm5, 0, %v1216_v23  ;;  %v1476_v32 = vld [vmem:[#allocation3] sm:$0x80]  ;;  %v1790_v33 = vpop.permute.xlu1 %1789  ;;  %v1788_v35 = vpop.permute.xlu0 %1787  ;;  %v2940_v22 = vrot.slane %v2938_v6, 1  ;;  %9274 = vmatpush3.bf16.msra.mxu0 %v9570_v36 }
  0xec   : > { %v1670_v31 = vsel %vm10380_vm13, 0, %v1669_v29  ;;  %1218 = vst [vmem:[#allocation3 + $0x30] sm:$0x1] %v1217_v25  ;;  %v1477_v41 = vsel %vm10333_vm6, 0, %v1476_v32  ;;  %v13208_v23 = vmov 0  ;;  %v9524_v25 = vld [vmem:[%s9789_s10 + $0x38] sm:$0xff]  }
  0xed   : > { %1671 = vst [vmem:[#allocation3 + $0x10] sm:$0x1] %v1670_v31  ;;  %v1675_v46 = vld [vmem:[#allocation3 + $0x20] sm:$0x1]  ;;  %1478 = vst [vmem:[#allocation3] sm:$0x80] %v1477_v41  ;;  %2956 = vrot.lane.b32.xlu1 %v2906_v4, %s9716_s16  ;;  %2795 = vrot.lane.b32.xlu0 %v9516_v16, %s9715_s9  ;;  %v2941_v41 = vor.u32 %v2940_v22, %v2936_v12 }
  0xee   : > { %v1676_v42 = vsel %vm10380_vm13, 0, %v1675_v46  ;;  %v9528_v62 = vld [vmem:[%s9789_s10 + $0x50] sm:$0xff]  }
  0xef   : > { %v1678_v52 = vld [vmem:[#allocation3 + $0x28] sm:$0x1]  ;;  %1677 = vst [vmem:[#allocation3 + $0x20] sm:$0x1] %v1676_v42  ;;  %v1885_v58 = vpop.permute.xlu1 %1884  ;;  %v1883_v60 = vpop.permute.xlu0 %1882 }
  0xf0   : > { %v1814_v54 = vld [vmem:[#allocation3 + $0x18] sm:$0xff]  ;;  %v1679_v55 = vsel %vm10380_vm13, 0, %v1678_v52  ;;  %v1808_v56 = vld [vmem:[#allocation3 + $0x8] sm:$0xff] }
  0xf1   : > { %v1815_v57 = vsel %vm10455_vm12, %v1790_v33, %v1814_v54  ;;  %1680 = vst [vmem:[#allocation3 + $0x28] sm:$0x1] %v1679_v55  ;;  %v1809_v63 = vsel %vm10455_vm12, %v1786_v15, %v1808_v56  ;;  %2960 = vrot.lane.b32.xlu1 %v2920_v48, %s9716_s16  ;;  %2958 = vrot.lane.b32.xlu0 %v2913_v40, %s9716_s16  ;;  %v9573_v54 = vld [vmem:[%s13098_s2 + $0x8] sm:$0xff]  }
  0xf2   : > { %1816 = vst [vmem:[#allocation3 + $0x18] sm:$0xff] %v1815_v57  ;;  %1810 = vst [vmem:[#allocation3 + $0x8] sm:$0xff] %v1809_v63  ;;  %v9527_v57 = vld [vmem:[%s9789_s10 + $0x40] sm:$0xff]   ;;  %9275 = vmatprep.subr.bf16.mxu0 %v9573_v54 }
  0xf3   : > { %1903 = vst.msk [vmem:[#allocation3 + $0x18] sm:$0xff] %vm13204_vm1, %v1885_v58  ;;  %v1379_v7 = vld [vmem:[#allocation3 + $0x30] sm:$0xff]  ;;  %v1348_v9 = vpop.permute.xlu1 %1347  ;;  %v547_v15 = vpop.permute.xlu0 %546  ;;  %vm13206_vm1 = vcmask 97344   ;;  %v2666_v58 = vshrl.u32 %v10514_v45, 16  ;;  %9276 = vmatpush3.bf16.msra.mxu0 %v9573_v54 }
  0xf4   : > { %1901 = vst.msk [vmem:[#allocation3 + $0x8] sm:$0xff] %vm13205_vm0, %v10430_v14  ;;  %v1811_v8 = vld [vmem:[#allocation3 + $0x10] sm:$0xff]  ;;  %v1380_v17 = vsel %vm10288_vm10, %v1348_v9, %v1379_v7  ;;  %v2934_v14 = vor.u32 %v2933_v53, %v2929_v61  ;;  %vm13207_vm0 = vsmask.f32 7966  ;;  %vm1908_vm10 = vcmask 195744   ;;  %v1638_v28 = vld [vmem:[#allocation3] sm:$0xff] }
  0xf5   : > { %v1812_v16 = vsel %vm10455_vm12, %v1788_v35, %v1811_v8  ;;  %561 = vst.msk [vmem:[#allocation3 + $0x38] sm:$0xff] %vm13206_vm1, %v547_v15  ;;  %1381 = vst [vmem:[#allocation3 + $0x30] sm:$0xff] %v1380_v17  ;;  %1626 = vrot.lane.b32.xlu1 %v1611_v1, %s13124_s21  ;;  %2962 = vrot.lane.b32.xlu0 %v2927_v3, %s9716_s16  ;;  %vm13210_vm1 = vcmask 130144   ;;  %v1781_v35 = vrot.slane %v1779_v19, 7  ;;  %v13215_v61 = vmov 0  ;;  %v10547_v3 = vld [vmem:[%s9789_s10 + $0x38] sm:$0xff]  }
  0xf6   : > { %1813 = vst [vmem:[#allocation3 + $0x10] sm:$0xff] %v1812_v16  ;;  %vm10495_vm2 = vmand %vm1910_vm7, %vm13207_vm0  ;;  %v1817_v4 = vld [vmem:[#allocation3 + $0x20] sm:$0xff]  ;;  %vm13211_vm7 = vcmask 64544   ;;  %v9576_v53 = vld [vmem:[%s13098_s2 + $0x10] sm:$0xff]   ;;  %v2668_v6 = vrot.slane %v2666_v58, 7  ;;  %v2669_v7 = vshll.u32 %v10514_v45, 16 }
  0xf7   : > { %v13209_v23 = vsel %vm10495_vm2, 4294967295, %v13208_v23  ;;  %1902 = vst.msk [vmem:[#allocation3 + $0x10] sm:$0xff] %vm13210_vm1, %v1883_v60  ;;  %v1792_v26 = vpop.permute.xlu1 %1791  ;;  %v1613_v29 = vpop.permute.xlu0 %1612  ;;  %vm13212_vm0 = vmmov %vm13210_vm1  ;;  %vm13213_vm1 = vcmask 490944   ;;  %v1784_v56 = vor.u32 %v1782_v30, %v1781_v35  ;;  %v10563_v8 = vld [vmem:[%s9789_s10 + $0x48] sm:$0xff]   ;;  %9277 = vmatprep.subr.bf16.mxu0 %v9576_v53  ;;  %v3594_v30 = vshll.u32 %v10547_v3, 16  ;;  %s13265_s21 = smov 64  }
  0xf8   : > { %v1818_v32 = vsel %vm10455_vm12, %v1792_v26, %v1817_v4  ;;  %v1639_v33 = vsel %vm10367_vm11, %v1613_v29, %v1638_v28  ;;  %v1820_v49 = vld [vmem:[#allocation3 + $0x28] sm:$0xff]  ;;  %9278 = vmatpush3.bf16.msra.mxu0 %v9576_v53  ;;  %v10576_v26 = vld [vmem:[%s9865_s18 + $0x30] sm:$0xff]   ;;  %v9579_v28 = vld [vmem:[%s13098_s2 + $0x18] sm:$0xff]   ;;  %v3592_v54 = vshrl.u32 %v10547_v3, 16 }
  0xf9   : > { %1819 = vst [vmem:[#allocation3 + $0x20] sm:$0xff] %v1818_v32  ;;  %1640 = vst [vmem:[#allocation3] sm:$0xff] %v1639_v33  ;;  %2964 = vrot.lane.b32.xlu1 %v2934_v14, %s9716_s16  ;;  %2502 = vrot.lane.b32.xlu0 %v2482_v20, %s9713_s29  ;;  %v9531_v14 = vld [vmem:[%s9865_s18 + $0x30] sm:$0xff]   ;;  %v10567_v20 = vld [vmem:[%s9789_s10 + $0x40] sm:$0xff]   ;;  %v3608_v33 = vshll.u32 %v10563_v8, 16 }
  0xfa   : > { %v1918_v31 = vld [vmem:[#allocation3 + $0x18] sm:$0x80]  ;;  %1663 = vst.msk [vmem:[#allocation3] sm:$0xff] %vm13211_vm7, %v13145_v10  ;;  %vm13214_vm7 = vsmask.f32 7424  ;;  %9279 = vmatprep.subr.bf16.mxu0 %v9579_v28 }
  0xfb   : > { %v1912_v37 = vld [vmem:[#allocation3 + $0x8] sm:$0x80]  ;;  %v1919_v24 = vsel %vm10495_vm2, 0, %v1918_v31  ;;  %1830 = vst.msk [vmem:[#allocation3] sm:$0xff] %vm13212_vm0, %v13145_v10  ;;  %v1794_v40 = vpop.permute.xlu1 %1793  ;;  %v1454_v50 = vpop.permute.xlu0 %1453  ;;  %vm10540_vm0 = vmand %vm1908_vm10, %vm13214_vm7  ;;  %v10585_v31 = vld [vmem:[%s9789_s10 + $0x50] sm:$0xff]  }
  0xfc   : > { %1920 = vst [vmem:[#allocation3 + $0x18] sm:$0x80] %v1919_v24  ;;  %v1913_v46 = vsel %vm10495_vm2, 0, %v1912_v37  ;;  %v585_v48 = vld [vmem:[#allocation3 + $0x38] sm:$0x80]  ;;  %1909 = vst.msk [vmem:[#allocation3] sm:$0xff] %vm1908_vm10, %v13145_v10  ;;  %v1821_v52 = vsel %vm10455_vm12, %v1794_v40, %v1820_v49  ;;  %9280 = vmatpush3.bf16.msra.mxu0 %v9579_v28 }
  0xfd   : > { %1914 = vst [vmem:[#allocation3 + $0x8] sm:$0x80] %v1913_v46  ;;  %v586_v42 = vsel %vm9992_vm14, 0, %v585_v48  ;;  %1472 = vst.msk [vmem:[#allocation3 + $0x30] sm:$0xff] %vm13213_vm1, %v1454_v50  ;;  %3479 = vrot.lane.b32.xlu1 %v9524_v25, %s9699_s11  ;;  %2966 = vrot.lane.b32.xlu0 %v2941_v41, %s9716_s16  ;;  %v13216_v61 = vsel %vm10540_vm0, 4294967295, %v13215_v61  ;;  %vm2075_vm1 = vcmask 254176   ;;  %v2671_v25 = vor.u32 %v2669_v7, %v2668_v6 }
  0xfe   : > { %v1915_v55 = vld [vmem:[#allocation3 + $0x10] sm:$0x80]  ;;  %587 = vst [vmem:[#allocation3 + $0x38] sm:$0x80] %v586_v42  ;;  %1822 = vst [vmem:[#allocation3 + $0x28] sm:$0xff] %v1821_v52  ;;  %vm13217_vm14 = vcmask 130144  }
  0xff   : > { %v1916_v60 = vsel %vm10495_vm2, 0, %v1915_v55  ;;  %v1889_v63 = vpop.permute.xlu1 %1888  ;;  %v1887_v1 = vpop.permute.xlu0 %1886  ;;  %vm13218_vm5 = vmmov %vm13217_vm14  ;;  %vm13219_vm10 = vsmask.f32 256  ;;  %v9532_v46 = vld [vmem:[%s9789_s10 + $0x58] sm:$0xff]   ;;  %v3601_v40 = vshll.u32 %v10567_v20, 16  ;;  %v3596_v55 = vrot.slane %v3594_v30, 1 }
 0x100   : > { %1917 = vst [vmem:[#allocation3 + $0x10] sm:$0x80] %v1916_v60  ;;  %1905 = vst.msk [vmem:[#allocation3 + $0x28] sm:$0xff] %vm13217_vm14, %v1889_v63  ;;  %vm13130_vm14 = vcmask 261344   ;;  %v9533_v48 = vld [vmem:[%s9865_s18 + $0x38] sm:$0xff]   ;;  %v9535_v63 = vld [vmem:[%s9789_s10 + $0x60] sm:$0xff]  }
 0x101   : > { %1904 = vst.msk [vmem:[#allocation3 + $0x20] sm:$0xff] %vm13218_vm5, %v1887_v1  ;;  %vm10555_vm7 = vmand %vm2075_vm1, %vm13219_vm10  ;;  %1797 = vrot.lane.b32.xlu1 %v1784_v56, %s9709_s23  ;;  %3481 = vrot.lane.b32.xlu0 %v9527_v57, %s9699_s11  ;;  %v2027_v56 = vshll.u32 %v10576_v26, 16  ;;  %vm13131_vm1 = vcmask 1043456   ;;  %v9582_v57 = vld [vmem:[%s13098_s2 + $0x20] ss:$0 sps:$4 sm:$0xff]   ;;  %v3606_v1 = vshrl.u32 %v10563_v8, 16 }
 0x102   : > { %v13221_v5 = vsel %vm10555_vm7, 4294967295, %v13220_v5  ;;  %v10613_v3 = vld [vmem:[%s9789_s10 + $0x58] sm:$0xff]   ;;  %vm13222_vm10 = vsmask.f32 7938  ;;  %v13223_v7 = vmov 0  ;;  %9369 = vmatprep.subr.msk.bf16.mxu0 %vm13131_vm1, %v9582_v57  ;;  %v3077_v8 = vsel %vm13131_vm1, %v9582_v57, 0 }
 0x103   : > { %v2077_v15 = vld [vmem:[#allocation3] sm:$0x1]  ;;  %v2034_v17 = vpop.permute.xlu1 %2033  ;;  %v2032_v19 = vpop.permute.xlu0 %2031  ;;  %v2060_v29 = vld [vmem:[#allocation3 + $0x18] sm:$0xff]  ;;  %vm10617_vm5 = vmand %vm13130_vm14, %vm13222_vm10  ;;  %9282 = vmatpush3.bf16.msra.mxu0 %v3077_v8  ;;  %vm13225_vm10 = vcmask 326944   ;;  %vm2352_vm14 = vcmask 392551  }
 0x104   : > { %v2054_v9 = vld [vmem:[#allocation3 + $0x8] sm:$0xff]  ;;  %v1494_v16 = vld [vmem:[#allocation3 + $0x30] sm:$0x80]  ;;  %v2078_v12 = vsel %vm10555_vm7, 0, %v2077_v15  ;;  %v13224_v7 = vsel %vm10617_vm5, 4294967295, %v13223_v7  ;;  %v3603_v15 = vrot.slane %v3601_v40, 1 }
 0x105   : > { %v1495_v22 = vsel %vm10333_vm6, 0, %v1494_v16  ;;  %v2055_v4 = vsel %vm10540_vm0, %v2032_v19, %v2054_v9  ;;  %2079 = vst [vmem:[#allocation3] sm:$0x1] %v2078_v12  ;;  %3485 = vrot.lane.b32.xlu1 %v9528_v62, %s9699_s11  ;;  %3483 = vrot.lane.b32.xlu0 %v9529_v2, %s9699_s11  ;;  %v728_v41 = vld [vmem:[#allocation3 + $0x38] sm:$0xff]  ;;  %v3599_v62 = vshrl.u32 %v10567_v20, 16  ;;  %v3615_v2 = vshll.u32 %v10585_v31, 16 }
 0x106   : > { %1496 = vst [vmem:[#allocation3 + $0x30] sm:$0x80] %v1495_v22  ;;  %2056 = vst [vmem:[#allocation3 + $0x8] sm:$0xff] %v2055_v4  ;;  %v3610_v9 = vrot.slane %v3608_v33, 1  ;;  %v2025_v20 = vshrl.u32 %v10576_v26, 16  ;;  %v10631_v12 = vld [vmem:[%s9865_s18 + $0x38] sm:$0xff]  }
 0x107   : > { %v2057_v32 = vld [vmem:[#allocation3 + $0x10] sm:$0xff]  ;;  %v1924_v35 = vld [vmem:[#allocation3 + $0x28] sm:$0x80]  ;;  %v699_v24 = vpop.permute.xlu1 %698  ;;  %v2036_v45 = vpop.permute.xlu0 %2035  ;;  %v2029_v22 = vrot.slane %v2027_v56, 1  ;;  %v3613_v4 = vshrl.u32 %v10585_v31, 16  ;;  %v3617_v30 = vrot.slane %v3615_v2, 1 }
 0x108   : > { %v1921_v36 = vld [vmem:[#allocation3 + $0x20] sm:$0x80]  ;;  %v2058_v37 = vsel %vm10540_vm0, %v2034_v17, %v2057_v32  ;;  %v1925_v49 = vsel %vm10495_vm2, 0, %v1924_v35  ;;  %v729_v42 = vsel %vm10035_vm15, %v699_v24, %v728_v41  ;;  %v2061_v52 = vsel %vm10540_vm0, %v2036_v45, %v2060_v29  ;;  %v9587_v10 = vld [vmem:[%s9789_s10 + $0x68] sm:$0xff]  }
 0x109   : > { %v1922_v50 = vsel %vm10495_vm2, 0, %v1921_v36  ;;  %2059 = vst [vmem:[#allocation3 + $0x10] sm:$0xff] %v2058_v37  ;;  %1926 = vst [vmem:[#allocation3 + $0x28] sm:$0x80] %v1925_v49  ;;  %2691 = vrot.lane.b32.xlu1 %v2671_v25, %s9714_s30  ;;  %1892 = vrot.lane.b32.xlu0 %v9531_v14, %s9708_s22  ;;  %v3597_v14 = vor.u32 %v3596_v55, %v3592_v54  ;;  %v3622_v32 = vshll.u32 %v10613_v3, 16  ;;  %v10636_v33 = vld [vmem:[%s9789_s10 + $0x40] sm:$0xff]  }
 0x10a   : > { %1923 = vst [vmem:[#allocation3 + $0x20] sm:$0x80] %v1922_v50  ;;  %730 = vst [vmem:[#allocation3 + $0x38] sm:$0xff] %v729_v42  ;;  %v10639_v35 = vld [vmem:[%s9789_s10 + $0x60] sm:$0xff]   ;;  %v3611_v41 = vor.u32 %v3610_v9, %v3606_v1  ;;  %v3604_v45 = vor.u32 %v3603_v15, %v3599_v62  ;;  %v2945_v50 = vshll.u32 %v10631_v12, 16  ;;  %v2943_v54 = vshrl.u32 %v10631_v12, 16 }
 0x10b   : > { %2062 = vst [vmem:[#allocation3 + $0x18] sm:$0xff] %v2061_v52  ;;  %v2038_v58 = vpop.permute.xlu1 %2037  ;;  %v1625_v60 = vpop.permute.xlu0 %1624  ;;  %v3620_v52 = vshrl.u32 %v10613_v3, 16  ;;  %v3624_v57 = vrot.slane %v3622_v32, 1  ;;  %v2030_v1 = vor.u32 %v2029_v22, %v2025_v20  ;;  %v3618_v62 = vor.u32 %v3617_v30, %v3613_v4  ;;  %v9546_v30 = vld [vmem:[%s9789_s10 + $0x50] sm:$0xff]  }
 0x10c   : > { %v2239_v19 = vld [vmem:[#allocation3] sm:$0xff]  ;;  %v2947_v2 = vrot.slane %v2945_v50, 1  ;;  %v3629_v3 = vshll.u32 %v10639_v35, 16  ;;  %v3627_v20 = vshrl.u32 %v10639_v35, 16  ;;  %vm13226_vm1 = vsmask.f32 7966 }
 0x10d   : > { %v2080_v53 = vld [vmem:[#allocation3 + $0x8] sm:$0x1]  ;;  %v1656_v6 = vld [vmem:[#allocation3 + $0x30] sm:$0xff]  ;;  %3487 = vrot.lane.b32.xlu1 %v9532_v46, %s9699_s11  ;;  %2797 = vrot.lane.b32.xlu0 %v9533_v48, %s9715_s9  ;;  %v13227_v22 = vmov 0 }
 0x10e   : > { %v2081_v16 = vsel %vm10555_vm7, 0, %v2080_v53  ;;  %v1657_v17 = vsel %vm10367_vm11, %v1625_v60, %v1656_v6  ;;  %v9545_v53 = vld [vmem:[%s9789_s10 + $0x48] sm:$0xff]  }
 0x10f   : > { %2082 = vst [vmem:[#allocation3 + $0x8] sm:$0x1] %v2081_v16  ;;  %1658 = vst [vmem:[#allocation3 + $0x30] sm:$0xff] %v1657_v17  ;;  %v2214_v29 = vpop.permute.xlu1 %2213  ;;  %v2040_v25 = vpop.permute.xlu0 %2039  ;;  %v3625_v17 = vor.u32 %v3624_v57, %v3620_v52  ;;  %v3791_v52 = vshrl.u32 %v9546_v30, 16 }
 0x110   : > { %v2083_v28 = vld [vmem:[#allocation3 + $0x10] sm:$0x1]  ;;  %v2240_v31 = vsel %vm10617_vm5, %v2214_v29, %v2239_v19  ;;  %v2066_v49 = vld [vmem:[#allocation3 + $0x28] sm:$0xff]  ;;  %v3631_v29 = vrot.slane %v3629_v3, 1 }
 0x111   : > { %v2084_v26 = vsel %vm10555_vm7, 0, %v2083_v28  ;;  %v754_v36 = vld [vmem:[#allocation3 + $0x38] sm:$0x1]  ;;  %v2063_v24 = vld [vmem:[#allocation3 + $0x20] sm:$0xff]  ;;  %2241 = vst [vmem:[#allocation3] sm:$0xff] %v2240_v31  ;;  %3647 = vrot.lane.b32.xlu1 %v3597_v14, %s9700_s12  ;;  %3489 = vrot.lane.b32.xlu0 %v9535_v63, %s9699_s11  ;;  %v2067_v42 = vsel %vm10540_vm0, %v2040_v25, %v2066_v49  ;;  %v3780_v14 = vshll.u32 %v10636_v33, 16  ;;  %v2948_v28 = vor.u32 %v2947_v2, %v2943_v54 }
 0x112   : > { %v2086_v37 = vld [vmem:[#allocation3 + $0x18] sm:$0x1]  ;;  %2085 = vst [vmem:[#allocation3 + $0x10] sm:$0x1] %v2084_v26  ;;  %v755_v46 = vsel %vm9947_vm9, 0, %v754_v36  ;;  %v2064_v40 = vsel %vm10540_vm0, %v2038_v58, %v2063_v24  ;;  %2068 = vst [vmem:[#allocation3 + $0x28] sm:$0xff] %v2067_v42  ;;  %v3632_v49 = vor.u32 %v3631_v29, %v3627_v20 }
 0x113   : > { %v2087_v48 = vsel %vm10555_vm7, 0, %v2086_v37  ;;  %756 = vst [vmem:[#allocation3 + $0x38] sm:$0x1] %v755_v46  ;;  %2065 = vst [vmem:[#allocation3 + $0x20] sm:$0xff] %v2064_v40  ;;  %v2320_v55 = vpop.permute.xlu1 %2319  ;;  %v2216_v56 = vpop.permute.xlu0 %2215  ;;  %v3777_v58 = vshrl.u32 %v10636_v33, 16  ;;  %v3784_v25 = vshrl.u32 %v9545_v53, 16 }
 0x114   : > { %2088 = vst [vmem:[#allocation3 + $0x18] sm:$0x1] %v2087_v48  ;;  %2344 = vst.msk [vmem:[#allocation3] sm:$0xff] %vm13225_vm10, %v2320_v55  ;;  %v9548_v40 = vld [vmem:[%s9865_s18 + $0x38] sm:$0xff]   ;;  %v3787_v42 = vshll.u32 %v9545_v53, 16 }
 0x115   : > { %3651 = vrot.lane.b32.xlu1 %v3611_v41, %s9700_s12  ;;  %3649 = vrot.lane.b32.xlu0 %v3604_v45, %s9700_s12  ;;  %v3779_v19 = vrot.slane %v3777_v58, 7  ;;  %vm10672_vm9 = vmand %vm2352_vm14, %vm13226_vm1  ;;  %v3786_v50 = vrot.slane %v3784_v25, 7  ;;  %v9549_v54 = vld [vmem:[%s9789_s10 + $0x58] sm:$0xff]   ;;  %v2207_v2 = vshrl.u32 %v9548_v40, 16 }
 0x116   : > { %v1681_v60 = vld [vmem:[#allocation3 + $0x30] sm:$0x1]  ;;  %v2242_v63 = vld [vmem:[#allocation3 + $0x8] sm:$0xff]  ;;  %v13228_v22 = vsel %vm10672_vm9, 4294967295, %v13227_v22  ;;  %vm13229_vm14 = vmmov %vm13225_vm10  ;;  %v3798_v3 = vshrl.u32 %v9549_v54, 16  ;;  %v3801_v20 = vshll.u32 %v9549_v54, 16 }
 0x117   : > { %v1682_v6 = vsel %vm10380_vm13, 0, %v1681_v60  ;;  %v2243_v9 = vsel %vm10617_vm5, %v2216_v56, %v2242_v63  ;;  %v2218_v15 = vpop.permute.xlu1 %2217  ;;  %v2322_v8 = vpop.permute.xlu0 %2321  ;;  %v3782_v48 = vor.u32 %v3780_v14, %v3779_v19  ;;  %vm13230_vm1 = vmmov %vm13225_vm10  ;;  %v3794_v60 = vshll.u32 %v9546_v30, 16  ;;  %v9544_v63 = vld [vmem:[%s9789_s10 + $0x40] sm:$0xff]  }
 0x118   : > { %1683 = vst [vmem:[#allocation3 + $0x30] sm:$0x1] %v1682_v6  ;;  %2244 = vst [vmem:[#allocation3 + $0x8] sm:$0xff] %v2243_v9  ;;  %v2209_v19 = vrot.slane %v2207_v2, 7  ;;  %v3800_v14 = vrot.slane %v3798_v3, 7  ;;  %v13235_v54 = vmov 0 }
 0x119   : > { %v2245_v16 = vld [vmem:[#allocation3 + $0x10] sm:$0xff]  ;;  %2345 = vst.msk [vmem:[#allocation3 + $0x8] sm:$0xff] %vm13225_vm10, %v2322_v8  ;;  %2043 = vrot.lane.b32.xlu1 %v2030_v1, %s9710_s24  ;;  %3653 = vrot.lane.b32.xlu0 %v3618_v62, %s9700_s12  ;;  %v2092_v33 = vld [vmem:[#allocation3 + $0x28] sm:$0x1]  ;;  %v3789_v1 = vor.u32 %v3787_v42, %v3786_v50  ;;  %v3793_v62 = vrot.slane %v3791_v52, 7  ;;  %vm13231_vm10 = vcmask 294144  }
 0x11a   : > { %v2089_v12 = vld [vmem:[#allocation3 + $0x20] sm:$0x1]  ;;  %v2246_v4 = vsel %vm10617_vm5, %v2218_v15, %v2245_v16  ;;  %v916_v35 = vld [vmem:[#allocation3 + $0x38] sm:$0xff]  ;;  %v2093_v26 = vsel %vm10555_vm7, 0, %v2092_v33  ;;  %v9547_v8 = vld [vmem:[%s9789_s10 + $0x48] sm:$0xff]   ;;  %v2210_v16 = vshll.u32 %v9548_v40, 16 }
 0x11b   : > { %v2090_v32 = vsel %vm10555_vm7, 0, %v2089_v12  ;;  %2247 = vst [vmem:[#allocation3 + $0x10] sm:$0xff] %v2246_v4  ;;  %v2354_v36 = vld [vmem:[#allocation3] sm:$0x80]  ;;  %v884_v37 = vpop.permute.xlu1 %883  ;;  %v2220_v24 = vpop.permute.xlu0 %2219  ;;  %v2248_v31 = vld [vmem:[#allocation3 + $0x18] sm:$0xff]  ;;  %v9551_v50 = vld [vmem:[%s9789_s10 + $0x50] sm:$0xff]  }
 0x11c   : > { %2091 = vst [vmem:[#allocation3 + $0x20] sm:$0x1] %v2090_v32  ;;  %2094 = vst [vmem:[#allocation3 + $0x28] sm:$0x1] %v2093_v26  ;;  %v2355_v41 = vsel %vm10672_vm9, 0, %v2354_v36  ;;  %v917_v45 = vsel %vm10098_vm8, %v884_v37, %v916_v35  ;;  %v2249_v46 = vsel %vm10617_vm5, %v2220_v24, %v2248_v31  ;;  %v9552_v12 = vld [vmem:[%s9789_s10 + $0x60] sm:$0xff]   ;;  %v2212_v36 = vor.u32 %v2210_v16, %v2209_v19 }
 0x11d   : > { %2356 = vst [vmem:[#allocation3] sm:$0x80] %v2355_v41  ;;  %918 = vst [vmem:[#allocation3 + $0x38] sm:$0xff] %v917_v45  ;;  %3655 = vrot.lane.b32.xlu1 %v3625_v17, %s9700_s12  ;;  %2968 = vrot.lane.b32.xlu0 %v2948_v28, %s9716_s16  ;;  %v3796_v17 = vor.u32 %v3794_v60, %v3793_v62  ;;  %v10717_v26 = vld [vmem:[%s9789_s10 + $0x68] sm:$0xff]   ;;  %v3803_v37 = vor.u32 %v3801_v20, %v3800_v14  ;;  %v3805_v24 = vshrl.u32 %v9552_v12, 16  ;;  %v9553_v62 = vld [vmem:[%s9865_s18 + $0x38] sm:$0xff]  }
 0x11e   : > { %2250 = vst [vmem:[#allocation3 + $0x18] sm:$0xff] %v2249_v46  ;;  %v3812_v42 = vshrl.u32 %v10717_v26, 16  ;;  %v10730_v52 = vld [vmem:[%s9789_s10 + $0x48] sm:$0xff]   ;;  %v3815_v2 = vshll.u32 %v10717_v26, 16  ;;  %v10758_v19 = vld [vmem:[%s9789_s10 + $0x50] sm:$0xff]  }
 0x11f   : > { %v2326_v56 = vpop.permute.xlu1 %2325  ;;  %v2324_v57 = vpop.permute.xlu0 %2323  ;;  %v1823_v6 = vld [vmem:[#allocation3 + $0x30] sm:$0xff] }
 0x120   : > { %v2357_v55 = vld [vmem:[#allocation3 + $0x8] sm:$0x80]  ;;  %2347 = vst.msk [vmem:[#allocation3 + $0x18] sm:$0xff] %vm13229_vm14, %v2326_v56  ;;  %vm13232_vm14 = vcmask 130144   ;;  %v3808_v56 = vshll.u32 %v9552_v12, 16 }
 0x121   : > { %v2358_v58 = vsel %vm10672_vm9, 0, %v2357_v55  ;;  %2346 = vst.msk [vmem:[#allocation3 + $0x10] sm:$0xff] %vm13230_vm1, %v2324_v57  ;;  %3832 = vrot.lane.b32.xlu1 %v3782_v48, %s9702_s14  ;;  %3657 = vrot.lane.b32.xlu0 %v3632_v49, %s9700_s12  ;;  %vm2514_vm1 = vcmask 392544   ;;  %v9550_v48 = vld [vmem:[%s9789_s10 + $0x58] sm:$0xff]   ;;  %v3807_v55 = vrot.slane %v3805_v24, 7  ;;  %v10741_v57 = vld [vmem:[%s9789_s10 + $0x40] sm:$0xff]  }
 0x122   : > { %2359 = vst [vmem:[#allocation3 + $0x8] sm:$0x80] %v2358_v58 }
 0x123   : > { %v1796_v53 = vpop.permute.xlu1 %1795  ;;  %v990_v9 = vpop.permute.xlu0 %989  ;;  %v2251_v30 = vld [vmem:[#allocation3 + $0x20] sm:$0xff]  ;;  %v2254_v46 = vld [vmem:[#allocation3 + $0x28] sm:$0xff]  ;;  %v3810_v16 = vor.u32 %v3808_v56, %v3807_v55 }
 0x124   : > { %v1824_v15 = vsel %vm10455_vm12, %v1796_v53, %v1823_v6  ;;  %1007 = vst.msk [vmem:[#allocation3 + $0x38] sm:$0xff] %vm13231_vm10, %v990_v9  ;;  %vm13233_vm10 = vcmask 326944   ;;  %v3814_v6 = vrot.slane %v3812_v42, 7  ;;  %v4058_v9 = vshll.u32 %v10730_v52, 16  ;;  %v9557_v42 = vld [vmem:[%s9789_s10 + $0x60] sm:$0xff]  }
 0x125   : > { %1825 = vst [vmem:[#allocation3 + $0x30] sm:$0xff] %v1824_v15  ;;  %3936 = vrot.lane.b32.xlu1 %v9544_v63, %s9701_s13  ;;  %3834 = vrot.lane.b32.xlu0 %v3789_v1, %s9702_s14  ;;  %v2516_v63 = vld [vmem:[#allocation3] sm:$0xff]  ;;  %v10752_v15 = vld [vmem:[%s9789_s10 + $0x58] sm:$0xff]  }
 0x126   : > { %v3817_v26 = vor.u32 %v3815_v2, %v3814_v6  ;;  %v4072_v24 = vshll.u32 %v10752_v15, 16  ;;  %v10800_v2 = vld [vmem:[%s9789_s10 + $0x68] sm:$0xff]  }
 0x127   : > { %v2363_v4 = vld [vmem:[#allocation3 + $0x18] sm:$0x80]  ;;  %v1891_v29 = vpop.permute.xlu1 %1890  ;;  %v2222_v25 = vpop.permute.xlu0 %2221 }
 0x128   : > { %v2360_v28 = vld [vmem:[#allocation3 + $0x10] sm:$0x80]  ;;  %v2364_v32 = vsel %vm10672_vm9, 0, %v2363_v4  ;;  %1906 = vst.msk [vmem:[#allocation3 + $0x30] sm:$0xff] %vm13232_vm14, %v1891_v29  ;;  %v2252_v35 = vsel %vm10617_vm5, %v2222_v25, %v2251_v30  ;;  %vm13234_vm14 = vsmask.f32 7424 }
 0x129   : > { %v2361_v33 = vsel %vm10672_vm9, 0, %v2360_v28  ;;  %2365 = vst [vmem:[#allocation3 + $0x18] sm:$0x80] %v2364_v32  ;;  %2253 = vst [vmem:[#allocation3 + $0x20] sm:$0xff] %v2252_v35  ;;  %3836 = vrot.lane.b32.xlu1 %v3796_v17, %s9702_s14  ;;  %3938 = vrot.lane.b32.xlu0 %v9547_v8, %s9701_s13  ;;  %v2519_v8 = vld [vmem:[#allocation3 + $0x8] sm:$0xff]  ;;  %v4051_v17 = vshll.u32 %v10741_v57, 16 }
 0x12a   : > { %2362 = vst [vmem:[#allocation3 + $0x10] sm:$0x80] %v2361_v33  ;;  %v9555_v28 = vld [vmem:[%s9789_s10 + $0x68] sm:$0xff]   ;;  %v4056_v29 = vshrl.u32 %v10730_v52, 16  ;;  %v4060_v33 = vrot.slane %v4058_v9, 1  ;;  %v13239_v35 = vmov 0 }
 0x12b   : > { %v1031_v31 = vld [vmem:[#allocation3 + $0x38] sm:$0x80]  ;;  %v2328_v41 = vpop.permute.xlu1 %2327  ;;  %v2224_v45 = vpop.permute.xlu0 %2223  ;;  %v4065_v52 = vshll.u32 %v10758_v19, 16 }
 0x12c   : > { %v1032_v40 = vsel %vm10140_vm3, 0, %v1031_v31  ;;  %2348 = vst.msk [vmem:[#allocation3 + $0x20] sm:$0xff] %vm13233_vm10, %v2328_v41  ;;  %v2255_v49 = vsel %vm10617_vm5, %v2224_v45, %v2254_v46  ;;  %vm10736_vm3 = vmand %vm2514_vm1, %vm13234_vm14  ;;  %vm2540_vm10 = vcmask 450976   ;;  %vm13237_vm1 = vcmask 326944   ;;  %v10780_v31 = vld [vmem:[%s9789_s10 + $0x68] sm:$0xff]  }
 0x12d   : > { %1033 = vst [vmem:[#allocation3 + $0x38] sm:$0x80] %v1032_v40  ;;  %2256 = vst [vmem:[#allocation3 + $0x28] sm:$0xff] %v2255_v49  ;;  %2227 = vrot.lane.b32.xlu1 %v2212_v36, %s9711_s25  ;;  %3838 = vrot.lane.b32.xlu0 %v3803_v37, %s9702_s14  ;;  %v13236_v54 = vsel %vm10736_vm3, 4294967295, %v13235_v54  ;;  %vm13138_vm14 = vcmask 458144   ;;  %v4049_v36 = vshrl.u32 %v10741_v57, 16 }
 0x12e   : > { %v4070_v37 = vshrl.u32 %v10752_v15, 16  ;;  %v4053_v45 = vrot.slane %v4051_v17, 1 }
 0x12f   : > { %v1927_v58 = vld [vmem:[#allocation3 + $0x30] sm:$0x80]  ;;  %v2491_v60 = vpop.permute.xlu1 %2490  ;;  %v2330_v1 = vpop.permute.xlu0 %2329 }
 0x130   : > { %v1928_v3 = vsel %vm10495_vm2, 0, %v1927_v58  ;;  %v2517_v53 = vsel %vm10736_vm3, %v2491_v60, %v2516_v63  ;;  %2349 = vst.msk [vmem:[#allocation3 + $0x28] sm:$0xff] %vm13237_vm1, %v2330_v1  ;;  %vm13238_vm1 = vsmask.f32 256  ;;  %v2525_v41 = vld [vmem:[#allocation3 + $0x18] sm:$0xff]  ;;  %v4074_v1 = vrot.slane %v4072_v24, 1 }
 0x131   : > { %1929 = vst [vmem:[#allocation3 + $0x30] sm:$0x80] %v1928_v3  ;;  %2518 = vst [vmem:[#allocation3] sm:$0xff] %v2517_v53  ;;  %3942 = vrot.lane.b32.xlu1 %v9550_v48, %s9701_s13  ;;  %3940 = vrot.lane.b32.xlu0 %v9551_v50, %s9701_s13  ;;  %v2522_v12 = vld [vmem:[#allocation3 + $0x10] sm:$0xff]  ;;  %v9556_v50 = vld [vmem:[%s9789_s10 + $0x68] sm:$0xff]   ;;  %v3636_v3 = vshll.u32 %v10780_v31, 16 }
 0x132   : > { %vm10770_vm8 = vmand %vm2540_vm10, %vm13238_vm1  ;;  %v10792_v60 = vld [vmem:[%s9865_s18 + $0x38] sm:$0xff]   ;;  %v10804_v53 = vld [vmem:[%s9789_s10 + $0x60] sm:$0xff]   ;;  %vm13241_vm1 = vsmask.f32 7938  ;;  %v4086_v24 = vshll.u32 %v10800_v2, 16 }
 0x133   : > { %v2366_v14 = vld [vmem:[#allocation3 + $0x20] sm:$0x80]  ;;  %v2495_v20 = vpop.permute.xlu1 %2494  ;;  %v2493_v4 = vpop.permute.xlu0 %2492  ;;  %v13240_v35 = vsel %vm10770_vm8, 4294967295, %v13239_v35  ;;  %vm10819_vm10 = vmand %vm13138_vm14, %vm13241_vm1  ;;  %vm13244_vm1 = vnez %v13190_v21  ;;  %vm2818_vm14 = vcmask 589351  }
 0x134   : > { %v2367_v25 = vsel %vm10672_vm9, 0, %v2366_v14  ;;  %v2523_v30 = vsel %vm10736_vm3, %v2495_v20, %v2522_v12  ;;  %v2520_v32 = vsel %vm10736_vm3, %v2493_v4, %v2519_v8  ;;  %v1193_v40 = vld [vmem:[#allocation3 + $0x38] sm:$0xff]  ;;  %v4067_v8 = vrot.slane %v4065_v52, 1 }
 0x135   : > { %2368 = vst [vmem:[#allocation3 + $0x20] sm:$0x80] %v2367_v25  ;;  %2524 = vst [vmem:[#allocation3 + $0x10] sm:$0xff] %v2523_v30  ;;  %3840 = vrot.lane.b32.xlu1 %v3810_v16, %s9702_s14  ;;  %2333 = vrot.lane.b32.xlu0 %v9553_v62, %s9712_s26  ;;  %v4063_v62 = vshrl.u32 %v10758_v19, 16  ;;  %v4061_v12 = vor.u32 %v4060_v33, %v4056_v29  ;;  %v2486_v19 = vshll.u32 %v10792_v60, 16  ;;  %v13242_v29 = vmov 0 }
 0x136   : > { %2521 = vst [vmem:[#allocation3 + $0x8] sm:$0xff] %v2520_v32  ;;  %v4054_v30 = vor.u32 %v4053_v45, %v4049_v36  ;;  %v13243_v29 = vsel %vm10819_vm10, 4294967295, %v13242_v29  ;;  %v3634_v32 = vshrl.u32 %v10780_v31, 16  ;;  %v3638_v33 = vrot.slane %v3636_v3, 1 }
 0x137   : > { %v2369_v46 = vld [vmem:[#allocation3 + $0x28] sm:$0x80]  ;;  %v1161_v48 = vpop.permute.xlu1 %1160  ;;  %v2497_v49 = vpop.permute.xlu0 %2496 }
 0x138   : > { %v2542_v55 = vld [vmem:[#allocation3] sm:$0x1]  ;;  %v2370_v56 = vsel %vm10672_vm9, 0, %v2369_v46  ;;  %v1194_v57 = vsel %vm10196_vm4, %v1161_v48, %v1193_v40  ;;  %v2526_v58 = vsel %vm10736_vm3, %v2497_v49, %v2525_v41  ;;  %v2069_v15 = vld [vmem:[#allocation3 + $0x30] sm:$0xff]  ;;  %v4075_v40 = vor.u32 %v4074_v1, %v4070_v37  ;;  %v10839_v37 = vld [vmem:[%s9789_s10 + $0x48] sm:$0xff]  }
 0x139   : > { %v2543_v63 = vsel %vm10770_vm8, 0, %v2542_v55  ;;  %2371 = vst [vmem:[#allocation3 + $0x28] sm:$0x80] %v2370_v56  ;;  %1195 = vst [vmem:[#allocation3 + $0x38] sm:$0xff] %v1194_v57  ;;  %3842 = vrot.lane.b32.xlu1 %v3817_v26, %s9702_s14  ;;  %3491 = vrot.lane.b32.xlu0 %v9555_v28, %s9699_s11  ;;  %v2484_v26 = vshrl.u32 %v10792_v60, 16  ;;  %v4068_v49 = vor.u32 %v4067_v8, %v4063_v62  ;;  %v2488_v56 = vrot.slane %v2486_v19, 1 }
 0x13a   : > { %2527 = vst [vmem:[#allocation3 + $0x18] sm:$0xff] %v2526_v58  ;;  %2544 = vst [vmem:[#allocation3] sm:$0x1] %v2543_v63  ;;  %v10836_v57 = vld [vmem:[%s9789_s10 + $0x50] sm:$0xff]   ;;  %v4084_v1 = vshrl.u32 %v10800_v2, 16  ;;  %v4088_v62 = vrot.slane %v4086_v24, 1 }
 0x13b   : > { %v2499_v6 = vpop.permute.xlu1 %2498  ;;  %v2042_v9 = vpop.permute.xlu0 %2041  ;;  %v4234_v2 = vshrl.u32 %v10836_v57, 16 }
 0x13c   : > { %v2548_v16 = vld [vmem:[#allocation3 + $0x10] sm:$0x1]  ;;  %v2528_v14 = vld [vmem:[#allocation3 + $0x20] sm:$0xff]  ;;  %v2070_v20 = vsel %vm10540_vm0, %v2042_v9, %v2069_v15  ;;  %v4077_v9 = vshrl.u32 %v10804_v53, 16 }
 0x13d   : > { %v2545_v17 = vld [vmem:[#allocation3 + $0x8] sm:$0x1]  ;;  %v2549_v4 = vsel %vm10770_vm8, 0, %v2548_v16  ;;  %v2529_v25 = vsel %vm10736_vm3, %v2499_v6, %v2528_v14  ;;  %2071 = vst [vmem:[#allocation3 + $0x30] sm:$0xff] %v2070_v20  ;;  %3946 = vrot.lane.b32.xlu1 %v9556_v50, %s9701_s13  ;;  %3944 = vrot.lane.b32.xlu0 %v9557_v42, %s9701_s13  ;;  %v4079_v50 = vshll.u32 %v10804_v53, 16  ;;  %v3639_v6 = vor.u32 %v3638_v33, %v3634_v32 }
 0x13e   : > { %v2546_v28 = vsel %vm10770_vm8, 0, %v2545_v17  ;;  %2550 = vst [vmem:[#allocation3 + $0x10] sm:$0x1] %v2549_v4  ;;  %2530 = vst [vmem:[#allocation3 + $0x20] sm:$0xff] %v2529_v25  ;;  %v2489_v14 = vor.u32 %v2488_v56, %v2484_v26  ;;  %v4227_v20 = vshrl.u32 %v10839_v37, 16  ;;  %v13247_v53 = vmov 0 }
 0x13f   : > { %2547 = vst [vmem:[#allocation3 + $0x8] sm:$0x1] %v2546_v28  ;;  %v2680_v41 = vpop.permute.xlu1 %2679  ;;  %v2501_v36 = vpop.permute.xlu0 %2500  ;;  %v4081_v15 = vrot.slane %v4079_v50, 1  ;;  %v4230_v33 = vshll.u32 %v10839_v37, 16  ;;  %v10868_v26 = vld [vmem:[%s9789_s10 + $0x60] sm:$0xff]  }
 0x140   : > { %v1219_v45 = vld [vmem:[#allocation3 + $0x38] sm:$0x1]  ;;  %v2531_v48 = vld [vmem:[#allocation3 + $0x28] sm:$0xff] }
 0x141   : > { %v2551_v46 = vld [vmem:[#allocation3 + $0x18] sm:$0x1]  ;;  %v1220_v42 = vsel %vm13244_vm1, 0, %v1219_v45  ;;  %v2705_v52 = vld [vmem:[#allocation3] sm:$0xff]  ;;  %v2532_v55 = vsel %vm10736_vm3, %v2501_v36, %v2531_v48  ;;  %4106 = vrot.lane.b32.xlu1 %v4061_v12, %s9703_s15  ;;  %4104 = vrot.lane.b32.xlu0 %v4054_v30, %s9703_s15  ;;  %vm13245_vm1 = vcmask 523744   ;;  %v4237_v30 = vshll.u32 %v10836_v57, 16 }
 0x142   : > { %v2552_v31 = vsel %vm10770_vm8, 0, %v2551_v46  ;;  %1221 = vst [vmem:[#allocation3 + $0x38] sm:$0x1] %v1220_v42  ;;  %v2706_v58 = vsel %vm10819_vm10, %v2680_v41, %v2705_v52  ;;  %2533 = vst [vmem:[#allocation3 + $0x28] sm:$0xff] %v2532_v55  ;;  %v4089_v41 = vor.u32 %v4088_v62, %v4084_v1  ;;  %v4082_v36 = vor.u32 %v4081_v15, %v4077_v9  ;;  %v9572_v48 = vld [vmem:[%s9789_s10 + $0x58] sm:$0xff]   ;;  %v10879_v42 = vld [vmem:[%s9789_s10 + $0x68] sm:$0xff]  }
 0x143   : > { %2553 = vst [vmem:[#allocation3 + $0x18] sm:$0x1] %v2552_v31  ;;  %2707 = vst [vmem:[#allocation3] sm:$0xff] %v2706_v58  ;;  %v2786_v60 = vpop.permute.xlu1 %2785  ;;  %v2682_v63 = vpop.permute.xlu0 %2681  ;;  %v4236_v45 = vrot.slane %v4234_v2, 7  ;;  %v4229_v46 = vrot.slane %v4227_v20, 7  ;;  %v4248_v1 = vshrl.u32 %v10868_v26, 16 }
 0x144   : > { %v2095_v3 = vld [vmem:[#allocation3 + $0x30] sm:$0x1]  ;;  %2810 = vst.msk [vmem:[#allocation3] sm:$0xff] %vm13245_vm1, %v2786_v60  ;;  %vm13246_vm1 = vsmask.f32 7966  ;;  %v4241_v62 = vshrl.u32 %v9572_v48, 16 }
 0x145   : > { %v2554_v8 = vld [vmem:[#allocation3 + $0x20] sm:$0x1]  ;;  %v2096_v16 = vsel %vm10555_vm7, 0, %v2095_v3  ;;  %4110 = vrot.lane.b32.xlu1 %v4075_v40, %s9703_s15  ;;  %4108 = vrot.lane.b32.xlu0 %v4068_v49, %s9703_s15  ;;  %vm10856_vm4 = vmand %vm2818_vm14, %vm13246_vm1  ;;  %v2711_v28 = vld [vmem:[#allocation3 + $0x10] sm:$0xff]  ;;  %vm13249_vm7 = vcmask 523744   ;;  %v4239_v60 = vor.u32 %v4237_v30, %v4236_v45  ;;  %v4255_v2 = vshrl.u32 %v10879_v42, 16 }
 0x146   : > { %v2708_v17 = vld [vmem:[#allocation3 + $0x8] sm:$0xff]  ;;  %v2555_v12 = vsel %vm10770_vm8, 0, %v2554_v8  ;;  %2097 = vst [vmem:[#allocation3 + $0x30] sm:$0x1] %v2096_v16  ;;  %v13248_v53 = vsel %vm10856_vm4, 4294967295, %v13247_v53  ;;  %v10874_v40 = vld [vmem:[%s9865_s18 + $0x40] sm:$0xff]  }
 0x147   : > { %v2709_v19 = vsel %vm10819_vm10, %v2682_v63, %v2708_v17  ;;  %2556 = vst [vmem:[#allocation3 + $0x20] sm:$0x1] %v2555_v12  ;;  %v2684_v4 = vpop.permute.xlu1 %2683  ;;  %v2788_v25 = vpop.permute.xlu0 %2787  ;;  %v4232_v63 = vor.u32 %v4230_v33, %v4229_v46  ;;  %v10891_v3 = vld [vmem:[%s9789_s10 + $0x70] sm:$0xff]   ;;  %v9569_v16 = vld [vmem:[%s9789_s10 + $0x48] sm:$0xff]   ;;  %v4251_v17 = vshll.u32 %v10868_v26, 16  ;;  %vm13251_vm14 = vcmask 523744  }
 0x148   : > { %2710 = vst [vmem:[#allocation3 + $0x8] sm:$0xff] %v2709_v19  ;;  %v2712_v32 = vsel %vm10819_vm10, %v2684_v4, %v2711_v28  ;;  %v9568_v8 = vld [vmem:[%s9789_s10 + $0x50] sm:$0xff]   ;;  %vm13252_vm1 = vmmov %vm13251_vm14  ;;  %v4250_v19 = vrot.slane %v4248_v1, 7  ;;  %v4243_v4 = vrot.slane %v4241_v62, 7  ;;  %v4244_v28 = vshll.u32 %v9572_v48, 16 }
 0x149   : > { %2811 = vst.msk [vmem:[#allocation3 + $0x8] sm:$0xff] %vm13249_vm7, %v2788_v25  ;;  %v2557_v24 = vld [vmem:[#allocation3 + $0x28] sm:$0x1]  ;;  %2713 = vst [vmem:[#allocation3 + $0x10] sm:$0xff] %v2712_v32  ;;  %3659 = vrot.lane.b32.xlu1 %v3639_v6, %s9700_s12  ;;  %2504 = vrot.lane.b32.xlu0 %v2489_v14, %s9713_s29  ;;  %v1382_v50 = vld [vmem:[#allocation3 + $0x38] sm:$0xff]  ;;  %vm13250_vm7 = vnez %v13192_v59  ;;  %v2673_v14 = vshrl.u32 %v10874_v40, 16 }
 0x14a   : > { %v2558_v49 = vsel %vm10770_vm8, 0, %v2557_v24  ;;  %v2714_v56 = vld [vmem:[#allocation3 + $0x18] sm:$0xff]  ;;  %v10903_v12 = vld [vmem:[%s9789_s10 + $0x70] sm:$0xff]   ;;  %v3819_v30 = vshrl.u32 %v10891_v3, 16  ;;  %v2676_v24 = vshll.u32 %v10874_v40, 16  ;;  %v4257_v45 = vrot.slane %v4255_v2, 7 }
 0x14b   : > { %2559 = vst [vmem:[#allocation3 + $0x28] sm:$0x1] %v2558_v49  ;;  %v2820_v31 = vld [vmem:[#allocation3] sm:$0x80]  ;;  %v1350_v52 = vpop.permute.xlu1 %1349  ;;  %v2686_v55 = vpop.permute.xlu0 %2685  ;;  %v10908_v25 = vld [vmem:[%s9789_s10 + $0x38] sm:$0xff]   ;;  %v4258_v46 = vshll.u32 %v10879_v42, 16  ;;  %v4253_v48 = vor.u32 %v4251_v17, %v4250_v19  ;;  %v4246_v49 = vor.u32 %v4244_v28, %v4243_v4 }
 0x14c   : > { %v2821_v57 = vsel %vm10856_vm4, 0, %v2820_v31  ;;  %v1383_v37 = vsel %vm13250_vm7, %v1350_v52, %v1382_v50  ;;  %v2715_v58 = vsel %vm10819_vm10, %v2686_v55, %v2714_v56  ;;  %vm13147_vm7 = vcmask 589344   ;;  %v10921_v31 = vld [vmem:[%s9789_s10 + $0x40] sm:$0xff]   ;;  %v10944_v17 = vld [vmem:[%s9789_s10 + $0x50] sm:$0xff]  }
 0x14d   : > { %2822 = vst [vmem:[#allocation3] sm:$0x80] %v2821_v57  ;;  %1384 = vst [vmem:[#allocation3 + $0x38] sm:$0xff] %v1383_v37  ;;  %4114 = vrot.lane.b32.xlu1 %v4089_v41, %s9703_s15  ;;  %4112 = vrot.lane.b32.xlu0 %v4082_v36, %s9703_s15  ;;  %v2257_v33 = vld [vmem:[#allocation3 + $0x30] sm:$0xff]  ;;  %v2675_v36 = vrot.slane %v2673_v14, 7  ;;  %v4262_v50 = vshrl.u32 %v10903_v12, 16 }
 0x14e   : > { %2716 = vst [vmem:[#allocation3 + $0x18] sm:$0xff] %v2715_v58  ;;  %v3336_v40 = vshrl.u32 %v10908_v25, 16  ;;  %v2717_v52 = vld [vmem:[#allocation3 + $0x20] sm:$0xff]  ;;  %v3821_v55 = vrot.slane %v3819_v30, 7  ;;  %v3822_v56 = vshll.u32 %v10891_v3, 16  ;;  %v10925_v57 = vld [vmem:[%s9789_s10 + $0x48] sm:$0xff]  }
 0x14f   : > { %v2792_v9 = vpop.permute.xlu1 %2791  ;;  %v2790_v15 = vpop.permute.xlu0 %2789  ;;  %v9574_v3 = vld [vmem:[%s9789_s10 + $0x58] sm:$0xff]   ;;  %v9577_v4 = vld [vmem:[%s9865_s18 + $0x40] sm:$0xff]   ;;  %v3343_v30 = vshrl.u32 %v10921_v31, 16 }
 0x150   : > { %v2823_v6 = vld [vmem:[#allocation3 + $0x8] sm:$0x80]  ;;  %2813 = vst.msk [vmem:[#allocation3 + $0x18] sm:$0xff] %vm13251_vm14, %v2792_v9  ;;  %vm13253_vm14 = vcmask 490944   ;;  %v2678_v9 = vor.u32 %v2676_v24, %v2675_v36  ;;  %v9578_v28 = vld [vmem:[%s9789_s10 + $0x60] sm:$0xff]   ;;  %v13257_v36 = vmov 0 }
 0x151   : > { %v2824_v20 = vsel %vm10856_vm4, 0, %v2823_v6  ;;  %2812 = vst.msk [vmem:[#allocation3 + $0x10] sm:$0xff] %vm13252_vm1, %v2790_v15  ;;  %4277 = vrot.lane.b32.xlu1 %v4239_v60, %s9704_s19  ;;  %4275 = vrot.lane.b32.xlu0 %v4232_v63, %s9704_s19  ;;  %v4265_v6 = vshll.u32 %v10903_v12, 16  ;;  %v10938_v15 = vrot.slane %v4262_v50, 7  ;;  %v4477_v50 = vshll.u32 %v10944_v17, 16 }
 0x152   : > { %2825 = vst [vmem:[#allocation3 + $0x8] sm:$0x80] %v2824_v20  ;;  %v2720_v19 = vld [vmem:[#allocation3 + $0x28] sm:$0xff] }
 0x153   : > { %v2226_v32 = vpop.permute.xlu1 %2225  ;;  %v1456_v26 = vpop.permute.xlu0 %1455 }
 0x154   : > { %v2258_v41 = vsel %vm10617_vm5, %v2226_v32, %v2257_v33  ;;  %1473 = vst.msk [vmem:[#allocation3 + $0x38] sm:$0xff] %vm13253_vm14, %v1456_v26  ;;  %vm13254_vm14 = vcmask 326944   ;;  %v3350_v32 = vshrl.u32 %v10925_v57, 16  ;;  %v10951_v33 = vld [vmem:[%s9789_s10 + $0x48] sm:$0xff]  }
 0x155   : > { %2259 = vst [vmem:[#allocation3 + $0x30] sm:$0xff] %v2258_v41  ;;  %4369 = vrot.lane.b32.xlu1 %v9568_v8, %s9705_s20  ;;  %4367 = vrot.lane.b32.xlu0 %v9569_v16, %s9705_s20  ;;  %v10940_v8 = vrot.slane %v3336_v40, 7  ;;  %v3339_v16 = vshll.u32 %v10908_v25, 16  ;;  %v10959_v41 = vld [vmem:[%s9789_s10 + $0x60] sm:$0xff]   ;;  %v10973_v40 = vld [vmem:[%s9789_s10 + $0x58] sm:$0xff]  }
 0x157   : > { %v2829_v42 = vld [vmem:[#allocation3 + $0x18] sm:$0x80]  ;;  %v2332_v58 = vpop.permute.xlu1 %2331  ;;  %v2688_v60 = vpop.permute.xlu0 %2687 }
 0x158   : > { %v2826_v37 = vld [vmem:[#allocation3 + $0x10] sm:$0x80]  ;;  %v2830_v63 = vsel %vm10856_vm4, 0, %v2829_v42  ;;  %2350 = vst.msk [vmem:[#allocation3 + $0x30] sm:$0xff] %vm13254_vm14, %v2332_v58  ;;  %v2718_v62 = vsel %vm10819_vm10, %v2688_v60, %v2717_v52  ;;  %vm13255_vm14 = vmmov %vm13252_vm1  ;;  %vm13256_vm1 = vsmask.f32 7424  ;;  %v4260_v60 = vor.u32 %v4258_v46, %v4257_v45 }
 0x159   : > { %v2827_v1 = vsel %vm10856_vm4, 0, %v2826_v37  ;;  %2831 = vst [vmem:[#allocation3 + $0x18] sm:$0x80] %v2830_v63  ;;  %2719 = vst [vmem:[#allocation3 + $0x20] sm:$0xff] %v2718_v62  ;;  %4281 = vrot.lane.b32.xlu1 %v4253_v48, %s9704_s19  ;;  %4279 = vrot.lane.b32.xlu0 %v4246_v49, %s9704_s19  ;;  %v2982_v37 = vld [vmem:[#allocation3] sm:$0xff]  ;;  %v10975_v63 = vrot.slane %v3343_v30, 7  ;;  %v3824_v45 = vor.u32 %v3822_v56, %v3821_v55 }
 0x15a   : > { %2828 = vst [vmem:[#allocation3 + $0x10] sm:$0x80] %v2827_v1  ;;  %vm10965_vm5 = vmand %vm13147_vm7, %vm13256_vm1  ;;  %v10987_v46 = vrot.slane %v4477_v50, 1  ;;  %v4491_v30 = vshll.u32 %v10959_v41, 16  ;;  %v9585_v55 = vld [vmem:[%s9789_s10 + $0x70] sm:$0xff]   ;;  %v4484_v56 = vshll.u32 %v10973_v40, 16 }
 0x15b   : > { %v1497_v14 = vld [vmem:[#allocation3 + $0x38] sm:$0x80]  ;;  %v2794_v2 = vpop.permute.xlu1 %2793  ;;  %v2690_v20 = vpop.permute.xlu0 %2689  ;;  %v13258_v36 = vsel %vm10965_vm5, 4294967295, %v13257_v36  ;;  %vm13259_vm1 = vmmov %vm13255_vm14 }
 0x15c   : > { %v1498_v26 = vsel %vm10333_vm6, 0, %v1497_v14  ;;  %2814 = vst.msk [vmem:[#allocation3 + $0x20] sm:$0xff] %vm13255_vm14, %v2794_v2  ;;  %v2721_v24 = vsel %vm10819_vm10, %v2690_v20, %v2720_v19  ;;  %v4468_v14 = vshrl.u32 %v10951_v33, 16  ;;  %v4470_v2 = vshll.u32 %v10951_v33, 16  ;;  %v10992_v20 = vld [vmem:[%s9789_s10 + $0x50] sm:$0xff]   ;;  %v2985_v19 = vld [vmem:[#allocation3 + $0x8] sm:$0xff] }
 0x15d   : > { %1499 = vst [vmem:[#allocation3 + $0x38] sm:$0x80] %v1498_v26  ;;  %2722 = vst [vmem:[#allocation3 + $0x28] sm:$0xff] %v2721_v24  ;;  %4371 = vrot.lane.b32.xlu1 %v9574_v3, %s9705_s20  ;;  %2693 = vrot.lane.b32.xlu0 %v2678_v9, %s9714_s30  ;;  %v10982_v3 = vrot.slane %v3350_v32, 7  ;;  %v4475_v9 = vshrl.u32 %v10944_v17, 16  ;;  %vm13260_vm14 = vcmask 588800  }
 0x15e   : > { %v4493_v12 = vrot.slane %v4491_v30, 1  ;;  %v4486_v49 = vrot.slane %v4484_v56, 1 }
 0x15f   : > { %v2372_v52 = vld [vmem:[#allocation3 + $0x30] sm:$0x80]  ;;  %v2957_v42 = vpop.permute.xlu1 %2956  ;;  %v2796_v58 = vpop.permute.xlu0 %2795 }
 0x160   : > { %v2373_v1 = vsel %vm10672_vm9, 0, %v2372_v52  ;;  %v2983_v62 = vsel %vm10965_vm5, %v2957_v42, %v2982_v37  ;;  %2815 = vst.msk [vmem:[#allocation3 + $0x28] sm:$0xff] %vm13259_vm1, %v2796_v58  ;;  %v11005_v42 = vld [vmem:[%s9789_s10 + $0x70] sm:$0xff]   ;;  %v4267_v37 = vor.u32 %v4265_v6, %v10938_v15  ;;  %v4489_v58 = vshrl.u32 %v10959_v41, 16  ;;  %vm13261_vm1 = vmmov %vm13260_vm14 }
 0x161   : > { %2374 = vst [vmem:[#allocation3 + $0x30] sm:$0x80] %v2373_v1  ;;  %2984 = vst [vmem:[#allocation3] sm:$0xff] %v2983_v62  ;;  %2799 = vrot.lane.b32.xlu1 %v9577_v4, %s9715_s9  ;;  %4373 = vrot.lane.b32.xlu0 %v9578_v28, %s9705_s20  ;;  %v2988_v4 = vld [vmem:[#allocation3 + $0x10] sm:$0xff]  ;;  %v4091_v48 = vshrl.u32 %v11005_v42, 16 }
 0x162   : > { %9283 = vmatprep.mubr.msk.bf16.mxu0 %vm13260_vm14, %v2983_v62  ;;  %v3357_v62 = vshrl.u32 %v10992_v20, 16  ;;  %vm13262_vm14 = vmmov %vm13261_vm1  ;;  %v4494_v25 = vor.u32 %v4493_v12, %v4489_v58  ;;  %v11084_v58 = vld [vmem:[%s9865_s18 + $0x38] sm:$0xff]  }
 0x163   : > { %v2832_v32 = vld [vmem:[#allocation3 + $0x20] sm:$0x80]  ;;  %v2961_v26 = vpop.permute.xlu1 %2960  ;;  %v2959_v24 = vpop.permute.xlu0 %2958  ;;  %vm13264_vm7 = vmmov %vm13262_vm14 }
 0x164   : > { %v2833_v28 = vsel %vm10856_vm4, 0, %v2832_v32  ;;  %v2989_v50 = vsel %vm10965_vm5, %v2961_v26, %v2988_v4  ;;  %v2986_v52 = vsel %vm10965_vm5, %v2959_v24, %v2985_v19  ;;  %v11016_v19 = vld [vmem:[%s9865_s18 + $0x40] sm:$0xff]   ;;  %v2991_v32 = vld [vmem:[#allocation3 + $0x18] sm:$0xff] }
 0x165   : > { %2834 = vst [vmem:[#allocation3 + $0x20] sm:$0x80] %v2833_v28  ;;  %2990 = vst [vmem:[#allocation3 + $0x10] sm:$0xff] %v2989_v50  ;;  %4283 = vrot.lane.b32.xlu1 %v4260_v60, %s9704_s19  ;;  %3844 = vrot.lane.b32.xlu0 %v3824_v45, %s9702_s14  ;;  %v4472_v60 = vrot.slane %v4470_v2, 1  ;;  %v1659_v4 = vld [vmem:[#allocation3 + $0x38] sm:$0xff]  ;;  %v9586_v2 = vld [vmem:[%s9789_s10 + $0x70] sm:$0xff]  }
 0x166   : > { %2987 = vst [vmem:[#allocation3 + $0x8] sm:$0xff] %v2986_v52  ;;  %9284 = vmatmul.mubr.msk.bf16.vlgmr.msra.gmra.mrb[0].mxu0 %vm13261_vm1, %v2986_v52  ;;  %vm13263_vm1 = vnez %v13174_v0  ;;  %v2950_v33 = vshrl.u32 %v11016_v19, 16 }
 0x167   : > { %v2835_v26 = vld [vmem:[#allocation3 + $0x28] sm:$0x80]  ;;  %v1627_v45 = vpop.permute.xlu1 %1626  ;;  %v2963_v24 = vpop.permute.xlu0 %2962  ;;  %9287 = vmatprep.mubr.msk.bf16.mxu0 %vm13262_vm14, %v2989_v50  ;;  %v3359_v50 = vrot.slane %v3357_v62, 7 }
 0x168   : > { %v2836_v6 = vsel %vm10856_vm4, 0, %v2835_v26  ;;  %v1660_v15 = vsel %vm10367_vm11, %v1627_v45, %v1659_v4  ;;  %v2992_v28 = vsel %vm10965_vm5, %v2963_v24, %v2991_v32  ;;  %v3254_v52 = vld [vmem:[#allocation3] sm:$0x1]  ;;  %v3360_v26 = vshll.u32 %v10992_v20, 16  ;;  %v11034_v45 = vld [vmem:[%s9789_s10 + $0x70] sm:$0xff]   ;;  %v11038_v4 = vld [vmem:[%s9789_s10 + $0x68] sm:$0xff]  }
 0x169   : > { %2837 = vst [vmem:[#allocation3 + $0x28] sm:$0x80] %v2836_v6  ;;  %1661 = vst [vmem:[#allocation3 + $0x38] sm:$0xff] %v1660_v15  ;;  %4285 = vrot.lane.b32.xlu1 %v4267_v37, %s9704_s19  ;;  %v3255_v30 = vsel %vm13263_vm1, 0, %v3254_v52  ;;  %3948 = vrot.lane.b32.xlu0 %v9585_v55, %s9701_s13  ;;  %v4093_v32 = vshll.u32 %v11005_v42, 16  ;;  %v2534_v6 = vld [vmem:[#allocation3 + $0x30] sm:$0xff]  ;;  %v4480_v20 = vor.u32 %v10987_v46, %v4475_v9 }
 0x16a   : > { %2993 = vst [vmem:[#allocation3 + $0x18] sm:$0xff] %v2992_v28  ;;  %3256 = vst [vmem:[#allocation3] sm:$0x1] %v3255_v30  ;;  %v2952_v37 = vshll.u32 %v11016_v19, 16  ;;  %v4473_v30 = vor.u32 %v4472_v60, %v4468_v14  ;;  %v11058_v9 = vld [vmem:[%s9789_s10 + $0x58] sm:$0xff]   ;;  %v3341_v46 = vor.u32 %v3339_v16, %v10940_v8  ;;  %v4498_v16 = vshll.u32 %v11038_v4, 16 }
 0x16b   : > { %v2965_v56 = vpop.permute.xlu1 %2964  ;;  %v2503_v24 = vpop.permute.xlu0 %2502  ;;  %v4095_v42 = vrot.slane %v4093_v32, 1  ;;  %v13266_v32 = vshrl.u32 %v10973_v40, 16 }
 0x16c   : > { %v2994_v15 = vld [vmem:[#allocation3 + $0x20] sm:$0xff]  ;;  %v2535_v55 = vsel %vm10736_vm3, %v2503_v24, %v2534_v6  ;;  %v3260_v52 = vld [vmem:[#allocation3 + $0x10] sm:$0x1]  ;;  %v2954_v60 = vrot.slane %v2952_v37, 1 }
 0x16d   : > { %v3257_v62 = vld [vmem:[#allocation3 + $0x8] sm:$0x1]  ;;  %v2995_v1 = vsel %vm10965_vm5, %v2965_v56, %v2994_v15  ;;  %2536 = vst [vmem:[#allocation3 + $0x30] sm:$0xff] %v2535_v55  ;;  %4377 = vrot.lane.b32.xlu1 %v9586_v2, %s9705_s20  ;;  %4375 = vrot.lane.b32.xlu0 %v9587_v10, %s9705_s20  ;;  %v3261_v17 = vsel %vm13263_vm1, 0, %v3260_v52  ;;  %v4505_v2 = vshll.u32 %v11034_v45, 16  ;;  %v11068_v56 = vld [vmem:[%s9865_s18 + $0x40] sm:$0xff]   ;;  %v4487_v37 = vor.u32 %v4486_v49, %v13266_v32 }
 0x16e   : > { %v3258_v24 = vsel %vm13263_vm1, 0, %v3257_v62  ;;  %2996 = vst [vmem:[#allocation3 + $0x20] sm:$0xff] %v2995_v1  ;;  %3262 = vst [vmem:[#allocation3 + $0x10] sm:$0x1] %v3261_v17  ;;  %9288 = vmatmul.mubr.msk.bf16.gmra.mrb[4].mxu0 %vm13262_vm14, %v2992_v28  ;;  %v13268_v55 = vshll.u32 %v10921_v31, 16  ;;  %v13269_v52 = vshll.u32 %v10925_v57, 16 }
 0x16f   : > { %3259 = vst [vmem:[#allocation3 + $0x8] sm:$0x1] %v3258_v24  ;;  %v3480_v10 = vpop.permute.xlu1 %3479  ;;  %v2967_v14 = vpop.permute.xlu0 %2966  ;;  %9291 = vmatprep.mubr.msk.bf16.mxu0 %vm13264_vm7, %v2995_v1  ;;  %vm13267_vm7 = vnez %v13176_v43  ;;  %v3364_v49 = vshrl.u32 %v11058_v9, 16  ;;  %v3362_v24 = vor.u32 %v3360_v26, %v3359_v50  ;;  %v4503_v17 = vshrl.u32 %v11034_v45, 16  ;;  %v11124_v32 = vld [vmem:[%s9865_s18 + $0x48] sm:$0xff]  }
 0x170   : > { %v1684_v19 = vld [vmem:[#allocation3 + $0x38] sm:$0x1]  ;;  %v2997_v6 = vld [vmem:[#allocation3 + $0x28] sm:$0xff]  ;;  %v3348_v62 = vor.u32 %v13268_v55, %v10975_v63  ;;  %vm13270_vm14 = vcmask 97344   ;;  %v4507_v31 = vrot.slane %v4505_v2, 1  ;;  %v4496_v63 = vshrl.u32 %v11038_v4, 16 }
 0x171   : > { %v3263_v8 = vld [vmem:[#allocation3 + $0x18] sm:$0x1]  ;;  %v1685_v28 = vsel %vm10380_vm13, 0, %v1684_v19  ;;  %v3399_v15 = vld [vmem:[#allocation3] sm:$0xff]  ;;  %v2998_v1 = vsel %vm10965_vm5, %v2967_v14, %v2997_v6  ;;  %4518 = vrot.lane.b32.xlu1 %v4480_v20, %s13265_s21  ;;  %4516 = vrot.lane.b32.xlu0 %v4473_v30, %s13265_s21  ;;  %v3355_v20 = vor.u32 %v13269_v52, %v10982_v3  ;;  %v4500_v57 = vrot.slane %v4498_v16, 1 }
 0x172   : > { %v3264_v41 = vsel %vm13263_vm1, 0, %v3263_v8  ;;  %1686 = vst [vmem:[#allocation3 + $0x38] sm:$0x1] %v1685_v28  ;;  %v3400_v12 = vsel %vm13267_vm7, %v3341_v46, %v3399_v15  ;;  %2999 = vst [vmem:[#allocation3 + $0x28] sm:$0xff] %v2998_v1  ;;  %v11097_v14 = vld [vmem:[%s9789_s10 + $0x60] sm:$0xff]   ;;  %v4647_v3 = vshrl.u32 %v11068_v56, 16  ;;  %v4096_v26 = vor.u32 %v4095_v42, %v4091_v48 }
 0x173   : > { %3265 = vst [vmem:[#allocation3 + $0x18] sm:$0x1] %v3264_v41  ;;  %3401 = vst [vmem:[#allocation3] sm:$0xff] %v3400_v12  ;;  %v1798_v40 = vpop.permute.xlu1 %1797  ;;  %v3482_v30 = vpop.permute.xlu0 %3481  ;;  %v2955_v45 = vor.u32 %v2954_v60, %v2950_v33  ;;  %v3366_v48 = vrot.slane %v3364_v49, 7  ;;  %v3371_v60 = vshrl.u32 %v11097_v14, 16  ;;  %v4650_v28 = vshll.u32 %v11068_v56, 16 }
 0x174   : > { %v2560_v46 = vld [vmem:[#allocation3 + $0x30] sm:$0x1]  ;;  %3503 = vst.msk [vmem:[#allocation3] sm:$0xff] %vm13270_vm14, %v3480_v10  ;;  %v4640_v10 = vshrl.u32 %v11084_v58, 16  ;;  %vm13271_vm14 = vcmask 588800   ;;  %vm13272_vm13 = vcmask 97344   ;;  %v4508_v41 = vor.u32 %v4507_v31, %v4503_v17 }
 0x175   : > { %v2561_v19 = vsel %vm10770_vm8, 0, %v2560_v46  ;;  %v3405_v8 = vld [vmem:[#allocation3 + $0x10] sm:$0xff]  ;;  %4522 = vrot.lane.b32.xlu1 %v4494_v25, %s13265_s21  ;;  %4520 = vrot.lane.b32.xlu0 %v4487_v37, %s13265_s21  ;;  %v3266_v50 = vld [vmem:[#allocation3 + $0x20] sm:$0x1]  ;;  %v3367_v25 = vshll.u32 %v11058_v9, 16  ;;  %vm13273_vm11 = vmmov %vm13272_vm13  ;;  %v4643_v9 = vshll.u32 %v11084_v58, 16  ;;  %v4501_v12 = vor.u32 %v4500_v57, %v4496_v63 }
 0x176   : > { %v3402_v6 = vld [vmem:[#allocation3 + $0x8] sm:$0xff]  ;;  %2562 = vst [vmem:[#allocation3 + $0x30] sm:$0x1] %v2561_v19  ;;  %v3406_v2 = vsel %vm13267_vm7, %v3355_v20, %v3405_v8  ;;  %v3267_v16 = vsel %vm13263_vm1, 0, %v3266_v50  ;;  %9292 = vmatmul.mubr.msk.bf16.gmra.mrb[8].mxu0 %vm13271_vm14, %v2998_v1  ;;  %v11118_v15 = vld [vmem:[%s9865_s18 + $0x50] sm:$0xff]   ;;  %v4649_v56 = vrot.slane %v4647_v3, 7 }
 0x177   : > { %v3403_v4 = vsel %vm13267_vm7, %v3348_v62, %v3402_v6  ;;  %3407 = vst [vmem:[#allocation3 + $0x10] sm:$0xff] %v3406_v2  ;;  %3268 = vst [vmem:[#allocation3 + $0x20] sm:$0x1] %v3267_v16  ;;  %v3486_v33 = vpop.permute.xlu1 %3485  ;;  %v3484_v42 = vpop.permute.xlu0 %3483  ;;  %v4642_v62 = vrot.slane %v4640_v10, 7  ;;  %v3373_v17 = vrot.slane %v3371_v60, 7  ;;  %v3374_v31 = vshll.u32 %v11097_v14, 16 }
 0x178   : > { %3404 = vst [vmem:[#allocation3 + $0x8] sm:$0xff] %v3403_v4  ;;  %3505 = vst.msk [vmem:[#allocation3 + $0x10] sm:$0xff] %vm13273_vm11, %v3484_v42  ;;  %vm13275_vm14 = vcmask 130144   ;;  %v4652_v57 = vor.u32 %v4650_v28, %v4649_v56  ;;  %v4654_v3 = vshrl.u32 %v11124_v32, 16  ;;  %v9603_v16 = vld [vmem:[%s9865_s18 + $0x40] sm:$0xff]   ;;  %v4664_v28 = vshll.u32 %v11118_v15, 16 }
 0x179   : > { %3504 = vst.msk [vmem:[#allocation3 + $0x8] sm:$0xff] %vm13272_vm13, %v3482_v30  ;;  %v1826_v1 = vld [vmem:[#allocation3 + $0x38] sm:$0xff]  ;;  %4116 = vrot.lane.b32.xlu1 %v4096_v26, %s9703_s15  ;;  %2970 = vrot.lane.b32.xlu0 %v2955_v45, %s9716_s16  ;;  %v3269_v55 = vld [vmem:[#allocation3 + $0x28] sm:$0x1]  ;;  %v3369_v30 = vor.u32 %v3367_v25, %v3366_v48  ;;  %vm13274_vm13 = vnez %v13180_v34  ;;  %v4645_v14 = vor.u32 %v4643_v9, %v4642_v62 }
 0x17a   : > { %v3408_v37 = vld [vmem:[#allocation3 + $0x18] sm:$0xff]  ;;  %v1827_v52 = vsel %vm10455_vm12, %v1798_v40, %v1826_v1  ;;  %v3270_v58 = vsel %vm13263_vm1, 0, %v3269_v55  ;;  %v4661_v40 = vshrl.u32 %v11118_v15, 16  ;;  %v3376_v10 = vor.u32 %v3374_v31, %v3373_v17 }
 0x17b   : > { %v3409_v20 = vsel %vm13267_vm7, %v3362_v24, %v3408_v37  ;;  %v3511_v49 = vld [vmem:[#allocation3] sm:$0x80]  ;;  %1828 = vst [vmem:[#allocation3 + $0x38] sm:$0xff] %v1827_v52  ;;  %v2692_v46 = vpop.permute.xlu1 %2691  ;;  %v1893_v19 = vpop.permute.xlu0 %1892  ;;  %3271 = vst [vmem:[#allocation3 + $0x28] sm:$0x1] %v3270_v58  ;;  %v9604_v25 = vld [vmem:[%s9865_s18 + $0x38] sm:$0xff]  }
 0x17c   : > { %3410 = vst [vmem:[#allocation3 + $0x18] sm:$0xff] %v3409_v20  ;;  %v3512_v63 = vsel %vm13274_vm13, 0, %v3511_v49  ;;  %1907 = vst.msk [vmem:[#allocation3 + $0x38] sm:$0xff] %vm13275_vm14, %v1893_v19  ;;  %v11150_v48 = vld [vmem:[%s9789_s10 + $0x78] sm:$0xff]   ;;  %v4663_v60 = vrot.slane %v4661_v40, 7  ;;  %vm13277_vm14 = vcmask 97344  }
 0x17d   : > { %3506 = vst.msk [vmem:[#allocation3 + $0x18] sm:$0xff] %vm13273_vm11, %v3486_v33  ;;  %3513 = vst [vmem:[#allocation3] sm:$0x80] %v3512_v63  ;;  %v2723_v24 = vld [vmem:[#allocation3 + $0x30] sm:$0xff]  ;;  %4526 = vrot.lane.b32.xlu1 %v4508_v41, %s13265_s21  ;;  %4524 = vrot.lane.b32.xlu0 %v4501_v12, %s13265_s21  ;;  %vm13276_vm11 = vcmask 523744   ;;  %v4656_v9 = vrot.slane %v4654_v3, 7 }
 0x17e   : > { %v3411_v6 = vld [vmem:[#allocation3 + $0x20] sm:$0xff]  ;;  %v2724_v8 = vsel %vm10819_vm10, %v2692_v46, %v2723_v24  ;;  %v4657_v1 = vshll.u32 %v11124_v32, 16  ;;  %v4269_v62 = vshrl.u32 %v11150_v48, 16  ;;  %v11170_v58 = vld [vmem:[%s9865_s18 + $0x58] sm:$0xff]   ;;  %v9607_v40 = vld [vmem:[%s9865_s18 + $0x50] sm:$0xff]  }
 0x17f   : > { %v3412_v26 = vsel %vm13267_vm7, %v3369_v30, %v3411_v6  ;;  %v3517_v45 = vld [vmem:[#allocation3 + $0x10] sm:$0x80]  ;;  %2725 = vst [vmem:[#allocation3 + $0x30] sm:$0xff] %v2724_v8  ;;  %v3488_v4 = vpop.permute.xlu1 %3487  ;;  %v2798_v2 = vpop.permute.xlu0 %2797  ;;  %v4666_v30 = vor.u32 %v4664_v28, %v4663_v60  ;;  %v11178_v19 = vld [vmem:[%s9865_s18 + $0x60] sm:$0xff]   ;;  %v9608_v24 = vld [vmem:[%s9865_s18 + $0x48] sm:$0xff]  }
 0x180   : > { %v3514_v50 = vld [vmem:[#allocation3 + $0x8] sm:$0x80]  ;;  %3413 = vst [vmem:[#allocation3 + $0x20] sm:$0xff] %v3412_v26  ;;  %2816 = vst.msk [vmem:[#allocation3 + $0x30] sm:$0xff] %vm13276_vm11, %v2798_v2  ;;  %v3518_v33 = vsel %vm13274_vm13, 0, %v3517_v45  ;;  %v4659_v46 = vor.u32 %v4657_v1, %v4656_v9  ;;  %v4675_v2 = vshrl.u32 %v11178_v19, 16 }
 0x181   : > { %v3515_v42 = vsel %vm13274_vm13, 0, %v3514_v50  ;;  %3507 = vst.msk [vmem:[#allocation3 + $0x20] sm:$0xff] %vm13277_vm14, %v3488_v4  ;;  %4697 = vrot.lane.b32.xlu1 %v4652_v57, %s9709_s23  ;;  %4695 = vrot.lane.b32.xlu0 %v4645_v14, %s9709_s23  ;;  %3519 = vst [vmem:[#allocation3 + $0x10] sm:$0x80] %v3518_v33  ;;  %v4272_v57 = vshll.u32 %v11150_v48, 16  ;;  %v4271_v50 = vrot.slane %v4269_v62, 7 }
 0x182   : > { %3516 = vst [vmem:[#allocation3 + $0x8] sm:$0x80] %v3515_v42  ;;  %v3414_v37 = vld [vmem:[#allocation3 + $0x28] sm:$0xff]  ;;  %vm13278_vm11 = vmmov %vm13277_vm14  ;;  %v4668_v4 = vshrl.u32 %v11170_v58, 16  ;;  %v9610_v42 = vld [vmem:[%s9789_s10 + $0x70] sm:$0xff]   ;;  %vm13279_vm14 = vnez %v13178_v47 }
 0x183   : > { %v1930_v12 = vld [vmem:[#allocation3 + $0x38] sm:$0x80]  ;;  %v3415_v55 = vsel %vm13267_vm7, %v3376_v10, %v3414_v37  ;;  %v3648_v56 = vpop.permute.xlu1 %3647  ;;  %v3490_v15 = vpop.permute.xlu0 %3489  ;;  %v4274_v1 = vor.u32 %v4272_v57, %v4271_v50  ;;  %v4671_v37 = vshll.u32 %v11170_v58, 16 }
 0x184   : > { %v3520_v41 = vld [vmem:[#allocation3 + $0x18] sm:$0x80]  ;;  %v1931_v52 = vsel %vm10495_vm2, 0, %v1930_v12  ;;  %3416 = vst [vmem:[#allocation3 + $0x28] sm:$0xff] %v3415_v55  ;;  %v3671_v20 = vld [vmem:[#allocation3] sm:$0xff]  ;;  %vm13285_vm2 = vnez %v13186_v51 }
 0x185   : > { %v3521_v32 = vsel %vm13274_vm13, 0, %v3520_v41  ;;  %1932 = vst [vmem:[#allocation3 + $0x38] sm:$0x80] %v1931_v52  ;;  %v3672_v49 = vsel %vm10035_vm15, %v3648_v56, %v3671_v20  ;;  %3508 = vst.msk [vmem:[#allocation3 + $0x28] sm:$0xff] %vm13278_vm11, %v3490_v15  ;;  %4801 = vrot.lane.b32.xlu1 %v9603_v16, %s9708_s22  ;;  %4799 = vrot.lane.b32.xlu0 %v9604_v25, %s9708_s22  ;;  %v11196_v16 = vld [vmem:[%s9789_s10 + $0x68] sm:$0xff]   ;;  %v11199_v25 = vld [vmem:[%s9865_s18 + $0x38] sm:$0xff]  }
 0x186   : > { %3522 = vst [vmem:[#allocation3 + $0x18] sm:$0x80] %v3521_v32  ;;  %3673 = vst [vmem:[#allocation3] sm:$0xff] %v3672_v49  ;;  %v4670_v15 = vrot.slane %v4668_v4, 7  ;;  %v11214_v52 = vld [vmem:[%s9865_s18 + $0x48] sm:$0xff]   ;;  %v9611_v58 = vld [vmem:[%s9789_s10 + $0x78] sm:$0xff]  }
 0x187   : > { %v2838_v17 = vld [vmem:[#allocation3 + $0x30] sm:$0x80]  ;;  %v3652_v31 = vpop.permute.xlu1 %3651  ;;  %v3650_v63 = vpop.permute.xlu0 %3649  ;;  %v4677_v49 = vrot.slane %v4675_v2, 7  ;;  %vm13280_vm11 = vcmask 588800   ;;  %v9613_v2 = vld [vmem:[%s9865_s18 + $0x58] sm:$0xff]  }
 0x188   : > { %v3523_v14 = vld [vmem:[#allocation3 + $0x20] sm:$0x80]  ;;  %v2839_v3 = vsel %vm10856_vm4, 0, %v2838_v17  ;;  %v3677_v6 = vld [vmem:[#allocation3 + $0x10] sm:$0xff] }
 0x189   : > { %v3674_v8 = vld [vmem:[#allocation3 + $0x8] sm:$0xff]  ;;  %2840 = vst [vmem:[#allocation3 + $0x30] sm:$0x80] %v2839_v3  ;;  %v3678_v26 = vsel %vm10035_vm15, %v3652_v31, %v3677_v6  ;;  %4701 = vrot.lane.b32.xlu1 %v4666_v30, %s9709_s23  ;;  %4699 = vrot.lane.b32.xlu0 %v4659_v46, %s9709_s23  ;;  %v3524_v10 = vsel %vm13274_vm13, 0, %v3523_v14  ;;  %v4678_v30 = vshll.u32 %v11178_v19, 16  ;;  %v4914_v46 = vshll.u32 %v11199_v25, 16 }
 0x18a   : > { %v3675_v45 = vsel %vm10035_vm15, %v3650_v63, %v3674_v8  ;;  %3679 = vst [vmem:[#allocation3 + $0x10] sm:$0xff] %v3678_v26  ;;  %3525 = vst [vmem:[#allocation3 + $0x20] sm:$0x80] %v3524_v10  ;;  %v3378_v31 = vshrl.u32 %v11196_v16, 16  ;;  %v3381_v63 = vshll.u32 %v11196_v16, 16  ;;  %v4673_v14 = vor.u32 %v4671_v37, %v4670_v15 }
 0x18b   : > { %3676 = vst [vmem:[#allocation3 + $0x8] sm:$0xff] %v3675_v45  ;;  %v2044_v48 = vpop.permute.xlu1 %2043  ;;  %v3654_v33 = vpop.permute.xlu0 %3653  ;;  %v4912_v6 = vshrl.u32 %v11199_v25, 16  ;;  %v4928_v45 = vshll.u32 %v11214_v52, 16  ;;  %v4916_v25 = vrot.slane %v4914_v46, 1  ;;  %v4926_v37 = vshrl.u32 %v11214_v52, 16  ;;  %v9617_v52 = vld [vmem:[%s9865_s18 + $0x60] sm:$0xff]  }
 0x18c   : > { %v3526_v60 = vld [vmem:[#allocation3 + $0x28] sm:$0x80]  ;;  %v2072_v28 = vld [vmem:[#allocation3 + $0x38] sm:$0xff] }
 0x18d   : > { %v3680_v9 = vld [vmem:[#allocation3 + $0x18] sm:$0xff]  ;;  %v3695_v41 = vld [vmem:[#allocation3] sm:$0x1]  ;;  %v2073_v12 = vsel %vm10540_vm0, %v2044_v48, %v2072_v28  ;;  %4805 = vrot.lane.b32.xlu1 %v9607_v40, %s9708_s22  ;;  %4803 = vrot.lane.b32.xlu0 %v9608_v24, %s9708_s22  ;;  %v3527_v56 = vsel %vm13274_vm13, 0, %v3526_v60  ;;  %v11239_v48 = vld [vmem:[%s9789_s10 + $0x70] sm:$0xff]   ;;  %v4930_v15 = vrot.slane %v4928_v45, 1  ;;  %vm13282_vm0 = vnez %v13184_v18 }
 0x18e   : > { %v3681_v55 = vsel %vm10035_vm15, %v3654_v33, %v3680_v9  ;;  %v3696_v62 = vsel %vm13279_vm14, 0, %v3695_v41  ;;  %2074 = vst [vmem:[#allocation3 + $0x38] sm:$0xff] %v2073_v12  ;;  %3528 = vst [vmem:[#allocation3 + $0x28] sm:$0x80] %v3527_v56  ;;  %v11222_v40 = vld [vmem:[%s9865_s18 + $0x40] sm:$0xff]   ;;  %v4680_v9 = vor.u32 %v4678_v30, %v4677_v49  ;;  %v11259_v49 = vld [vmem:[%s9865_s18 + $0x58] sm:$0xff]  }
 0x18f   : > { %3682 = vst [vmem:[#allocation3 + $0x18] sm:$0xff] %v3681_v55  ;;  %3697 = vst [vmem:[#allocation3] sm:$0x1] %v3696_v62  ;;  %v3656_v20 = vpop.permute.xlu1 %3655  ;;  %v2969_v32 = vpop.permute.xlu0 %2968  ;;  %v4921_v33 = vshll.u32 %v11222_v40, 16  ;;  %v3643_v46 = vshll.u32 %v11239_v48, 16 }
 0x190   : > { %v3000_v17 = vld [vmem:[#allocation3 + $0x30] sm:$0xff] }
 0x191   : > { %v3683_v24 = vld [vmem:[#allocation3 + $0x20] sm:$0xff]  ;;  %v3001_v57 = vsel %vm10965_vm5, %v2969_v32, %v3000_v17  ;;  %4287 = vrot.lane.b32.xlu1 %v4274_v1, %s9704_s19  ;;  %3493 = vrot.lane.b32.xlu0 %v9610_v42, %s9699_s11  ;;  %v3701_v3 = vld [vmem:[#allocation3 + $0x10] sm:$0x1]  ;;  %v4923_v30 = vrot.slane %v4921_v33, 1  ;;  %v4931_v33 = vor.u32 %v4930_v15, %v4926_v37 }
 0x192   : > { %v3698_v19 = vld [vmem:[#allocation3 + $0x8] sm:$0x1]  ;;  %v3684_v8 = vsel %vm10035_vm15, %v3656_v20, %v3683_v24  ;;  %3002 = vst [vmem:[#allocation3 + $0x30] sm:$0xff] %v3001_v57  ;;  %9295 = vmatprep.mubr.msk.bf16.mxu0 %vm13280_vm11, %v3001_v57  ;;  %v3702_v26 = vsel %vm13279_vm14, 0, %v3701_v3  ;;  %v11243_v42 = vld [vmem:[%s9865_s18 + $0x50] sm:$0xff]   ;;  %vm13281_vm11 = vnez %v13221_v5  ;;  %v4917_v24 = vor.u32 %v4916_v25, %v4912_v6  ;;  %v11278_v25 = vld [vmem:[%s9865_s18 + $0x40] sm:$0xff]  }
 0x193   : > { %v3699_v50 = vsel %vm13279_vm14, 0, %v3698_v19  ;;  %3685 = vst [vmem:[#allocation3 + $0x20] sm:$0xff] %v3684_v8  ;;  %v3833_v10 = vpop.permute.xlu1 %3832  ;;  %v3658_v4 = vpop.permute.xlu0 %3657  ;;  %3703 = vst [vmem:[#allocation3 + $0x10] sm:$0x1] %v3702_v26  ;;  %v4935_v57 = vshll.u32 %v11243_v42, 16  ;;  %v3380_v3 = vrot.slane %v3378_v31, 7 }
 0x194   : > { %3700 = vst [vmem:[#allocation3 + $0x8] sm:$0x1] %v3699_v50  ;;  %v3641_v6 = vshrl.u32 %v11239_v48, 16 }
 0x195   : > { %v2098_v60 = vld [vmem:[#allocation3 + $0x38] sm:$0x1]  ;;  %v3686_v28 = vld [vmem:[#allocation3 + $0x28] sm:$0xff]  ;;  %4379 = vrot.lane.b32.xlu1 %v9611_v58, %s9705_s20  ;;  %4703 = vrot.lane.b32.xlu0 %v4673_v14, %s9709_s23  ;;  %v4919_v58 = vshrl.u32 %v11222_v40, 16  ;;  %v3383_v37 = vor.u32 %v3381_v63, %v3380_v3 }
 0x196   : > { %v3704_v1 = vld [vmem:[#allocation3 + $0x18] sm:$0x1]  ;;  %v2099_v41 = vsel %vm13281_vm11, 0, %v2098_v60  ;;  %v3856_v12 = vld [vmem:[#allocation3] sm:$0xff]  ;;  %v3687_v55 = vsel %vm10035_vm15, %v3658_v4, %v3686_v28  ;;  %vm13283_vm11 = vcmask 294144   ;;  %v3645_v60 = vrot.slane %v3643_v46, 1 }
 0x197   : > { %v3705_v56 = vsel %vm13279_vm14, 0, %v3704_v1  ;;  %2100 = vst [vmem:[#allocation3 + $0x38] sm:$0x1] %v2099_v41  ;;  %v3857_v62 = vsel %vm13282_vm0, %v3833_v10, %v3856_v12  ;;  %3688 = vst [vmem:[#allocation3 + $0x28] sm:$0xff] %v3687_v55  ;;  %v3937_v20 = vpop.permute.xlu1 %3936  ;;  %v3835_v32 = vpop.permute.xlu0 %3834  ;;  %v11267_v14 = vld [vmem:[%s9789_s10 + $0x78] sm:$0xff]   ;;  %v11283_v28 = vld [vmem:[%s9865_s18 + $0x60] sm:$0xff]   ;;  %v4924_v48 = vor.u32 %v4923_v30, %v4919_v58 }
 0x198   : > { %3706 = vst [vmem:[#allocation3 + $0x18] sm:$0x1] %v3705_v56  ;;  %3858 = vst [vmem:[#allocation3] sm:$0xff] %v3857_v62  ;;  %v4937_v1 = vrot.slane %v4935_v57, 1  ;;  %v4512_v41 = vshll.u32 %v11267_v14, 16  ;;  %v3646_v30 = vor.u32 %v3645_v60, %v3641_v6  ;;  %v4949_v46 = vshll.u32 %v11283_v28, 16 }
 0x199   : > { %3960 = vst.msk [vmem:[#allocation3] sm:$0xff] %vm13283_vm11, %v3937_v20  ;;  %4807 = vrot.lane.b32.xlu1 %v9613_v2, %s9708_s22  ;;  %4705 = vrot.lane.b32.xlu0 %v4680_v9, %s9709_s23  ;;  %v3272_v17 = vld [vmem:[#allocation3 + $0x30] sm:$0x1]  ;;  %v4942_v2 = vshll.u32 %v11259_v49, 16  ;;  %v4933_v9 = vshrl.u32 %v11243_v42, 16  ;;  %v4940_v20 = vshrl.u32 %v11259_v49, 16 }
 0x19a   : > { %v3273_v19 = vsel %vm13263_vm1, 0, %v3272_v17  ;;  %v3862_v8 = vld [vmem:[#allocation3 + $0x10] sm:$0xff]  ;;  %v3707_v50 = vld [vmem:[#allocation3 + $0x20] sm:$0x1]  ;;  %v5097_v42 = vshrl.u32 %v11278_v25, 16  ;;  %v11302_v17 = vld [vmem:[%s9865_s18 + $0x48] sm:$0xff]  }
 0x19b   : > { %v3859_v40 = vld [vmem:[#allocation3 + $0x8] sm:$0xff]  ;;  %3274 = vst [vmem:[#allocation3 + $0x30] sm:$0x1] %v3273_v19  ;;  %v3837_v45 = vpop.permute.xlu1 %3836  ;;  %v3939_v10 = vpop.permute.xlu0 %3938  ;;  %v3708_v4 = vsel %vm13279_vm14, 0, %v3707_v50  ;;  %v4510_v57 = vshrl.u32 %v11267_v14, 16  ;;  %v11310_v19 = vld [vmem:[%s9865_s18 + $0x50] sm:$0xff]  }
 0x19c   : > { %v3860_v26 = vsel %vm13282_vm0, %v3835_v32, %v3859_v40  ;;  %v3863_v31 = vsel %vm13282_vm0, %v3837_v45, %v3862_v8  ;;  %3709 = vst [vmem:[#allocation3 + $0x20] sm:$0x1] %v3708_v4  ;;  %v4944_v32 = vrot.slane %v4942_v2, 1  ;;  %v4514_v40 = vrot.slane %v4512_v41, 1  ;;  %v9631_v41 = vld [vmem:[%s9865_s18 + $0x58] sm:$0xff]  }
 0x19d   : > { %3861 = vst [vmem:[#allocation3 + $0x8] sm:$0xff] %v3860_v26  ;;  %3864 = vst [vmem:[#allocation3 + $0x10] sm:$0xff] %v3863_v31  ;;  %4967 = vrot.lane.b32.xlu1 %v4917_v24, %s9710_s24  ;;  %4809 = vrot.lane.b32.xlu0 %v9617_v52, %s9708_s22  ;;  %v4938_v24 = vor.u32 %v4937_v1, %v4933_v9  ;;  %v5100_v45 = vshll.u32 %v11278_v25, 16  ;;  %v5099_v4 = vrot.slane %v5097_v42, 7  ;;  %v4951_v2 = vrot.slane %v4949_v46, 1 }
 0x19e   : > { %3961 = vst.msk [vmem:[#allocation3 + $0x8] sm:$0xff] %vm13283_vm11, %v3939_v10  ;;  %v2260_v12 = vld [vmem:[#allocation3 + $0x38] sm:$0xff]  ;;  %v3710_v56 = vld [vmem:[#allocation3 + $0x28] sm:$0x1]  ;;  %vm13284_vm11 = vnez %v13224_v7  ;;  %v4947_v10 = vshrl.u32 %v11283_v28, 16  ;;  %v4945_v14 = vor.u32 %v4944_v32, %v4940_v20  ;;  %v4515_v31 = vor.u32 %v4514_v40, %v4510_v57 }
 0x19f   : > { %v3865_v55 = vld [vmem:[#allocation3 + $0x18] sm:$0xff]  ;;  %v2228_v15 = vpop.permute.xlu1 %2227  ;;  %v3839_v62 = vpop.permute.xlu0 %3838  ;;  %v3711_v52 = vsel %vm13279_vm14, 0, %v3710_v56  ;;  %v5111_v60 = vshrl.u32 %v11310_v19, 16  ;;  %v5107_v56 = vshll.u32 %v11302_v17, 16  ;;  %v5114_v20 = vshll.u32 %v11310_v19, 16 }
 0x1a0   : > { %v3968_v58 = vld [vmem:[#allocation3] sm:$0x80]  ;;  %v2261_v16 = vsel %vm13284_vm11, %v2228_v15, %v2260_v12  ;;  %v3866_v63 = vsel %vm13282_vm0, %v3839_v62, %v3865_v55  ;;  %3712 = vst [vmem:[#allocation3 + $0x28] sm:$0x1] %v3711_v52  ;;  %vm13286_vm11 = vcmask 294144   ;;  %v11325_v28 = vld [vmem:[%s9789_s10 + $0x78] sm:$0xff]   ;;  %v5102_v12 = vor.u32 %v5100_v45, %v5099_v4 }
 0x1a1   : > { %v3969_v49 = vsel %vm13285_vm2, 0, %v3968_v58  ;;  %2262 = vst [vmem:[#allocation3 + $0x38] sm:$0xff] %v2261_v16  ;;  %3867 = vst [vmem:[#allocation3 + $0x18] sm:$0xff] %v3866_v63  ;;  %4971 = vrot.lane.b32.xlu1 %v4931_v33, %s9710_s24  ;;  %4969 = vrot.lane.b32.xlu0 %v4924_v48, %s9710_s24  ;;  %v5104_v33 = vshrl.u32 %v11302_v17, 16  ;;  %v4952_v55 = vor.u32 %v4951_v2, %v4947_v10  ;;  %v5113_v62 = vrot.slane %v5111_v60, 7  ;;  %v9629_v10 = vld [vmem:[%s9865_s18 + $0x48] sm:$0xff]  }
 0x1a2   : > { %3970 = vst [vmem:[#allocation3] sm:$0x80] %v3969_v49  ;;  %v3417_v3 = vld [vmem:[#allocation3 + $0x30] sm:$0xff]  ;;  %vm13287_vm12 = vmmov %vm13286_vm11  ;;  %v3826_v32 = vshrl.u32 %v11325_v28, 16  ;;  %v5118_v46 = vshrl.u32 %v9631_v41, 16  ;;  %v3829_v19 = vshll.u32 %v11325_v28, 16 }
 0x1a3   : > { %v3418_v8 = vsel %vm13267_vm7, %v3383_v37, %v3417_v3  ;;  %v3943_v50 = vpop.permute.xlu1 %3942  ;;  %v3941_v26 = vpop.permute.xlu0 %3940  ;;  %v3868_v9 = vld [vmem:[#allocation3 + $0x20] sm:$0xff]  ;;  %v5106_v15 = vrot.slane %v5104_v33, 7  ;;  %v5121_v3 = vshll.u32 %v9631_v41, 16  ;;  %v5116_v2 = vor.u32 %v5114_v20, %v5113_v62 }
 0x1a4   : > { %3419 = vst [vmem:[#allocation3 + $0x30] sm:$0xff] %v3418_v8  ;;  %3963 = vst.msk [vmem:[#allocation3 + $0x18] sm:$0xff] %vm13286_vm11, %v3943_v50  ;;  %vm13289_vm11 = vcmask 97344   ;;  %v3828_v40 = vrot.slane %v3826_v32, 7  ;;  %v9634_v8 = vld [vmem:[%s9865_s18 + $0x68] sm:$0xff]   ;;  %v11356_v33 = vld [vmem:[%s9865_s18 + $0x60] sm:$0xff]  }
 0x1a5   : > { %v3971_v6 = vld [vmem:[#allocation3 + $0x8] sm:$0x80]  ;;  %3962 = vst.msk [vmem:[#allocation3 + $0x10] sm:$0xff] %vm13287_vm12, %v3941_v26  ;;  %3661 = vrot.lane.b32.xlu1 %v3646_v30, %s9700_s12  ;;  %4973 = vrot.lane.b32.xlu0 %v4938_v24, %s9710_s24  ;;  %vm13288_vm12 = vcmask 326944   ;;  %v9626_v30 = vld [vmem:[%s9865_s18 + $0x40] sm:$0xff]   ;;  %v5109_v57 = vor.u32 %v5107_v56, %v5106_v15  ;;  %v4685_v15 = vshll.u32 %v9634_v8, 16 }
 0x1a6   : > { %v3972_v25 = vsel %vm13285_vm2, 0, %v3971_v6 }
 0x1a7   : > { %3973 = vst [vmem:[#allocation3 + $0x8] sm:$0x80] %v3972_v25  ;;  %v3841_v48 = vpop.permute.xlu1 %3840  ;;  %v2334_v1 = vpop.permute.xlu0 %2333  ;;  %v3871_v16 = vld [vmem:[#allocation3 + $0x28] sm:$0xff] }
 0x1a8   : > { %v3869_v37 = vsel %vm13282_vm0, %v3841_v48, %v3868_v9  ;;  %2351 = vst.msk [vmem:[#allocation3 + $0x38] sm:$0xff] %vm13288_vm12, %v2334_v1  ;;  %vm13290_vm12 = vcmask 294144  }
 0x1a9   : > { %3870 = vst [vmem:[#allocation3 + $0x20] sm:$0xff] %v3869_v37  ;;  %4975 = vrot.lane.b32.xlu1 %v4945_v14, %s9710_s24  ;;  %4528 = vrot.lane.b32.xlu0 %v4515_v31, %s13265_s21  ;;  %v5120_v14 = vrot.slane %v5118_v46, 7  ;;  %v4128_v4 = vld [vmem:[#allocation3] sm:$0xff]  ;;  %v4682_v31 = vshrl.u32 %v9634_v8, 16  ;;  %v3831_v37 = vor.u32 %v3829_v19, %v3828_v40 }
 0x1aa   : > { %v11382_v8 = vld [vmem:[%s9865_s18 + $0x40] sm:$0xff]  }
 0x1ab   : > { %v3977_v52 = vld [vmem:[#allocation3 + $0x18] sm:$0x80]  ;;  %v3843_v58 = vpop.permute.xlu1 %3842  ;;  %v3492_v63 = vpop.permute.xlu0 %3491  ;;  %v4684_v56 = vrot.slane %v4682_v31, 7 }
 0x1ac   : > { %v3974_v42 = vld [vmem:[#allocation3 + $0x10] sm:$0x80]  ;;  %v3872_v17 = vsel %vm13282_vm0, %v3843_v58, %v3871_v16  ;;  %3509 = vst.msk [vmem:[#allocation3 + $0x30] sm:$0xff] %vm13289_vm11, %v3492_v63  ;;  %v3978_v49 = vsel %vm13285_vm2, 0, %v3977_v52  ;;  %vm13291_vm11 = vmmov %vm13290_vm12  ;;  %v5125_v58 = vshrl.u32 %v11356_v33, 16  ;;  %v9635_v31 = vld [vmem:[%s9789_s10 + $0x78] sm:$0xff]  }
 0x1ad   : > { %v3975_v24 = vsel %vm13285_vm2, 0, %v3974_v42  ;;  %3873 = vst [vmem:[#allocation3 + $0x28] sm:$0xff] %v3872_v17  ;;  %5152 = vrot.lane.b32.xlu1 %v5102_v12, %s9711_s25  ;;  %4977 = vrot.lane.b32.xlu0 %v4952_v55, %s9710_s24  ;;  %3979 = vst [vmem:[#allocation3 + $0x18] sm:$0x80] %v3978_v49  ;;  %v5123_v12 = vor.u32 %v5121_v3, %v5120_v14  ;;  %v9633_v49 = vld [vmem:[%s9865_s18 + $0x50] sm:$0xff]   ;;  %v5128_v3 = vshll.u32 %v11356_v33, 16 }
 0x1ae   : > { %3976 = vst [vmem:[#allocation3 + $0x10] sm:$0x80] %v3975_v24  ;;  %v4131_v28 = vld [vmem:[#allocation3 + $0x8] sm:$0xff]  ;;  %v5127_v14 = vrot.slane %v5125_v58, 7 }
 0x1af   : > { %v2375_v50 = vld [vmem:[#allocation3 + $0x38] sm:$0x80]  ;;  %v3947_v26 = vpop.permute.xlu1 %3946  ;;  %v3945_v45 = vpop.permute.xlu0 %3944  ;;  %v9639_v24 = vld [vmem:[%s9865_s18 + $0x68] sm:$0xff]  }
 0x1b0   : > { %v2376_v6 = vsel %vm10672_vm9, 0, %v2375_v50  ;;  %3965 = vst.msk [vmem:[#allocation3 + $0x28] sm:$0xff] %vm13290_vm12, %v3947_v26  ;;  %vm13292_vm9 = vnez %v13188_v38  ;;  %vm13293_vm12 = vnez %v13190_v21 }
 0x1b1   : > { %3964 = vst.msk [vmem:[#allocation3 + $0x20] sm:$0xff] %vm13291_vm11, %v3945_v45  ;;  %2377 = vst [vmem:[#allocation3 + $0x38] sm:$0x80] %v2376_v6  ;;  %5256 = vrot.lane.b32.xlu1 %v9626_v30, %s9712_s26  ;;  %5154 = vrot.lane.b32.xlu0 %v5109_v57, %s9711_s25  ;;  %v9632_v30 = vld [vmem:[%s9865_s18 + $0x58] sm:$0xff]   ;;  %vm13294_vm11 = vnez %v13192_v59 }
 0x1b3   : > { %v3529_v25 = vld [vmem:[#allocation3 + $0x30] sm:$0x80]  ;;  %v4107_v60 = vpop.permute.xlu1 %4106  ;;  %v4105_v48 = vpop.permute.xlu0 %4104 }
 0x1b4   : > { %v4132_v9 = vsel %vm13292_vm9, %v4107_v60, %v4131_v28  ;;  %v4129_v1 = vsel %vm13292_vm9, %v4105_v48, %v4128_v4  ;;  %v3530_v41 = vsel %vm13274_vm13, 0, %v3529_v25  ;;  %v4137_v55 = vld [vmem:[#allocation3 + $0x18] sm:$0xff]  ;;  %v5132_v25 = vshrl.u32 %v9639_v24, 16  ;;  %v11396_v48 = vld [vmem:[%s9865_s18 + $0x50] sm:$0xff]  }
 0x1b5   : > { %4133 = vst [vmem:[#allocation3 + $0x8] sm:$0xff] %v4132_v9  ;;  %4130 = vst [vmem:[#allocation3] sm:$0xff] %v4129_v1  ;;  %5156 = vrot.lane.b32.xlu1 %v5116_v2, %s9711_s25  ;;  %5258 = vrot.lane.b32.xlu0 %v9629_v10, %s9712_s26  ;;  %v4134_v42 = vld [vmem:[#allocation3 + $0x10] sm:$0xff]  ;;  %v4687_v10 = vor.u32 %v4685_v15, %v4684_v56 }
 0x1b6   : > { %3531 = vst [vmem:[#allocation3 + $0x30] sm:$0x80] %v3530_v41  ;;  %v5130_v41 = vor.u32 %v5128_v3, %v5127_v14 }
 0x1b7   : > { %v3983_v62 = vld [vmem:[#allocation3 + $0x28] sm:$0x80]  ;;  %v4111_v32 = vpop.permute.xlu1 %4110  ;;  %v4109_v52 = vpop.permute.xlu0 %4108 }
 0x1b8   : > { %v3980_v20 = vld [vmem:[#allocation3 + $0x20] sm:$0x80]  ;;  %v4138_v16 = vsel %vm13292_vm9, %v4111_v32, %v4137_v55  ;;  %v4135_v63 = vsel %vm13292_vm9, %v4109_v52, %v4134_v42  ;;  %v3984_v46 = vsel %vm13285_vm2, 0, %v3983_v62  ;;  %v2537_v19 = vld [vmem:[#allocation3 + $0x38] sm:$0xff]  ;;  %v5371_v55 = vshll.u32 %v11382_v8, 16  ;;  %v9636_v62 = vld [vmem:[%s9865_s18 + $0x68] sm:$0xff]  }
 0x1b9   : > { %v3981_v17 = vsel %vm13285_vm2, 0, %v3980_v20  ;;  %4139 = vst [vmem:[#allocation3 + $0x18] sm:$0xff] %v4138_v16  ;;  %4136 = vst [vmem:[#allocation3 + $0x10] sm:$0xff] %v4135_v63  ;;  %3846 = vrot.lane.b32.xlu1 %v3831_v37, %s9702_s14  ;;  %5158 = vrot.lane.b32.xlu0 %v5123_v12, %s9711_s25  ;;  %v5135_v37 = vshll.u32 %v9639_v24, 16  ;;  %v5134_v20 = vrot.slane %v5132_v25, 7  ;;  %v11409_v42 = vld [vmem:[%s9865_s18 + $0x48] sm:$0xff]  }
 0x1ba   : > { %3985 = vst [vmem:[#allocation3 + $0x28] sm:$0x80] %v3984_v46  ;;  %3982 = vst [vmem:[#allocation3 + $0x20] sm:$0x80] %v3981_v17  ;;  %v11417_v46 = vld [vmem:[%s9865_s18 + $0x58] sm:$0xff]   ;;  %v5369_v24 = vshrl.u32 %v11382_v8, 16 }
 0x1bb   : > { %v3660_v57 = vpop.permute.xlu1 %3659  ;;  %v2505_v40 = vpop.permute.xlu0 %2504  ;;  %v11436_v25 = vld [vmem:[%s9865_s18 + $0x60] sm:$0xff]  }
 0x1bc   : > { %v4155_v50 = vld [vmem:[#allocation3] sm:$0x1]  ;;  %v2538_v45 = vsel %vm10736_vm3, %v2505_v40, %v2537_v19  ;;  %v4158_v6 = vld [vmem:[#allocation3 + $0x8] sm:$0x1]  ;;  %v5385_v40 = vshll.u32 %v11396_v48, 16 }
 0x1bd   : > { %v3689_v26 = vld [vmem:[#allocation3 + $0x30] sm:$0xff]  ;;  %v4156_v4 = vsel %vm13293_vm12, 0, %v4155_v50  ;;  %2539 = vst [vmem:[#allocation3 + $0x38] sm:$0xff] %v2538_v45  ;;  %5262 = vrot.lane.b32.xlu1 %v9632_v30, %s9712_s26  ;;  %5260 = vrot.lane.b32.xlu0 %v9633_v49, %s9712_s26  ;;  %v4159_v33 = vsel %vm13293_vm12, 0, %v4158_v6  ;;  %v11414_v30 = vld [vmem:[%s9789_s10 + $0x78] sm:$0xff]   ;;  %v9638_v49 = vld [vmem:[%s9865_s18 + $0x60] sm:$0xff]  }
 0x1be   : > { %v3690_v2 = vsel %vm10035_vm15, %v3660_v57, %v3689_v26  ;;  %4157 = vst [vmem:[#allocation3] sm:$0x1] %v4156_v4  ;;  %4160 = vst [vmem:[#allocation3 + $0x8] sm:$0x1] %v4159_v33  ;;  %v5373_v57 = vrot.slane %v5371_v55, 1  ;;  %v5137_v26 = vor.u32 %v5135_v37, %v5134_v20  ;;  %v5378_v45 = vshll.u32 %v11409_v42, 16 }
 0x1bf   : > { %3691 = vst [vmem:[#allocation3 + $0x30] sm:$0xff] %v3690_v2  ;;  %v4115_v60 = vpop.permute.xlu1 %4114  ;;  %v4113_v28 = vpop.permute.xlu0 %4112  ;;  %v5392_v33 = vshll.u32 %v11417_v46, 16  ;;  %v11446_v55 = vld [vmem:[%s9865_s18 + $0x68] sm:$0xff]  }
 0x1c0   : > { %v4164_v12 = vld [vmem:[#allocation3 + $0x18] sm:$0x1]  ;;  %v4161_v52 = vld [vmem:[#allocation3 + $0x10] sm:$0x1]  ;;  %v5380_v37 = vrot.slane %v5378_v45, 1 }
 0x1c1   : > { %v4143_v9 = vld [vmem:[#allocation3 + $0x28] sm:$0xff]  ;;  %v4140_v1 = vld [vmem:[#allocation3 + $0x20] sm:$0xff]  ;;  %4707 = vrot.lane.b32.xlu1 %v4687_v10, %s9709_s23  ;;  %3950 = vrot.lane.b32.xlu0 %v9635_v31, %s9701_s13  ;;  %v4165_v32 = vsel %vm13293_vm12, 0, %v4164_v12  ;;  %v4162_v58 = vsel %vm13293_vm12, 0, %v4161_v52  ;;  %v4100_v31 = vshll.u32 %v11414_v30, 16 }
 0x1c2   : > { %v4144_v56 = vsel %vm13292_vm9, %v4115_v60, %v4143_v9  ;;  %v4141_v15 = vsel %vm13292_vm9, %v4113_v28, %v4140_v1  ;;  %4166 = vst [vmem:[#allocation3 + $0x18] sm:$0x1] %v4165_v32  ;;  %4163 = vst [vmem:[#allocation3 + $0x10] sm:$0x1] %v4162_v58  ;;  %v9641_v60 = vld [vmem:[%s9865_s18 + $0x68] sm:$0xff]   ;;  %v5383_v28 = vshrl.u32 %v11396_v48, 16 }
 0x1c3   : > { %4145 = vst [vmem:[#allocation3 + $0x28] sm:$0xff] %v4144_v56  ;;  %4142 = vst [vmem:[#allocation3 + $0x20] sm:$0xff] %v4141_v15  ;;  %v4278_v16 = vpop.permute.xlu1 %4277  ;;  %v4276_v63 = vpop.permute.xlu0 %4275  ;;  %v5387_v9 = vrot.slane %v5385_v40, 1  ;;  %v5376_v1 = vshrl.u32 %v11409_v42, 16  ;;  %v4098_v15 = vshrl.u32 %v11414_v30, 16  ;;  %v4102_v58 = vrot.slane %v4100_v31, 1 }
 0x1c4   : > { %v2563_v17 = vld [vmem:[#allocation3 + $0x38] sm:$0x1] }
 0x1c5   : > { %v2564_v19 = vsel %vm10770_vm8, 0, %v2563_v17  ;;  %v4299_v3 = vld [vmem:[#allocation3 + $0x8] sm:$0xff]  ;;  %v4296_v50 = vld [vmem:[#allocation3] sm:$0xff]  ;;  %4811 = vrot.lane.b32.xlu1 %v9636_v62, %s9708_s22  ;;  %5160 = vrot.lane.b32.xlu0 %v5130_v41, %s9711_s25  ;;  %vm13295_vm8 = vcmask 490944   ;;  %v5374_v41 = vor.u32 %v5373_v57, %v5369_v24  ;;  %v5399_v17 = vshll.u32 %v11436_v25, 16 }
 0x1c6   : > { %v3713_v10 = vld [vmem:[#allocation3 + $0x30] sm:$0x1]  ;;  %2565 = vst [vmem:[#allocation3 + $0x38] sm:$0x1] %v2564_v19  ;;  %v4300_v8 = vsel %vm13294_vm11, %v4278_v16, %v4299_v3  ;;  %v4297_v6 = vsel %vm13294_vm11, %v4276_v63, %v4296_v50  ;;  %vm13296_vm3 = vmmov %vm13295_vm8  ;;  %v5390_v16 = vshrl.u32 %v11417_v46, 16  ;;  %v5394_v63 = vrot.slane %v5392_v33, 1 }
 0x1c7   : > { %v3714_v14 = vsel %vm13279_vm14, 0, %v3713_v10  ;;  %4301 = vst [vmem:[#allocation3 + $0x8] sm:$0xff] %v4300_v8  ;;  %4298 = vst [vmem:[#allocation3] sm:$0xff] %v4297_v6  ;;  %v4370_v4 = vpop.permute.xlu1 %4369  ;;  %v4368_v2 = vpop.permute.xlu0 %4367  ;;  %v9648_v24 = vld [vmem:[%s9865_s18 + $0x48] sm:$0xff]   ;;  %v6129_v57 = vld [vmem:[#allocation4 + $0x10] sm:$0x1]  ;;  %v5388_v46 = vor.u32 %v5387_v9, %v5383_v28  ;;  %v5381_v40 = vor.u32 %v5380_v37, %v5376_v1 }
 0x1c8   : > { %3715 = vst [vmem:[#allocation3 + $0x30] sm:$0x1] %v3714_v14  ;;  %4389 = vst.msk [vmem:[#allocation3 + $0x8] sm:$0xff] %vm13295_vm8, %v4370_v4  ;;  %v4956_v19 = vshll.u32 %v11446_v55, 16  ;;  %v9649_v3 = vld [vmem:[%s9865_s18 + $0x68] sm:$0xff]   ;;  %v6130_v50 = vsel %vm13263_vm1, 0, %v6129_v57  ;;  %v4103_v4 = vor.u32 %v4102_v58, %v4098_v15 }
 0x1c9   : > { %4388 = vst.msk [vmem:[#allocation3] sm:$0xff] %vm13296_vm3, %v4368_v2  ;;  %5264 = vrot.lane.b32.xlu1 %v9638_v49, %s9712_s26  ;;  %5162 = vrot.lane.b32.xlu0 %v5137_v26, %s9711_s25  ;;  %v4305_v32 = vld [vmem:[#allocation3 + $0x18] sm:$0xff]  ;;  %v4302_v42 = vld [vmem:[#allocation3 + $0x10] sm:$0xff]  ;;  %v5397_v26 = vshrl.u32 %v11436_v25, 16  ;;  %6131 = vst [vmem:[#allocation4 + $0x10] sm:$0x1] %v6130_v50  ;;  %v5395_v2 = vor.u32 %v5394_v63, %v5390_v16 }
 0x1ca   : > { %v4167_v12 = vld [vmem:[#allocation3 + $0x20] sm:$0x1]  ;;  %v4170_v56 = vld [vmem:[#allocation3 + $0x28] sm:$0x1]  ;;  %v5401_v31 = vrot.slane %v5399_v17, 1  ;;  %v4954_v1 = vshrl.u32 %v11446_v55, 16 }
 0x1cb   : > { %v4168_v62 = vsel %vm13293_vm12, 0, %v4167_v12  ;;  %v4171_v48 = vsel %vm13293_vm12, 0, %v4170_v56  ;;  %v4282_v20 = vpop.permute.xlu1 %4281  ;;  %v4280_v52 = vpop.permute.xlu0 %4279  ;;  %v6126_v9 = vld [vmem:[#allocation4 + $0x8] sm:$0x1]  ;;  %v5406_v37 = vshll.u32 %v9649_v3, 16  ;;  %v9651_v12 = vld [vmem:[%s9865_s18 + $0x50] sm:$0xff]  }
 0x1cc   : > { %4169 = vst [vmem:[#allocation3 + $0x20] sm:$0x1] %v4168_v62  ;;  %4172 = vst [vmem:[#allocation3 + $0x28] sm:$0x1] %v4171_v48  ;;  %v4306_v30 = vsel %vm13294_vm11, %v4282_v20, %v4305_v32  ;;  %v4303_v49 = vsel %vm13294_vm11, %v4280_v52, %v4302_v42  ;;  %v6127_v56 = vsel %vm13263_vm1, 0, %v6126_v9  ;;  %vm13297_vm8 = vcmask 523744  }
 0x1cd   : > { %4307 = vst [vmem:[#allocation3 + $0x18] sm:$0xff] %v4306_v30  ;;  %4304 = vst [vmem:[#allocation3 + $0x10] sm:$0xff] %v4303_v49  ;;  %5424 = vrot.lane.b32.xlu1 %v5374_v41, %s9713_s29  ;;  %5266 = vrot.lane.b32.xlu0 %v9641_v60, %s9712_s26  ;;  %v2726_v14 = vld [vmem:[#allocation3 + $0x38] sm:$0xff]  ;;  %v5546_v60 = vshrl.u32 %v9648_v24, 16  ;;  %v4958_v41 = vrot.slane %v4956_v19, 1  ;;  %v5402_v48 = vor.u32 %v5401_v31, %v5397_v26  ;;  %v5549_v32 = vshll.u32 %v9648_v24, 16 }
 0x1ce   : > { %6128 = vst [vmem:[#allocation4 + $0x8] sm:$0x1] %v6127_v56  ;;  %v5404_v52 = vshrl.u32 %v9649_v3, 16  ;;  %v5408_v42 = vrot.slane %v5406_v37, 1  ;;  %v5553_v58 = vshrl.u32 %v9651_v12, 16  ;;  %v9652_v16 = vld [vmem:[%s9865_s18 + $0x58] sm:$0xff]  }
 0x1cf   : > { %v4400_v45 = vld [vmem:[#allocation3 + $0x8] sm:$0x80]  ;;  %v4372_v8 = vpop.permute.xlu1 %4371  ;;  %v2694_v6 = vpop.permute.xlu0 %2693  ;;  %v5548_v20 = vrot.slane %v5546_v60, 7  ;;  %v4959_v55 = vor.u32 %v4958_v41, %v4954_v1  ;;  %v3874_v57 = vld [vmem:[#allocation3 + $0x30] sm:$0xff]  ;;  %v5556_v26 = vshll.u32 %v9651_v12, 16 }
 0x1d0   : > { %v4397_v10 = vld [vmem:[#allocation3] sm:$0x80]  ;;  %4390 = vst.msk [vmem:[#allocation3 + $0x10] sm:$0xff] %vm13296_vm3, %v4372_v8  ;;  %v2727_v33 = vsel %vm10819_vm10, %v2694_v6, %v2726_v14  ;;  %v4401_v28 = vsel %vm10333_vm6, 0, %v4400_v45  ;;  %v5409_v3 = vor.u32 %v5408_v42, %v5404_v52  ;;  %v5555_v50 = vrot.slane %v5553_v58, 7  ;;  %v9650_v41 = vld [vmem:[%s9865_s18 + $0x48] sm:$0xff]  }
 0x1d1   : > { %v4398_v25 = vsel %vm10333_vm6, 0, %v4397_v10  ;;  %2728 = vst [vmem:[#allocation3 + $0x38] sm:$0xff] %v2727_v33  ;;  %5428 = vrot.lane.b32.xlu1 %v5388_v46, %s9713_s29  ;;  %5426 = vrot.lane.b32.xlu0 %v5381_v40, %s9713_s29  ;;  %4402 = vst [vmem:[#allocation3 + $0x8] sm:$0x80] %v4401_v28  ;;  %v5551_v40 = vor.u32 %v5549_v32, %v5548_v20  ;;  %v5560_v45 = vshrl.u32 %v9652_v16, 16  ;;  %v9655_v10 = vld [vmem:[%s9865_s18 + $0x60] sm:$0xff]  }
 0x1d2   : > { %4399 = vst [vmem:[#allocation3] sm:$0x80] %v4398_v25  ;;  %v5563_v6 = vshll.u32 %v9652_v16, 16  ;;  %v6135_v14 = vld [vmem:[#allocation4 + $0x20] sm:$0x1]  ;;  %v5558_v37 = vor.u32 %v5556_v26, %v5555_v50  ;;  %v5567_v56 = vshrl.u32 %v9655_v10, 16 }
 0x1d3   : > { %v2800_v15 = vpop.permute.xlu1 %2799  ;;  %v4374_v62 = vpop.permute.xlu0 %4373  ;;  %v4308_v30 = vld [vmem:[#allocation3 + $0x20] sm:$0xff]  ;;  %v4311_v8 = vld [vmem:[#allocation3 + $0x28] sm:$0xff]  ;;  %v6132_v60 = vld [vmem:[#allocation4 + $0x18] sm:$0x1]  ;;  %v5562_v12 = vrot.slane %v5560_v45, 7  ;;  %v5570_v58 = vshll.u32 %v9655_v10, 16 }
 0x1d4   : > { %2817 = vst.msk [vmem:[#allocation3 + $0x38] sm:$0xff] %vm13297_vm8, %v2800_v15  ;;  %vm13298_vm8 = vcmask 294144   ;;  %v6133_v1 = vsel %vm13263_vm1, 0, %v6132_v60  ;;  %v11507_v15 = vld [vmem:[%s9865_s18 + $0x70] sm:$0xff]   ;;  %v5569_v42 = vrot.slane %v5567_v56, 7 }
 0x1d5   : > { %4391 = vst.msk [vmem:[#allocation3 + $0x18] sm:$0xff] %vm13296_vm3, %v4374_v62  ;;  %4118 = vrot.lane.b32.xlu1 %v4103_v4, %s9703_s15  ;;  %5430 = vrot.lane.b32.xlu0 %v5395_v2, %s9713_s29  ;;  %6134 = vst [vmem:[#allocation4 + $0x18] sm:$0x1] %v6133_v1  ;;  %v6136_v62 = vsel %vm13263_vm1, 0, %v6135_v14  ;;  %v9653_v52 = vld [vmem:[%s9865_s18 + $0x50] sm:$0xff]   ;;  %v4689_v16 = vshrl.u32 %v11507_v15, 16 }
 0x1d6   : > { %6137 = vst [vmem:[#allocation4 + $0x20] sm:$0x1] %v6136_v62  ;;  %v6138_v50 = vld [vmem:[#allocation4 + $0x28] sm:$0x1]  ;;  %v5572_v14 = vor.u32 %v5570_v58, %v5569_v42 }
 0x1d7   : > { %v4403_v63 = vld [vmem:[#allocation3 + $0x10] sm:$0x80]  ;;  %v4284_v17 = vpop.permute.xlu1 %4283  ;;  %v3845_v49 = vpop.permute.xlu0 %3844 }
 0x1d8   : > { %v4309_v46 = vsel %vm13294_vm11, %v4284_v17, %v4308_v30  ;;  %v3875_v24 = vsel %vm13282_vm0, %v3845_v49, %v3874_v57  ;;  %v4404_v19 = vsel %vm10333_vm6, 0, %v4403_v63  ;;  %v11521_v63 = vld [vmem:[%s9865_s18 + $0x68] sm:$0xff]   ;;  %v6141_v57 = vld [vmem:[#allocation4 + $0x30] sm:$0x1] }
 0x1d9   : > { %4310 = vst [vmem:[#allocation3 + $0x20] sm:$0xff] %v4309_v46  ;;  %3876 = vst [vmem:[#allocation3 + $0x30] sm:$0xff] %v3875_v24  ;;  %5432 = vrot.lane.b32.xlu1 %v5402_v48, %s9713_s29  ;;  %4979 = vrot.lane.b32.xlu0 %v4959_v55, %s9710_s24  ;;  %v11512_v48 = vld [vmem:[%s9865_s18 + $0x70] sm:$0xff]   ;;  %v5565_v55 = vor.u32 %v5563_v6, %v5562_v12  ;;  %v4540_v17 = vld [vmem:[#allocation3 + $0x8] sm:$0xff] }
 0x1da   : > { %4405 = vst [vmem:[#allocation3 + $0x10] sm:$0x80] %v4404_v19  ;;  %v4537_v30 = vld [vmem:[#allocation3] sm:$0xff]  ;;  %v5139_v49 = vshrl.u32 %v11512_v48, 16  ;;  %v9654_v6 = vld [vmem:[%s9865_s18 + $0x58] sm:$0xff]   ;;  %v5142_v60 = vshll.u32 %v11512_v48, 16 }
 0x1db   : > { %v2841_v4 = vld [vmem:[#allocation3 + $0x38] sm:$0x80]  ;;  %v4286_v31 = vpop.permute.xlu1 %4285  ;;  %v3949_v33 = vpop.permute.xlu0 %3948  ;;  %v9680_v19 = vld [vmem:[%s13098_s2] sm:$0xff]   ;;  %v9681_v48 = vld [vmem:[%s13098_s2 + $0x8] sm:$0xff]  }
 0x1dc   : > { %v4406_v2 = vld [vmem:[#allocation3 + $0x18] sm:$0x80]  ;;  %v2842_v28 = vsel %vm10856_vm4, 0, %v2841_v4  ;;  %v4312_v25 = vsel %vm13294_vm11, %v4286_v31, %v4311_v8  ;;  %3966 = vst.msk [vmem:[#allocation3 + $0x30] sm:$0xff] %vm13298_vm8, %v3949_v33  ;;  %vm13299_vm8 = vmmov %vm13296_vm3  ;;  %v6139_v8 = vsel %vm13263_vm1, 0, %v6138_v50  ;;  %v4691_v4 = vrot.slane %v4689_v16, 7  ;;  %9299 = vmatprep.subr.bf16.mxu1 %v9680_v19 }
 0x1dd   : > { %v4407_v9 = vsel %vm10333_vm6, 0, %v4406_v2  ;;  %2843 = vst [vmem:[#allocation3 + $0x38] sm:$0x80] %v2842_v28  ;;  %4313 = vst [vmem:[#allocation3 + $0x28] sm:$0xff] %v4312_v25  ;;  %5594 = vrot.lane.b32.xlu1 %v5551_v40, %s9714_s30  ;;  %5434 = vrot.lane.b32.xlu0 %v5409_v3, %s9713_s29  ;;  %v6142_v3 = vsel %vm13263_vm1, 0, %v6141_v57  ;;  %v4692_v2 = vshll.u32 %v11507_v15, 16 }
 0x1de   : > { %4408 = vst [vmem:[#allocation3 + $0x18] sm:$0x80] %v4407_v9  ;;  %6143 = vst [vmem:[#allocation4 + $0x30] sm:$0x1] %v6142_v3  ;;  %v5141_v33 = vrot.slane %v5139_v49, 7  ;;  %9300 = vmatpush3.bf16.msra.mxu1 %v9680_v19  ;;  %v5577_v16 = vshll.u32 %v11521_v63, 16 }
 0x1df   : > { %v4378_v20 = vpop.permute.xlu1 %4377  ;;  %v4376_v32 = vpop.permute.xlu0 %4375  ;;  %6140 = vst [vmem:[#allocation4 + $0x28] sm:$0x1] %v6139_v8  ;;  %9301 = vmatprep.subr.bf16.mxu1 %v9681_v48  ;;  %vm13304_vm4 = vcmask 1043456  }
 0x1e0   : > { %4393 = vst.msk [vmem:[#allocation3 + $0x28] sm:$0xff] %vm13296_vm3, %v4378_v20  ;;  %vm13300_vm3 = vnez %v13196_v13  ;;  %v4694_v20 = vor.u32 %v4692_v2, %v4691_v4  ;;  %v11585_v4 = vld [vmem:[%s9865_s18 + $0x58] sm:$0xff]   ;;  %v11588_v2 = vld [vmem:[%s9865_s18 + $0x50] sm:$0xff]   ;;  %vm13305_vm10 = vmmov %vm13304_vm4 }
 0x1e1   : > { %4392 = vst.msk [vmem:[#allocation3 + $0x20] sm:$0xff] %vm13299_vm8, %v4376_v32  ;;  %5686 = vrot.lane.b32.xlu1 %v9650_v41, %s9715_s9  ;;  %5596 = vrot.lane.b32.xlu0 %v5558_v37, %s9714_s30  ;;  %v4543_v31 = vld [vmem:[#allocation3 + $0x10] sm:$0xff]  ;;  %v5574_v37 = vshrl.u32 %v11521_v63, 16  ;;  %v9657_v32 = vld [vmem:[%s9865_s18 + $0x60] sm:$0xff]   ;;  %vm13301_vm8 = vnez %v13199_v27  ;;  %v5801_v21 = vshrl.u32 %v11585_v4, 16 }
 0x1e2   : > { %9302 = vmatpush3.bf16.msra.mxu1 %v9681_v48  ;;  %v9659_v63 = vld [vmem:[%s9865_s18 + $0x70] sm:$0xff]  }
 0x1e3   : > { %v3986_v46 = vld [vmem:[#allocation3 + $0x30] sm:$0x80]  ;;  %v4519_v24 = vpop.permute.xlu1 %4518  ;;  %v4517_v40 = vpop.permute.xlu0 %4516  ;;  %v5576_v19 = vrot.slane %v5574_v37, 7 }
 0x1e4   : > { %v4541_v26 = vsel %vm13300_vm3, %v4519_v24, %v4540_v17  ;;  %v4538_v45 = vsel %vm13300_vm3, %v4517_v40, %v4537_v30  ;;  %v3987_v10 = vsel %vm13285_vm2, 0, %v3986_v46  ;;  %v3003_v58 = vld [vmem:[#allocation3 + $0x38] sm:$0xff]  ;;  %v11562_v17 = vld [vmem:[%s9789_s10 + $0x70] sm:$0xff]   ;;  %v11565_v30 = vld [vmem:[%s9865_s18 + $0x48] sm:$0xff]   ;;  %v5144_v46 = vor.u32 %v5142_v60, %v5141_v33 }
 0x1e5   : > { %4542 = vst [vmem:[#allocation3 + $0x8] sm:$0xff] %v4541_v26  ;;  %4539 = vst [vmem:[#allocation3] sm:$0xff] %v4538_v45  ;;  %5598 = vrot.lane.b32.xlu1 %v5565_v55, %s9714_s30  ;;  %5688 = vrot.lane.b32.xlu0 %v9653_v52, %s9715_s9  ;;  %v4546_v1 = vld [vmem:[#allocation3 + $0x18] sm:$0xff]  ;;  %v11558_v55 = vld [vmem:[%s9865_s18 + $0x70] sm:$0xff]   ;;  %v5579_v60 = vor.u32 %v5577_v16, %v5576_v19  ;;  %v5803_v16 = vshll.u32 %v11585_v4, 16 }
 0x1e6   : > { %3988 = vst [vmem:[#allocation3 + $0x30] sm:$0x80] %v3987_v10  ;;  %v5581_v45 = vshrl.u32 %v11558_v55, 16  ;;  %v9682_v10 = vld [vmem:[%s13098_s2 + $0x10] sm:$0xff]  }
 0x1e7   : > { %v4412_v28 = vld [vmem:[#allocation3 + $0x28] sm:$0x80]  ;;  %v4523_v9 = vpop.permute.xlu1 %4522  ;;  %v4521_v41 = vpop.permute.xlu0 %4520  ;;  %9303 = vmatprep.subr.bf16.mxu1 %v9682_v10  ;;  %v9660_v37 = vld [vmem:[%s9865_s18 + $0x70] sm:$0xff]  }
 0x1e8   : > { %v4409_v25 = vld [vmem:[#allocation3 + $0x20] sm:$0x80]  ;;  %v4547_v12 = vsel %vm13300_vm3, %v4523_v9, %v4546_v1  ;;  %v4544_v56 = vsel %vm13300_vm3, %v4521_v41, %v4543_v31  ;;  %v4413_v15 = vsel %vm10333_vm6, 0, %v4412_v28  ;;  %v5584_v28 = vshll.u32 %v11558_v55, 16  ;;  %9304 = vmatpush3.bf16.msra.mxu1 %v9682_v10 }
 0x1e9   : > { %v4410_v62 = vsel %vm10333_vm6, 0, %v4409_v25  ;;  %4548 = vst [vmem:[#allocation3 + $0x18] sm:$0xff] %v4547_v12  ;;  %4545 = vst [vmem:[#allocation3 + $0x10] sm:$0xff] %v4544_v56  ;;  %5690 = vrot.lane.b32.xlu1 %v9654_v6, %s9715_s9  ;;  %5600 = vrot.lane.b32.xlu0 %v5572_v14, %s9714_s30  ;;  %v3385_v14 = vshrl.u32 %v11562_v17, 16  ;;  %v5789_v9 = vshll.u32 %v11565_v30, 16  ;;  %v5583_v12 = vrot.slane %v5581_v45, 7 }
 0x1ea   : > { %4414 = vst [vmem:[#allocation3 + $0x28] sm:$0x80] %v4413_v15  ;;  %4411 = vst [vmem:[#allocation3 + $0x20] sm:$0x80] %v4410_v62  ;;  %v9683_v62 = vld [vmem:[%s13098_s2 + $0x18] sm:$0xff]  }
 0x1eb   : > { %v4117_v52 = vpop.permute.xlu1 %4116  ;;  %v2971_v42 = vpop.permute.xlu0 %2970  ;;  %v3387_v55 = vrot.slane %v3385_v14, 7  ;;  %9305 = vmatprep.subr.bf16.mxu1 %v9683_v62 }
 0x1ec   : > { %v3004_v57 = vsel %vm10965_vm5, %v2971_v42, %v3003_v58  ;;  %v4561_v24 = vld [vmem:[#allocation3 + $0x8] sm:$0x1]  ;;  %v4558_v40 = vld [vmem:[#allocation3] sm:$0x1]  ;;  %vm13302_vm5 = vcmask 588800   ;;  %v5787_v58 = vshrl.u32 %v11565_v30, 16  ;;  %9306 = vmatpush3.bf16.msra.mxu1 %v9683_v62 }
 0x1ed   : > { %v4146_v49 = vld [vmem:[#allocation3 + $0x30] sm:$0xff]  ;;  %3005 = vst [vmem:[#allocation3 + $0x38] sm:$0xff] %v3004_v57  ;;  %4709 = vrot.lane.b32.xlu1 %v4694_v20, %s9709_s23  ;;  %5692 = vrot.lane.b32.xlu0 %v9657_v32, %s9715_s9  ;;  %v4562_v50 = vsel %vm13301_vm8, 0, %v4561_v24  ;;  %v4559_v26 = vsel %vm13301_vm8, 0, %v4558_v40  ;;  %v9663_v42 = vld [vmem:[%s9865_s18 + $0x68] sm:$0xff]   ;;  %v11615_v24 = vld [vmem:[%s9865_s18 + $0x60] sm:$0xff]  }
 0x1ee   : > { %v4147_v3 = vsel %vm13292_vm9, %v4117_v52, %v4146_v49  ;;  %4563 = vst [vmem:[#allocation3 + $0x8] sm:$0x1] %v4562_v50  ;;  %4560 = vst [vmem:[#allocation3] sm:$0x1] %v4559_v26  ;;  %9296 = vmatmul.mubr.msk.bf16.gmra.mrb[12].mxu0 %vm13302_vm5, %v3004_v57  ;;  %v3388_v52 = vshll.u32 %v11562_v17, 16  ;;  %v11611_v49 = vld [vmem:[%s9865_s18 + $0x70] sm:$0xff]   ;;  %vm13303_vm5 = vnez %v13203_v44 }
 0x1ef   : > { %4148 = vst [vmem:[#allocation3 + $0x30] sm:$0xff] %v4147_v3  ;;  %v4527_v8 = vpop.permute.xlu1 %4526  ;;  %v4525_v6 = vpop.permute.xlu0 %4524  ;;  %v9684_v40 = vld [vmem:[%s13098_s2 + $0x20] ss:$0 sps:$4 sm:$0xff]   ;;  %v5586_v3 = vor.u32 %v5584_v28, %v5583_v12  ;;  %v5794_v28 = vshrl.u32 %v11588_v2, 16  ;;  %v11645_v12 = vld [vmem:[%s9865_s18 + $0x68] sm:$0xff]  }
 0x1f0   : > { %v4567_v25 = vld [vmem:[#allocation3 + $0x18] sm:$0x1]  ;;  %v4564_v15 = vld [vmem:[#allocation3 + $0x10] sm:$0x1]  ;;  %9370 = vmatprep.subr.msk.bf16.mxu1 %vm13304_vm4, %v9684_v40  ;;  %v3390_v4 = vor.u32 %v3388_v52, %v3387_v55 }
 0x1f1   : > { %v4552_v31 = vld [vmem:[#allocation3 + $0x28] sm:$0xff]  ;;  %v4549_v33 = vld [vmem:[#allocation3 + $0x20] sm:$0xff]  ;;  %5164 = vrot.lane.b32.xlu1 %v5144_v46, %s9711_s25  ;;  %4813 = vrot.lane.b32.xlu0 %v9659_v63, %s9708_s22  ;;  %v4568_v56 = vsel %vm13301_vm8, 0, %v4567_v25  ;;  %v4565_v48 = vsel %vm13301_vm8, 0, %v4564_v15  ;;  %v5796_v46 = vshll.u32 %v11588_v2, 16  ;;  %v5791_v63 = vrot.slane %v5789_v9, 1 }
 0x1f2   : > { %v4553_v1 = vsel %vm13300_vm3, %v4527_v8, %v4552_v31  ;;  %v4550_v41 = vsel %vm13300_vm3, %v4525_v6, %v4549_v33  ;;  %4569 = vst [vmem:[#allocation3 + $0x18] sm:$0x1] %v4568_v56  ;;  %4566 = vst [vmem:[#allocation3 + $0x10] sm:$0x1] %v4565_v48  ;;  %v5946_v8 = vsel %vm13305_vm10, %v9684_v40, 0  ;;  %v4963_v31 = vshll.u32 %v11611_v49, 16 }
 0x1f3   : > { %4554 = vst [vmem:[#allocation3 + $0x28] sm:$0xff] %v4553_v1  ;;  %4551 = vst [vmem:[#allocation3 + $0x20] sm:$0xff] %v4550_v41  ;;  %v4698_v20 = vpop.permute.xlu1 %4697  ;;  %v4696_v32 = vpop.permute.xlu0 %4695  ;;  %v9666_v33 = vld [vmem:[%s9865_s18 + $0x70] sm:$0xff]   ;;  %v5798_v25 = vrot.slane %v5796_v46, 1  ;;  %9308 = vmatpush3.bf16.msra.mxu1 %v5946_v8  ;;  %v5792_v1 = vor.u32 %v5791_v63, %v5787_v58  ;;  %v5810_v41 = vshll.u32 %v11615_v24, 16  ;;  %vm13310_vm10 = vnez %v13209_v23 }
 0x1f4   : > { %v3275_v57 = vld [vmem:[#allocation3 + $0x38] sm:$0x1]  ;;  %v11639_v9 = vld [vmem:[%s9865_s18 + $0x70] sm:$0xff]   ;;  %v4965_v58 = vrot.slane %v4963_v31, 1 }
 0x1f5   : > { %v4722_v17 = vld [vmem:[#allocation3 + $0x8] sm:$0xff]  ;;  %v4719_v19 = vld [vmem:[#allocation3] sm:$0xff]  ;;  %5268 = vrot.lane.b32.xlu1 %v9660_v37, %s9712_s26  ;;  %5602 = vrot.lane.b32.xlu0 %v5579_v60, %s9714_s30  ;;  %v3276_v30 = vsel %vm13263_vm1, 0, %v3275_v57  ;;  %vm13306_vm1 = vcmask 130144   ;;  %v5805_v60 = vrot.slane %v5803_v16, 1  ;;  %v5413_v57 = vshll.u32 %v11639_v9, 16 }
 0x1f6   : > { %v4173_v50 = vld [vmem:[#allocation3 + $0x30] sm:$0x1]  ;;  %v4723_v26 = vsel %vm13303_vm5, %v4698_v20, %v4722_v17  ;;  %v4720_v45 = vsel %vm13303_vm5, %v4696_v32, %v4719_v19  ;;  %3277 = vst [vmem:[#allocation3 + $0x38] sm:$0x1] %v3276_v30  ;;  %vm13307_vm9 = vmmov %vm13306_vm1  ;;  %v5808_v17 = vshrl.u32 %v11615_v24, 16  ;;  %v5812_v19 = vrot.slane %v5810_v41, 1 }
 0x1f7   : > { %v4174_v10 = vsel %vm13293_vm12, 0, %v4173_v50  ;;  %4724 = vst [vmem:[#allocation3 + $0x8] sm:$0xff] %v4723_v26  ;;  %4721 = vst [vmem:[#allocation3] sm:$0xff] %v4720_v45  ;;  %v4802_v6 = vpop.permute.xlu1 %4801  ;;  %v4800_v14 = vpop.permute.xlu0 %4799  ;;  %v5806_v52 = vor.u32 %v5805_v60, %v5801_v21  ;;  %v9673_v46 = vld [vmem:[%s9865_s18 + $0x70] sm:$0xff]   ;;  %v5817_v30 = vshll.u32 %v11645_v12, 16  ;;  %v5415_v24 = vrot.slane %v5413_v57, 1 }
 0x1f8   : > { %4175 = vst [vmem:[#allocation3 + $0x30] sm:$0x1] %v4174_v10  ;;  %4824 = vst.msk [vmem:[#allocation3 + $0x8] sm:$0xff] %vm13306_vm1, %v4802_v6  ;;  %v5411_v6 = vshrl.u32 %v11639_v9, 16  ;;  %v5813_v21 = vor.u32 %v5812_v19, %v5808_v17  ;;  %v5815_v60 = vshrl.u32 %v11645_v12, 16  ;;  %v9675_v9 = vld [vmem:[%s9865_s18 + $0x78] sm:$0xff]  }
 0x1f9   : > { %4823 = vst.msk [vmem:[#allocation3] sm:$0xff] %vm13307_vm9, %v4800_v14  ;;  %5694 = vrot.lane.b32.xlu1 %v9663_v42, %s9715_s9  ;;  %5604 = vrot.lane.b32.xlu0 %v5586_v3, %s9714_s30  ;;  %v4728_v48 = vld [vmem:[#allocation3 + $0x18] sm:$0xff]  ;;  %v4725_v32 = vld [vmem:[#allocation3 + $0x10] sm:$0xff]  ;;  %v4961_v42 = vshrl.u32 %v11611_v49, 16  ;;  %v5799_v49 = vor.u32 %v5798_v25, %v5794_v28  ;;  %vm13308_vm4 = vmmov %vm13306_vm1  ;;  %v5824_v14 = vshll.u32 %v9673_v46, 16  ;;  %v5819_v28 = vrot.slane %v5817_v30, 1 }
 0x1fa   : > { %v4570_v37 = vld [vmem:[#allocation3 + $0x20] sm:$0x1]  ;;  %v4573_v56 = vld [vmem:[#allocation3 + $0x28] sm:$0x1]  ;;  %v9674_v3 = vld [vmem:[%s9865_s18 + $0x78] sm:$0xff]   ;;  %vm13312_vm12 = vcmask 490944  }
 0x1fb   : > { %v4571_v2 = vsel %vm13301_vm8, 0, %v4570_v37  ;;  %v4574_v15 = vsel %vm13301_vm8, 0, %v4573_v56  ;;  %v4702_v62 = vpop.permute.xlu1 %4701  ;;  %v4700_v20 = vpop.permute.xlu0 %4699  ;;  %v4966_v8 = vor.u32 %v4965_v58, %v4961_v42  ;;  %vm13309_vm9 = vmmov %vm13306_vm1  ;;  %v5146_v25 = vshrl.u32 %v9674_v3, 16 }
 0x1fc   : > { %4572 = vst [vmem:[#allocation3 + $0x20] sm:$0x1] %v4571_v2  ;;  %4575 = vst [vmem:[#allocation3 + $0x28] sm:$0x1] %v4574_v15  ;;  %v4729_v16 = vsel %vm13303_vm5, %v4702_v62, %v4728_v48  ;;  %v4726_v55 = vsel %vm13303_vm5, %v4700_v20, %v4725_v32  ;;  %vm13311_vm1 = vcmask 97344   ;;  %v5822_v2 = vshrl.u32 %v9673_v46, 16 }
 0x1fd   : > { %v3420_v40 = vld [vmem:[#allocation3 + $0x38] sm:$0xff]  ;;  %4730 = vst [vmem:[#allocation3 + $0x18] sm:$0xff] %v4729_v16  ;;  %4727 = vst [vmem:[#allocation3 + $0x10] sm:$0xff] %v4726_v55  ;;  %5835 = vrot.lane.b32.xlu1 %v5792_v1, %s9716_s16  ;;  %5696 = vrot.lane.b32.xlu0 %v9666_v33, %s9715_s9  ;;  %v5826_v15 = vrot.slane %v5824_v14, 1  ;;  %v5820_v12 = vor.u32 %v5819_v28, %v5815_v60  ;;  %v5148_v62 = vrot.slane %v5146_v25, 7  ;;  %v5149_v48 = vshll.u32 %v9674_v3, 16 }
 0x1fe   : > { %v3421_v63 = vsel %vm13267_vm7, %v3390_v4, %v3420_v40  ;;  %v5416_v4 = vor.u32 %v5415_v24, %v5411_v6  ;;  %v5588_v20 = vshrl.u32 %v9675_v9, 16  ;;  %v9678_v32 = vld [vmem:[%s9865_s18 + $0x78] sm:$0xff]   ;;  %v5591_v19 = vshll.u32 %v9675_v9, 16 }
 0x1ff   : > { %3422 = vst [vmem:[#allocation3 + $0x38] sm:$0xff] %v3421_v63  ;;  %v4834_v50 = vld [vmem:[#allocation3 + $0x8] sm:$0x80]  ;;  %v4806_v45 = vpop.permute.xlu1 %4805  ;;  %v4804_v10 = vpop.permute.xlu0 %4803  ;;  %v4314_v41 = vld [vmem:[#allocation3 + $0x30] sm:$0xff]  ;;  %v5827_v57 = vor.u32 %v5826_v15, %v5822_v2  ;;  %v5420_v30 = vshll.u32 %v9678_v32, 16  ;;  %v9679_v3 = vld [vmem:[%s9865_s18 + $0x78] sm:$0xff]  }
 0x200   : > { %v4831_v26 = vld [vmem:[#allocation3] sm:$0x80]  ;;  %4826 = vst.msk [vmem:[#allocation3 + $0x18] sm:$0xff] %vm13308_vm4, %v4806_v45  ;;  %v4835_v33 = vsel %vm13310_vm10, 0, %v4834_v50  ;;  %v5590_v17 = vrot.slane %v5588_v20, 7  ;;  %v9676_v24 = vld [vmem:[%s9865_s18 + $0x78] sm:$0xff]  }
 0x201   : > { %4825 = vst.msk [vmem:[#allocation3 + $0x10] sm:$0xff] %vm13309_vm9, %v4804_v10  ;;  %v4832_v31 = vsel %vm13310_vm10, 0, %v4831_v26  ;;  %5839 = vrot.lane.b32.xlu1 %v5806_v52, %s9716_s16  ;;  %5837 = vrot.lane.b32.xlu0 %v5799_v49, %s9716_s16  ;;  %4836 = vst [vmem:[#allocation3 + $0x8] sm:$0x80] %v4835_v33  ;;  %v5151_v49 = vor.u32 %v5149_v48, %v5148_v62  ;;  %v5418_v14 = vshrl.u32 %v9678_v32, 16  ;;  %v5831_v33 = vshll.u32 %v9679_v3, 16 }
 0x202   : > { %4833 = vst [vmem:[#allocation3] sm:$0x80] %v4832_v31  ;;  %v5593_v6 = vor.u32 %v5591_v19, %v5590_v17  ;;  %v5422_v31 = vrot.slane %v5420_v30, 1 }
 0x203   : > { %v4288_v1 = vpop.permute.xlu1 %4287  ;;  %v3494_v37 = vpop.permute.xlu0 %3493  ;;  %v4731_v55 = vld [vmem:[#allocation3 + $0x20] sm:$0xff]  ;;  %v4734_v45 = vld [vmem:[#allocation3 + $0x28] sm:$0xff] }
 0x204   : > { %v4315_v56 = vsel %vm13294_vm11, %v4288_v1, %v4314_v41  ;;  %3510 = vst.msk [vmem:[#allocation3 + $0x38] sm:$0xff] %vm13311_vm1, %v3494_v37  ;;  %vm13313_vm11 = vmmov %vm13308_vm4  ;;  %vm13314_vm4 = vnez %v13216_v61  ;;  %v9677_v1 = vld [vmem:[%s9865_s18 + $0x78] sm:$0xff]   ;;  %v5423_v41 = vor.u32 %v5422_v31, %v5418_v14  ;;  %v5829_v37 = vshrl.u32 %v9679_v3, 16 }
 0x205   : > { %4316 = vst [vmem:[#allocation3 + $0x30] sm:$0xff] %v4315_v56  ;;  %4981 = vrot.lane.b32.xlu1 %v4966_v8, %s9710_s24  ;;  %5841 = vrot.lane.b32.xlu0 %v5813_v21, %s9716_s16  ;;  %v5833_v56 = vrot.slane %v5831_v33, 1  ;;  %vm13320_vm1 = vnez %v13228_v22 }
 0x207   : > { %v4840_v42 = vld [vmem:[#allocation3 + $0x18] sm:$0x80]  ;;  %v4380_v16 = vpop.permute.xlu1 %4379  ;;  %v4704_v59 = vpop.permute.xlu0 %4703  ;;  %v5834_v32 = vor.u32 %v5833_v56, %v5829_v37 }
 0x208   : > { %v4837_v58 = vld [vmem:[#allocation3 + $0x10] sm:$0x80]  ;;  %4394 = vst.msk [vmem:[#allocation3 + $0x30] sm:$0xff] %vm13312_vm12, %v4380_v16  ;;  %v4732_v52 = vsel %vm13303_vm5, %v4704_v59, %v4731_v55  ;;  %v4841_v40 = vsel %vm13310_vm10, 0, %v4840_v42  ;;  %v4994_v62 = vld [vmem:[#allocation3 + $0x8] sm:$0xff] }
 0x209   : > { %v4838_v46 = vsel %vm13310_vm10, 0, %v4837_v58  ;;  %4733 = vst [vmem:[#allocation3 + $0x20] sm:$0xff] %v4732_v52  ;;  %5436 = vrot.lane.b32.xlu0 %v5416_v4, %s9713_s29  ;;  %5843 = vrot.lane.b32.xlu1 %v5820_v12, %s9716_s16  ;;  %4842 = vst [vmem:[#allocation3 + $0x18] sm:$0x80] %v4841_v40  ;;  %v4991_v28 = vld [vmem:[#allocation3] sm:$0xff] }
 0x20a   : > { %4839 = vst [vmem:[#allocation3 + $0x10] sm:$0x80] %v4838_v46 }
 0x20b   : > { %v3532_v63 = vld [vmem:[#allocation3 + $0x38] sm:$0x80]  ;;  %v4808_v50 = vpop.permute.xlu1 %4807  ;;  %v4706_v26 = vpop.permute.xlu0 %4705 }
 0x20c   : > { %4827 = vst.msk [vmem:[#allocation3 + $0x20] sm:$0xff] %vm13313_vm11, %v4808_v50  ;;  %v4735_v10 = vsel %vm13303_vm5, %v4706_v26, %v4734_v45  ;;  %v3533_v8 = vsel %vm13274_vm13, 0, %v3532_v63  ;;  %vm13315_vm13 = vmmov %vm13309_vm9 }
 0x20d   : > { %4736 = vst [vmem:[#allocation3 + $0x28] sm:$0xff] %v4735_v10  ;;  %5845 = vrot.lane.b32.xlu0 %v5827_v57, %s9716_s16  ;;  %5166 = vrot.lane.b32.xlu1 %v5151_v49, %s9711_s25  ;;  %3534 = vst [vmem:[#allocation3 + $0x38] sm:$0x80] %v3533_v8 }
 0x20f   : > { %v4415_v21 = vld [vmem:[#allocation3 + $0x30] sm:$0x80]  ;;  %v4968_v60 = vpop.permute.xlu1 %4967  ;;  %v4810_v25 = vpop.permute.xlu0 %4809 }
 0x210   : > { %v4992_v34 = vsel %vm13314_vm4, %v4968_v60, %v4991_v28  ;;  %4828 = vst.msk [vmem:[#allocation3 + $0x28] sm:$0xff] %vm13315_vm13, %v4810_v25  ;;  %v4416_v9 = vsel %vm10333_vm6, 0, %v4415_v21  ;;  %v5000_v55 = vld [vmem:[#allocation3 + $0x18] sm:$0xff]  ;;  %vm13316_vm6 = vnez %v13221_v5  ;;  %vm13323_vm13 = vcmask 294144  }
 0x211   : > { %4993 = vst [vmem:[#allocation3] sm:$0xff] %v4992_v34  ;;  %5606 = vrot.lane.b32.xlu1 %v5593_v6, %s9714_s30  ;;  %4417 = vst [vmem:[#allocation3 + $0x30] sm:$0x80] %v4416_v9  ;;  %5270 = vrot.lane.b32.xlu0 %v9676_v24, %s9712_s26  ;;  %v4997_v15 = vld [vmem:[#allocation3 + $0x10] sm:$0xff] }
 0x213   : > { %v4843_v4 = vld [vmem:[#allocation3 + $0x20] sm:$0x80]  ;;  %v4972_v2 = vpop.permute.xlu1 %4971  ;;  %v4970_v12 = vpop.permute.xlu0 %4969 }
 0x214   : > { %v4998_v48 = vsel %vm13314_vm4, %v4972_v2, %v4997_v15  ;;  %v4995_v39 = vsel %vm13314_vm4, %v4970_v12, %v4994_v62  ;;  %v4844_v20 = vsel %vm13310_vm10, 0, %v4843_v4  ;;  %v3692_v16 = vld [vmem:[#allocation3 + $0x38] sm:$0xff] }
 0x215   : > { %4999 = vst [vmem:[#allocation3 + $0x10] sm:$0xff] %v4998_v48  ;;  %4996 = vst [vmem:[#allocation3 + $0x8] sm:$0xff] %v4995_v39  ;;  %5698 = vrot.lane.b32.xlu0 %v9677_v1, %s9715_s9  ;;  %5438 = vrot.lane.b32.xlu1 %v5423_v41, %s9713_s29 }
 0x216   : > { %4845 = vst [vmem:[#allocation3 + $0x20] sm:$0x80] %v4844_v20 }
 0x217   : > { %v4846_v42 = vld [vmem:[#allocation3 + $0x28] sm:$0x80]  ;;  %v3662_v58 = vpop.permute.xlu1 %3661  ;;  %v4974_v59 = vpop.permute.xlu0 %4973 }
 0x218   : > { %v3693_v52 = vsel %vm10035_vm15, %v3662_v58, %v3692_v16  ;;  %v5001_v57 = vsel %vm13314_vm4, %v4974_v59, %v5000_v55  ;;  %v5015_v46 = vld [vmem:[#allocation3] sm:$0x1]  ;;  %v4847_v40 = vsel %vm13310_vm10, 0, %v4846_v42  ;;  %v4555_v11 = vld [vmem:[#allocation3 + $0x30] sm:$0xff]  ;;  %vm13317_vm15 = vnez %v13224_v7 }
 0x219   : > { %3694 = vst [vmem:[#allocation3 + $0x38] sm:$0xff] %v3693_v52  ;;  %5002 = vst [vmem:[#allocation3 + $0x18] sm:$0xff] %v5001_v57  ;;  %v5016_v49 = vsel %vm13316_vm6, 0, %v5015_v46  ;;  %5847 = vrot.lane.b32.xlu0 %v5834_v32, %s9716_s16 }
 0x21a   : > { %4848 = vst [vmem:[#allocation3 + $0x28] sm:$0x80] %v4847_v40  ;;  %5017 = vst [vmem:[#allocation3] sm:$0x1] %v5016_v49 }
 0x21b   : > { %v4976_v17 = vpop.permute.xlu1 %4975  ;;  %v4529_v19 = vpop.permute.xlu0 %4528 }
 0x21c   : > { %v4556_v3 = vsel %vm13300_vm3, %v4529_v19, %v4555_v11  ;;  %v5018_v63 = vld [vmem:[#allocation3 + $0x8] sm:$0x1]  ;;  %v5021_v50 = vld [vmem:[#allocation3 + $0x10] sm:$0x1]  ;;  %vm13318_vm3 = vcmask 326944  }
 0x21d   : > { %v5003_v30 = vld [vmem:[#allocation3 + $0x20] sm:$0xff]  ;;  %4557 = vst [vmem:[#allocation3 + $0x30] sm:$0xff] %v4556_v3  ;;  %v5019_v45 = vsel %vm13316_vm6, 0, %v5018_v63  ;;  %v5022_v10 = vsel %vm13316_vm6, 0, %v5021_v50  ;;  %vm13319_vm9 = vmmov %vm13318_vm3 }
 0x21e   : > { %v5004_v26 = vsel %vm13314_vm4, %v4976_v17, %v5003_v30  ;;  %5020 = vst [vmem:[#allocation3 + $0x8] sm:$0x1] %v5019_v45  ;;  %5023 = vst [vmem:[#allocation3 + $0x10] sm:$0x1] %v5022_v10  ;;  %v11769_v3 = vld [vmem:[%s13099_s3] ss:$0 sm:$0xff] }
 0x21f   : > { %5005 = vst [vmem:[#allocation3 + $0x20] sm:$0xff] %v5004_v26  ;;  %v5153_v8 = vpop.permute.xlu1 %5152  ;;  %v4978_v6 = vpop.permute.xlu0 %4977  ;;  %vm13321_vm12 = vmmov %vm13318_vm3 }
 0x220   : > { %v3716_v13 = vld [vmem:[#allocation3 + $0x38] sm:$0x1]  ;;  %vm13322_vm11 = vmmov %vm13318_vm3 }
 0x221   : > { %v5006_v24 = vld [vmem:[#allocation3 + $0x28] sm:$0xff]  ;;  %v5024_v14 = vld [vmem:[#allocation3 + $0x18] sm:$0x1]  ;;  %v5176_v31 = vld [vmem:[#allocation3] sm:$0xff]  ;;  %v3717_v21 = vsel %vm13279_vm14, 0, %v3716_v13 }
 0x222   : > { %v5007_v33 = vsel %vm13314_vm4, %v4978_v6, %v5006_v24  ;;  %v5025_v60 = vsel %vm13316_vm6, 0, %v5024_v14  ;;  %v5177_v28 = vsel %vm13317_vm15, %v5153_v8, %v5176_v31  ;;  %3718 = vst [vmem:[#allocation3 + $0x38] sm:$0x1] %v3717_v21  ;;  %v11782_v31 = vld [vmem:[%s13100_s4] ss:$0 sm:$0xff] }
 0x223   : > { %5008 = vst [vmem:[#allocation3 + $0x28] sm:$0xff] %v5007_v33  ;;  %5026 = vst [vmem:[#allocation3 + $0x18] sm:$0x1] %v5025_v60  ;;  %v5257_v25 = vpop.permute.xlu1 %5256  ;;  %v5155_v34 = vpop.permute.xlu0 %5154 }
 0x224   : > { %5178 = vst [vmem:[#allocation3] sm:$0xff] %v5177_v28  ;;  %v4576_v9 = vld [vmem:[#allocation3 + $0x30] sm:$0x1] }
 0x225   : > { %5280 = vst.msk [vmem:[#allocation3] sm:$0xff] %vm13318_vm3, %v5257_v25  ;;  %v5179_v1 = vld [vmem:[#allocation3 + $0x8] sm:$0xff]  ;;  %v4577_v41 = vsel %vm13301_vm8, 0, %v4576_v9  ;;  %v5182_v15 = vld [vmem:[#allocation3 + $0x10] sm:$0xff]  ;;  %vm13324_vm3 = vcmask 130144  }
 0x226   : > { %v5027_v37 = vld [vmem:[#allocation3 + $0x20] sm:$0x1]  ;;  %v5180_v56 = vsel %vm13317_vm15, %v5155_v34, %v5179_v1  ;;  %4578 = vst [vmem:[#allocation3 + $0x30] sm:$0x1] %v4577_v41 }
 0x227   : > { %v5028_v4 = vsel %vm13316_vm6, 0, %v5027_v37  ;;  %5181 = vst [vmem:[#allocation3 + $0x8] sm:$0xff] %v5180_v56  ;;  %v5157_v2 = vpop.permute.xlu1 %5156  ;;  %v5259_v12 = vpop.permute.xlu0 %5258 }
 0x228   : > { %5029 = vst [vmem:[#allocation3 + $0x20] sm:$0x1] %v5028_v4  ;;  %v5183_v62 = vsel %vm13317_vm15, %v5157_v2, %v5182_v15  ;;  %5281 = vst.msk [vmem:[#allocation3 + $0x8] sm:$0xff] %vm13319_vm9, %v5259_v12 }
 0x229   : > { %5184 = vst [vmem:[#allocation3 + $0x10] sm:$0xff] %v5183_v62  ;;  %v3877_v42 = vld [vmem:[#allocation3 + $0x38] sm:$0xff] }
 0x22a   : > { %v5030_v48 = vld [vmem:[#allocation3 + $0x28] sm:$0x1]  ;;  %v5185_v16 = vld [vmem:[#allocation3 + $0x18] sm:$0xff] }
 0x22b   : > { %v5031_v39 = vsel %vm13316_vm6, 0, %v5030_v48  ;;  %v3847_v32 = vpop.permute.xlu1 %3846  ;;  %v5159_v58 = vpop.permute.xlu0 %5158 }
 0x22c   : > { %v5288_v20 = vld [vmem:[#allocation3] sm:$0x80]  ;;  %5032 = vst [vmem:[#allocation3 + $0x28] sm:$0x1] %v5031_v39  ;;  %v3878_v59 = vsel %vm13282_vm0, %v3847_v32, %v3877_v42  ;;  %v5186_v55 = vsel %vm13317_vm15, %v5159_v58, %v5185_v16 }
 0x22d   : > { %v5289_v52 = vsel %vm13320_vm1, 0, %v5288_v20  ;;  %3879 = vst [vmem:[#allocation3 + $0x38] sm:$0xff] %v3878_v59  ;;  %5187 = vst [vmem:[#allocation3 + $0x18] sm:$0xff] %v5186_v55  ;;  %v4737_v19 = vld [vmem:[#allocation3 + $0x30] sm:$0xff] }
 0x22e   : > { %5290 = vst [vmem:[#allocation3] sm:$0x80] %v5289_v52 }
 0x22f   : > { %v5263_v57 = vpop.permute.xlu1 %5262  ;;  %v5261_v46 = vpop.permute.xlu0 %5260  ;;  %v5291_v40 = vld [vmem:[#allocation3 + $0x8] sm:$0x80]  ;;  %v5188_v26 = vld [vmem:[#allocation3 + $0x20] sm:$0xff] }
 0x230   : > { %5283 = vst.msk [vmem:[#allocation3 + $0x18] sm:$0xff] %vm13321_vm12, %v5263_v57  ;;  %v5292_v49 = vsel %vm13320_vm1, 0, %v5291_v40  ;;  %vm13325_vm12 = vnez %v13236_v54 }
 0x231   : > { %5282 = vst.msk [vmem:[#allocation3 + $0x10] sm:$0xff] %vm13322_vm11, %v5261_v46  ;;  %5293 = vst [vmem:[#allocation3 + $0x8] sm:$0x80] %v5292_v49  ;;  %vm13327_vm11 = vcmask 31744  }
 0x233   : > { %v4708_v17 = vpop.permute.xlu1 %4707  ;;  %v3951_v11 = vpop.permute.xlu0 %3950  ;;  %v5191_v25 = vld [vmem:[#allocation3 + $0x28] sm:$0xff] }
 0x234   : > { %v4738_v30 = vsel %vm13303_vm5, %v4708_v17, %v4737_v19  ;;  %3967 = vst.msk [vmem:[#allocation3 + $0x38] sm:$0xff] %vm13323_vm13, %v3951_v11  ;;  %vm13328_vm13 = vmmov %vm13327_vm11 }
 0x235   : > { %4739 = vst [vmem:[#allocation3 + $0x30] sm:$0xff] %v4738_v30  ;;  %v5448_v48 = vld [vmem:[#allocation3] sm:$0xff] }
 0x237   : > { %v4812_v63 = vpop.permute.xlu1 %4811  ;;  %v5161_v50 = vpop.permute.xlu0 %5160  ;;  %v5297_v10 = vld [vmem:[#allocation3 + $0x18] sm:$0x80] }
 0x238   : > { %v5294_v45 = vld [vmem:[#allocation3 + $0x10] sm:$0x80]  ;;  %4829 = vst.msk [vmem:[#allocation3 + $0x30] sm:$0xff] %vm13324_vm3, %v4812_v63  ;;  %v5189_v8 = vsel %vm13317_vm15, %v5161_v50, %v5188_v26  ;;  %v5298_v24 = vsel %vm13320_vm1, 0, %v5297_v10  ;;  %v5451_v11 = vld [vmem:[#allocation3 + $0x8] sm:$0xff]  ;;  %vm13329_vm3 = vnez %v13188_v38  ;;  %v13331_v38 = vmov 0  }
 0x239   : > { %v5295_v6 = vsel %vm13320_vm1, 0, %v5294_v45  ;;  %5190 = vst [vmem:[#allocation3 + $0x20] sm:$0xff] %v5189_v8  ;;  %v9285_v13 = vpop.f32.mrb[0].mxu0  ;;  %5299 = vst [vmem:[#allocation3 + $0x18] sm:$0x80] %v5298_v24 }
 0x23a   : > { %5296 = vst [vmem:[#allocation3 + $0x10] sm:$0x80] %v5295_v6  ;;  %v3185_v14 = vmul.f32 %v9285_v13, %v11769_v3  ;;  %v3113_v33 = vpop.f32.mrb[1].mxu0 }
 0x23b   : > { %v3989_v21 = vld [vmem:[#allocation3 + $0x38] sm:$0x80]  ;;  %v5265_v60 = vpop.permute.xlu1 %5264  ;;  %v5163_v28 = vpop.permute.xlu0 %5162  ;;  %v3183_v34 = vmul.f32 %v11769_v3, %v3113_v33 }
 0x23c   : > { %5284 = vst.msk [vmem:[#allocation3 + $0x20] sm:$0xff] %vm13319_vm9, %v5265_v60  ;;  %v5192_v9 = vsel %vm13317_vm15, %v5163_v28, %v5191_v25  ;;  %v9286_v1 = vpop.f32.mrb[2].mxu0  ;;  %v3990_v41 = vsel %vm13285_vm2, 0, %v3989_v21  ;;  %v3208_v37 = vadd.f32 %v11782_v31, %v3185_v14  ;;  %vm13326_vm2 = vmmov %vm13319_vm9  ;;  %vm13330_vm9 = vnez %v13240_v35 }
 0x23d   : > { %5193 = vst [vmem:[#allocation3 + $0x28] sm:$0xff] %v5192_v9  ;;  %v3186_v56 = vmul.f32 %v9286_v1, %v11769_v3  ;;  %v3116_v4 = vpop.f32.mrb[3].mxu0  ;;  %3991 = vst [vmem:[#allocation3 + $0x38] sm:$0x80] %v3990_v41  ;;  %v3206_v2 = vadd.f32 %v11782_v31, %v3183_v34 }
 0x23e   : > { %v3184_v15 = vmul.f32 %v11769_v3, %v3116_v4  ;;  %v3224_v58 = vmax.f32 %v3208_v37, 0.0 }
 0x23f   : > { %v4849_v12 = vld [vmem:[#allocation3 + $0x30] sm:$0x80]  ;;  %v5425_v62 = vpop.permute.xlu1 %5424  ;;  %v5267_v39 = vpop.permute.xlu0 %5266  ;;  %v3209_v20 = vadd.f32 %v11782_v31, %v3186_v56  ;;  %v3222_v55 = vmax.f32 %v3206_v2, 0.0 }
 0x240   : > { %v5449_v51 = vsel %vm13325_vm12, %v5425_v62, %v5448_v48  ;;  %5285 = vst.msk [vmem:[#allocation3 + $0x28] sm:$0xff] %vm13326_vm2, %v5267_v39  ;;  %v3207_v32 = vadd.f32 %v11782_v31, %v3184_v15  ;;  %v4850_v42 = vsel %vm13310_vm10, 0, %v4849_v12  ;;  %v5457_v25 = vld [vmem:[#allocation3 + $0x18] sm:$0xff]  ;;  %vm13332_vm2 = vcmask 425344  }
 0x241   : > { %5450 = vst [vmem:[#allocation3] sm:$0xff] %v5449_v51  ;;  %v3225_v16 = vmax.f32 %v3209_v20, 0.0  ;;  %v9289_v59 = vpop.f32.mrb[4].mxu0  ;;  %4851 = vst [vmem:[#allocation3 + $0x30] sm:$0x80] %v4850_v42  ;;  %v5454_v17 = vld [vmem:[#allocation3 + $0x10] sm:$0xff] }
 0x242   : > { %v3223_v52 = vmax.f32 %v3207_v32, 0.0  ;;  %v3189_v57 = vmul.f32 %v9289_v59, %v11769_v3  ;;  %v3129_v46 = vpop.f32.mrb[5].mxu0 }
 0x243   : > { %v3239_v40 = vpack.c.bf16 %v3225_v16, %v3224_v58  ;;  %v5429_v49 = vpop.permute.xlu1 %5428  ;;  %v5427_v19 = vpop.permute.xlu0 %5426  ;;  %v3187_v30 = vmul.f32 %v11769_v3, %v3129_v46  ;;  %v5300_v63 = vld [vmem:[#allocation3 + $0x20] sm:$0x80] }
 0x244   : > { %v5455_v50 = vsel %vm13325_vm12, %v5429_v49, %v5454_v17  ;;  %v5452_v26 = vsel %vm13325_vm12, %v5427_v19, %v5451_v11  ;;  %v3238_v45 = vpack.c.bf16 %v3223_v52, %v3222_v55  ;;  %v9290_v10 = vpop.f32.mrb[6].mxu0  ;;  %v3212_v8 = vadd.f32 %v11782_v31, %v3189_v57  ;;  %v4149_v60 = vld [vmem:[#allocation3 + $0x38] sm:$0xff] }
 0x245   : > { %3247 = vst.msk [vmem:[#allocation2 + $0x8] sm:$0xff] %vm13327_vm11, %v3239_v40  ;;  %5456 = vst [vmem:[#allocation3 + $0x10] sm:$0xff] %v5455_v50  ;;  %v3190_v6 = vmul.f32 %v9290_v10, %v11769_v3  ;;  %v5301_v24 = vsel %vm13320_vm1, 0, %v5300_v63  ;;  %v3132_v13 = vpop.f32.mrb[7].mxu0  ;;  %v3210_v14 = vadd.f32 %v11782_v31, %v3187_v30  ;;  %vm13333_vm11 = vcmask 490944  }
 0x246   : > { %5453 = vst [vmem:[#allocation3 + $0x8] sm:$0xff] %v5452_v26  ;;  %3246 = vst.msk [vmem:[#allocation2] sm:$0xff] %vm13328_vm13, %v3238_v45  ;;  %v3188_v33 = vmul.f32 %v11769_v3, %v3132_v13  ;;  %v3228_v2 = vmax.f32 %v3212_v8, 0.0  ;;  %vm13334_vm13 = vcmask 556544  }
 0x247   : > { %5302 = vst [vmem:[#allocation3 + $0x20] sm:$0x80] %v5301_v24  ;;  %v4119_v21 = vpop.permute.xlu1 %4118  ;;  %v5431_v28 = vpop.permute.xlu0 %5430  ;;  %v3213_v34 = vadd.f32 %v11782_v31, %v3190_v6  ;;  %v5303_v9 = vld [vmem:[#allocation3 + $0x28] sm:$0x80]  ;;  %v3226_v48 = vmax.f32 %v3210_v14, 0.0 }
 0x248   : > { %v4150_v1 = vsel %vm13329_vm3, %v4119_v21, %v4149_v60  ;;  %v5458_v41 = vsel %vm13325_vm12, %v5431_v28, %v5457_v25  ;;  %v3211_v37 = vadd.f32 %v11782_v31, %v3188_v33  ;;  %v5474_v56 = vld [vmem:[#allocation3] sm:$0x1]  ;;  %v5304_v4 = vsel %vm13320_vm1, 0, %v5303_v9  ;;  %v5009_v16 = vld [vmem:[#allocation3 + $0x30] sm:$0xff] }
 0x249   : > { %4151 = vst [vmem:[#allocation3 + $0x38] sm:$0xff] %v4150_v1  ;;  %5459 = vst [vmem:[#allocation3 + $0x18] sm:$0xff] %v5458_v41  ;;  %v3229_v15 = vmax.f32 %v3213_v34, 0.0  ;;  %v5475_v12 = vsel %vm13330_vm9, 0, %v5474_v56  ;;  %v9293_v62 = vpop.f32.mrb[8].mxu0  ;;  %vm13335_vm3 = vcmask 31744  }
 0x24a   : > { %5305 = vst [vmem:[#allocation3 + $0x28] sm:$0x80] %v5304_v4  ;;  %4154 = vst.msk [vmem:[#allocation3 + $0x38] sm:$0xff] %vm13332_vm2, %v13331_v38  ;;  %v3227_v39 = vmax.f32 %v3211_v37, 0.0  ;;  %v3193_v20 = vmul.f32 %v9293_v62, %v11769_v3  ;;  %v3145_v51 = vpop.f32.mrb[9].mxu0 }
 0x24b   : > { %5476 = vst [vmem:[#allocation3] sm:$0x1] %v5475_v12  ;;  %4317 = vst.msk [vmem:[#allocation3 + $0x38] sm:$0xff] %vm13333_vm11, %v13331_v38  ;;  %v3241_v32 = vpack.c.bf16 %v3229_v15, %v3228_v2  ;;  %v5433_v42 = vpop.permute.xlu1 %5432  ;;  %v4980_v58 = vpop.permute.xlu0 %4979  ;;  %v3191_v59 = vmul.f32 %v11769_v3, %v3145_v51  ;;  %vm13337_vm11 = vnez %v13243_v29 }
 0x24c   : > { %4396 = vst.msk [vmem:[#allocation3 + $0x38] sm:$0xff] %vm13334_vm13, %v13331_v38  ;;  %v5010_v55 = vsel %vm13314_vm4, %v4980_v58, %v5009_v16  ;;  %v3240_v52 = vpack.c.bf16 %v3227_v39, %v3226_v48  ;;  %v3216_v57 = vadd.f32 %v11782_v31, %v3193_v20  ;;  %v9294_v46 = vpop.f32.mrb[10].mxu0  ;;  %v11836_v49 = vld [vmem:[#allocation2 + $0x8] sm:$0xff]  ;;  %v5480_v17 = vld [vmem:[#allocation3 + $0x10] sm:$0x1]  ;;  %vm13336_vm2 = vmmov %vm13335_vm3  ;;  %vm13338_vm13 = vcmask 523744  }
 0x24d   : > { %v5477_v40 = vld [vmem:[#allocation3 + $0x8] sm:$0x1]  ;;  %3249 = vst.msk [vmem:[#allocation2 + $0x18] sm:$0xff] %vm13335_vm3, %v3241_v32  ;;  %5011 = vst [vmem:[#allocation3 + $0x30] sm:$0xff] %v5010_v55  ;;  %v3194_v11 = vmul.f32 %v9294_v46, %v11769_v3  ;;  %6556 = vrot.lane.b32.xlu1 %v11836_v49, %s9700_s12  ;;  %6248 = vrot.lane.b32.xlu0 %v11836_v49, %s9709_s23  ;;  %v3148_v63 = vpop.f32.mrb[11].mxu0  ;;  %v5481_v50 = vsel %vm13330_vm9, 0, %v5480_v17  ;;  %v3214_v10 = vadd.f32 %v11782_v31, %v3191_v59 }
 0x24e   : > { %v5460_v19 = vld [vmem:[#allocation3 + $0x20] sm:$0xff]  ;;  %v5478_v30 = vsel %vm13330_vm9, 0, %v5477_v40  ;;  %3248 = vst.msk [vmem:[#allocation2 + $0x10] sm:$0xff] %vm13336_vm2, %v3240_v52  ;;  %v3192_v8 = vmul.f32 %v11769_v3, %v3148_v63  ;;  %5482 = vst [vmem:[#allocation3 + $0x10] sm:$0x1] %v5481_v50  ;;  %v6313_v6 = vshrl.u32 %v11836_v49, 16 }
 0x24f   : > { %v11848_v26 = vld [vmem:[#allocation2] sm:$0xff]  ;;  %v5461_v45 = vsel %vm13325_vm12, %v5433_v42, %v5460_v19  ;;  %5479 = vst [vmem:[#allocation3 + $0x8] sm:$0x1] %v5478_v30  ;;  %v5595_v24 = vpop.permute.xlu1 %5594  ;;  %v5435_v13 = vpop.permute.xlu0 %5434  ;;  %v3217_v14 = vadd.f32 %v11782_v31, %v3194_v11  ;;  %v6315_v33 = vshll.u32 %v11836_v49, 16  ;;  %v3232_v60 = vmax.f32 %v3216_v57, 0.0  ;;  %vm13339_vm3 = vmmov %vm13336_vm2  ;;  %v6213_v11 = vld [vmem:[#allocation4 + $0x10] sm:$0xff] }
 0x250   : > { %5462 = vst [vmem:[#allocation3 + $0x20] sm:$0xff] %v5461_v45  ;;  %v3215_v28 = vadd.f32 %v11782_v31, %v3192_v8  ;;  %v5483_v25 = vld [vmem:[#allocation3 + $0x18] sm:$0x1]  ;;  %v6442_v34 = vrot.slane %v6313_v6, 7  ;;  %v6621_v9 = vshll.u32 %v11848_v26, 16  ;;  %v3230_v15 = vmax.f32 %v3214_v10, 0.0 }
 0x251   : > { %v5463_v21 = vld [vmem:[#allocation3 + $0x28] sm:$0xff]  ;;  %v3233_v37 = vmax.f32 %v3217_v14, 0.0  ;;  %6554 = vrot.lane.b32.xlu0 %v11848_v26, %s9700_s12  ;;  %6246 = vrot.lane.b32.xlu1 %v11848_v26, %s9709_s23  ;;  %v5484_v56 = vsel %vm13330_vm9, 0, %v5483_v25  ;;  %v6317_v4 = vrot.slane %v6315_v33, 1  ;;  %v6619_v58 = vshrl.u32 %v11848_v26, 16  ;;  %v6216_v26 = vld [vmem:[#allocation4 + $0x18] sm:$0xff] }
 0x252   : > { %v5615_v1 = vld [vmem:[#allocation3] sm:$0xff]  ;;  %v5464_v41 = vsel %vm13325_vm12, %v5435_v13, %v5463_v21  ;;  %v3231_v12 = vmax.f32 %v3215_v28, 0.0  ;;  %5485 = vst [vmem:[#allocation3 + $0x18] sm:$0x1] %v5484_v56  ;;  %v6623_v62 = vrot.slane %v6621_v9, 1  ;;  %v6445_v32 = vor.u32 %v6442_v34, %v6315_v33  ;;  %v6210_v25 = vld [vmem:[#allocation4 + $0x8] sm:$0xff] }
 0x253   : > { %v5616_v2 = vsel %vm13337_vm11, %v5595_v24, %v5615_v1  ;;  %5465 = vst [vmem:[#allocation3 + $0x28] sm:$0xff] %v5464_v41  ;;  %v3243_v48 = vpack.c.bf16 %v3233_v37, %v3232_v60  ;;  %v5687_v39 = vpop.permute.xlu1 %5686  ;;  %v5597_v20 = vpop.permute.xlu0 %5596  ;;  %v6318_v51 = vor.u32 %v6317_v4, %v6313_v6  ;;  %v4579_v42 = vld [vmem:[#allocation3 + $0x38] sm:$0x1]  ;;  %v6157_v6 = vrot.slane %v6619_v58, 7  ;;  %v6400_v13 = vld [vmem:[#allocation4] sm:$0x1] }
 0x254   : > { %5617 = vst [vmem:[#allocation3] sm:$0xff] %v5616_v2  ;;  %v3242_v16 = vpack.c.bf16 %v3231_v12, %v3230_v15  ;;  %v4580_v59 = vsel %vm13301_vm8, 0, %v4579_v42  ;;  %v5033_v55 = vld [vmem:[#allocation3 + $0x30] sm:$0x1]  ;;  %v11876_v52 = vld [vmem:[#allocation2 + $0x18] sm:$0xff]  ;;  %vm13340_vm8 = vmmov %vm13336_vm2  ;;  %v11888_v17 = vor.u32 %v6623_v62, %v6619_v58  ;;  %v6214_v33 = vsel %vm13267_vm7, %v6445_v32, %v6213_v11 }
 0x255   : > { %5707 = vst.msk [vmem:[#allocation3] sm:$0xff] %vm13338_vm13, %v5687_v39  ;;  %6356 = vrot.lane.b32.xlu0 %v6318_v51, %s9699_s11  ;;  %6490 = vrot.lane.b32.xlu1 %v6445_v32, %s9708_s22  ;;  %4581 = vst [vmem:[#allocation3 + $0x38] sm:$0x1] %v4580_v59  ;;  %v5034_v46 = vsel %vm13316_vm6, 0, %v5033_v55  ;;  %v11883_v40 = vld [vmem:[#allocation2 + $0x10] sm:$0xff]  ;;  %v6640_v10 = vshrl.u32 %v11876_v52, 16  ;;  %v6160_v4 = vor.u32 %v6621_v9, %v6157_v6 }
 0x256   : > { %3251 = vst.msk [vmem:[#allocation2 + $0x28] sm:$0xff] %vm13339_vm3, %v3243_v48  ;;  %v5618_v57 = vld [vmem:[#allocation3 + $0x8] sm:$0xff]  ;;  %5035 = vst [vmem:[#allocation3 + $0x30] sm:$0x1] %v5034_v46  ;;  %v5621_v63 = vld [vmem:[#allocation3 + $0x10] sm:$0xff]  ;;  %v6320_v8 = vshrl.u32 %v11883_v40, 16 }
 0x257   : > { %v5619_v27 = vsel %vm13337_vm11, %v5597_v20, %v5618_v57  ;;  %3250 = vst.msk [vmem:[#allocation2 + $0x20] sm:$0xff] %vm13340_vm8, %v3242_v16  ;;  %v5486_v19 = vld [vmem:[#allocation3 + $0x20] sm:$0x1]  ;;  %v5599_v30 = vpop.permute.xlu1 %5598  ;;  %v5689_v50 = vpop.permute.xlu0 %5688  ;;  %vm13341_vm2 = vmmov %vm13338_vm13  ;;  %vm6398_vm13 = vcmask 122976   ;;  %v6642_v60 = vshll.u32 %v11876_v52, 16  ;;  %v6322_v28 = vshll.u32 %v11883_v40, 16 }
 0x258   : > { %5620 = vst [vmem:[#allocation3 + $0x8] sm:$0xff] %v5619_v27  ;;  %v5487_v45 = vsel %vm13330_vm9, 0, %v5486_v19  ;;  %v5622_v24 = vsel %vm13337_vm11, %v5599_v30, %v5621_v63  ;;  %6215 = vst [vmem:[#allocation4 + $0x10] sm:$0xff] %v6214_v33  ;;  %vm13342_vm3 = vsmask.f32 256  ;;  %v6171_v2 = vrot.slane %v6320_v8, 7 }
 0x259   : > { %5708 = vst.msk [vmem:[#allocation3 + $0x8] sm:$0xff] %vm13341_vm2, %v5689_v50  ;;  %5488 = vst [vmem:[#allocation3 + $0x20] sm:$0x1] %v5487_v45  ;;  %6676 = vrot.lane.b32.xlu0 %v6318_v51, %s9710_s24  ;;  %6674 = vrot.lane.b32.xlu1 %v11888_v17, %s9710_s24  ;;  %v5624_v56 = vld [vmem:[#allocation3 + $0x18] sm:$0xff]  ;;  %v6178_v12 = vrot.slane %v6640_v10, 7  ;;  %vm13345_vm2 = vnez %v13248_v53  ;;  %v6211_v42 = vsel %vm13267_vm7, %v6160_v4, %v6210_v25  ;;  %v6219_v59 = vld [vmem:[#allocation4 + $0x20] sm:$0xff] }
 0x25a   : > { %5623 = vst [vmem:[#allocation3 + $0x10] sm:$0xff] %v5622_v24  ;;  %v5489_v14 = vld [vmem:[#allocation3 + $0x28] sm:$0x1]  ;;  %vm11907_vm8 = vmand %vm6398_vm13, %vm13342_vm3  ;;  %vm13346_vm13 = vcmask 523744   ;;  %v11934_v58 = vor.u32 %v6322_v28, %v6171_v2  ;;  %v6644_v46 = vrot.slane %v6642_v60, 1  ;;  %v6225_v6 = vld [vmem:[#allocation4 + $0x30] sm:$0xff] }
 0x25b   : > { %v5490_v21 = vsel %vm13330_vm9, 0, %v5489_v14  ;;  %v5691_v41 = vpop.permute.xlu1 %5690  ;;  %v5601_v37 = vpop.permute.xlu0 %5600  ;;  %v6401_v15 = vsel %vm11907_vm8, 0, %v6400_v13  ;;  %6212 = vst [vmem:[#allocation4 + $0x8] sm:$0xff] %v6211_v42  ;;  %v11937_v55 = vor.u32 %v6642_v60, %v6178_v12  ;;  %vm13347_vm3 = vmmov %vm13346_vm13  ;;  %v6324_v60 = vrot.slane %v6322_v28, 1 }
 0x25c   : > { %v5716_v1 = vld [vmem:[#allocation3] sm:$0x80]  ;;  %5491 = vst [vmem:[#allocation3 + $0x28] sm:$0x1] %v5490_v21  ;;  %5709 = vst.msk [vmem:[#allocation3 + $0x10] sm:$0xff] %vm13346_vm13, %v5691_v41  ;;  %v5625_v48 = vsel %vm13337_vm11, %v5601_v37, %v5624_v56  ;;  %v4740_v9 = vld [vmem:[#allocation3 + $0x38] sm:$0xff]  ;;  %v6217_v19 = vsel %vm13267_vm7, %v11934_v58, %v6216_v26  ;;  %v6645_v21 = vor.u32 %v6644_v46, %v6640_v10 }
 0x25d   : > { %v5717_v62 = vsel %vm13345_vm2, 0, %v5716_v1  ;;  %v11924_v39 = vld [vmem:[#allocation2 + $0x28] sm:$0xff]  ;;  %6402 = vst [vmem:[#allocation4] sm:$0x1] %v6401_v15  ;;  %5626 = vst [vmem:[#allocation3 + $0x18] sm:$0xff] %v5625_v48  ;;  %6811 = vrot.lane.b32.xlu0 %v6445_v32, %s9702_s14  ;;  %6250 = vrot.lane.b32.xlu1 %v11883_v40, %s9709_s23  ;;  %v6220_v44 = vsel %vm13267_vm7, %v11937_v55, %v6219_v59  ;;  %v5194_v14 = vld [vmem:[#allocation3 + $0x30] sm:$0xff] }
 0x25e   : > { %5718 = vst [vmem:[#allocation3] sm:$0x80] %v5717_v62  ;;  %v11929_v20 = vld [vmem:[#allocation2 + $0x20] sm:$0xff]  ;;  %v6654_v51 = vshrl.u32 %v11924_v39, 16  ;;  %v6656_v50 = vshll.u32 %v11924_v39, 16  ;;  %6218 = vst [vmem:[#allocation4 + $0x18] sm:$0xff] %v6217_v19  ;;  %v6325_v62 = vor.u32 %v6324_v60, %v6320_v8 }
 0x25f   : > { %v6334_v16 = vshrl.u32 %v11929_v20, 16  ;;  %v4710_v57 = vpop.permute.xlu1 %4709  ;;  %v5693_v32 = vpop.permute.xlu0 %5692  ;;  %v6336_v45 = vshll.u32 %v11929_v20, 16  ;;  %6221 = vst [vmem:[#allocation4 + $0x20] sm:$0xff] %v6220_v44  ;;  %v6222_v41 = vld [vmem:[#allocation4 + $0x28] sm:$0xff]  ;;  %vm13349_vm13 = vcmask 326944  }
 0x260   : > { %v5719_v27 = vld [vmem:[#allocation3 + $0x8] sm:$0x80]  ;;  %v6192_v11 = vrot.slane %v6654_v51, 7  ;;  %v4741_v30 = vsel %vm13303_vm5, %v4710_v57, %v4740_v9  ;;  %5710 = vst.msk [vmem:[#allocation3 + $0x18] sm:$0xff] %vm13347_vm3, %v5693_v32  ;;  %vm13348_vm5 = vcmask 130144   ;;  %v5627_v12 = vld [vmem:[#allocation3 + $0x20] sm:$0xff]  ;;  %vm13350_vm3 = vnez %v13174_v0 }
 0x261   : > { %v5720_v63 = vsel %vm13345_vm2, 0, %v5719_v27  ;;  %4742 = vst [vmem:[#allocation3 + $0x38] sm:$0xff] %v4741_v30  ;;  %6354 = vrot.lane.b32.xlu0 %v11888_v17, %s9699_s11  ;;  %6558 = vrot.lane.b32.xlu1 %v11883_v40, %s9700_s12  ;;  %v6779_v24 = vrot.slane %v6334_v16, 7  ;;  %v6144_v9 = vld [vmem:[#allocation4 + $0x38] sm:$0x1] }
 0x262   : > { %5721 = vst [vmem:[#allocation3 + $0x8] sm:$0x80] %v5720_v63  ;;  %v11962_v13 = vor.u32 %v6656_v50, %v6192_v11  ;;  %v6145_v8 = vsel %vm13350_vm3, 0, %v6144_v9  ;;  %vm13353_vm3 = vcmask 588800  }
 0x263   : > { %v5165_v17 = vpop.permute.xlu1 %5164  ;;  %v4814_v33 = vpop.permute.xlu0 %4813  ;;  %v5722_v25 = vld [vmem:[#allocation3 + $0x10] sm:$0x80]  ;;  %v11968_v1 = vor.u32 %v6779_v24, %v6336_v45  ;;  %6146 = vst [vmem:[#allocation4 + $0x38] sm:$0x1] %v6145_v8  ;;  %v5630_v32 = vld [vmem:[#allocation3 + $0x28] sm:$0xff]  ;;  %v6658_v8 = vrot.slane %v6656_v50, 1 }
 0x264   : > { %v5195_v37 = vsel %vm13317_vm15, %v5165_v17, %v5194_v14  ;;  %4830 = vst.msk [vmem:[#allocation3 + $0x38] sm:$0xff] %vm13348_vm5, %v4814_v33  ;;  %v5723_v56 = vsel %vm13345_vm2, 0, %v5722_v25  ;;  %v6226_v2 = vsel %vm13267_vm7, %v11962_v13, %v6225_v6  ;;  %vm13351_vm5 = vcmask 523744  }
 0x265   : > { %5196 = vst [vmem:[#allocation3 + $0x30] sm:$0xff] %v5195_v37  ;;  %6488 = vrot.lane.b32.xlu0 %v6160_v4, %s9708_s22  ;;  %6680 = vrot.lane.b32.xlu1 %v6645_v21, %s9710_s24  ;;  %5724 = vst [vmem:[#allocation3 + $0x10] sm:$0x80] %v5723_v56  ;;  %v6223_v10 = vsel %vm13267_vm7, %v11968_v1, %v6222_v41  ;;  %v5856_v11 = vld [vmem:[#allocation3] sm:$0xff]  ;;  %v6659_v50 = vor.u32 %v6658_v8, %v6654_v51 }
 0x266   : > { %6227 = vst [vmem:[#allocation4 + $0x30] sm:$0xff] %v6226_v2  ;;  %6224 = vst [vmem:[#allocation4 + $0x28] sm:$0xff] %v6223_v10 }
 0x267   : > { %v5269_v28 = vpop.permute.xlu1 %5268  ;;  %v5603_v15 = vpop.permute.xlu0 %5602  ;;  %v5725_v48 = vld [vmem:[#allocation3 + $0x18] sm:$0x80] }
 0x268   : > { %5286 = vst.msk [vmem:[#allocation3 + $0x30] sm:$0xff] %vm13349_vm13, %v5269_v28  ;;  %v5628_v4 = vsel %vm13337_vm11, %v5603_v15, %v5627_v12  ;;  %v5726_v26 = vsel %vm13345_vm2, 0, %v5725_v48  ;;  %vm13352_vm13 = vnez %v13258_v36 }
 0x269   : > { %5629 = vst [vmem:[#allocation3 + $0x20] sm:$0xff] %v5628_v4  ;;  %6252 = vrot.lane.b32.xlu0 %v11876_v52, %s9709_s23  ;;  %6358 = vrot.lane.b32.xlu1 %v6325_v62, %s9699_s11  ;;  %5727 = vst [vmem:[#allocation3 + $0x18] sm:$0x80] %v5726_v26  ;;  %v5859_v33 = vld [vmem:[#allocation3 + $0x8] sm:$0xff] }
 0x26b   : > { %v4852_v42 = vld [vmem:[#allocation3 + $0x38] sm:$0x80]  ;;  %v5695_v59 = vpop.permute.xlu1 %5694  ;;  %v5605_v57 = vpop.permute.xlu0 %5604 }
 0x26c   : > { %5711 = vst.msk [vmem:[#allocation3 + $0x20] sm:$0xff] %vm13351_vm5, %v5695_v59  ;;  %v5631_v46 = vsel %vm13337_vm11, %v5605_v57, %v5630_v32  ;;  %v4853_v27 = vsel %vm13310_vm10, 0, %v4852_v42  ;;  %v5862_v17 = vld [vmem:[#allocation3 + $0x10] sm:$0xff] }
 0x26d   : > { %5632 = vst [vmem:[#allocation3 + $0x28] sm:$0xff] %v5631_v46  ;;  %6560 = vrot.lane.b32.xlu0 %v11876_v52, %s9700_s12  ;;  %6492 = vrot.lane.b32.xlu1 %v11934_v58, %s9708_s22  ;;  %4854 = vst [vmem:[#allocation3 + $0x38] sm:$0x80] %v4853_v27 }
 0x26f   : > { %v5836_v19 = vpop.permute.xlu1 %5835  ;;  %v5697_v30 = vpop.permute.xlu0 %5696  ;;  %v5306_v63 = vld [vmem:[#allocation3 + $0x30] sm:$0x80] }
 0x270   : > { %v5857_v44 = vsel %vm13352_vm13, %v5836_v19, %v5856_v11  ;;  %5712 = vst.msk [vmem:[#allocation3 + $0x28] sm:$0xff] %vm13351_vm5, %v5697_v30  ;;  %v5307_v6 = vsel %vm13320_vm1, 0, %v5306_v63  ;;  %v5865_v10 = vld [vmem:[#allocation3 + $0x18] sm:$0xff]  ;;  %vm13354_vm5 = vmmov %vm13353_vm3 }
 0x271   : > { %5858 = vst [vmem:[#allocation3] sm:$0xff] %v5857_v44  ;;  %6360 = vrot.lane.b32.xlu0 %v6645_v21, %s9699_s11  ;;  %6256 = vrot.lane.b32.xlu1 %v11924_v39, %s9709_s23  ;;  %5308 = vst [vmem:[#allocation3 + $0x30] sm:$0x80] %v5307_v6 }
 0x272   : > { %9309 = vmatprep.mubr.msk.bf16.mxu1 %vm13353_vm3, %v5857_v44 }
 0x273   : > { %v5840_v24 = vpop.permute.xlu1 %5839  ;;  %v5838_v14 = vpop.permute.xlu0 %5837  ;;  %v5728_v60 = vld [vmem:[#allocation3 + $0x20] sm:$0x80] }
 0x274   : > { %v5863_v25 = vsel %vm13352_vm13, %v5840_v24, %v5862_v17  ;;  %v5860_v41 = vsel %vm13352_vm13, %v5838_v14, %v5859_v33  ;;  %v5729_v21 = vsel %vm13345_vm2, 0, %v5728_v60  ;;  %v5012_v56 = vld [vmem:[#allocation3 + $0x38] sm:$0xff] }
 0x275   : > { %5864 = vst [vmem:[#allocation3 + $0x10] sm:$0xff] %v5863_v25  ;;  %5861 = vst [vmem:[#allocation3 + $0x8] sm:$0xff] %v5860_v41  ;;  %6494 = vrot.lane.b32.xlu0 %v11937_v55, %s9708_s22  ;;  %6254 = vrot.lane.b32.xlu1 %v11929_v20, %s9709_s23 }
 0x276   : > { %5730 = vst [vmem:[#allocation3 + $0x20] sm:$0x80] %v5729_v21  ;;  %9310 = vmatmul.mubr.msk.bf16.vlgmr.msra.gmra.mrb[0].mxu1 %vm13353_vm3, %v5860_v41 }
 0x277   : > { %v4982_v37 = vpop.permute.xlu1 %4981  ;;  %v5842_v2 = vpop.permute.xlu0 %5841  ;;  %9313 = vmatprep.mubr.msk.bf16.mxu1 %vm13354_vm5, %v5863_v25  ;;  %v5731_v28 = vld [vmem:[#allocation3 + $0x28] sm:$0x80]  ;;  %vm13355_vm5 = vmmov %vm13353_vm3 }
 0x278   : > { %v5013_v15 = vsel %vm13314_vm4, %v4982_v37, %v5012_v56  ;;  %v5866_v12 = vsel %vm13352_vm13, %v5842_v2, %v5865_v10  ;;  %v5732_v48 = vsel %vm13345_vm2, 0, %v5731_v28  ;;  %v5466_v26 = vld [vmem:[#allocation3 + $0x30] sm:$0xff] }
 0x279   : > { %5014 = vst [vmem:[#allocation3 + $0x38] sm:$0xff] %v5013_v15  ;;  %5867 = vst [vmem:[#allocation3 + $0x18] sm:$0xff] %v5866_v12  ;;  %6678 = vrot.lane.b32.xlu0 %v6325_v62, %s9710_s24  ;;  %6813 = vrot.lane.b32.xlu1 %v11934_v58, %s9702_s14  ;;  %v6338_v62 = vrot.slane %v6336_v45, 1 }
 0x27a   : > { %5733 = vst [vmem:[#allocation3 + $0x28] sm:$0x80] %v5732_v48 }
 0x27b   : > { %v5437_v4 = vpop.permute.xlu0 %5436  ;;  %v5844_v9 = vpop.permute.xlu1 %5843  ;;  %v12059_v51 = vor.u32 %v6338_v62, %v6334_v16 }
 0x27c   : > { %v5467_v42 = vsel %vm13325_vm12, %v5437_v4, %v5466_v26 }
 0x27d   : > { %v5868_v59 = vld [vmem:[#allocation3 + $0x20] sm:$0xff]  ;;  %5468 = vst [vmem:[#allocation3 + $0x30] sm:$0xff] %v5467_v42  ;;  %6564 = vrot.lane.b32.xlu0 %v11924_v39, %s9700_s12  ;;  %6562 = vrot.lane.b32.xlu1 %v11929_v20, %s9700_s12 }
 0x27e   : > { %v5869_v57 = vsel %vm13352_vm13, %v5844_v9, %v5868_v59  ;;  %9314 = vmatmul.mubr.msk.bf16.gmra.mrb[4].mxu1 %vm13353_vm3, %v5866_v12 }
 0x27f   : > { %5870 = vst [vmem:[#allocation3 + $0x20] sm:$0xff] %v5869_v57  ;;  %v5846_v58 = vpop.permute.xlu0 %5845  ;;  %9317 = vmatprep.mubr.msk.bf16.mxu1 %vm13355_vm5, %v5869_v57  ;;  %v5167_v11 = vpop.permute.xlu1 %5166  ;;  %vm13363_vm5 = vcmask 64544  }
 0x280   : > { %v5036_v46 = vld [vmem:[#allocation3 + $0x38] sm:$0x1] }
 0x281   : > { %v5871_v32 = vld [vmem:[#allocation3 + $0x28] sm:$0xff]  ;;  %6875 = vrot.lane.b32.xlu0 %v11836_v49, %s9711_s25  ;;  %6684 = vrot.lane.b32.xlu1 %v6659_v50, %s9710_s24  ;;  %v5037_v19 = vsel %vm13316_vm6, 0, %v5036_v46  ;;  %vm13356_vm6 = vcmask 326944  }
 0x282   : > { %v5872_v27 = vsel %vm13352_vm13, %v5846_v58, %v5871_v32  ;;  %5038 = vst [vmem:[#allocation3 + $0x38] sm:$0x1] %v5037_v19 }
 0x283   : > { %5873 = vst [vmem:[#allocation3 + $0x28] sm:$0xff] %v5872_v27  ;;  %v5271_v16 = vpop.permute.xlu0 %5270  ;;  %v5607_v63 = vpop.permute.xlu1 %5606 }
 0x284   : > { %v5492_v45 = vld [vmem:[#allocation3 + $0x30] sm:$0x1] }
 0x285   : > { %6364 = vrot.lane.b32.xlu0 %v6659_v50, %s9699_s11  ;;  %6362 = vrot.lane.b32.xlu1 %v12059_v51, %s9699_s11  ;;  %v5493_v49 = vsel %vm13330_vm9, 0, %v5492_v45  ;;  %vm13357_vm9 = vcmask 523744  }
 0x286   : > { %5494 = vst [vmem:[#allocation3 + $0x30] sm:$0x1] %v5493_v49  ;;  %9318 = vmatmul.mubr.msk.bf16.gmra.mrb[8].mxu1 %vm13353_vm3, %v5872_v27 }
 0x287   : > { %v5699_v44 = vpop.permute.xlu0 %5698  ;;  %v5439_v33 = vpop.permute.xlu1 %5438 }
 0x289   : > { %v5197_v5 = vld [vmem:[#allocation3 + $0x38] sm:$0xff]  ;;  %6498 = vrot.lane.b32.xlu0 %v11962_v13, %s9708_s22  ;;  %6496 = vrot.lane.b32.xlu1 %v11968_v1, %s9708_s22 }
 0x28a   : > { %v5198_v30 = vsel %vm13317_vm15, %v5167_v11, %v5197_v5  ;;  %vm13358_vm15 = vcmask 458144  }
 0x28b   : > { %5199 = vst [vmem:[#allocation3 + $0x38] sm:$0xff] %v5198_v30  ;;  %v5848_v29 = vpop.permute.xlu0 %5847 }
 0x28c   : > { %5287 = vst.msk [vmem:[#allocation3 + $0x38] sm:$0xff] %vm13356_vm6, %v5271_v16  ;;  %vm13365_vm6 = vsmask.f32 7966 }
 0x28d   : > { %v5633_v35 = vld [vmem:[#allocation3 + $0x30] sm:$0xff]  ;;  %6682 = vrot.lane.b32.xlu0 %v12059_v51, %s9710_s24 }
 0x28e   : > { %v5634_v6 = vsel %vm13337_vm11, %v5607_v63, %v5633_v35  ;;  %vm13359_vm11 = vmmov %vm13357_vm9 }
 0x28f   : > { %5635 = vst [vmem:[#allocation3 + $0x30] sm:$0xff] %v5634_v6 }
 0x290   : > { %5713 = vst.msk [vmem:[#allocation3 + $0x30] sm:$0xff] %vm13357_vm9, %v5699_v44 }
 0x293   : > { %v5309_v24 = vld [vmem:[#allocation3 + $0x38] sm:$0x80] }
 0x294   : > { %v5310_v7 = vsel %vm13320_vm1, 0, %v5309_v24  ;;  %vm13360_vm1 = vcmask 589344  }
 0x295   : > { %5311 = vst [vmem:[#allocation3 + $0x38] sm:$0x80] %v5310_v7 }
 0x297   : > { %v5734_v17 = vld [vmem:[#allocation3 + $0x30] sm:$0x80] }
 0x298   : > { %v5735_v14 = vsel %vm13345_vm2, 0, %v5734_v17  ;;  %vm13361_vm2 = vmmov %vm13353_vm3  ;;  %vm6275_vm3 = vcmask 97351   ;;  %v12925_v17 = vld [vmem:[%s13103_s7] ss:$0 sm:$0xff] }
 0x299   : > { %5736 = vst [vmem:[#allocation3 + $0x30] sm:$0x80] %v5735_v14  ;;  %vm12102_vm9 = vmand %vm6275_vm3, %vm13365_vm6  ;;  %vm13374_vm3 = vsmask.f32 7938 }
 0x29c   : > { %v5469_v60 = vld [vmem:[#allocation3 + $0x38] sm:$0xff] }
 0x29d   : > { %v5470_v25 = vsel %vm13325_vm12, %v5439_v33, %v5469_v60  ;;  %vm13362_vm12 = vmmov %vm13361_vm2  ;;  %v6514_v60 = vld [vmem:[#allocation4] sm:$0xff] }
 0x29e   : > { %5471 = vst [vmem:[#allocation3 + $0x38] sm:$0xff] %v5470_v25 }
 0x29f   : > { %5473 = vst.msk [vmem:[#allocation3 + $0x38] sm:$0xff] %vm13358_vm15, %v13331_v38  ;;  %vm13368_vm15 = vcmask 31744  }
 0x2a0   : > { %5636 = vst.msk [vmem:[#allocation3 + $0x38] sm:$0xff] %vm13359_vm11, %v13331_v38  ;;  %v5874_v22 = vld [vmem:[#allocation3 + $0x30] sm:$0xff]  ;;  %vm13369_vm11 = vmmov %vm13368_vm15 }
 0x2a1   : > { %v5875_v41 = vsel %vm13352_vm13, %v5848_v29, %v5874_v22  ;;  %5715 = vst.msk [vmem:[#allocation3 + $0x38] sm:$0xff] %vm13360_vm1, %v13331_v38  ;;  %vm13364_vm13 = vmmov %vm13363_vm5  ;;  %vm13370_vm1 = vsmask.f32 7424 }
 0x2a2   : > { %5876 = vst [vmem:[#allocation3 + $0x30] sm:$0xff] %v5875_v41  ;;  %9321 = vmatprep.mubr.msk.bf16.mxu1 %vm13361_vm2, %v5875_v41  ;;  %vm13371_vm2 = vcmask 97344  }
 0x2a8   : > { %v5884_v54 = vld [vmem:[#allocation3 + $0x38] sm:$0xff] }
 0x2a9   : > { %9322 = vmatmul.mubr.msk.bf16.gmra.mrb[12].mxu1 %vm13362_vm12, %v5884_v54  ;;  %vm12126_vm12 = vmand %vm13371_vm2, %vm13370_vm1 }
 0x2aa   : > { %vm13380_vm1 = vmmov %vm13363_vm5 }
 0x2bf   : > { %v12095_v53 = vpop.permute.xlu1 %6556  ;;  %v6249_v21 = vpop.permute.xlu0 %6248 }
 0x2c0   : > { %6268 = vst.msk [vmem:[#allocation4 + $0x10] sm:$0xff] %vm13363_vm5, %v6249_v21 }
 0x2c1   : > { %v9297_v37 = vpop.f32.mrb[12].mxu0 }
 0x2c2   : > { %v3197_v56 = vmul.f32 %v9297_v37, %v11769_v3  ;;  %v3161_v36 = vpop.f32.mrb[13].mxu0 }
 0x2c3   : > { %v6555_v2 = vpop.permute.xlu0 %6554  ;;  %v6247_v10 = vpop.permute.xlu1 %6246  ;;  %v3195_v28 = vmul.f32 %v11769_v3, %v3161_v36 }
 0x2c4   : > { %6267 = vst.msk [vmem:[#allocation4 + $0x8] sm:$0xff] %vm13364_vm13, %v6247_v10  ;;  %v9298_v15 = vpop.f32.mrb[14].mxu0  ;;  %v3220_v48 = vadd.f32 %v11782_v31, %v3197_v56  ;;  %vm13375_vm13 = vcmask 130144   ;;  %v6228_v10 = vld [vmem:[#allocation4 + $0x38] sm:$0xff] }
 0x2c5   : > { %v3198_v4 = vmul.f32 %v9298_v15, %v11769_v3  ;;  %v3164_v26 = vpop.f32.mrb[15].mxu0  ;;  %v3218_v9 = vadd.f32 %v11782_v31, %v3195_v28  ;;  %vm12137_vm6 = vmand %vm13375_vm13, %vm13374_vm3 }
 0x2c6   : > { %v3196_v8 = vmul.f32 %v11769_v3, %v3164_v26  ;;  %v3236_v32 = vmax.f32 %v3220_v48, 0.0 }
 0x2c7   : > { %v6280_v42 = vld [vmem:[#allocation4 + $0x10] sm:$0x80]  ;;  %v3221_v59 = vadd.f32 %v11782_v31, %v3198_v4  ;;  %v6357_v57 = vpop.permute.xlu0 %6356  ;;  %v12111_v58 = vpop.permute.xlu1 %6490  ;;  %v3234_v27 = vmax.f32 %v3218_v9, 0.0 }
 0x2c8   : > { %v6281_v50 = vsel %vm12102_vm9, 0, %v6280_v42  ;;  %v3219_v62 = vadd.f32 %v11782_v31, %v3196_v8 }
 0x2c9   : > { %6282 = vst [vmem:[#allocation4 + $0x10] sm:$0x80] %v6281_v50  ;;  %v3237_v46 = vmax.f32 %v3221_v59, 0.0 }
 0x2ca   : > { %v3235_v19 = vmax.f32 %v3219_v62, 0.0 }
 0x2cb   : > { %v6277_v45 = vld [vmem:[#allocation4 + $0x8] sm:$0x80]  ;;  %v3245_v11 = vpack.c.bf16 %v3237_v46, %v3236_v32  ;;  %v12116_v49 = vpop.permute.xlu0 %6676  ;;  %v12118_v3 = vpop.permute.xlu1 %6674 }
 0x2cc   : > { %v6278_v5 = vsel %vm12102_vm9, 0, %v6277_v45  ;;  %v3244_v16 = vpack.c.bf16 %v3235_v19, %v3234_v27 }
 0x2cd   : > { %6279 = vst [vmem:[#allocation4 + $0x8] sm:$0x80] %v6278_v5  ;;  %3253 = vst.msk [vmem:[#allocation2 + $0x38] sm:$0xff] %vm13368_vm15, %v3245_v11  ;;  %vm13378_vm15 = vcmask 162944  }
 0x2ce   : > { %3252 = vst.msk [vmem:[#allocation2 + $0x30] sm:$0xff] %vm13369_vm11, %v3244_v16  ;;  %vm13379_vm11 = vmmov %vm13363_vm5 }
 0x2cf   : > { %v12130_v30 = vpop.permute.xlu0 %6811  ;;  %v6251_v63 = vpop.permute.xlu1 %6250  ;;  %vm13381_vm2 = vmmov %vm13378_vm15 }
 0x2d0   : > { %v6380_v35 = vld [vmem:[#allocation4 + $0x10] sm:$0xff]  ;;  %6269 = vst.msk [vmem:[#allocation4 + $0x18] sm:$0xff] %vm13363_vm5, %v6251_v63  ;;  %vm13382_vm5 = vmmov %vm13380_vm1 }
 0x2d1   : > { %v6381_v44 = vsel %vm12126_vm12, %v6357_v57, %v6380_v35  ;;  %vm13383_vm3 = vmmov %vm13381_vm2 }
 0x2d2   : > { %6382 = vst [vmem:[#allocation4 + $0x10] sm:$0xff] %v6381_v44  ;;  %vm13384_vm13 = vmmov %vm13381_vm2 }
 0x2d3   : > { %v6355_v6 = vpop.permute.xlu0 %6354  ;;  %v6559_v24 = vpop.permute.xlu1 %6558 }
 0x2d4   : > { %v6377_v7 = vld [vmem:[#allocation4 + $0x8] sm:$0xff] }
 0x2d5   : > { %v6378_v14 = vsel %vm12126_vm12, %v6355_v6, %v6377_v7  ;;  %v12143_v33 = vld [vmem:[#allocation2 + $0x30] sm:$0xff]  ;;  %v6934_v6 = vld [vmem:[#allocation2 + $0x8] sm:$0xff] }
 0x2d6   : > { %6379 = vst [vmem:[#allocation4 + $0x8] sm:$0xff] %v6378_v14  ;;  %6258 = vrot.lane.b32.xlu1 %v12143_v33, %s9709_s23  ;;  %v6475_v25 = vshrl.u32 %v12143_v33, 16  ;;  %v6478_v29 = vshll.u32 %v12143_v33, 16  ;;  %v6945_v7 = vshll.u32 %v6934_v6, 16 }
 0x2d7   : > { %v6283_v22 = vld [vmem:[#allocation4 + $0x18] sm:$0x80]  ;;  %v6489_v41 = vpop.permute.xlu0 %6488  ;;  %v12149_v54 = vpop.permute.xlu1 %6680 }
 0x2d8   : > { %v6284_v21 = vsel %vm12102_vm9, 0, %v6283_v22  ;;  %v6515_v37 = vsel %vm12137_vm6, %v6489_v41, %v6514_v60  ;;  %v6477_v56 = vrot.slane %v6475_v25, 7  ;;  %v6352_v48 = vrot.slane %v6478_v29, 1 }
 0x2d9   : > { %v6406_v36 = vld [vmem:[#allocation4 + $0x10] sm:$0x1]  ;;  %6285 = vst [vmem:[#allocation4 + $0x18] sm:$0x80] %v6284_v21  ;;  %6516 = vst [vmem:[#allocation4] sm:$0xff] %v6515_v37 }
 0x2da   : > { %v6407_v28 = vsel %vm11907_vm8, 0, %v6406_v36  ;;  %6578 = vst.msk [vmem:[#allocation4] sm:$0xff] %vm13378_vm15, %v6555_v2  ;;  %6566 = vrot.lane.b32.xlu1 %v12143_v33, %s9700_s12  ;;  %v12160_v15 = vor.u32 %v6478_v29, %v6477_v56  ;;  %v12172_v42 = vor.u32 %v6475_v25, %v6352_v48  ;;  %vm13172_vm15 = vcmask 1041408  }
 0x2db   : > { %6408 = vst [vmem:[#allocation4 + $0x10] sm:$0x1] %v6407_v28  ;;  %v6253_v4 = vpop.permute.xlu0 %6252  ;;  %v6359_v26 = vpop.permute.xlu1 %6358 }
 0x2dc   : > { %6270 = vst.msk [vmem:[#allocation4 + $0x20] sm:$0xff] %vm13379_vm11, %v6253_v4  ;;  %6500 = vrot.lane.b32.xlu0 %v12160_v15, %s9708_s22  ;;  %v6229_v9 = vsel %vm13267_vm7, %v12160_v15, %v6228_v10  ;;  %v6943_v4 = vshrl.u32 %v6934_v6, 16  ;;  %vm13385_vm11 = vcmask 261344  }
 0x2dd   : > { %v6403_v8 = vld [vmem:[#allocation4 + $0x8] sm:$0x1]  ;;  %6230 = vst [vmem:[#allocation4 + $0x38] sm:$0xff] %v6229_v9  ;;  %v9685_v9 = vld [vmem:[%s13101_s5] sm:$0xff]  }
 0x2de   : > { %v6404_v2 = vsel %vm11907_vm8, 0, %v6403_v8  ;;  %6877 = vrot.lane.b32.xlu1 %v11883_v40, %s9711_s25  ;;  %v9686_v8 = vld [vmem:[%s13101_s5 + $0x8] sm:$0xff]   ;;  %9325 = vmatprep.subr.bf16.mxu0 %v9685_v9 }
 0x2df   : > { %6405 = vst [vmem:[#allocation4 + $0x8] sm:$0x1] %v6404_v2  ;;  %v12174_v59 = vpop.permute.xlu0 %6560  ;;  %v6493_v57 = vpop.permute.xlu1 %6492  ;;  %9326 = vmatpush3.bf16.msra.mxu0 %v9685_v9 }
 0x2e0   : > { %v6383_v50 = vld [vmem:[#allocation4 + $0x18] sm:$0xff]  ;;  %6366 = vrot.lane.b32.xlu0 %v12172_v42, %s9699_s11  ;;  %9327 = vmatprep.subr.bf16.mxu0 %v9686_v8 }
 0x2e1   : > { %v6586_v62 = vld [vmem:[#allocation4] sm:$0x80]  ;;  %v6384_v32 = vsel %vm12126_vm12, %v6359_v26, %v6383_v50 }
 0x2e2   : > { %v6587_v46 = vsel %vm13310_vm10, 0, %v6586_v62  ;;  %6385 = vst [vmem:[#allocation4 + $0x18] sm:$0xff] %v6384_v32  ;;  %v6520_v27 = vld [vmem:[#allocation4 + $0x10] sm:$0xff]  ;;  %6686 = vrot.lane.b32.xlu1 %v12172_v42, %s9710_s24 }
 0x2e3   : > { %6588 = vst [vmem:[#allocation4] sm:$0x80] %v6587_v46  ;;  %v6286_v40 = vld [vmem:[#allocation4 + $0x20] sm:$0x80]  ;;  %v6521_v19 = vsel %vm12137_vm6, %v6493_v57, %v6520_v27  ;;  %v6361_v45 = vpop.permute.xlu0 %6360  ;;  %v6257_v11 = vpop.permute.xlu1 %6256  ;;  %9328 = vmatpush3.bf16.msra.mxu0 %v9686_v8 }
 0x2e4   : > { %v6287_v5 = vsel %vm12102_vm9, 0, %v6286_v40  ;;  %6522 = vst [vmem:[#allocation4 + $0x10] sm:$0xff] %v6521_v19  ;;  %6272 = vst.msk [vmem:[#allocation4 + $0x30] sm:$0xff] %vm13380_vm1, %v6257_v11  ;;  %6815 = vrot.lane.b32.xlu0 %v11937_v55, %s9702_s14  ;;  %v6936_v40 = vld [vmem:[#allocation2 + $0x18] sm:$0xff]  ;;  %vm6908_vm1 = vcmask 294151  }
 0x2e5   : > { %6288 = vst [vmem:[#allocation4 + $0x20] sm:$0x80] %v6287_v5  ;;  %6580 = vst.msk [vmem:[#allocation4 + $0x10] sm:$0xff] %vm13381_vm2, %v6559_v24  ;;  %v6935_v24 = vld [vmem:[#allocation2 + $0x10] sm:$0xff] }
 0x2e6   : > { %v6517_v16 = vld [vmem:[#allocation4 + $0x8] sm:$0xff]  ;;  %6817 = vrot.lane.b32.xlu1 %v11968_v1, %s9702_s14  ;;  %v6950_v57 = vshrl.u32 %v6935_v24, 16 }
 0x2e7   : > { %v6518_v63 = vsel %vm12137_vm6, %v12111_v58, %v6517_v16  ;;  %v6495_v35 = vpop.permute.xlu0 %6494  ;;  %v6255_v44 = vpop.permute.xlu1 %6254 }
 0x2e8   : > { %6519 = vst [vmem:[#allocation4 + $0x8] sm:$0xff] %v6518_v63  ;;  %6271 = vst.msk [vmem:[#allocation4 + $0x28] sm:$0xff] %vm13382_vm5, %v6255_v44  ;;  %6879 = vrot.lane.b32.xlu0 %v11876_v52, %s9711_s25  ;;  %v6959_v44 = vshll.u32 %v6936_v40, 16  ;;  %vm13386_vm5 = vsmask.f32 7966 }
 0x2e9   : > { %6579 = vst.msk [vmem:[#allocation4 + $0x8] sm:$0xff] %vm13383_vm3, %v12095_v53  ;;  %v6409_v55 = vld [vmem:[#allocation4 + $0x18] sm:$0x1]  ;;  %vm12305_vm3 = vmand %vm6908_vm1, %vm13386_vm5  ;;  %vm13393_vm5 = vcmask 31744  }
 0x2ea   : > { %v6410_v1 = vsel %vm11907_vm8, 0, %v6409_v55  ;;  %6881 = vrot.lane.b32.xlu1 %v11929_v20, %s9711_s25  ;;  %v6698_v58 = vld [vmem:[#allocation4] sm:$0xff]  ;;  %v12211_v53 = vld [vmem:[#allocation2 + $0x38] sm:$0xff]  ;;  %v6952_v20 = vshll.u32 %v6935_v24, 16  ;;  %v6938_v24 = vld [vmem:[#allocation2 + $0x28] sm:$0xff] }
 0x2eb   : > { %6411 = vst [vmem:[#allocation4 + $0x18] sm:$0x1] %v6410_v1  ;;  %v6292_v14 = vld [vmem:[#allocation4 + $0x30] sm:$0x80]  ;;  %v6679_v60 = vpop.permute.xlu0 %6678  ;;  %v12206_v25 = vpop.permute.xlu1 %6813  ;;  %v6699_v52 = vsel %vm13314_vm4, %v12118_v3, %v6698_v58  ;;  %v6947_v3 = vrot.slane %v6945_v7, 1  ;;  %v6482_v56 = vshrl.u32 %v12211_v53, 16  ;;  %vm13391_vm1 = vmmov %vm13381_vm2 }
 0x2ec   : > { %v6592_v29 = vld [vmem:[#allocation4 + $0x10] sm:$0x80]  ;;  %v6386_v22 = vld [vmem:[#allocation4 + $0x20] sm:$0xff]  ;;  %v6293_v41 = vsel %vm12102_vm9, 0, %v6292_v14  ;;  %6819 = vrot.lane.b32.xlu0 %v11962_v13, %s9702_s14  ;;  %6700 = vst [vmem:[#allocation4] sm:$0xff] %v6699_v52  ;;  %v6954_v26 = vrot.slane %v6952_v20, 1 }
 0x2ed   : > { %v6593_v21 = vsel %vm13310_vm10, 0, %v6592_v29  ;;  %v6387_v37 = vsel %vm12126_vm12, %v6361_v45, %v6386_v22  ;;  %6294 = vst [vmem:[#allocation4 + $0x30] sm:$0x80] %v6293_v41  ;;  %v6484_v50 = vrot.slane %v6482_v56, 7  ;;  %v6485_v45 = vshll.u32 %v12211_v53, 16 }
 0x2ee   : > { %6594 = vst [vmem:[#allocation4 + $0x10] sm:$0x80] %v6593_v21  ;;  %6388 = vst [vmem:[#allocation4 + $0x20] sm:$0xff] %v6387_v37  ;;  %6821 = vrot.lane.b32.xlu1 %v12160_v15, %s9702_s14  ;;  %v9687_v1 = vld [vmem:[%s13101_s5 + $0x10] ss:$0 sps:$4 sm:$0x33]  }
 0x2ef   : > { %v6289_v36 = vld [vmem:[#allocation4 + $0x28] sm:$0x80]  ;;  %v12224_v10 = vpop.permute.xlu0 %6564  ;;  %v12226_v13 = vpop.permute.xlu1 %6562  ;;  %9371 = vmatprep.subr.msk.bf16.mxu0 %vm13172_vm15, %v9687_v1  ;;  %v7103_v52 = vsel %vm13172_vm15, %v9687_v1, 0  ;;  %v6961_v22 = vrot.slane %v6959_v44, 1  ;;  %v6973_v41 = vshll.u32 %v6938_v24, 16  ;;  %v6957_v37 = vshrl.u32 %v6936_v40, 16 }
 0x2f0   : > { %v6589_v28 = vld [vmem:[#allocation4 + $0x8] sm:$0x80]  ;;  %v6290_v48 = vsel %vm12102_vm9, 0, %v6289_v36  ;;  %6883 = vrot.lane.b32.xlu0 %v11924_v39, %s9711_s25  ;;  %v6948_v39 = vor.u32 %v6947_v3, %v6943_v4  ;;  %9330 = vmatpush3.bf16.msra.mxu0 %v7103_v52  ;;  %v6971_v8 = vshrl.u32 %v6938_v24, 16  ;;  %v12351_v52 = vld [vmem:[%s13099_s3] ss:$0 sm:$0xff] }
 0x2f1   : > { %v6590_v15 = vsel %vm13310_vm10, 0, %v6589_v28  ;;  %6291 = vst [vmem:[#allocation4 + $0x28] sm:$0x80] %v6290_v48  ;;  %v6962_v4 = vor.u32 %v6961_v22, %v6957_v37  ;;  %vm13406_vm15 = vcmask 261344  }
 0x2f2   : > { %6591 = vst [vmem:[#allocation4 + $0x8] sm:$0x80] %v6590_v15  ;;  %v6523_v2 = vld [vmem:[#allocation4 + $0x18] sm:$0xff]  ;;  %6885 = vrot.lane.b32.xlu1 %v12143_v33, %s9711_s25  ;;  %v6955_v33 = vor.u32 %v6954_v26, %v6950_v57  ;;  %v6975_v26 = vrot.slane %v6973_v41, 1  ;;  %v12357_v41 = vld [vmem:[%s13100_s4] ss:$0 sm:$0xff] }
 0x2f3   : > { %v6524_v62 = vsel %vm12137_vm6, %v6495_v35, %v6523_v2  ;;  %v6722_v32 = vld [vmem:[#allocation4] sm:$0x1]  ;;  %v6876_v46 = vpop.permute.xlu0 %6875  ;;  %v12246_v27 = vpop.permute.xlu1 %6684  ;;  %v12261_v35 = vor.u32 %v6485_v45, %v6484_v50 }
 0x2f4   : > { %6525 = vst [vmem:[#allocation4 + $0x18] sm:$0xff] %v6524_v62  ;;  %v6723_v19 = vsel %vm13279_vm14, 0, %v6722_v32  ;;  %6998 = vrot.lane.b32.xlu0 %v6948_v39, %s9701_s13  ;;  %v6976_v62 = vor.u32 %v6975_v26, %v6971_v8 }
 0x2f5   : > { %v6412_v11 = vld [vmem:[#allocation4 + $0x20] sm:$0x1]  ;;  %6581 = vst.msk [vmem:[#allocation4 + $0x18] sm:$0xff] %vm13384_vm13, %v12174_v59  ;;  %v6704_v5 = vld [vmem:[#allocation4 + $0x10] sm:$0xff]  ;;  %6724 = vst [vmem:[#allocation4] sm:$0x1] %v6723_v19 }
 0x2f6   : > { %v6413_v16 = vsel %vm11907_vm8, 0, %v6412_v11  ;;  %v6705_v63 = vsel %vm13314_vm4, %v6679_v60, %v6704_v5  ;;  %7000 = vrot.lane.b32.xlu1 %v6955_v33, %s9701_s13  ;;  %v6392_v59 = vld [vmem:[#allocation4 + $0x30] sm:$0xff]  ;;  %vm13389_vm13 = vmmov %vm13381_vm2 }
 0x2f7   : > { %6414 = vst [vmem:[#allocation4 + $0x20] sm:$0x1] %v6413_v16  ;;  %6706 = vst [vmem:[#allocation4 + $0x10] sm:$0xff] %v6705_v63  ;;  %v6365_v6 = vpop.permute.xlu0 %6364  ;;  %v6363_v55 = vpop.permute.xlu1 %6362 }
 0x2f8   : > { %v6393_v58 = vsel %vm12126_vm12, %v6365_v6, %v6392_v59  ;;  %v6389_v7 = vld [vmem:[#allocation4 + $0x28] sm:$0xff]  ;;  %6502 = vrot.lane.b32.xlu0 %v12261_v35, %s9708_s22 }
 0x2f9   : > { %v6701_v14 = vld [vmem:[#allocation4 + $0x8] sm:$0xff]  ;;  %6394 = vst [vmem:[#allocation4 + $0x30] sm:$0xff] %v6393_v58  ;;  %v6390_v60 = vsel %vm12126_vm12, %v6363_v55, %v6389_v7 }
 0x2fa   : > { %v6702_v29 = vsel %vm13314_vm4, %v12116_v49, %v6701_v14  ;;  %6391 = vst [vmem:[#allocation4 + $0x28] sm:$0xff] %v6390_v60  ;;  %6568 = vrot.lane.b32.xlu1 %v12211_v53, %s9700_s12 }
 0x2fb   : > { %6703 = vst [vmem:[#allocation4 + $0x8] sm:$0xff] %v6702_v29  ;;  %v6497_v48 = vpop.permute.xlu1 %6496 }
 0x2fc   : > { %v6595_v20 = vld [vmem:[#allocation4 + $0x18] sm:$0x80]  ;;  %v6835_v21 = vld [vmem:[#allocation4] sm:$0xff]  ;;  %6823 = vrot.lane.b32.xlu0 %v12261_v35, %s9702_s14 }
 0x2fd   : > { %v6596_v3 = vsel %vm13310_vm10, 0, %v6595_v20  ;;  %v6836_v49 = vsel %vm13282_vm0, %v12130_v30, %v6835_v21 }
 0x2fe   : > { %6597 = vst [vmem:[#allocation4 + $0x18] sm:$0x80] %v6596_v3  ;;  %v6728_v36 = vld [vmem:[#allocation4 + $0x10] sm:$0x1]  ;;  %6837 = vst [vmem:[#allocation4] sm:$0xff] %v6836_v49  ;;  %v6526_v28 = vld [vmem:[#allocation4 + $0x20] sm:$0xff]  ;;  %6887 = vrot.lane.b32.xlu1 %v12211_v53, %s9711_s25 }
 0x2ff   : > { %v6729_v15 = vsel %vm13279_vm14, 0, %v6728_v36  ;;  %6900 = vst.msk [vmem:[#allocation4] sm:$0xff] %vm13385_vm11, %v6876_v46  ;;  %v6527_v9 = vsel %vm12137_vm6, %v6497_v48, %v6526_v28  ;;  %vm13390_vm11 = vcmask 64544  }
 0x300   : > { %6730 = vst [vmem:[#allocation4 + $0x10] sm:$0x1] %v6729_v15  ;;  %v6418_v30 = vld [vmem:[#allocation4 + $0x30] sm:$0x1]  ;;  %6528 = vst [vmem:[#allocation4 + $0x20] sm:$0xff] %v6527_v9  ;;  %7002 = vrot.lane.b32.xlu0 %v6962_v4, %s9701_s13 }
 0x301   : > { %v6419_v2 = vsel %vm11907_vm8, 0, %v6418_v30  ;;  %v6415_v39 = vld [vmem:[#allocation4 + $0x28] sm:$0x1]  ;;  %6582 = vst.msk [vmem:[#allocation4 + $0x20] sm:$0xff] %vm13381_vm2, %v12226_v13  ;;  %v6989_v13 = vrot.slane %v6485_v45, 1  ;;  %vm13392_vm2 = vcmask 261344  }
 0x302   : > { %v6725_v57 = vld [vmem:[#allocation4 + $0x8] sm:$0x1]  ;;  %6420 = vst [vmem:[#allocation4 + $0x30] sm:$0x1] %v6419_v2  ;;  %v6416_v50 = vsel %vm11907_vm8, 0, %v6415_v39  ;;  %7004 = vrot.lane.b32.xlu1 %v12059_v51, %s9701_s13 }
 0x303   : > { %v6726_v32 = vsel %vm13279_vm14, 0, %v6725_v57  ;;  %6417 = vst [vmem:[#allocation4 + $0x28] sm:$0x1] %v6416_v50  ;;  %v6990_v45 = vor.u32 %v6989_v13, %v6482_v56 }
 0x304   : > { %6727 = vst [vmem:[#allocation4 + $0x8] sm:$0x1] %v6726_v32  ;;  %7006 = vrot.lane.b32.xlu0 %v6976_v62, %s9701_s13 }
 0x305   : > { %v6707_v40 = vld [vmem:[#allocation4 + $0x18] sm:$0xff] }
 0x306   : > { %v6708_v51 = vsel %vm13314_vm4, %v12149_v54, %v6707_v40  ;;  %v6910_v19 = vld [vmem:[#allocation4] sm:$0x80]  ;;  %7008 = vrot.lane.b32.xlu1 %v12172_v42, %s9701_s13  ;;  %v6499_v54 = vpop.permute.xlu0 %6498 }
 0x307   : > { %6709 = vst [vmem:[#allocation4 + $0x18] sm:$0xff] %v6708_v51  ;;  %v6911_v33 = vsel %vm12305_vm3, 0, %v6910_v19 }
 0x308   : > { %6912 = vst [vmem:[#allocation4] sm:$0x80] %v6911_v33  ;;  %v6598_v11 = vld [vmem:[#allocation4 + $0x20] sm:$0x80]  ;;  %7417 = vrot.lane.b32.xlu0 %v12211_v53, %s9709_s23 }
 0x309   : > { %v6599_v5 = vsel %vm13310_vm10, 0, %v6598_v11  ;;  %v6532_v15 = vld [vmem:[#allocation4 + $0x30] sm:$0xff] }
 0x30a   : > { %v6529_v16 = vld [vmem:[#allocation4 + $0x28] sm:$0xff]  ;;  %6600 = vst [vmem:[#allocation4 + $0x20] sm:$0x80] %v6599_v5  ;;  %7010 = vrot.lane.b32.xlu1 %v6990_v45, %s9701_s13  ;;  %v6683_v6 = vpop.permute.xlu0 %6682 }
 0x30b   : > { %v6838_v42 = vld [vmem:[#allocation4 + $0x8] sm:$0xff]  ;;  %v6530_v63 = vsel %vm12137_vm6, %v6499_v54, %v6529_v16 }
 0x30c   : > { %v6839_v44 = vsel %vm13282_vm0, %v12206_v25, %v6838_v42  ;;  %6531 = vst [vmem:[#allocation4 + $0x28] sm:$0xff] %v6530_v63  ;;  %6688 = vrot.lane.b32.xlu0 %v6990_v45, %s9710_s24 }
 0x30d   : > { %6840 = vst [vmem:[#allocation4 + $0x8] sm:$0xff] %v6839_v44  ;;  %6583 = vst.msk [vmem:[#allocation4 + $0x28] sm:$0xff] %vm13389_vm13, %v12224_v10 }
 0x30e   : > { %v6731_v53 = vld [vmem:[#allocation4 + $0x18] sm:$0x1]  ;;  %vm13394_vm13 = vmmov %vm13393_vm5 }
 0x30f   : > { %v6732_v56 = vsel %vm13279_vm14, 0, %v6731_v53 }
 0x310   : > { %6733 = vst [vmem:[#allocation4 + $0x18] sm:$0x1] %v6732_v56  ;;  %7537 = vrot.lane.b32.xlu0 %v6990_v45, %s9699_s11 }
 0x311   : > { %v6710_v59 = vld [vmem:[#allocation4 + $0x20] sm:$0xff] }
 0x312   : > { %v6711_v55 = vsel %vm13314_vm4, %v6683_v6, %v6710_v59  ;;  %v6841_v59 = vld [vmem:[#allocation4 + $0x10] sm:$0xff] }
 0x313   : > { %6712 = vst [vmem:[#allocation4 + $0x20] sm:$0xff] %v6711_v55 }
 0x314   : > { %v6601_v25 = vld [vmem:[#allocation4 + $0x28] sm:$0x80] }
 0x315   : > { %v6602_v24 = vsel %vm13310_vm10, 0, %v6601_v25 }
 0x316   : > { %6603 = vst [vmem:[#allocation4 + $0x28] sm:$0x80] %v6602_v24 }
 0x31a   : > { %v6734_v1 = vld [vmem:[#allocation4 + $0x20] sm:$0x1] }
 0x31b   : > { %v6735_v10 = vsel %vm13279_vm14, 0, %v6734_v1 }
 0x31c   : > { %6736 = vst [vmem:[#allocation4 + $0x20] sm:$0x1] %v6735_v10  ;;  %v6844_v10 = vld [vmem:[#allocation4 + $0x18] sm:$0xff] }
 0x31d   : > { %v6713_v58 = vld [vmem:[#allocation4 + $0x28] sm:$0xff] }
 0x31e   : > { %v6714_v7 = vsel %vm13314_vm4, %v12246_v27, %v6713_v58 }
 0x31f   : > { %6715 = vst [vmem:[#allocation4 + $0x28] sm:$0xff] %v6714_v7 }
 0x326   : > { %v6737_v14 = vld [vmem:[#allocation4 + $0x28] sm:$0x1] }
 0x327   : > { %v6738_v60 = vsel %vm13279_vm14, 0, %v6737_v14 }
 0x328   : > { %6739 = vst [vmem:[#allocation4 + $0x28] sm:$0x1] %v6738_v60 }
 0x348   : > { %v6259_v29 = vpop.permute.xlu1 %6258 }
 0x349   : > { %6273 = vst.msk [vmem:[#allocation4 + $0x38] sm:$0xff] %vm13390_vm11, %v6259_v29  ;;  %v9311_v22 = vpop.f32.mrb[0].mxu1  ;;  %vm13395_vm11 = vmmov %vm13392_vm2 }
 0x34a   : > { %v6054_v27 = vmul.f32 %v9311_v22, %v12351_v52  ;;  %v5982_v20 = vpop.f32.mrb[1].mxu1 }
 0x34b   : > { %v6052_v21 = vmul.f32 %v12351_v52, %v5982_v20  ;;  %v9312_v37 = vpop.f32.mrb[2].mxu1 }
 0x34c   : > { %v6077_v3 = vadd.f32 %v12357_v41, %v6054_v27  ;;  %v6055_v49 = vmul.f32 %v9312_v37, %v12351_v52  ;;  %v6567_v36 = vpop.permute.xlu1 %6566  ;;  %v5985_v28 = vpop.f32.mrb[3].mxu1 }
 0x34d   : > { %v6075_v48 = vadd.f32 %v12357_v41, %v6052_v21  ;;  %v6053_v4 = vmul.f32 %v12351_v52, %v5985_v28 }
 0x34e   : > { %v6078_v26 = vadd.f32 %v12357_v41, %v6055_v49  ;;  %v6501_v9 = vpop.permute.xlu0 %6500  ;;  %v6093_v39 = vmax.f32 %v6077_v3, 0.0 }
 0x34f   : > { %v6076_v30 = vadd.f32 %v12357_v41, %v6053_v4  ;;  %v6533_v8 = vsel %vm12137_vm6, %v6501_v9, %v6532_v15  ;;  %v6091_v32 = vmax.f32 %v6075_v48, 0.0 }
 0x350   : > { %v6295_v2 = vld [vmem:[#allocation4 + $0x38] sm:$0x80]  ;;  %v6094_v57 = vmax.f32 %v6078_v26, 0.0  ;;  %6534 = vst [vmem:[#allocation4 + $0x30] sm:$0xff] %v6533_v8  ;;  %v6878_v50 = vpop.permute.xlu1 %6877 }
 0x351   : > { %v6296_v62 = vsel %vm12102_vm9, 0, %v6295_v2  ;;  %v6092_v13 = vmax.f32 %v6076_v30, 0.0  ;;  %6584 = vst.msk [vmem:[#allocation4 + $0x30] sm:$0xff] %vm13391_vm1, %v6567_v36  ;;  %v9315_v40 = vpop.f32.mrb[4].mxu1  ;;  %vm13396_vm1 = vmmov %vm13393_vm5 }
 0x352   : > { %6901 = vst.msk [vmem:[#allocation4 + $0x8] sm:$0xff] %vm13392_vm2, %v6878_v50  ;;  %6297 = vst [vmem:[#allocation4 + $0x38] sm:$0x80] %v6296_v62  ;;  %v6108_v51 = vpack.c.bf16 %v6094_v57, %v6093_v39  ;;  %v6058_v19 = vmul.f32 %v9315_v40, %v12351_v52  ;;  %v6367_v33 = vpop.permute.xlu0 %6366  ;;  %v5998_v11 = vpop.f32.mrb[5].mxu1 }
 0x353   : > { %v6107_v45 = vpack.c.bf16 %v6092_v13, %v6091_v32  ;;  %v6056_v5 = vmul.f32 %v12351_v52, %v5998_v11  ;;  %v9316_v54 = vpop.f32.mrb[6].mxu1  ;;  %vm13397_vm2 = vmmov %vm13396_vm1 }
 0x354   : > { %6117 = vst.msk [vmem:[#allocation2 + $0x48] sm:$0xff] %vm13393_vm5, %v6108_v51  ;;  %v6081_v16 = vadd.f32 %v12357_v41, %v6058_v19  ;;  %v6059_v42 = vmul.f32 %v9316_v54, %v12351_v52  ;;  %v12378_v63 = vpop.permute.xlu1 %6686  ;;  %v6001_v44 = vpop.f32.mrb[7].mxu1  ;;  %vm13398_vm5 = vmmov %vm13395_vm11 }
 0x355   : > { %6116 = vst.msk [vmem:[#allocation2 + $0x40] sm:$0xff] %vm13394_vm13, %v6107_v45  ;;  %v6079_v53 = vadd.f32 %v12357_v41, %v6056_v5  ;;  %v6057_v56 = vmul.f32 %v12351_v52, %v6001_v44  ;;  %v6850_v44 = vld [vmem:[#allocation4 + $0x28] sm:$0xff]  ;;  %vm13399_vm13 = vmmov %vm13398_vm5 }
 0x356   : > { %v6082_v6 = vadd.f32 %v12357_v41, %v6059_v42  ;;  %v6816_v55 = vpop.permute.xlu0 %6815  ;;  %v6097_v25 = vmax.f32 %v6081_v16, 0.0 }
 0x357   : > { %v6080_v24 = vadd.f32 %v12357_v41, %v6057_v56  ;;  %v6842_v1 = vsel %vm13282_vm0, %v6816_v55, %v6841_v59  ;;  %v6095_v14 = vmax.f32 %v6079_v53, 0.0 }
 0x358   : > { %v6604_v58 = vld [vmem:[#allocation4 + $0x30] sm:$0x80]  ;;  %v6098_v60 = vmax.f32 %v6082_v6, 0.0  ;;  %6843 = vst [vmem:[#allocation4 + $0x10] sm:$0xff] %v6842_v1  ;;  %v6818_v29 = vpop.permute.xlu1 %6817 }
 0x359   : > { %v6913_v7 = vld [vmem:[#allocation4 + $0x8] sm:$0x80]  ;;  %v6605_v22 = vsel %vm13310_vm10, 0, %v6604_v58  ;;  %v6395_v20 = vld [vmem:[#allocation4 + $0x38] sm:$0xff]  ;;  %v6096_v21 = vmax.f32 %v6080_v24, 0.0  ;;  %v6845_v37 = vsel %vm13282_vm0, %v6818_v29, %v6844_v10  ;;  %v9319_v3 = vpop.f32.mrb[8].mxu1 }
 0x35a   : > { %v6914_v27 = vsel %vm12305_vm3, 0, %v6913_v7  ;;  %6606 = vst [vmem:[#allocation4 + $0x30] sm:$0x80] %v6605_v22  ;;  %v6396_v49 = vsel %vm12126_vm12, %v6367_v33, %v6395_v20  ;;  %v6110_v36 = vpack.c.bf16 %v6098_v60, %v6097_v25  ;;  %6846 = vst [vmem:[#allocation4 + $0x18] sm:$0xff] %v6845_v37  ;;  %v6062_v28 = vmul.f32 %v9319_v3, %v12351_v52  ;;  %v6880_v48 = vpop.permute.xlu0 %6879  ;;  %v6014_v4 = vpop.f32.mrb[9].mxu1  ;;  %v6847_v33 = vld [vmem:[#allocation4 + $0x20] sm:$0xff] }
 0x35b   : > { %6915 = vst [vmem:[#allocation4 + $0x8] sm:$0x80] %v6914_v27  ;;  %v12396_v26 = vld [vmem:[#allocation2 + $0x48] sm:$0xff]  ;;  %6397 = vst [vmem:[#allocation4 + $0x38] sm:$0xff] %v6396_v49  ;;  %v6109_v15 = vpack.c.bf16 %v6096_v21, %v6095_v14  ;;  %v6060_v9 = vmul.f32 %v12351_v52, %v6014_v4  ;;  %v9320_v30 = vpop.f32.mrb[10].mxu1 }
 0x35c   : > { %6902 = vst.msk [vmem:[#allocation4 + $0x10] sm:$0xff] %vm13395_vm11, %v6880_v48  ;;  %v7328_v8 = vshrl.u32 %v12396_v26, 16  ;;  %v12401_v2 = vld [vmem:[#allocation2 + $0x40] sm:$0xff]  ;;  %v6085_v39 = vadd.f32 %v12357_v41, %v6062_v28  ;;  %v6063_v57 = vmul.f32 %v9320_v30, %v12351_v52  ;;  %v6882_v50 = vpop.permute.xlu1 %6881  ;;  %v6017_v62 = vpop.f32.mrb[11].mxu1  ;;  %7421 = vrot.lane.b32.xlu0 %v12396_v26, %s9709_s23  ;;  %v7331_v45 = vshll.u32 %v12396_v26, 16  ;;  %vm13400_vm11 = vmmov %vm13396_vm1 }
 0x35d   : > { %6119 = vst.msk [vmem:[#allocation2 + $0x58] sm:$0xff] %vm13396_vm1, %v6110_v36  ;;  %v6083_v32 = vadd.f32 %v12357_v41, %v6060_v9  ;;  %v6061_v13 = vmul.f32 %v12351_v52, %v6017_v62  ;;  %7419 = vrot.lane.b32.xlu1 %v12401_v2, %s9709_s23  ;;  %v7321_v51 = vshrl.u32 %v12401_v2, 16  ;;  %v7324_v56 = vshll.u32 %v12401_v2, 16 }
 0x35e   : > { %6118 = vst.msk [vmem:[#allocation2 + $0x50] sm:$0xff] %vm13397_vm2, %v6109_v15  ;;  %v7330_v40 = vrot.slane %v7328_v8, 7  ;;  %v6086_v19 = vadd.f32 %v12357_v41, %v6063_v57  ;;  %v6820_v11 = vpop.permute.xlu0 %6819  ;;  %v6101_v16 = vmax.f32 %v6085_v39, 0.0  ;;  %v7500_v21 = vrot.slane %v7331_v45, 1  ;;  %v7024_v15 = vld [vmem:[#allocation4] sm:$0xff] }
 0x35f   : > { %6903 = vst.msk [vmem:[#allocation4 + $0x18] sm:$0xff] %vm13398_vm5, %v6882_v50  ;;  %v6084_v5 = vadd.f32 %v12357_v41, %v6061_v13  ;;  %v6848_v54 = vsel %vm13282_vm0, %v6820_v11, %v6847_v33  ;;  %v6099_v59 = vmax.f32 %v6083_v32, 0.0  ;;  %v7323_v1 = vrot.slane %v7321_v51, 7 }
 0x360   : > { %v6102_v42 = vmax.f32 %v6086_v19, 0.0  ;;  %6849 = vst [vmem:[#allocation4 + $0x20] sm:$0xff] %v6848_v54  ;;  %v6822_v53 = vpop.permute.xlu1 %6821  ;;  %7739 = vrot.lane.b32.xlu0 %v12396_v26, %s9700_s12  ;;  %v12429_v24 = vor.u32 %v7331_v45, %v7330_v40  ;;  %vm13401_vm1 = vsmask.f32 7424  ;;  %vm13402_vm2 = vcmask 294144  }
 0x361   : > { %v6716_v6 = vld [vmem:[#allocation4 + $0x30] sm:$0xff]  ;;  %v6100_v55 = vmax.f32 %v6084_v5, 0.0  ;;  %v6851_v25 = vsel %vm13282_vm0, %v6822_v53, %v6850_v44  ;;  %6889 = vrot.lane.b32.xlu1 %v12401_v2, %s9711_s25  ;;  %vm12450_vm5 = vmand %vm13402_vm2, %vm13401_vm1  ;;  %v12461_v48 = vor.u32 %v7324_v56, %v7323_v1  ;;  %v12468_v39 = vor.u32 %v7500_v21, %v7328_v8 }
 0x362   : > { %v6421_v10 = vld [vmem:[#allocation4 + $0x38] sm:$0x1]  ;;  %v6717_v58 = vsel %vm13314_vm4, %v12378_v63, %v6716_v6  ;;  %v6112_v14 = vpack.c.bf16 %v6102_v42, %v6101_v16  ;;  %6852 = vst [vmem:[#allocation4 + $0x28] sm:$0xff] %v6851_v25  ;;  %v6884_v60 = vpop.permute.xlu0 %6883  ;;  %v7493_v57 = vrot.slane %v7324_v56, 1  ;;  %v7027_v62 = vld [vmem:[#allocation4 + $0x8] sm:$0xff]  ;;  %vm13408_vm1 = vnez %v13174_v0 }
 0x363   : > { %v6916_v7 = vld [vmem:[#allocation4 + $0x10] sm:$0x80]  ;;  %v6422_v29 = vsel %vm11907_vm8, 0, %v6421_v10  ;;  %6718 = vst [vmem:[#allocation4 + $0x30] sm:$0xff] %v6717_v58  ;;  %v6111_v20 = vpack.c.bf16 %v6100_v55, %v6099_v59  ;;  %6904 = vst.msk [vmem:[#allocation4 + $0x20] sm:$0xff] %vm13399_vm13, %v6884_v60  ;;  %vm13409_vm2 = vcmask 261344  }
 0x364   : > { %v12438_v22 = vld [vmem:[#allocation2 + $0x58] sm:$0xff]  ;;  %v6917_v27 = vsel %vm12305_vm3, 0, %v6916_v7  ;;  %6423 = vst [vmem:[#allocation4 + $0x38] sm:$0x1] %v6422_v29  ;;  %6121 = vst.msk [vmem:[#allocation2 + $0x68] sm:$0xff] %vm13400_vm11, %v6112_v14  ;;  %v6886_v3 = vpop.permute.xlu1 %6885  ;;  %7675 = vrot.lane.b32.xlu0 %v12429_v24, %s9708_s22  ;;  %v12496_v53 = vor.u32 %v7493_v57, %v7321_v51 }
 0x365   : > { %v12443_v37 = vld [vmem:[#allocation2 + $0x50] sm:$0xff]  ;;  %6918 = vst [vmem:[#allocation4 + $0x10] sm:$0x80] %v6917_v27  ;;  %vm13405_vm13 = vmmov %vm13400_vm11  ;;  %7737 = vrot.lane.b32.xlu1 %v12401_v2, %s9700_s12  ;;  %vm7076_vm11 = vcmask 293888   ;;  %v7345_v4 = vshll.u32 %v12438_v22, 16  ;;  %v7342_v40 = vshrl.u32 %v12438_v22, 16 }
 0x366   : > { %v6919_v63 = vld [vmem:[#allocation4 + $0x18] sm:$0x80]  ;;  %v7338_v36 = vshll.u32 %v12443_v37, 16  ;;  %6120 = vst.msk [vmem:[#allocation2 + $0x60] sm:$0xff] %vm13405_vm13, %v6111_v20  ;;  %v6999_v9 = vpop.permute.xlu0 %6998  ;;  %v7335_v50 = vshrl.u32 %v12443_v37, 16  ;;  %vm13410_vm13 = vcmask 64544  }
 0x367   : > { %v6920_v28 = vsel %vm12305_vm3, 0, %v6919_v63  ;;  %6905 = vst.msk [vmem:[#allocation4 + $0x28] sm:$0xff] %vm13406_vm15, %v6886_v3  ;;  %v7025_v30 = vsel %vm12450_vm5, %v6999_v9, %v7024_v15  ;;  %v8119_v5 = vrot.slane %v7345_v4, 1  ;;  %vm13407_vm15 = vcmask 162944  }
 0x368   : > { %6921 = vst [vmem:[#allocation4 + $0x18] sm:$0x80] %v6920_v28  ;;  %7026 = vst [vmem:[#allocation4] sm:$0xff] %v7025_v30  ;;  %v7001_v32 = vpop.permute.xlu1 %7000  ;;  %6825 = vrot.lane.b32.xlu0 %v12461_v48, %s9702_s14  ;;  %9331 = vmatprep.mubr.msk.bf16.mxu0 %vm7076_vm11, %v7025_v30  ;;  %v8112_v13 = vrot.slane %v7338_v36, 1  ;;  %v7344_v3 = vrot.slane %v7342_v40, 7 }
 0x369   : > { %v7028_v8 = vsel %vm12450_vm5, %v7001_v32, %v7027_v62  ;;  %7541 = vrot.lane.b32.xlu1 %v12468_v39, %s9699_s11  ;;  %v12505_v1 = vor.u32 %v8119_v5, %v7342_v40 }
 0x36a   : > { %v6740_v19 = vld [vmem:[#allocation4 + $0x30] sm:$0x1]  ;;  %v6922_v33 = vld [vmem:[#allocation4 + $0x20] sm:$0x80]  ;;  %7029 = vst [vmem:[#allocation4 + $0x8] sm:$0xff] %v7028_v8  ;;  %v6503_v11 = vpop.permute.xlu0 %6502  ;;  %9332 = vmatmul.mubr.msk.bf16.vlgmr.msra.gmra.mrb[16].mxu0 %vm7076_vm11, %v7028_v8  ;;  %v12484_v45 = vor.u32 %v8112_v13, %v7335_v50 }
 0x36b   : > { %v6741_v54 = vsel %vm13279_vm14, 0, %v6740_v19  ;;  %v12490_v16 = vld [vmem:[#allocation2 + $0x68] sm:$0xff]  ;;  %v6923_v42 = vsel %vm12305_vm3, 0, %v6922_v33  ;;  %v6535_v44 = vld [vmem:[#allocation4 + $0x38] sm:$0xff]  ;;  %v12548_v33 = vor.u32 %v7345_v4, %v7344_v3 }
 0x36c   : > { %6742 = vst [vmem:[#allocation4 + $0x30] sm:$0x1] %v6741_v54  ;;  %v7359_v56 = vshll.u32 %v12490_v16, 16  ;;  %6924 = vst [vmem:[#allocation4 + $0x20] sm:$0x80] %v6923_v42  ;;  %v6536_v55 = vsel %vm12137_vm6, %v6503_v11, %v6535_v44  ;;  %v6569_v25 = vpop.permute.xlu1 %6568  ;;  %7425 = vrot.lane.b32.xlu0 %v12438_v22, %s9709_s23  ;;  %v7356_v7 = vshrl.u32 %v12490_v16, 16 }
 0x36d   : > { %v12499_v6 = vld [vmem:[#allocation2 + $0x60] sm:$0xff]  ;;  %6537 = vst [vmem:[#allocation4 + $0x38] sm:$0xff] %v6536_v55  ;;  %7539 = vrot.lane.b32.xlu1 %v12496_v53, %s9699_s11  ;;  %v7030_v28 = vld [vmem:[#allocation4 + $0x10] sm:$0xff] }
 0x36e   : > { %v6925_v59 = vld [vmem:[#allocation4 + $0x28] sm:$0x80]  ;;  %v7352_v2 = vshll.u32 %v12499_v6, 16  ;;  %6585 = vst.msk [vmem:[#allocation4 + $0x38] sm:$0xff] %vm13407_vm15, %v6569_v25  ;;  %v6824_v10 = vpop.permute.xlu0 %6823  ;;  %v8133_v58 = vrot.slane %v7359_v56, 1  ;;  %v7349_v29 = vshrl.u32 %v12499_v6, 16 }
 0x36f   : > { %v6926_v51 = vsel %vm12305_vm3, 0, %v6925_v59  ;;  %v7280_v14 = vld [vmem:[#allocation4] sm:$0x1]  ;;  %v7033_v13 = vld [vmem:[#allocation4 + $0x18] sm:$0xff]  ;;  %vm13411_vm15 = vcmask 31744  }
 0x370   : > { %6927 = vst [vmem:[#allocation4 + $0x28] sm:$0x80] %v6926_v51  ;;  %v8126_v60 = vrot.slane %v7352_v2, 1  ;;  %v7281_v27 = vsel %vm13408_vm1, 0, %v7280_v14  ;;  %v6888_v20 = vpop.permute.xlu1 %6887  ;;  %7543 = vrot.lane.b32.xlu0 %v12484_v45, %s9699_s11  ;;  %v12527_v63 = vor.u32 %v8133_v58, %v7356_v7 }
 0x371   : > { %7282 = vst [vmem:[#allocation4] sm:$0x1] %v7281_v27  ;;  %7673 = vrot.lane.b32.xlu1 %v12461_v48, %s9708_s22  ;;  %v7283_v21 = vld [vmem:[#allocation4 + $0x8] sm:$0x1] }
 0x372   : > { %v7003_v15 = vpop.permute.xlu0 %7002  ;;  %v7284_v9 = vsel %vm13408_vm1, 0, %v7283_v21  ;;  %v12533_v30 = vor.u32 %v8126_v60, %v7349_v29 }
 0x373   : > { %v6853_v57 = vld [vmem:[#allocation4 + $0x30] sm:$0xff]  ;;  %v7031_v62 = vsel %vm12450_vm5, %v7003_v15, %v7030_v28  ;;  %7285 = vst [vmem:[#allocation4 + $0x8] sm:$0x1] %v7284_v9  ;;  %v7036_v5 = vld [vmem:[#allocation4 + $0x20] sm:$0xff] }
 0x374   : > { %v6854_v32 = vsel %vm13282_vm0, %v6824_v10, %v6853_v57  ;;  %7032 = vst [vmem:[#allocation4 + $0x10] sm:$0xff] %v7031_v62  ;;  %v7005_v40 = vpop.permute.xlu1 %7004  ;;  %7429 = vrot.lane.b32.xlu0 %v12490_v16, %s9709_s23  ;;  %9335 = vmatprep.mubr.msk.bf16.mxu0 %vm7076_vm11, %v7031_v62 }
 0x375   : > { %v6607_v8 = vld [vmem:[#allocation4 + $0x38] sm:$0x80]  ;;  %6855 = vst [vmem:[#allocation4 + $0x30] sm:$0xff] %v6854_v32  ;;  %v7034_v19 = vsel %vm12450_vm5, %v7005_v40, %v7033_v13  ;;  %7423 = vrot.lane.b32.xlu1 %v12443_v37, %s9709_s23  ;;  %v7337_v32 = vrot.slane %v7335_v50, 7 }
 0x376   : > { %v6608_v11 = vsel %vm13310_vm10, 0, %v6607_v8  ;;  %6906 = vst.msk [vmem:[#allocation4 + $0x30] sm:$0xff] %vm13409_vm2, %v6888_v20  ;;  %7035 = vst [vmem:[#allocation4 + $0x18] sm:$0xff] %v7034_v19  ;;  %v7007_v54 = vpop.permute.xlu0 %7006  ;;  %9336 = vmatmul.mubr.msk.bf16.gmra.mrb[20].mxu0 %vm7076_vm11, %v7034_v19 }
 0x377   : > { %6609 = vst [vmem:[#allocation4 + $0x38] sm:$0x80] %v6608_v11  ;;  %v7037_v42 = vsel %vm12450_vm5, %v7007_v54, %v7036_v5  ;;  %v7039_v44 = vld [vmem:[#allocation4 + $0x28] sm:$0xff]  ;;  %vm13412_vm2 = vmmov %vm13411_vm15 }
 0x378   : > { %7038 = vst [vmem:[#allocation4 + $0x20] sm:$0xff] %v7037_v42  ;;  %v7009_v59 = vpop.permute.xlu1 %7008  ;;  %7679 = vrot.lane.b32.xlu0 %v12548_v33, %s9708_s22  ;;  %v7377_v4 = vld [vmem:[#allocation4] sm:$0xff]  ;;  %9339 = vmatprep.mubr.msk.bf16.mxu0 %vm7076_vm11, %v7037_v42  ;;  %v7358_v42 = vrot.slane %v7356_v7, 7 }
 0x379   : > { %v7040_v55 = vsel %vm12450_vm5, %v7009_v59, %v7039_v44  ;;  %v7378_v25 = vsel %vm13267_vm7, %v12261_v35, %v7377_v4  ;;  %7545 = vrot.lane.b32.xlu1 %v12505_v1, %s9699_s11 }
 0x37a   : > { %7041 = vst [vmem:[#allocation4 + $0x28] sm:$0xff] %v7040_v55  ;;  %7379 = vst [vmem:[#allocation4] sm:$0xff] %v7378_v25  ;;  %v7418_v51 = vpop.permute.xlu0 %7417  ;;  %v7380_v10 = vld [vmem:[#allocation4 + $0x8] sm:$0xff] }
 0x37b   : > { %7441 = vst.msk [vmem:[#allocation4] sm:$0xff] %vm13410_vm13, %v7418_v51  ;;  %v7286_v58 = vld [vmem:[#allocation4 + $0x10] sm:$0x1]  ;;  %v7381_v14 = vsel %vm13267_vm7, %v12461_v48, %v7380_v10  ;;  %vm13413_vm13 = vcmask 1041408  }
 0x37c   : > { %v7287_v60 = vsel %vm13408_vm1, 0, %v7286_v58  ;;  %7743 = vrot.lane.b32.xlu0 %v12438_v22, %s9700_s12  ;;  %v9323_v35 = vpop.f32.mrb[12].mxu1  ;;  %7382 = vst [vmem:[#allocation4 + $0x8] sm:$0xff] %v7381_v14 }
 0x37d   : > { %v6928_v27 = vld [vmem:[#allocation4 + $0x30] sm:$0x80]  ;;  %7288 = vst [vmem:[#allocation4 + $0x10] sm:$0x1] %v7287_v60  ;;  %7427 = vrot.lane.b32.xlu1 %v12499_v6, %s9709_s23  ;;  %v7289_v20 = vld [vmem:[#allocation4 + $0x18] sm:$0x1]  ;;  %v6066_v21 = vmul.f32 %v9323_v35, %v12351_v52 }
 0x37e   : > { %v6030_v3 = vpop.f32.mrb[13].mxu1  ;;  %v6929_v48 = vsel %vm12305_vm3, 0, %v6928_v27  ;;  %v6689_v28 = vpop.permute.xlu0 %6688  ;;  %v6719_v15 = vld [vmem:[#allocation4 + $0x38] sm:$0xff]  ;;  %v7290_v9 = vsel %vm13408_vm1, 0, %v7289_v20  ;;  %9340 = vmatmul.mubr.msk.bf16.gmra.mrb[24].mxu0 %vm7076_vm11, %v7040_v55  ;;  %v7351_v35 = vrot.slane %v7349_v29, 7  ;;  %v12620_v27 = vor.u32 %v7359_v56, %v7358_v42 }
 0x37f   : > { %v6064_v57 = vmul.f32 %v12351_v52, %v6030_v3  ;;  %v9324_v62 = vpop.f32.mrb[14].mxu1  ;;  %6930 = vst [vmem:[#allocation4 + $0x30] sm:$0x80] %v6929_v48  ;;  %v6720_v13 = vsel %vm13314_vm4, %v6689_v28, %v6719_v15  ;;  %7291 = vst [vmem:[#allocation4 + $0x18] sm:$0x1] %v7290_v9  ;;  %v6089_v8 = vadd.f32 %v12357_v41, %v6066_v21  ;;  %v7011_v21 = vpop.permute.xlu1 %7010 }
 0x380   : > { %v7292_v40 = vld [vmem:[#allocation4 + $0x20] sm:$0x1]  ;;  %v6067_v19 = vmul.f32 %v9324_v62, %v12351_v52  ;;  %v6033_v11 = vpop.f32.mrb[15].mxu1  ;;  %6721 = vst [vmem:[#allocation4 + $0x38] sm:$0xff] %v6720_v13  ;;  %7549 = vrot.lane.b32.xlu0 %v12527_v63, %s9699_s11 }
 0x381   : > { %v7293_v5 = vsel %vm13408_vm1, 0, %v7292_v40  ;;  %v6087_v50 = vadd.f32 %v12357_v41, %v6064_v57  ;;  %v6065_v54 = vmul.f32 %v12351_v52, %v6033_v11  ;;  %7012 = vrot.lane.b32.xlu1 %v12496_v53, %s9701_s13  ;;  %v7295_v44 = vld [vmem:[#allocation4 + $0x28] sm:$0x1]  ;;  %v6105_v59 = vmax.f32 %v6089_v8, 0.0 }
 0x382   : > { %7294 = vst [vmem:[#allocation4 + $0x20] sm:$0x1] %v7293_v5  ;;  %v6090_v4 = vadd.f32 %v12357_v41, %v6067_v19  ;;  %v7449_v55 = vld [vmem:[#allocation4] sm:$0x80]  ;;  %v7296_v25 = vsel %vm13408_vm1, 0, %v7295_v44  ;;  %v12605_v52 = vor.u32 %v7338_v36, %v7337_v32  ;;  %v7354_v57 = vor.u32 %v7352_v2, %v7351_v35  ;;  %v7538_v40 = vpop.permute.xlu0 %7537 }
 0x383   : > { %v6103_v51 = vmax.f32 %v6087_v50, 0.0  ;;  %v6088_v10 = vadd.f32 %v12357_v41, %v6065_v54  ;;  %v7450_v7 = vsel %vm12102_vm9, 0, %v7449_v55  ;;  %7297 = vst [vmem:[#allocation4 + $0x28] sm:$0x1] %v7296_v25 }
 0x384   : > { %v6106_v58 = vmax.f32 %v6090_v4, 0.0  ;;  %7451 = vst [vmem:[#allocation4] sm:$0x80] %v7450_v7  ;;  %7547 = vrot.lane.b32.xlu0 %v12533_v30, %s9699_s11  ;;  %v7383_v60 = vld [vmem:[#allocation4 + $0x10] sm:$0xff] }
 0x385   : > { %v6104_v14 = vmax.f32 %v6088_v10, 0.0  ;;  %7677 = vrot.lane.b32.xlu1 %v12605_v52, %s9708_s22  ;;  %v7384_v36 = vsel %vm13267_vm7, %v12429_v24, %v7383_v60 }
 0x386   : > { %v6114_v41 = vpack.c.bf16 %v6106_v58, %v6105_v59  ;;  %v7042_v20 = vld [vmem:[#allocation4 + $0x30] sm:$0xff]  ;;  %7385 = vst [vmem:[#allocation4 + $0x10] sm:$0xff] %v7384_v36  ;;  %v7386_v48 = vld [vmem:[#allocation4 + $0x18] sm:$0xff] }
 0x387   : > { %v6113_v3 = vpack.c.bf16 %v6104_v14, %v6103_v51  ;;  %v7043_v29 = vsel %vm12450_vm5, %v7011_v21, %v7042_v20  ;;  %v6743_v28 = vld [vmem:[#allocation4 + $0x38] sm:$0x1]  ;;  %v7387_v15 = vsel %vm13267_vm7, %v12605_v52, %v7386_v48  ;;  %v9688_v51 = vld [vmem:[%s13101_s5] sm:$0xff]  }
 0x388   : > { %6123 = vst.msk [vmem:[#allocation2 + $0x78] sm:$0xff] %vm13411_vm15, %v6114_v41  ;;  %7044 = vst [vmem:[#allocation4 + $0x30] sm:$0xff] %v7043_v29  ;;  %v6744_v56 = vsel %vm13279_vm14, 0, %v6743_v28  ;;  %7683 = vrot.lane.b32.xlu0 %v12620_v27, %s9708_s22  ;;  %9343 = vmatprep.mubr.msk.bf16.mxu0 %vm7076_vm11, %v7043_v29 }
 0x389   : > { %6122 = vst.msk [vmem:[#allocation2 + $0x70] sm:$0xff] %vm13412_vm2, %v6113_v3  ;;  %v7389_v9 = vld [vmem:[#allocation4 + $0x20] sm:$0xff]  ;;  %7388 = vst [vmem:[#allocation4 + $0x18] sm:$0xff] %v7387_v15  ;;  %7741 = vrot.lane.b32.xlu1 %v12443_v37, %s9700_s12  ;;  %9347 = vmatprep.subr.bf16.mxu1 %v9688_v51  ;;  %vm13415_vm2 = vcmask 64544  }
 0x38a   : > { %6745 = vst [vmem:[#allocation4 + $0x38] sm:$0x1] %v6744_v56  ;;  %v7390_v62 = vsel %vm13267_vm7, %v12548_v33, %v7389_v9  ;;  %v7392_v32 = vld [vmem:[#allocation4 + $0x28] sm:$0xff]  ;;  %9348 = vmatpush3.bf16.msra.mxu1 %v9688_v51  ;;  %vm13414_vm15 = vmmov %vm13413_vm13 }
 0x38b   : > { %7391 = vst [vmem:[#allocation4 + $0x20] sm:$0xff] %v7390_v62  ;;  %v7561_v13 = vld [vmem:[#allocation4] sm:$0xff]  ;;  %v7393_v8 = vsel %vm13267_vm7, %v7354_v57, %v7392_v32 }
 0x38c   : > { %v7562_v19 = vsel %vm12126_vm12, %v7538_v40, %v7561_v13  ;;  %7747 = vrot.lane.b32.xlu0 %v12490_v16, %s9700_s12  ;;  %7394 = vst [vmem:[#allocation4 + $0x28] sm:$0xff] %v7393_v8 }
 0x38d   : > { %7563 = vst [vmem:[#allocation4] sm:$0xff] %v7562_v19  ;;  %7745 = vrot.lane.b32.xlu1 %v12499_v6, %s9700_s12 }
 0x38f   : > { %v7298_v2 = vld [vmem:[#allocation4 + $0x30] sm:$0x1] }
 0x390   : > { %v7299_v11 = vsel %vm13408_vm1, 0, %v7298_v2  ;;  %7859 = vrot.lane.b32.xlu0 %v12468_v39, %s9710_s24  ;;  %v7312_v5 = vld [vmem:[#allocation2 + $0x70] sm:$0xff] }
 0x391   : > { %7300 = vst [vmem:[#allocation4 + $0x30] sm:$0x1] %v7299_v11  ;;  %7857 = vrot.lane.b32.xlu1 %v12496_v53, %s9710_s24  ;;  %v7363_v54 = vshrl.u32 %v7312_v5, 16  ;;  %v7366_v59 = vshll.u32 %v7312_v5, 16  ;;  %v6856_v20 = vld [vmem:[#allocation4 + $0x38] sm:$0xff] }
 0x393   : > { %v7365_v44 = vrot.slane %v7363_v54, 7 }
 0x394   : > { %v7585_v50 = vld [vmem:[#allocation4] sm:$0x1]  ;;  %7861 = vrot.lane.b32.xlu0 %v12484_v45, %s9710_s24 }
 0x395   : > { %v7586_v42 = vsel %vm11907_vm8, 0, %v7585_v50  ;;  %7863 = vrot.lane.b32.xlu1 %v12505_v1, %s9710_s24  ;;  %v12668_v55 = vor.u32 %v7366_v59, %v7365_v44 }
 0x396   : > { %7587 = vst [vmem:[#allocation4] sm:$0x1] %v7586_v42 }
 0x398   : > { %7986 = vrot.lane.b32.xlu0 %v12429_v24, %s9702_s14  ;;  %v7395_v4 = vld [vmem:[#allocation4 + $0x30] sm:$0xff]  ;;  %v7535_v24 = vrot.slane %v7366_v59, 1 }
 0x399   : > { %7867 = vrot.lane.b32.xlu1 %v12527_v63, %s9710_s24  ;;  %v7396_v53 = vsel %vm13267_vm7, %v12620_v27, %v7395_v4 }
 0x39a   : > { %7397 = vst [vmem:[#allocation4 + $0x30] sm:$0xff] %v7396_v53  ;;  %v7536_v25 = vor.u32 %v7535_v24, %v7363_v54 }
 0x39c   : > { %7865 = vrot.lane.b32.xlu0 %v12533_v30, %s9710_s24 }
 0x39d   : > { %7681 = vrot.lane.b32.xlu1 %v7354_v57, %s9708_s22  ;;  %v7697_v62 = vld [vmem:[#allocation4] sm:$0xff] }
 0x3a0   : > { %7685 = vrot.lane.b32.xlu0 %v12668_v55, %s9708_s22 }
 0x3a1   : > { %7988 = vrot.lane.b32.xlu1 %v12605_v52, %s9702_s14 }
 0x3a4   : > { %8043 = vrot.lane.b32.xlu0 %v12396_v26, %s9711_s25  ;;  %v7616_v26 = vld [vmem:[#allocation2 + $0x78] sm:$0xff] }
 0x3a5   : > { %7431 = vrot.lane.b32.xlu1 %v7312_v5, %s9709_s23 }
 0x3a8   : > { %7990 = vrot.lane.b32.xlu0 %v12548_v33, %s9702_s14  ;;  %v7670_v33 = vshll.u32 %v7616_v26, 16 }
 0x3a9   : > { %7749 = vrot.lane.b32.xlu1 %v7312_v5, %s9700_s12 }
 0x3aa   : > { %v7855_v52 = vrot.slane %v7670_v33, 1 }
 0x3ac   : > { %8047 = vrot.lane.b32.xlu0 %v12438_v22, %s9711_s25  ;;  %v7667_v22 = vshrl.u32 %v7616_v26, 16 }
 0x3ad   : > { %8045 = vrot.lane.b32.xlu1 %v12443_v37, %s9711_s25 }
 0x3ae   : > { %v7669_v37 = vrot.slane %v7667_v22, 7  ;;  %v7856_v7 = vor.u32 %v7855_v52, %v7667_v22 }
 0x3b0   : > { %7551 = vrot.lane.b32.xlu0 %v7536_v25, %s9699_s11  ;;  %v7672_v10 = vor.u32 %v7670_v33, %v7669_v37 }
 0x3b1   : > { %7992 = vrot.lane.b32.xlu1 %v7354_v57, %s9702_s14 }
 0x3b4   : > { %7994 = vrot.lane.b32.xlu0 %v12620_v27, %s9702_s14 }
 0x3b5   : > { %8049 = vrot.lane.b32.xlu1 %v12499_v6, %s9711_s25  ;;  %v9689_v6 = vld [vmem:[%s13101_s5 + $0x8] sm:$0xff]  }
 0x3b6   : > { %9349 = vmatprep.subr.bf16.mxu1 %v9689_v6 }
 0x3b7   : > { %9350 = vmatpush3.bf16.msra.mxu1 %v9689_v6 }
 0x3b8   : > { %8051 = vrot.lane.b32.xlu0 %v12490_v16, %s9711_s25  ;;  %v9690_v16 = vld [vmem:[%s13101_s5 + $0x10] ss:$0 sps:$4 sm:$0x33]  }
 0x3b9   : > { %7869 = vrot.lane.b32.xlu1 %v7536_v25, %s9710_s24  ;;  %9372 = vmatprep.subr.msk.bf16.mxu1 %vm13413_vm13, %v9690_v16  ;;  %vm13416_vm13 = vmmov %vm13415_vm2 }
 0x3bc   : > { %8149 = vrot.lane.b32.xlu0 %v12468_v39, %s9701_s13  ;;  %v8244_v39 = vsel %vm13414_vm15, %v9690_v16, 0  ;;  %vm13417_vm15 = vcmask 261344  }
 0x3bd   : > { %8053 = vrot.lane.b32.xlu1 %v7312_v5, %s9711_s25  ;;  %9352 = vmatpush3.bf16.msra.mxu1 %v8244_v39 }
 0x3c0   : > { %7687 = vrot.lane.b32.xlu0 %v7672_v10, %s9708_s22 }
 0x3c1   : > { %8151 = vrot.lane.b32.xlu1 %v12484_v45, %s9701_s13 }
 0x3c4   : > { %7998 = vrot.lane.b32.xlu0 %v7672_v10, %s9702_s14 }
 0x3c5   : > { %7996 = vrot.lane.b32.xlu1 %v12668_v55, %s9702_s14 }
 0x3c8   : > { %8153 = vrot.lane.b32.xlu0 %v12505_v1, %s9701_s13 }
 0x3c9   : > { %7751 = vrot.lane.b32.xlu1 %v7616_v26, %s9700_s12 }
 0x3cc   : > { %8157 = vrot.lane.b32.xlu0 %v12527_v63, %s9701_s13 }
 0x3cd   : > { %8055 = vrot.lane.b32.xlu1 %v7616_v26, %s9711_s25 }
 0x3ce   : > { %v7422_v45 = vpop.permute.xlu0 %7421 }
 0x3cf   : > { %7443 = vst.msk [vmem:[#allocation4 + $0x10] sm:$0xff] %vm13415_vm2, %v7422_v45  ;;  %v7420_v58 = vpop.permute.xlu1 %7419 }
 0x3d0   : > { %7442 = vst.msk [vmem:[#allocation4 + $0x8] sm:$0xff] %vm13416_vm13, %v7420_v58  ;;  %7871 = vrot.lane.b32.xlu0 %v7856_v7, %s9710_s24  ;;  %vm13418_vm13 = vcmask 162944   ;;  %s9224_s24 = sshll.u32 %s13469_s28, 8 }
 0x3d1   : > { %8155 = vrot.lane.b32.xlu1 %v12533_v30, %s9701_s13  ;;  %s12940_s10 = scalar_lea.vmem %s13104_s8, %s9224_s24 }
 0x3d2   : > { %v12727_v1 = vpop.permute.xlu0 %7739 }
 0x3d3   : > { %v6890_v14 = vpop.permute.xlu1 %6889 }
 0x3d5   : > { %8159 = vrot.lane.b32.xlu1 %v7536_v25, %s9701_s13 }
 0x3d6   : > { %v7455_v63 = vld [vmem:[#allocation4 + $0x10] sm:$0x80]  ;;  %v12730_v60 = vpop.permute.xlu0 %7675 }
 0x3d7   : > { %v7456_v35 = vsel %vm12102_vm9, 0, %v7455_v63  ;;  %v7452_v41 = vld [vmem:[#allocation4 + $0x8] sm:$0x80]  ;;  %v7738_v36 = vpop.permute.xlu1 %7737 }
 0x3d8   : > { %7457 = vst [vmem:[#allocation4 + $0x10] sm:$0x80] %v7456_v35  ;;  %v7453_v27 = vsel %vm12102_vm9, 0, %v7452_v41 }
 0x3d9   : > { %7454 = vst [vmem:[#allocation4 + $0x8] sm:$0x80] %v7453_v27  ;;  %8161 = vrot.lane.b32.xlu1 %v7856_v7, %s9701_s13 }
 0x3da   : > { %v6826_v30 = vpop.permute.xlu0 %6825 }
 0x3db   : > { %v6857_v21 = vsel %vm13282_vm0, %v6826_v30, %v6856_v20  ;;  %v7542_v3 = vpop.permute.xlu1 %7541 }
 0x3dc   : > { %6858 = vst [vmem:[#allocation4 + $0x38] sm:$0xff] %v6857_v21 }
 0x3dd   : > { %6907 = vst.msk [vmem:[#allocation4 + $0x38] sm:$0xff] %vm13417_vm15, %v6890_v14  ;;  %vm13419_vm15 = vmmov %vm13415_vm2 }
 0x3de   : > { %v7426_v48 = vpop.permute.xlu0 %7425 }
 0x3df   : > { %v7567_v29 = vld [vmem:[#allocation4 + $0x10] sm:$0xff]  ;;  %7445 = vst.msk [vmem:[#allocation4 + $0x20] sm:$0xff] %vm13415_vm2, %v7426_v48  ;;  %v7540_v28 = vpop.permute.xlu1 %7539 }
 0x3e0   : > { %v7568_v15 = vsel %vm12126_vm12, %v7542_v3, %v7567_v29  ;;  %v7564_v56 = vld [vmem:[#allocation4 + $0x8] sm:$0xff] }
 0x3e1   : > { %7569 = vst [vmem:[#allocation4 + $0x10] sm:$0xff] %v7568_v15  ;;  %v7565_v9 = vsel %vm12126_vm12, %v7540_v28, %v7564_v56 }
 0x3e2   : > { %7566 = vst [vmem:[#allocation4 + $0x8] sm:$0xff] %v7565_v9  ;;  %v12745_v57 = vpop.permute.xlu0 %7543 }
 0x3e3   : > { %v7674_v32 = vpop.permute.xlu1 %7673 }
 0x3e4   : > { %v6931_v13 = vld [vmem:[#allocation4 + $0x38] sm:$0x80]  ;;  %v7698_v40 = vsel %vm12137_vm6, %v7674_v32, %v7697_v62 }
 0x3e5   : > { %v6932_v8 = vsel %vm12305_vm3, 0, %v6931_v13  ;;  %7699 = vst [vmem:[#allocation4] sm:$0xff] %v7698_v40 }
 0x3e6   : > { %6933 = vst [vmem:[#allocation4 + $0x38] sm:$0x80] %v6932_v8  ;;  %v7461_v19 = vld [vmem:[#allocation4 + $0x20] sm:$0x80]  ;;  %7761 = vst.msk [vmem:[#allocation4] sm:$0xff] %vm13418_vm13, %v7738_v36  ;;  %v7430_v2 = vpop.permute.xlu0 %7429 }
 0x3e7   : > { %v7462_v11 = vsel %vm12102_vm9, 0, %v7461_v19  ;;  %7447 = vst.msk [vmem:[#allocation4 + $0x30] sm:$0xff] %vm13419_vm15, %v7430_v2  ;;  %v7424_v5 = vpop.permute.xlu1 %7423  ;;  %vm13420_vm13 = vmmov %vm13415_vm2  ;;  %vm13421_vm15 = vcmask 162944  }
 0x3e8   : > { %v7591_v50 = vld [vmem:[#allocation4 + $0x10] sm:$0x1]  ;;  %7463 = vst [vmem:[#allocation4 + $0x20] sm:$0x80] %v7462_v11  ;;  %7444 = vst.msk [vmem:[#allocation4 + $0x18] sm:$0xff] %vm13415_vm2, %v7424_v5 }
 0x3e9   : > { %v7592_v54 = vsel %vm11907_vm8, 0, %v7591_v50  ;;  %v7588_v42 = vld [vmem:[#allocation4 + $0x8] sm:$0x1]  ;;  %vm13422_vm2 = vmmov %vm13421_vm15 }
 0x3ea   : > { %7593 = vst [vmem:[#allocation4 + $0x10] sm:$0x1] %v7592_v54  ;;  %v7589_v44 = vsel %vm11907_vm8, 0, %v7588_v42  ;;  %v12760_v59 = vpop.permute.xlu0 %7679 }
 0x3eb   : > { %7590 = vst [vmem:[#allocation4 + $0x8] sm:$0x1] %v7589_v44  ;;  %v7546_v4 = vpop.permute.xlu1 %7545 }
 0x3ed   : > { %v7769_v53 = vld [vmem:[#allocation4] sm:$0x80]  ;;  %v7045_v7 = vld [vmem:[#allocation4 + $0x38] sm:$0xff] }
 0x3ee   : > { %v7467_v24 = vld [vmem:[#allocation4 + $0x30] sm:$0x80]  ;;  %v12762_v25 = vpop.permute.xlu0 %7743  ;;  %v7770_v26 = vsel %vm13310_vm10, 0, %v7769_v53 }
 0x3ef   : > { %v7468_v51 = vsel %vm12102_vm9, 0, %v7467_v24  ;;  %v7458_v22 = vld [vmem:[#allocation4 + $0x18] sm:$0x80]  ;;  %v7573_v37 = vld [vmem:[#allocation4 + $0x20] sm:$0xff]  ;;  %v7428_v33 = vpop.permute.xlu1 %7427  ;;  %7771 = vst [vmem:[#allocation4] sm:$0x80] %v7770_v26 }
 0x3f0   : > { %7469 = vst [vmem:[#allocation4 + $0x30] sm:$0x80] %v7468_v51  ;;  %v7459_v10 = vsel %vm12102_vm9, 0, %v7458_v22  ;;  %v7574_v6 = vsel %vm12126_vm12, %v7546_v4, %v7573_v37  ;;  %7446 = vst.msk [vmem:[#allocation4 + $0x28] sm:$0xff] %vm13420_vm13, %v7428_v33 }
 0x3f1   : > { %7460 = vst [vmem:[#allocation4 + $0x18] sm:$0x80] %v7459_v10  ;;  %7575 = vst [vmem:[#allocation4 + $0x20] sm:$0xff] %v7574_v6  ;;  %v7703_v41 = vld [vmem:[#allocation4 + $0x10] sm:$0xff] }
 0x3f2   : > { %v7700_v16 = vld [vmem:[#allocation4 + $0x8] sm:$0xff]  ;;  %v7550_v39 = vpop.permute.xlu0 %7549 }
 0x3f3   : > { %v7701_v52 = vsel %vm12137_vm6, %v12730_v60, %v7700_v16  ;;  %v7013_v45 = vpop.permute.xlu1 %7012 }
 0x3f4   : > { %7702 = vst [vmem:[#allocation4 + $0x8] sm:$0xff] %v7701_v52  ;;  %v7046_v58 = vsel %vm12450_vm5, %v7013_v45, %v7045_v7 }
 0x3f5   : > { %7762 = vst.msk [vmem:[#allocation4 + $0x8] sm:$0xff] %vm13421_vm15, %v12727_v1  ;;  %7047 = vst [vmem:[#allocation4 + $0x38] sm:$0xff] %v7046_v58  ;;  %9344 = vmatmul.mubr.msk.bf16.gmra.mrb[28].mxu0 %vm7076_vm11, %v7046_v58  ;;  %vm13426_vm15 = vcmask 261344  }
 0x3f6   : > { %v7548_v14 = vpop.permute.xlu0 %7547  ;;  %v7881_v5 = vld [vmem:[#allocation4] sm:$0xff] }
 0x3f7   : > { %v7464_v63 = vld [vmem:[#allocation4 + $0x28] sm:$0x80]  ;;  %v7579_v35 = vld [vmem:[#allocation4 + $0x30] sm:$0xff]  ;;  %v7678_v36 = vpop.permute.xlu1 %7677 }
 0x3f8   : > { %v7570_v27 = vld [vmem:[#allocation4 + $0x18] sm:$0xff]  ;;  %v7597_v30 = vld [vmem:[#allocation4 + $0x20] sm:$0x1]  ;;  %v7465_v60 = vsel %vm12102_vm9, 0, %v7464_v63  ;;  %v7580_v20 = vsel %vm12126_vm12, %v7550_v39, %v7579_v35  ;;  %v7704_v21 = vsel %vm12137_vm6, %v7678_v36, %v7703_v41 }
 0x3f9   : > { %v7571_v1 = vsel %vm12126_vm12, %v12745_v57, %v7570_v27  ;;  %v7598_v3 = vsel %vm11907_vm8, 0, %v7597_v30  ;;  %7466 = vst [vmem:[#allocation4 + $0x28] sm:$0x80] %v7465_v60  ;;  %7581 = vst [vmem:[#allocation4 + $0x30] sm:$0xff] %v7580_v20 }
 0x3fa   : > { %7705 = vst [vmem:[#allocation4 + $0x10] sm:$0xff] %v7704_v21  ;;  %7572 = vst [vmem:[#allocation4 + $0x18] sm:$0xff] %v7571_v1  ;;  %v12792_v48 = vpop.permute.xlu0 %7683 }
 0x3fb   : > { %7599 = vst [vmem:[#allocation4 + $0x20] sm:$0x1] %v7598_v3  ;;  %v7742_v29 = vpop.permute.xlu1 %7741 }
 0x3fc   : > { %7763 = vst.msk [vmem:[#allocation4 + $0x10] sm:$0xff] %vm13422_vm2, %v7742_v29  ;;  %v7301_v28 = vld [vmem:[#allocation4 + $0x38] sm:$0x1]  ;;  %v7772_v15 = vld [vmem:[#allocation4 + $0x8] sm:$0x80] }
 0x3fd   : > { %v7302_v56 = vsel %vm13408_vm1, 0, %v7301_v28  ;;  %v7773_v9 = vsel %vm13310_vm10, 0, %v7772_v15  ;;  %vm13424_vm1 = vmmov %vm13422_vm2 }
 0x3fe   : > { %7303 = vst [vmem:[#allocation4 + $0x38] sm:$0x1] %v7302_v56  ;;  %v7748_v57 = vpop.permute.xlu0 %7747  ;;  %7774 = vst [vmem:[#allocation4 + $0x8] sm:$0x80] %v7773_v9 }
 0x3ff   : > { %v7746_v62 = vpop.permute.xlu1 %7745  ;;  %vm13425_vm13 = vmmov %vm13424_vm1 }
 0x400   : > { %v7603_v32 = vld [vmem:[#allocation4 + $0x30] sm:$0x1]  ;;  %v7576_v13 = vld [vmem:[#allocation4 + $0x28] sm:$0xff] }
 0x401   : > { %v7594_v40 = vld [vmem:[#allocation4 + $0x18] sm:$0x1]  ;;  %v7604_v8 = vsel %vm11907_vm8, 0, %v7603_v32  ;;  %v7577_v19 = vsel %vm12126_vm12, %v7548_v14, %v7576_v13 }
 0x402   : > { %v7595_v0 = vsel %vm11907_vm8, 0, %v7594_v40  ;;  %7605 = vst [vmem:[#allocation4 + $0x30] sm:$0x1] %v7604_v8  ;;  %7578 = vst [vmem:[#allocation4 + $0x28] sm:$0xff] %v7577_v19  ;;  %v7860_v2 = vpop.permute.xlu0 %7859  ;;  %v7709_v58 = vld [vmem:[#allocation4 + $0x20] sm:$0xff] }
 0x403   : > { %7596 = vst [vmem:[#allocation4 + $0x18] sm:$0x1] %v7595_v0  ;;  %v7775_v11 = vld [vmem:[#allocation4 + $0x10] sm:$0x80]  ;;  %v7858_v50 = vpop.permute.xlu1 %7857 }
 0x404   : > { %v7776_v54 = vsel %vm13310_vm10, 0, %v7775_v11  ;;  %v7882_v42 = vsel %vm13314_vm4, %v7858_v50, %v7881_v5 }
 0x405   : > { %7777 = vst [vmem:[#allocation4 + $0x10] sm:$0x80] %v7776_v54  ;;  %v7884_v44 = vld [vmem:[#allocation4 + $0x8] sm:$0xff]  ;;  %7883 = vst [vmem:[#allocation4] sm:$0xff] %v7882_v42  ;;  %v7398_v4 = vld [vmem:[#allocation4 + $0x38] sm:$0xff] }
 0x406   : > { %v7885_v53 = vsel %vm13314_vm4, %v7860_v2, %v7884_v44  ;;  %v7862_v24 = vpop.permute.xlu0 %7861  ;;  %v7399_v26 = vsel %vm13267_vm7, %v12668_v55, %v7398_v4  ;;  %vm13423_vm7 = vmmov %vm13422_vm2  ;;  %vm13427_vm2 = vcmask 64544  }
 0x407   : > { %7886 = vst [vmem:[#allocation4 + $0x8] sm:$0xff] %v7885_v53  ;;  %v12814_v51 = vpop.permute.xlu1 %7863  ;;  %7400 = vst [vmem:[#allocation4 + $0x38] sm:$0xff] %v7399_v26 }
 0x409   : > { %v7600_v22 = vld [vmem:[#allocation4 + $0x28] sm:$0x1]  ;;  %v7715_v41 = vld [vmem:[#allocation4 + $0x30] sm:$0xff] }
 0x40a   : > { %v7706_v37 = vld [vmem:[#allocation4 + $0x18] sm:$0xff]  ;;  %v7601_v33 = vsel %vm11907_vm8, 0, %v7600_v22  ;;  %v7987_v10 = vpop.permute.xlu0 %7986 }
 0x40b   : > { %v7707_v6 = vsel %vm12137_vm6, %v12760_v59, %v7706_v37  ;;  %7602 = vst [vmem:[#allocation4 + $0x28] sm:$0x1] %v7601_v33  ;;  %v12821_v16 = vpop.permute.xlu1 %7867 }
 0x40c   : > { %7708 = vst [vmem:[#allocation4 + $0x18] sm:$0xff] %v7707_v6  ;;  %v7908_v43 = vld [vmem:[#allocation4] sm:$0x1]  ;;  %v7887_v55 = vld [vmem:[#allocation4 + $0x10] sm:$0xff] }
 0x40d   : > { %7764 = vst.msk [vmem:[#allocation4 + $0x18] sm:$0xff] %vm13423_vm7, %v12762_v25  ;;  %v7909_v39 = vsel %vm13279_vm14, 0, %v7908_v43  ;;  %v7888_v52 = vsel %vm13314_vm4, %v7862_v24, %v7887_v55  ;;  %vm13428_vm7 = vmmov %vm13424_vm1 }
 0x40e   : > { %v7911_v45 = vld [vmem:[#allocation4 + $0x8] sm:$0x1]  ;;  %7910 = vst [vmem:[#allocation4] sm:$0x1] %v7909_v39  ;;  %7889 = vst [vmem:[#allocation4 + $0x10] sm:$0xff] %v7888_v52  ;;  %v12829_v7 = vpop.permute.xlu0 %7865 }
 0x40f   : > { %v7912_v59 = vsel %vm13279_vm14, 0, %v7911_v45  ;;  %v7682_v14 = vpop.permute.xlu1 %7681 }
 0x410   : > { %7913 = vst [vmem:[#allocation4 + $0x8] sm:$0x1] %v7912_v59  ;;  %v7710_v25 = vsel %vm12137_vm6, %v7682_v14, %v7709_v58 }
 0x411   : > { %7711 = vst [vmem:[#allocation4 + $0x20] sm:$0xff] %v7710_v25 }
 0x412   : > { %v7712_v63 = vld [vmem:[#allocation4 + $0x28] sm:$0xff]  ;;  %7765 = vst.msk [vmem:[#allocation4 + $0x20] sm:$0xff] %vm13424_vm1, %v7746_v62  ;;  %v7686_v35 = vpop.permute.xlu0 %7685  ;;  %vm13429_vm1 = vmmov %vm13426_vm15 }
 0x413   : > { %v7713_v36 = vsel %vm12137_vm6, %v12792_v48, %v7712_v63  ;;  %v7716_v27 = vsel %vm12137_vm6, %v7686_v35, %v7715_v41  ;;  %v7989_v30 = vpop.permute.xlu1 %7988 }
 0x414   : > { %v7778_v60 = vld [vmem:[#allocation4 + $0x18] sm:$0x80]  ;;  %7714 = vst [vmem:[#allocation4 + $0x28] sm:$0xff] %v7713_v36  ;;  %7717 = vst [vmem:[#allocation4 + $0x30] sm:$0xff] %v7716_v27 }
 0x415   : > { %v7779_v20 = vsel %vm13310_vm10, 0, %v7778_v60  ;;  %7766 = vst.msk [vmem:[#allocation4 + $0x28] sm:$0xff] %vm13425_vm13, %v7748_v57  ;;  %v7914_v21 = vld [vmem:[#allocation4 + $0x10] sm:$0x1]  ;;  %v8007_v1 = vld [vmem:[#allocation4] sm:$0xff]  ;;  %vm13430_vm13 = vmmov %vm13429_vm1 }
 0x416   : > { %7780 = vst [vmem:[#allocation4 + $0x18] sm:$0x80] %v7779_v20  ;;  %v7915_v3 = vsel %vm13279_vm14, 0, %v7914_v21  ;;  %v8008_v48 = vsel %vm13282_vm0, %v7987_v10, %v8007_v1  ;;  %v8044_v29 = vpop.permute.xlu0 %8043 }
 0x417   : > { %7916 = vst [vmem:[#allocation4 + $0x10] sm:$0x1] %v7915_v3  ;;  %8009 = vst [vmem:[#allocation4] sm:$0xff] %v8008_v48  ;;  %v8010_v28 = vld [vmem:[#allocation4 + $0x8] sm:$0xff]  ;;  %v7432_v15 = vpop.permute.xlu1 %7431 }
 0x418   : > { %v8011_v56 = vsel %vm13282_vm0, %v7989_v30, %v8010_v28  ;;  %8064 = vst.msk [vmem:[#allocation4] sm:$0xff] %vm13426_vm15, %v8044_v29 }
 0x419   : > { %7448 = vst.msk [vmem:[#allocation4 + $0x38] sm:$0xff] %vm13427_vm2, %v7432_v15  ;;  %v7781_v9 = vld [vmem:[#allocation4 + $0x20] sm:$0x80]  ;;  %8012 = vst [vmem:[#allocation4 + $0x8] sm:$0xff] %v8011_v56 }
 0x41a   : > { %v7782_v57 = vsel %vm13310_vm10, 0, %v7781_v9  ;;  %v7991_v62 = vpop.permute.xlu0 %7990 }
 0x41b   : > { %7783 = vst [vmem:[#allocation4 + $0x20] sm:$0x80] %v7782_v57  ;;  %v7750_v32 = vpop.permute.xlu1 %7749 }
 0x41c   : > { %v7784_v13 = vld [vmem:[#allocation4 + $0x28] sm:$0x80]  ;;  %7767 = vst.msk [vmem:[#allocation4 + $0x30] sm:$0xff] %vm13428_vm7, %v7750_v32 }
 0x41d   : > { %v7785_v40 = vsel %vm13310_vm10, 0, %v7784_v13  ;;  %v7890_v8 = vld [vmem:[#allocation4 + $0x18] sm:$0xff] }
 0x41e   : > { %7786 = vst [vmem:[#allocation4 + $0x28] sm:$0x80] %v7785_v40  ;;  %v7891_v19 = vsel %vm13314_vm4, %v12814_v51, %v7890_v8  ;;  %v8013_v0 = vld [vmem:[#allocation4 + $0x10] sm:$0xff]  ;;  %v8048_v2 = vpop.permute.xlu0 %8047 }
 0x41f   : > { %7892 = vst [vmem:[#allocation4 + $0x18] sm:$0xff] %v7891_v19  ;;  %v8072_v11 = vld [vmem:[#allocation4] sm:$0x80]  ;;  %v8014_v50 = vsel %vm13282_vm0, %v7991_v62, %v8013_v0  ;;  %v8046_v54 = vpop.permute.xlu1 %8045 }
 0x420   : > { %v7470_v5 = vld [vmem:[#allocation4 + $0x38] sm:$0x80]  ;;  %v8073_v42 = vsel %vm12305_vm3, 0, %v8072_v11  ;;  %8015 = vst [vmem:[#allocation4 + $0x10] sm:$0xff] %v8014_v50  ;;  %8065 = vst.msk [vmem:[#allocation4 + $0x8] sm:$0xff] %vm13429_vm1, %v8046_v54 }
 0x421   : > { %v7471_v44 = vsel %vm12102_vm9, 0, %v7470_v5  ;;  %8074 = vst [vmem:[#allocation4] sm:$0x80] %v8073_v42  ;;  %8066 = vst.msk [vmem:[#allocation4 + $0x10] sm:$0xff] %vm13430_vm13, %v8048_v2  ;;  %v12918_v54 = vld [vmem:[%s13102_s6] ss:$0 sm:$0xff] }
 0x422   : > { %7472 = vst [vmem:[#allocation4 + $0x38] sm:$0x80] %v7471_v44  ;;  %v7552_v4 = vpop.permute.xlu0 %7551  ;;  %v7893_v53 = vld [vmem:[#allocation4 + $0x20] sm:$0xff]  ;;  %vm13431_vm9 = vmmov %vm13429_vm1  ;;  %vm13443_vm13 = vcmask 294144  }
 0x423   : > { %v7787_v24 = vld [vmem:[#allocation4 + $0x30] sm:$0x80]  ;;  %v7993_v26 = vpop.permute.xlu1 %7992  ;;  %v7894_v51 = vsel %vm13314_vm4, %v12829_v7, %v7893_v53 }
 0x424   : > { %v7788_v22 = vsel %vm13310_vm10, 0, %v7787_v24  ;;  %7895 = vst [vmem:[#allocation4 + $0x20] sm:$0xff] %v7894_v51 }
 0x425   : > { %v7896_v12 = vld [vmem:[#allocation4 + $0x28] sm:$0xff]  ;;  %7789 = vst [vmem:[#allocation4 + $0x30] sm:$0x80] %v7788_v22 }
 0x426   : > { %v7917_v37 = vld [vmem:[#allocation4 + $0x18] sm:$0x1]  ;;  %v7897_v33 = vsel %vm13314_vm4, %v12821_v16, %v7896_v12  ;;  %v7995_v10 = vpop.permute.xlu0 %7994 }
 0x427   : > { %v7918_v6 = vsel %vm13279_vm14, 0, %v7917_v37  ;;  %7898 = vst [vmem:[#allocation4 + $0x28] sm:$0xff] %v7897_v33  ;;  %v8075_v43 = vld [vmem:[#allocation4 + $0x8] sm:$0x80]  ;;  %v8050_v55 = vpop.permute.xlu1 %8049 }
 0x428   : > { %7919 = vst [vmem:[#allocation4 + $0x18] sm:$0x1] %v7918_v6  ;;  %v8078_v39 = vld [vmem:[#allocation4 + $0x10] sm:$0x80]  ;;  %v8076_v52 = vsel %vm12305_vm3, 0, %v8075_v43  ;;  %v8170_v27 = vld [vmem:[#allocation4] sm:$0xff] }
 0x429   : > { %v7582_v45 = vld [vmem:[#allocation4 + $0x38] sm:$0xff]  ;;  %v8079_v7 = vsel %vm12305_vm3, 0, %v8078_v39  ;;  %8077 = vst [vmem:[#allocation4 + $0x8] sm:$0x80] %v8076_v52 }
 0x42a   : > { %v7583_v16 = vsel %vm12126_vm12, %v7552_v4, %v7582_v45  ;;  %8080 = vst [vmem:[#allocation4 + $0x10] sm:$0x80] %v8079_v7  ;;  %v8052_v59 = vpop.permute.xlu0 %8051  ;;  %vm13433_vm12 = vmmov %vm13429_vm1 }
 0x42b   : > { %7584 = vst [vmem:[#allocation4 + $0x38] sm:$0xff] %v7583_v16  ;;  %v7920_v58 = vld [vmem:[#allocation4 + $0x20] sm:$0x1]  ;;  %v7870_v14 = vpop.permute.xlu1 %7869 }
 0x42c   : > { %v7921_v25 = vsel %vm13279_vm14, 0, %v7920_v58  ;;  %v7899_v63 = vld [vmem:[#allocation4 + $0x30] sm:$0xff] }
 0x42d   : > { %7922 = vst [vmem:[#allocation4 + $0x20] sm:$0x1] %v7921_v25  ;;  %v7900_v35 = vsel %vm13314_vm4, %v7870_v14, %v7899_v63 }
 0x42e   : > { %v7923_v41 = vld [vmem:[#allocation4 + $0x28] sm:$0x1]  ;;  %7901 = vst [vmem:[#allocation4 + $0x30] sm:$0xff] %v7900_v35  ;;  %v8150_v36 = vpop.permute.xlu0 %8149 }
 0x42f   : > { %v7924_v31 = vsel %vm13279_vm14, 0, %v7923_v41  ;;  %v8016_v30 = vld [vmem:[#allocation4 + $0x18] sm:$0xff]  ;;  %v8171_v60 = vsel %vm12450_vm5, %v8150_v36, %v8170_v27  ;;  %v8054_v20 = vpop.permute.xlu1 %8053 }
 0x430   : > { %7925 = vst [vmem:[#allocation4 + $0x28] sm:$0x1] %v7924_v31  ;;  %v8017_v21 = vsel %vm13282_vm0, %v7993_v26, %v8016_v30  ;;  %8172 = vst [vmem:[#allocation4] sm:$0xff] %v8171_v60  ;;  %9353 = vmatprep.mubr.msk.bf16.mxu1 %vm7076_vm11, %v8171_v60  ;;  %v8173_v29 = vld [vmem:[#allocation4 + $0x8] sm:$0xff] }
 0x431   : > { %8018 = vst [vmem:[#allocation4 + $0x18] sm:$0xff] %v8017_v21  ;;  %v8176_v2 = vld [vmem:[#allocation4 + $0x10] sm:$0xff] }
 0x432   : > { %v7606_v1 = vld [vmem:[#allocation4 + $0x38] sm:$0x1]  ;;  %8067 = vst.msk [vmem:[#allocation4 + $0x18] sm:$0xff] %vm13431_vm9, %v8050_v55  ;;  %v7688_v48 = vpop.permute.xlu0 %7687 }
 0x433   : > { %v7607_v3 = vsel %vm11907_vm8, 0, %v7606_v1  ;;  %v8152_v28 = vpop.permute.xlu1 %8151  ;;  %vm13432_vm8 = vmmov %vm13429_vm1 }
 0x434   : > { %7608 = vst [vmem:[#allocation4 + $0x38] sm:$0x1] %v7607_v3  ;;  %v8019_v15 = vld [vmem:[#allocation4 + $0x20] sm:$0xff]  ;;  %v8174_v56 = vsel %vm12450_vm5, %v8152_v28, %v8173_v29 }
 0x435   : > { %v8020_v9 = vsel %vm13282_vm0, %v7995_v10, %v8019_v15  ;;  %v7926_v57 = vld [vmem:[#allocation4 + $0x30] sm:$0x1]  ;;  %8175 = vst [vmem:[#allocation4 + $0x8] sm:$0xff] %v8174_v56  ;;  %9354 = vmatmul.mubr.msk.bf16.vlgmr.msra.gmra.mrb[16].mxu1 %vm7076_vm11, %v8174_v56 }
 0x436   : > { %8021 = vst [vmem:[#allocation4 + $0x20] sm:$0xff] %v8020_v9  ;;  %v7927_v34 = vsel %vm13279_vm14, 0, %v7926_v57  ;;  %v7999_v62 = vpop.permute.xlu0 %7998  ;;  %vm13434_vm14 = vmmov %vm13428_vm7 }
 0x437   : > { %8068 = vst.msk [vmem:[#allocation4 + $0x20] sm:$0xff] %vm13432_vm8, %v8052_v59  ;;  %7928 = vst [vmem:[#allocation4 + $0x30] sm:$0x1] %v7927_v34  ;;  %v8022_v32 = vld [vmem:[#allocation4 + $0x28] sm:$0xff]  ;;  %v7997_v13 = vpop.permute.xlu1 %7996 }
 0x438   : > { %v8023_v40 = vsel %vm13282_vm0, %v7997_v13, %v8022_v32 }
 0x439   : > { %v8081_v8 = vld [vmem:[#allocation4 + $0x18] sm:$0x80]  ;;  %8024 = vst [vmem:[#allocation4 + $0x28] sm:$0xff] %v8023_v40 }
 0x43a   : > { %v8082_v19 = vsel %vm12305_vm3, 0, %v8081_v8  ;;  %8069 = vst.msk [vmem:[#allocation4 + $0x28] sm:$0xff] %vm13433_vm12, %v8054_v20  ;;  %v8154_v47 = vpop.permute.xlu0 %8153 }
 0x43b   : > { %v7718_v0 = vld [vmem:[#allocation4 + $0x38] sm:$0xff]  ;;  %8083 = vst [vmem:[#allocation4 + $0x18] sm:$0x80] %v8082_v19  ;;  %v8177_v5 = vsel %vm12450_vm5, %v8154_v47, %v8176_v2  ;;  %v7752_v50 = vpop.permute.xlu1 %7751 }
 0x43c   : > { %v7719_v11 = vsel %vm12137_vm6, %v7688_v48, %v7718_v0  ;;  %8178 = vst [vmem:[#allocation4 + $0x10] sm:$0xff] %v8177_v5  ;;  %9357 = vmatprep.mubr.msk.bf16.mxu1 %vm7076_vm11, %v8177_v5  ;;  %vm13435_vm6 = vmmov %vm13429_vm1 }
 0x43d   : > { %7720 = vst [vmem:[#allocation4 + $0x38] sm:$0xff] %v7719_v11  ;;  %v9333_v42 = vpop.f32.mrb[16].mxu0 }
 0x43e   : > { %7768 = vst.msk [vmem:[#allocation4 + $0x38] sm:$0xff] %vm13434_vm14, %v7752_v50  ;;  %v8084_v44 = vld [vmem:[#allocation4 + $0x20] sm:$0x80]  ;;  %v8025_v4 = vld [vmem:[#allocation4 + $0x30] sm:$0xff]  ;;  %v7211_v53 = vmul.f32 %v9333_v42, %v12918_v54  ;;  %v7139_v24 = vpop.f32.mrb[17].mxu0  ;;  %v8158_v36 = vpop.permute.xlu0 %8157 }
 0x43f   : > { %v8085_v26 = vsel %vm12305_vm3, 0, %v8084_v44  ;;  %v8026_v51 = vsel %vm13282_vm0, %v7999_v62, %v8025_v4  ;;  %v8056_v22 = vpop.permute.xlu1 %8055  ;;  %v7209_v12 = vmul.f32 %v12918_v54, %v7139_v24  ;;  %v9334_v37 = vpop.f32.mrb[18].mxu0  ;;  %vm13436_vm0 = vcmask 31744  }
 0x440   : > { %8086 = vst [vmem:[#allocation4 + $0x20] sm:$0x80] %v8085_v26  ;;  %8027 = vst [vmem:[#allocation4 + $0x30] sm:$0xff] %v8026_v51  ;;  %v7234_v33 = vadd.f32 %v12925_v17, %v7211_v53  ;;  %v7212_v10 = vmul.f32 %v9334_v37, %v12918_v54  ;;  %v7142_v6 = vpop.f32.mrb[19].mxu0 }
 0x441   : > { %8070 = vst.msk [vmem:[#allocation4 + $0x30] sm:$0xff] %vm13435_vm6, %v8056_v22  ;;  %v7232_v18 = vadd.f32 %v12925_v17, %v7209_v12  ;;  %v7210_v43 = vmul.f32 %v12918_v54, %v7142_v6  ;;  %v8087_v55 = vld [vmem:[#allocation4 + $0x28] sm:$0x80]  ;;  %vm13437_vm15 = vmmov %vm13436_vm0 }
 0x442   : > { %v8179_v39 = vld [vmem:[#allocation4 + $0x18] sm:$0xff]  ;;  %v7250_v52 = vmax.f32 %v7234_v33, 0.0  ;;  %v7235_v45 = vadd.f32 %v12925_v17, %v7212_v10  ;;  %v8088_v7 = vsel %vm12305_vm3, 0, %v8087_v55  ;;  %vm13438_vm2 = vmmov %vm13436_vm0  ;;  %v7872_v9 = vpop.permute.xlu0 %7871 }
 0x443   : > { %v8156_v16 = vpop.permute.xlu1 %8155  ;;  %v7248_v59 = vmax.f32 %v7232_v18, 0.0  ;;  %v7233_v58 = vadd.f32 %v12925_v17, %v7210_v43  ;;  %8089 = vst [vmem:[#allocation4 + $0x28] sm:$0x80] %v8088_v7  ;;  %vm13439_vm7 = vmmov %vm13436_vm0 }
 0x444   : > { %v8180_v25 = vsel %vm12450_vm5, %v8156_v16, %v8179_v39  ;;  %7266 = vst.msk [vmem:[%s12940_s10 + $0x10] sm:$0xff] %vm13436_vm0, %v7250_v52  ;;  %v7251_v63 = vmax.f32 %v7235_v45, 0.0  ;;  %vm13444_vm9 = vmmov %vm13436_vm0 }
 0x445   : > { %v7790_v14 = vld [vmem:[#allocation4 + $0x38] sm:$0x80]  ;;  %8181 = vst [vmem:[#allocation4 + $0x18] sm:$0xff] %v8180_v25  ;;  %7264 = vst.msk [vmem:[%s12940_s10] sm:$0xff] %vm13437_vm15, %v7248_v59  ;;  %v7249_v41 = vmax.f32 %v7233_v58, 0.0  ;;  %9358 = vmatmul.mubr.msk.bf16.gmra.mrb[20].mxu1 %vm7076_vm11, %v8180_v25 }
 0x446   : > { %v7791_v35 = vsel %vm13310_vm10, 0, %v7790_v14  ;;  %7267 = vst.msk [vmem:[%s12940_s10 + $0x18] sm:$0xff] %vm13438_vm2, %v7251_v63  ;;  %vm13440_vm10 = vcmask 228544   ;;  %vm13445_vm8 = vmmov %vm13436_vm0 }
 0x447   : > { %7792 = vst [vmem:[#allocation4 + $0x38] sm:$0x80] %v7791_v35  ;;  %v8182_v27 = vld [vmem:[#allocation4 + $0x20] sm:$0xff]  ;;  %7265 = vst.msk [vmem:[%s12940_s10 + $0x8] sm:$0xff] %vm13439_vm7, %v7249_v41  ;;  %v8160_v21 = vpop.permute.xlu1 %8159 }
 0x448   : > { %v8183_v31 = vsel %vm12450_vm5, %v8158_v36, %v8182_v27  ;;  %v8090_v30 = vld [vmem:[#allocation4 + $0x30] sm:$0x80]  ;;  %vm13447_vm12 = vmmov %vm13436_vm0 }
 0x449   : > { %8184 = vst [vmem:[#allocation4 + $0x20] sm:$0xff] %v8183_v31  ;;  %v8091_v23 = vsel %vm12305_vm3, 0, %v8090_v30  ;;  %v9337_v60 = vpop.f32.mrb[20].mxu0  ;;  %9361 = vmatprep.mubr.msk.bf16.mxu1 %vm7076_vm11, %v8183_v31  ;;  %vm13441_vm3 = vmmov %vm13436_vm0 }
 0x44a   : > { %8092 = vst [vmem:[#allocation4 + $0x30] sm:$0x80] %v8091_v23  ;;  %v8185_v20 = vld [vmem:[#allocation4 + $0x28] sm:$0xff]  ;;  %v7215_v1 = vmul.f32 %v9337_v60, %v12918_v54  ;;  %v7155_v3 = vpop.f32.mrb[21].mxu0  ;;  %vm13448_vm14 = vmmov %vm13436_vm0 }
 0x44b   : > { %v8186_v48 = vsel %vm12450_vm5, %v8160_v21, %v8185_v20  ;;  %v7213_v29 = vmul.f32 %v12918_v54, %v7155_v3  ;;  %v9338_v28 = vpop.f32.mrb[22].mxu0  ;;  %v8162_v47 = vpop.permute.xlu1 %8161  ;;  %vm13449_vm6 = vmmov %vm13436_vm0 }
 0x44c   : > { %8187 = vst [vmem:[#allocation4 + $0x28] sm:$0xff] %v8186_v48  ;;  %v7238_v46 = vadd.f32 %v12925_v17, %v7215_v1  ;;  %v7216_v15 = vmul.f32 %v9338_v28, %v12918_v54  ;;  %v7158_v56 = vpop.f32.mrb[23].mxu0  ;;  %vm13451_vm15 = vmmov %vm13436_vm0 }
 0x44d   : > { %v7236_v34 = vadd.f32 %v12925_v17, %v7213_v29  ;;  %v7214_v62 = vmul.f32 %v12918_v54, %v7158_v56  ;;  %9362 = vmatmul.mubr.msk.bf16.gmra.mrb[24].mxu1 %vm7076_vm11, %v8186_v48  ;;  %vm13452_vm2 = vmmov %vm13436_vm0 }
 0x44e   : > { %v7902_v57 = vld [vmem:[#allocation4 + $0x38] sm:$0xff]  ;;  %v7254_v13 = vmax.f32 %v7238_v46, 0.0  ;;  %v7239_v40 = vadd.f32 %v12925_v17, %v7216_v15  ;;  %vm13453_vm7 = vmmov %vm13436_vm0 }
 0x44f   : > { %v7903_v32 = vsel %vm13314_vm4, %v7872_v9, %v7902_v57  ;;  %v7252_v8 = vmax.f32 %v7236_v34, 0.0  ;;  %v7237_v19 = vadd.f32 %v12925_v17, %v7214_v62  ;;  %vm13442_vm4 = vmmov %vm13436_vm0 }
 0x450   : > { %7904 = vst [vmem:[#allocation4 + $0x38] sm:$0xff] %v7903_v32  ;;  %7270 = vst.msk [vmem:[%s12940_s10 + $0x30] sm:$0xff] %vm13441_vm3, %v7254_v13  ;;  %v7255_v0 = vmax.f32 %v7239_v40, 0.0 }
 0x451   : > { %7907 = vst.msk [vmem:[#allocation4 + $0x38] sm:$0xff] %vm13440_vm10, %v13331_v38  ;;  %v8188_v61 = vld [vmem:[#allocation4 + $0x30] sm:$0xff]  ;;  %v7253_v2 = vmax.f32 %v7237_v19, 0.0  ;;  %v9341_v11 = vpop.f32.mrb[24].mxu0  ;;  %vm13454_vm10 = vmmov %vm13436_vm0 }
 0x452   : > { %8028 = vst.msk [vmem:[#allocation4 + $0x38] sm:$0xff] %vm13429_vm1, %v13331_v38  ;;  %v8189_v5 = vsel %vm12450_vm5, %v8162_v47, %v8188_v61  ;;  %v7219_v50 = vmul.f32 %v9341_v11, %v12918_v54  ;;  %v7171_v42 = vpop.f32.mrb[25].mxu0  ;;  %vm13446_vm5 = vmmov %vm13436_vm0 }
 0x453   : > { %7268 = vst.msk [vmem:[%s12940_s10 + $0x20] sm:$0xff] %vm13442_vm4, %v7252_v8  ;;  %8190 = vst [vmem:[#allocation4 + $0x30] sm:$0xff] %v8189_v5  ;;  %v7217_v44 = vmul.f32 %v12918_v54, %v7171_v42  ;;  %v9342_v4 = vpop.f32.mrb[26].mxu0  ;;  %9365 = vmatprep.mubr.msk.bf16.mxu1 %vm7076_vm11, %v8189_v5 }
 0x454   : > { %8071 = vst.msk [vmem:[#allocation4 + $0x38] sm:$0xff] %vm13443_vm13, %v13331_v38  ;;  %v7242_v38 = vadd.f32 %v12925_v17, %v7219_v50  ;;  %v7220_v49 = vmul.f32 %v9342_v4, %v12918_v54  ;;  %v7174_v53 = vpop.f32.mrb[27].mxu0  ;;  %vm13455_vm3 = vmmov %vm13436_vm0 }
 0x455   : > { %7271 = vst.msk [vmem:[%s12940_s10 + $0x38] sm:$0xff] %vm13444_vm9, %v7255_v0  ;;  %v7240_v24 = vadd.f32 %v12925_v17, %v7217_v44  ;;  %v7218_v26 = vmul.f32 %v12918_v54, %v7174_v53  ;;  %vm13456_vm1 = vmmov %vm13436_vm0 }
 0x456   : > { %7269 = vst.msk [vmem:[%s12940_s10 + $0x28] sm:$0xff] %vm13445_vm8, %v7253_v2  ;;  %v7258_v51 = vmax.f32 %v7242_v38, 0.0  ;;  %v7243_v22 = vadd.f32 %v12925_v17, %v7220_v49  ;;  %vm13457_vm4 = vmmov %vm13436_vm0 }
 0x457   : > { %v7256_v12 = vmax.f32 %v7240_v24, 0.0  ;;  %v7241_v37 = vadd.f32 %v12925_v17, %v7218_v26  ;;  %vm13458_vm13 = vmmov %vm13436_vm0 }
 0x458   : > { %7274 = vst.msk [vmem:[%s12940_s10 + $0x50] sm:$0xff] %vm13446_vm5, %v7258_v51  ;;  %v7259_v33 = vmax.f32 %v7243_v22, 0.0  ;;  %vm13459_vm9 = vmmov %vm13436_vm0 }
 0x459   : > { %7272 = vst.msk [vmem:[%s12940_s10 + $0x40] sm:$0xff] %vm13447_vm12, %v7256_v12  ;;  %v7257_v10 = vmax.f32 %v7241_v37, 0.0  ;;  %vm13460_vm8 = vmmov %vm13436_vm0 }
 0x45a   : > { %7275 = vst.msk [vmem:[%s12940_s10 + $0x58] sm:$0xff] %vm13448_vm14, %v7259_v33  ;;  %vm13461_vm5 = vmmov %vm13436_vm0 }
 0x45b   : > { %v8198_v6 = vld [vmem:[#allocation4 + $0x38] sm:$0xff]  ;;  %7273 = vst.msk [vmem:[%s12940_s10 + $0x48] sm:$0xff] %vm13449_vm6, %v7257_v10  ;;  %vm13462_vm12 = vmmov %vm13436_vm0 }
 0x45c   : > { %9366 = vmatmul.mubr.msk.bf16.gmra.mrb[28].mxu1 %vm7076_vm11, %v8198_v6  ;;  %vm13450_vm11 = vmmov %vm13436_vm0 }
 0x45d   : > { %vm13463_vm14 = vmmov %vm13436_vm0 }
 0x45e   : > { %vm13464_vm6 = vmmov %vm13436_vm0 }
 0x4c8   : > { %v9345_v18 = vpop.f32.mrb[28].mxu0 }
 0x4c9   : > { %v7223_v43 = vmul.f32 %v9345_v18, %v12918_v54  ;;  %v7187_v55 = vpop.f32.mrb[29].mxu0 }
 0x4ca   : > { %v7221_v39 = vmul.f32 %v12918_v54, %v7187_v55  ;;  %v9346_v52 = vpop.f32.mrb[30].mxu0 }
 0x4cb   : > { %v7246_v45 = vadd.f32 %v12925_v17, %v7223_v43  ;;  %v7224_v7 = vmul.f32 %v9346_v52, %v12918_v54  ;;  %v7190_v16 = vpop.f32.mrb[31].mxu0 }
 0x4cc   : > { %v7244_v59 = vadd.f32 %v12925_v17, %v7221_v39  ;;  %v7222_v58 = vmul.f32 %v12918_v54, %v7190_v16 }
 0x4cd   : > { %v7262_v14 = vmax.f32 %v7246_v45, 0.0  ;;  %v7247_v25 = vadd.f32 %v12925_v17, %v7224_v7 }
 0x4ce   : > { %v7260_v63 = vmax.f32 %v7244_v59, 0.0  ;;  %v7245_v35 = vadd.f32 %v12925_v17, %v7222_v58 }
 0x4cf   : > { %7278 = vst.msk [vmem:[%s12940_s10 + $0x70] sm:$0xff] %vm13450_vm11, %v7262_v14  ;;  %v7263_v41 = vmax.f32 %v7247_v25, 0.0  ;;  %vm13465_vm11 = vmmov %vm13436_vm0 }
 0x4d0   : > { %7276 = vst.msk [vmem:[%s12940_s10 + $0x60] sm:$0xff] %vm13436_vm0, %v7260_v63  ;;  %v7261_v36 = vmax.f32 %v7245_v35, 0.0 }
 0x4d1   : > { %7279 = vst.msk [vmem:[%s12940_s10 + $0x78] sm:$0xff] %vm13451_vm15, %v7263_v41  ;;  %vm13466_vm15 = vmmov %vm13436_vm0 }
 0x4d2   : > { %7277 = vst.msk [vmem:[%s12940_s10 + $0x68] sm:$0xff] %vm13452_vm2, %v7261_v36  ;;  %vm13467_vm2 = vmmov %vm13436_vm0 }
 0x508   : > { %v9355_v27 = vpop.f32.mrb[16].mxu1 }
 0x509   : > { %v8352_v31 = vmul.f32 %v9355_v27, %v12918_v54  ;;  %v8280_v30 = vpop.f32.mrb[17].mxu1 }
 0x50a   : > { %v8350_v23 = vmul.f32 %v12918_v54, %v8280_v30  ;;  %v9356_v60 = vpop.f32.mrb[18].mxu1 }
 0x50b   : > { %v8375_v20 = vadd.f32 %v12925_v17, %v8352_v31  ;;  %v8353_v21 = vmul.f32 %v9356_v60, %v12918_v54  ;;  %v8283_v1 = vpop.f32.mrb[19].mxu1 }
 0x50c   : > { %v8373_v3 = vadd.f32 %v12925_v17, %v8350_v23  ;;  %v8351_v48 = vmul.f32 %v12918_v54, %v8283_v1 }
 0x50d   : > { %v8391_v29 = vmax.f32 %v8375_v20, 0.0  ;;  %v8376_v28 = vadd.f32 %v12925_v17, %v8353_v21 }
 0x50e   : > { %v8389_v46 = vmax.f32 %v8373_v3, 0.0  ;;  %v8374_v15 = vadd.f32 %v12925_v17, %v8351_v48 }
 0x50f   : > { %9206 = vst.msk [vmem:[%s12940_s10 + $0x90] sm:$0xff] %vm13453_vm7, %v8391_v29  ;;  %v8392_v56 = vmax.f32 %v8376_v28, 0.0 }
 0x510   : > { %9204 = vst.msk [vmem:[%s12940_s10 + $0x80] sm:$0xff] %vm13454_vm10, %v8389_v46  ;;  %v8390_v9 = vmax.f32 %v8374_v15, 0.0 }
 0x511   : > { %9207 = vst.msk [vmem:[%s12940_s10 + $0x98] sm:$0xff] %vm13455_vm3, %v8392_v56 }
 0x512   : > { %9205 = vst.msk [vmem:[%s12940_s10 + $0x88] sm:$0xff] %vm13456_vm1, %v8390_v9 }
 0x518   : > { %v9359_v57 = vpop.f32.mrb[20].mxu1 }
 0x519   : > { %v8356_v34 = vmul.f32 %v9359_v57, %v12918_v54  ;;  %v8296_v62 = vpop.f32.mrb[21].mxu1 }
 0x51a   : > { %v8354_v32 = vmul.f32 %v12918_v54, %v8296_v62  ;;  %v9360_v13 = vpop.f32.mrb[22].mxu1 }
 0x51b   : > { %v8379_v40 = vadd.f32 %v12925_v17, %v8356_v34  ;;  %v8357_v8 = vmul.f32 %v9360_v13, %v12918_v54  ;;  %v8299_v19 = vpop.f32.mrb[23].mxu1 }
 0x51c   : > { %v8377_v0 = vadd.f32 %v12925_v17, %v8354_v32  ;;  %v8355_v61 = vmul.f32 %v12918_v54, %v8299_v19 }
 0x51d   : > { %v8395_v47 = vmax.f32 %v8379_v40, 0.0  ;;  %v8380_v2 = vadd.f32 %v12925_v17, %v8357_v8 }
 0x51e   : > { %v8393_v11 = vmax.f32 %v8377_v0, 0.0  ;;  %v8378_v5 = vadd.f32 %v12925_v17, %v8355_v61 }
 0x51f   : > { %9210 = vst.msk [vmem:[%s12940_s10 + $0xb0] sm:$0xff] %vm13457_vm4, %v8395_v47  ;;  %v8396_v50 = vmax.f32 %v8380_v2, 0.0 }
 0x520   : > { %9208 = vst.msk [vmem:[%s12940_s10 + $0xa0] sm:$0xff] %vm13458_vm13, %v8393_v11  ;;  %v8394_v42 = vmax.f32 %v8378_v5, 0.0  ;;  %v9363_v44 = vpop.f32.mrb[24].mxu1 }
 0x521   : > { %9211 = vst.msk [vmem:[%s12940_s10 + $0xb8] sm:$0xff] %vm13459_vm9, %v8396_v50  ;;  %v8360_v4 = vmul.f32 %v9363_v44, %v12918_v54  ;;  %v8312_v38 = vpop.f32.mrb[25].mxu1 }
 0x522   : > { %9209 = vst.msk [vmem:[%s12940_s10 + $0xa8] sm:$0xff] %vm13460_vm8, %v8394_v42  ;;  %v8358_v49 = vmul.f32 %v12918_v54, %v8312_v38  ;;  %v9364_v53 = vpop.f32.mrb[26].mxu1 }
 0x523   : > { %v8383_v24 = vadd.f32 %v12925_v17, %v8360_v4  ;;  %v8361_v26 = vmul.f32 %v9364_v53, %v12918_v54  ;;  %v8315_v51 = vpop.f32.mrb[27].mxu1 }
 0x524   : > { %v8381_v22 = vadd.f32 %v12925_v17, %v8358_v49  ;;  %v8359_v12 = vmul.f32 %v12918_v54, %v8315_v51 }
 0x525   : > { %v8399_v37 = vmax.f32 %v8383_v24, 0.0  ;;  %v8384_v33 = vadd.f32 %v12925_v17, %v8361_v26 }
 0x526   : > { %v8397_v10 = vmax.f32 %v8381_v22, 0.0  ;;  %v8382_v6 = vadd.f32 %v12925_v17, %v8359_v12 }
 0x527   : > { %9214 = vst.msk [vmem:[%s12940_s10 + $0xd0] sm:$0xff] %vm13461_vm5, %v8399_v37  ;;  %v8400_v18 = vmax.f32 %v8384_v33, 0.0 }
 0x528   : > { %9212 = vst.msk [vmem:[%s12940_s10 + $0xc0] sm:$0xff] %vm13462_vm12, %v8397_v10  ;;  %v8398_v43 = vmax.f32 %v8382_v6, 0.0 }
 0x529   : > { %9215 = vst.msk [vmem:[%s12940_s10 + $0xd8] sm:$0xff] %vm13463_vm14, %v8400_v18 }
 0x52a   : > { %9213 = vst.msk [vmem:[%s12940_s10 + $0xc8] sm:$0xff] %vm13464_vm6, %v8398_v43 }
 0x52f   : > { %v9367_v55 = vpop.f32.mrb[28].mxu1 }
 0x530   : > { %v8364_v39 = vmul.f32 %v9367_v55, %v12918_v54  ;;  %v8328_v52 = vpop.f32.mrb[29].mxu1 }
 0x531   : > { %v8362_v45 = vmul.f32 %v12918_v54, %v8328_v52  ;;  %v9368_v7 = vpop.f32.mrb[30].mxu1 }
 0x532   : > { %v8387_v16 = vadd.f32 %v12925_v17, %v8364_v39  ;;  %v8365_v59 = vmul.f32 %v9368_v7, %v12918_v54  ;;  %v8331_v58 = vpop.f32.mrb[31].mxu1 }
 0x533   : > { %v8385_v14 = vadd.f32 %v12925_v17, %v8362_v45  ;;  %v8363_v25 = vmul.f32 %v12918_v54, %v8331_v58 }
 0x534   : > { %v8403_v63 = vmax.f32 %v8387_v16, 0.0  ;;  %v8388_v35 = vadd.f32 %v12925_v17, %v8365_v59 }
 0x535   : > { %v8401_v41 = vmax.f32 %v8385_v14, 0.0  ;;  %v8386_v36 = vadd.f32 %v12925_v17, %v8363_v25 }
 0x536   : > { %9218 = vst.msk [vmem:[%s12940_s10 + $0xf0] sm:$0xff] %vm13465_vm11, %v8403_v63  ;;  %v8404_v27 = vmax.f32 %v8388_v35, 0.0 }
 0x537   : > { %9216 = vst.msk [vmem:[%s12940_s10 + $0xe0] sm:$0xff] %vm13436_vm0, %v8401_v41  ;;  %v8402_v31 = vmax.f32 %v8386_v36, 0.0 }
 0x538   : > { %9219 = vst.msk [vmem:[%s12940_s10 + $0xf8] sm:$0xff] %vm13466_vm15, %v8404_v27 }
 0x539   : > { %9217 = vst.msk [vmem:[%s12940_s10 + $0xe8] sm:$0xff] %vm13467_vm2, %v8402_v31 }
 0x53a PF: > { %s18_s27 = sadd.s32 1, %s9697_s27  }
 0x53b   : > { %p15_p4 = scmp.ge.s32.totalorder %s18_s27, 4  }
 0x53d   :  { %17 = sbr.rel (!%p15_p4) target bundleno = 1 (0x1), region = 102 }

</bundles_post_ra>
